<compile_context>
chip_gen: v5e
topology: v5e:2x2
jax: 0.10.0
libtpu: 0.0.40
codegen_flags: <defaults>
</compile_context>

<pallas_src>
import math
from functools import partial

import jax
import jax.numpy as jnp
from jax.experimental import pallas as pl
from jax.experimental.pallas import tpu as pltpu


# ---------------------------------------------------------------------------
# Helpers
# ---------------------------------------------------------------------------
def _layer_norm(x, gamma, beta, eps=1e-5):
    # PyTorch LayerNorm: biased variance over the last dim, eps=1e-5.
    mean = jnp.mean(x, axis=-1, keepdims=True)
    var = jnp.mean((x - mean) ** 2, axis=-1, keepdims=True)
    return (x - mean) * jax.lax.rsqrt(var + eps) * gamma + beta


def _resident_spec(shape):
    """Full-array block with a constant index_map -> fetched once, stays
    resident in VMEM across all grid steps (weights)."""
    n = len(shape)
    return pl.BlockSpec(shape, lambda i, _n=n: (0,) * _n)


# ---------------------------------------------------------------------------
# Fused Pallas kernel: PE add + L encoder layers + classifier
# ---------------------------------------------------------------------------
def pos_tagger_kernel(nhead,
                      emb_ref, pe_ref,
                      wq_ref, wk_ref, wv_ref, bq_ref, bk_ref, bv_ref,
                      wo_ref, bo_ref,
                      g1_ref, bn1_ref, w1_ref, b1_ref, w2_ref, b2_ref,
                      g2_ref, bn2_ref,
                      fcw_ref, fcb_ref,
                      o_ref):
    Bt, S, D = emb_ref.shape
    L = wq_ref.shape[0]
    H = nhead
    hd = D // H
    N = Bt * S
    scale = 1.0 / math.sqrt(hd)

    # positional encoding add (f32), then flatten (Bt, S) -> N rows
    x = emb_ref[...].astype(jnp.float32) + pe_ref[...][None, :, :]   # (Bt, S, D)
    x = x.reshape(N, D)

    def to_heads(t):
        """(N, D) bf16 -> (H*Bt, S, hd): one lane slice per head (H total),
        stacked along the (free) major axis so all (batch, head) matmuls run
        as ONE batched einsum."""
        t3 = t.reshape(Bt, S, D)
        return jnp.concatenate(
            [t3[:, :, h * hd:(h + 1) * hd] for h in range(H)], axis=0)

    for l in range(L):          # static unroll; fine for small L (scal. guard)
        xb = x.astype(jnp.bfloat16)

        # ---- multi-head self attention (post-norm) -------------------------
        q = jnp.dot(xb, wq_ref[l], preferred_element_type=jnp.float32) + bq_ref[l]
        k = jnp.dot(xb, wk_ref[l], preferred_element_type=jnp.float32) + bk_ref[l]
        v = jnp.dot(xb, wv_ref[l], preferred_element_type=jnp.float32) + bv_ref[l]

        qg = to_heads(q.astype(jnp.bfloat16))      # (G, S, hd), G = H*Bt
        kg = to_heads(k.astype(jnp.bfloat16))
        vg = to_heads(v.astype(jnp.bfloat16))

        # batched scores / softmax / AV — one einsum each for all (b, h)
        s = jnp.einsum("gsd,gtd->gst", qg, kg,
                       preferred_element_type=jnp.float32) * scale   # (G,S,S) f32
        s = s - jnp.max(s, axis=-1, keepdims=True)
        p = jnp.exp(s)
        p = p * pl.reciprocal(jnp.sum(p, axis=-1, keepdims=True), approx=True)
        a = jnp.einsum("gst,gtd->gsd", p.astype(jnp.bfloat16), vg,
                       preferred_element_type=jnp.float32)           # (G,S,hd)

        # heads back onto lanes: (G, S, hd) -> (Bt, S, D) -> (N, D)
        attn = jnp.concatenate(
            [a[h * Bt:(h + 1) * Bt] for h in range(H)], axis=-1).reshape(N, D)

        attn_out = jnp.dot(attn.astype(jnp.bfloat16), wo_ref[l],
                           preferred_element_type=jnp.float32) + bo_ref[l]
        x1 = _layer_norm(x + attn_out, g1_ref[l], bn1_ref[l])

        # ---- feed forward (ReLU) --------------------------------------------
        h1 = jnp.maximum(
            jnp.dot(x1.astype(jnp.bfloat16), w1_ref[l],
                    preferred_element_type=jnp.float32) + b1_ref[l], 0.0)
        ffn = jnp.dot(h1.astype(jnp.bfloat16), w2_ref[l],
                      preferred_element_type=jnp.float32) + b2_ref[l]
        x = _layer_norm(x1 + ffn, g2_ref[l], bn2_ref[l])

    # ---- final classifier, lane-padded to Tpad (=128) lanes ------------------
    logits = jnp.dot(x.astype(jnp.bfloat16), fcw_ref[...],
                     preferred_element_type=jnp.float32) + fcb_ref[...]  # (N,Tpad)
    o_ref[...] = logits.reshape(Bt, S, -1).astype(o_ref.dtype)


# ---------------------------------------------------------------------------
# Wrapper
# ---------------------------------------------------------------------------
@partial(jax.jit, static_argnames=("nhead", "tag_num"))
def pos_tagger_forward(X, emb_table, pe, kparams, *, nhead, tag_num):
    """X: (S, B) int32 token ids -> (S, B, tag_num) float32 logits."""
    S, B = X.shape
    D = emb_table.shape[1]
    # Embedding lookup directly in kernel layout (B, S, D).
    # TODO(synk): the token-id gather stays in XLA; a Pallas DMA-gather is not
    # worth it at this vocab / activation size.
    emb = emb_table[X.T]                      # (B, S, D) f32
    pe_s = pe[:S, 0, :]                       # (S, D)
    Tpad = kparams["fc_w"].shape[1]

    # Batch tile: >=2 grid steps (v7x megacore) while keeping >=128 rows per
    # matmul slab when possible; otherwise one step with the whole batch.
    if B % 2 == 0 and (B // 2) * S >= 128:
        Bt = B // 2
    else:
        Bt = B
    grid = (B // Bt,)

    weight_args = (kparams["wq"], kparams["wk"], kparams["wv"],
                   kparams["bq"], kparams["bk"], kparams["bv"],
                   kparams["wo"], kparams["bo"],
                   kparams["g1"], kparams["bn1"],
                   kparams["w1"], kparams["b1"],
                   kparams["w2"], kparams["b2"],
                   kparams["g2"], kparams["bn2"],
                   kparams["fc_w"], kparams["fc_b"])

    in_specs = ([pl.BlockSpec((Bt, S, D), lambda i: (i, 0, 0)),   # activations move
                 pl.BlockSpec((S, D), lambda i: (0, 0))]          # PE resident
                + [_resident_spec(w.shape) for w in weight_args]) # weights resident

    out = pl.pallas_call(
        partial(pos_tagger_kernel, nhead),
        out_shape=jax.ShapeDtypeStruct((B, S, Tpad), jnp.float32),
        grid=grid,
        in_specs=in_specs,
        out_specs=pl.BlockSpec((Bt, S, Tpad), lambda i: (i, 0, 0)),
        compiler_params=pltpu.CompilerParams(
            dimension_semantics=("parallel",)),
    )(emb, pe_s, *weight_args)

    logits = out[:, :, :tag_num]                  # drop zero-padded lanes
    return jnp.transpose(logits, (1, 0, 2))       # (S, B, tag_num)


# ---------------------------------------------------------------------------
# Parameters (PyTorch-layout init + one-time conversion to kernel layout)
# ---------------------------------------------------------------------------
def make_positional_encoding(d_model, max_len):
    position = jnp.arange(max_len, dtype=jnp.float32)[:, None]        # (L, 1)
    div_term = jnp.exp(jnp.arange(0, d_model, 2, dtype=jnp.float32)
                       * (-math.log(10000.0) / d_model))              # (D/2,)
    pe = jnp.zeros((max_len, d_model), dtype=jnp.float32)
    pe = pe.at[:, 0::2].set(jnp.sin(position * div_term))
    pe = pe.at[:, 1::2].set(jnp.cos(position * div_term))
    return pe[:, None, :]                                             # (L, 1, D)


def init_params(key, vocab_size, tag_num, max_len, emb_dim, num_layers,
                dim_feedforward):
    keys = jax.random.split(key, 4 + num_layers)
    params = {
        "emb": jax.random.normal(keys[0], (vocab_size, emb_dim), jnp.float32) * 0.1,
        "pe": make_positional_encoding(emb_dim, max_len),
        "fc_w": jax.random.normal(keys[1], (tag_num, emb_dim), jnp.float32) * 0.1,
        "fc_b": jnp.zeros((1, tag_num), jnp.float32),
        "layers": [],
    }
    for l in range(num_layers):
        lk = jax.random.split(keys[4 + l], 8)
        D, Dff = emb_dim, dim_feedforward
        params["layers"].append({
            "wqkv": jax.random.normal(lk[0], (3 * D, D), jnp.float32) * 0.1,
            "bqkv": jnp.zeros((1, 3 * D), jnp.float32),
            "wo":   jax.random.normal(lk[1], (D, D), jnp.float32) * 0.1,
            "bo":   jnp.zeros((1, D), jnp.float32),
            "g1":   jnp.ones((1, D), jnp.float32),
            "bn1":  jnp.zeros((1, D), jnp.float32),
            "w1":   jax.random.normal(lk[2], (Dff, D), jnp.float32) * 0.1,
            "b1":   jnp.zeros((1, Dff), jnp.float32),
            "w2":   jax.random.normal(lk[3], (D, Dff), jnp.float32) * 0.1,
            "b2":   jnp.zeros((1, D), jnp.float32),
            "g2":   jnp.ones((1, D), jnp.float32),
            "bn2":  jnp.zeros((1, D), jnp.float32),
        })
    return params


def prepare_kernel_params(params, lane=128, matmul_dtype=jnp.bfloat16):
    """One-time conversion: split in_proj into Q/K/V, transpose weights, stack
    over layers, cast MXU-operand weights to bf16, and pad the classifier to a
    lane-dense (D, Tpad) / (1, Tpad) layout.  Biases / LN params stay f32."""
    layers = params["layers"]
    D = params["emb"].shape[1]

    def stk(fn, dtype=jnp.float32):
        return jnp.stack([fn(p) for p in layers], axis=0).astype(dtype)

    kp = {
        "wq": stk(lambda p: p["wqkv"][:D].T,        matmul_dtype),  # (L, D, D)
        "wk": stk(lambda p: p["wqkv"][D:2 * D].T,   matmul_dtype),
        "wv": stk(lambda p: p["wqkv"][2 * D:].T,    matmul_dtype),
        "bq": stk(lambda p: p["bqkv"][:, :D]),                      # (L, 1, D)
        "bk": stk(lambda p: p["bqkv"][:, D:2 * D]),
        "bv": stk(lambda p: p["bqkv"][:, 2 * D:]),
        "wo": stk(lambda p: p["wo"].T,              matmul_dtype),  # (L, D, D)
        "bo": stk(lambda p: p["bo"]),
        "g1": stk(lambda p: p["g1"]),
        "bn1": stk(lambda p: p["bn1"]),
        "w1": stk(lambda p: p["w1"].T,              matmul_dtype),  # (L, D, Dff)
        "b1": stk(lambda p: p["b1"]),
        "w2": stk(lambda p: p["w2"].T,              matmul_dtype),  # (L, Dff, D)
        "b2": stk(lambda p: p["b2"]),
        "g2": stk(lambda p: p["g2"]),
        "bn2": stk(lambda p: p["bn2"]),
    }
    T, D_ = params["fc_w"].shape
    Tpad = max(lane, ((T + lane - 1) // lane) * lane)
    kp["fc_w"] = (jnp.zeros((D_, Tpad), jnp.float32)
                  .at[:, :T].set(params["fc_w"].T).astype(matmul_dtype))
    kp["fc_b"] = jnp.zeros((1, Tpad), jnp.float32).at[:, :T].set(params["fc_b"])
    return kp


# ---------------------------------------------------------------------------
if __name__ == "__main__":
    vocab_size = 50
    tag_num = 8
    max_len = 30
    emb_dim = 32
    num_layers = 2
    nhead = 4
    dim_feedforward = 64
    S, B = 16, 16        # seq len, batch  (128 rows per grid step, 2-step grid)

    key = jax.random.PRNGKey(0)
    k_data, k_params = jax.random.split(key)

    params = init_params(k_params, vocab_size, tag_num, max_len, emb_dim,
                         num_layers, dim_feedforward)
    kparams = prepare_kernel_params(params)
    X = jax.random.randint(k_data, (S, B), 0, vocab_size, dtype=jnp.int32)

    out = pos_tagger_forward(X, params["emb"], params["pe"], kparams,
                             nhead=nhead, tag_num=tag_num)
    out = jax.block_until_ready(out)
    assert out.shape == (S, B, tag_num), out.shape
    print("KERNEL_OK")
</pallas_src>

<mosaic_0001>
module attributes {stable_mosaic.version = 11 : i64} {
  func.func @pos_tagger_kernel(%arg0: i32, %arg1: memref<8x16x32xf32, #tpu.memory_space<vmem>>, %arg2: memref<16x32xf32, #tpu.memory_space<vmem>>, %arg3: memref<2x32x32xbf16, #tpu.memory_space<vmem>>, %arg4: memref<2x32x32xbf16, #tpu.memory_space<vmem>>, %arg5: memref<2x32x32xbf16, #tpu.memory_space<vmem>>, %arg6: memref<2x1x32xf32, #tpu.memory_space<vmem>>, %arg7: memref<2x1x32xf32, #tpu.memory_space<vmem>>, %arg8: memref<2x1x32xf32, #tpu.memory_space<vmem>>, %arg9: memref<2x32x32xbf16, #tpu.memory_space<vmem>>, %arg10: memref<2x1x32xf32, #tpu.memory_space<vmem>>, %arg11: memref<2x1x32xf32, #tpu.memory_space<vmem>>, %arg12: memref<2x1x32xf32, #tpu.memory_space<vmem>>, %arg13: memref<2x32x64xbf16, #tpu.memory_space<vmem>>, %arg14: memref<2x1x64xf32, #tpu.memory_space<vmem>>, %arg15: memref<2x64x32xbf16, #tpu.memory_space<vmem>>, %arg16: memref<2x1x32xf32, #tpu.memory_space<vmem>>, %arg17: memref<2x1x32xf32, #tpu.memory_space<vmem>>, %arg18: memref<2x1x32xf32, #tpu.memory_space<vmem>>, %arg19: memref<32x128xbf16, #tpu.memory_space<vmem>>, %arg20: memref<1x128xf32, #tpu.memory_space<vmem>>, %arg21: memref<8x16x128xf32, #tpu.memory_space<vmem>>) attributes {dimension_semantics = [#tpu.dimension_semantics<parallel>], iteration_bounds = array<i64: 2>, scalar_prefetch = 0 : i64, scratch_operands = 0 : i64, tpu.core_type = #tpu.core_type<tc>, window_params = [{transform_indices = @transform_0, window_bounds = array<i64: 8, 16, 32>}, {pipeline_mode = #tpu.pipeline_mode<synchronous>, transform_indices = @transform_1, window_bounds = array<i64: 16, 32>}, {pipeline_mode = #tpu.pipeline_mode<synchronous>, transform_indices = @transform_2, window_bounds = array<i64: 2, 32, 32>}, {pipeline_mode = #tpu.pipeline_mode<synchronous>, transform_indices = @transform_3, window_bounds = array<i64: 2, 32, 32>}, {pipeline_mode = #tpu.pipeline_mode<synchronous>, transform_indices = @transform_4, window_bounds = array<i64: 2, 32, 32>}, {pipeline_mode = #tpu.pipeline_mode<synchronous>, transform_indices = @transform_5, window_bounds = array<i64: 2, 1, 32>}, {pipeline_mode = #tpu.pipeline_mode<synchronous>, transform_indices = @transform_6, window_bounds = array<i64: 2, 1, 32>}, {pipeline_mode = #tpu.pipeline_mode<synchronous>, transform_indices = @transform_7, window_bounds = array<i64: 2, 1, 32>}, {pipeline_mode = #tpu.pipeline_mode<synchronous>, transform_indices = @transform_8, window_bounds = array<i64: 2, 32, 32>}, {pipeline_mode = #tpu.pipeline_mode<synchronous>, transform_indices = @transform_9, window_bounds = array<i64: 2, 1, 32>}, {pipeline_mode = #tpu.pipeline_mode<synchronous>, transform_indices = @transform_10, window_bounds = array<i64: 2, 1, 32>}, {pipeline_mode = #tpu.pipeline_mode<synchronous>, transform_indices = @transform_11, window_bounds = array<i64: 2, 1, 32>}, {pipeline_mode = #tpu.pipeline_mode<synchronous>, transform_indices = @transform_12, window_bounds = array<i64: 2, 32, 64>}, {pipeline_mode = #tpu.pipeline_mode<synchronous>, transform_indices = @transform_13, window_bounds = array<i64: 2, 1, 64>}, {pipeline_mode = #tpu.pipeline_mode<synchronous>, transform_indices = @transform_14, window_bounds = array<i64: 2, 64, 32>}, {pipeline_mode = #tpu.pipeline_mode<synchronous>, transform_indices = @transform_15, window_bounds = array<i64: 2, 1, 32>}, {pipeline_mode = #tpu.pipeline_mode<synchronous>, transform_indices = @transform_16, window_bounds = array<i64: 2, 1, 32>}, {pipeline_mode = #tpu.pipeline_mode<synchronous>, transform_indices = @transform_17, window_bounds = array<i64: 2, 1, 32>}, {pipeline_mode = #tpu.pipeline_mode<synchronous>, transform_indices = @transform_18, window_bounds = array<i64: 32, 128>}, {pipeline_mode = #tpu.pipeline_mode<synchronous>, transform_indices = @transform_19, window_bounds = array<i64: 1, 128>}, {transform_indices = @transform_20, window_bounds = array<i64: 8, 16, 128>}]} {
    %c0 = arith.constant 0 : index
    %c0_0 = arith.constant 0 : index
    %c0_1 = arith.constant 0 : index
    %0 = vector.load %arg1[%c0, %c0_0, %c0_1] : memref<8x16x32xf32, #tpu.memory_space<vmem>>, vector<8x16x32xf32>
    %c0_2 = arith.constant 0 : index
    %c0_3 = arith.constant 0 : index
    %1 = vector.load %arg2[%c0_2, %c0_3] : memref<16x32xf32, #tpu.memory_space<vmem>>, vector<16x32xf32>
    %2 = vector.shape_cast %1 : vector<16x32xf32> to vector<1x16x32xf32>
    %3 = vector.broadcast %2 : vector<1x16x32xf32> to vector<8x16x32xf32>
    %4 = arith.addf %0, %3 : vector<8x16x32xf32>
    %5 = vector.shape_cast %4 : vector<8x16x32xf32> to vector<128x32xf32>
    %6 = arith.truncf %5 : vector<128x32xf32> to vector<128x32xbf16>
    %c0_4 = arith.constant 0 : index
    %c0_5 = arith.constant 0 : index
    %c0_6 = arith.constant 0 : index
    %7 = vector.load %arg3[%c0_4, %c0_5, %c0_6] : memref<2x32x32xbf16, #tpu.memory_space<vmem>>, vector<1x32x32xbf16>
    %8 = vector.shape_cast %7 : vector<1x32x32xbf16> to vector<32x32xbf16>
    %cst = arith.constant dense<0.000000e+00> : vector<128x32xf32>
    %9 = tpu.matmul %6, %8, %cst {dimension_numbers = #tpu.dot_dimension_numbers<[1], [0], [0], [1], [0, 0, 1, 1], [], []>} : vector<128x32xbf16>, vector<32x32xbf16>, vector<128x32xf32> -> vector<128x32xf32>
    %c0_7 = arith.constant 0 : index
    %c0_8 = arith.constant 0 : index
    %c0_9 = arith.constant 0 : index
    %10 = vector.load %arg6[%c0_7, %c0_8, %c0_9] : memref<2x1x32xf32, #tpu.memory_space<vmem>>, vector<1x1x32xf32>
    %11 = vector.shape_cast %10 : vector<1x1x32xf32> to vector<1x32xf32>
    %12 = vector.broadcast %11 : vector<1x32xf32> to vector<128x32xf32>
    %13 = arith.addf %9, %12 : vector<128x32xf32>
    %c0_10 = arith.constant 0 : index
    %c0_11 = arith.constant 0 : index
    %c0_12 = arith.constant 0 : index
    %14 = vector.load %arg4[%c0_10, %c0_11, %c0_12] : memref<2x32x32xbf16, #tpu.memory_space<vmem>>, vector<1x32x32xbf16>
    %15 = vector.shape_cast %14 : vector<1x32x32xbf16> to vector<32x32xbf16>
    %cst_13 = arith.constant dense<0.000000e+00> : vector<128x32xf32>
    %16 = tpu.matmul %6, %15, %cst_13 {dimension_numbers = #tpu.dot_dimension_numbers<[1], [0], [0], [1], [0, 0, 1, 1], [], []>} : vector<128x32xbf16>, vector<32x32xbf16>, vector<128x32xf32> -> vector<128x32xf32>
    %c0_14 = arith.constant 0 : index
    %c0_15 = arith.constant 0 : index
    %c0_16 = arith.constant 0 : index
    %17 = vector.load %arg7[%c0_14, %c0_15, %c0_16] : memref<2x1x32xf32, #tpu.memory_space<vmem>>, vector<1x1x32xf32>
    %18 = vector.shape_cast %17 : vector<1x1x32xf32> to vector<1x32xf32>
    %19 = vector.broadcast %18 : vector<1x32xf32> to vector<128x32xf32>
    %20 = arith.addf %16, %19 : vector<128x32xf32>
    %c0_17 = arith.constant 0 : index
    %c0_18 = arith.constant 0 : index
    %c0_19 = arith.constant 0 : index
    %21 = vector.load %arg5[%c0_17, %c0_18, %c0_19] : memref<2x32x32xbf16, #tpu.memory_space<vmem>>, vector<1x32x32xbf16>
    %22 = vector.shape_cast %21 : vector<1x32x32xbf16> to vector<32x32xbf16>
    %cst_20 = arith.constant dense<0.000000e+00> : vector<128x32xf32>
    %23 = tpu.matmul %6, %22, %cst_20 {dimension_numbers = #tpu.dot_dimension_numbers<[1], [0], [0], [1], [0, 0, 1, 1], [], []>} : vector<128x32xbf16>, vector<32x32xbf16>, vector<128x32xf32> -> vector<128x32xf32>
    %c0_21 = arith.constant 0 : index
    %c0_22 = arith.constant 0 : index
    %c0_23 = arith.constant 0 : index
    %24 = vector.load %arg8[%c0_21, %c0_22, %c0_23] : memref<2x1x32xf32, #tpu.memory_space<vmem>>, vector<1x1x32xf32>
    %25 = vector.shape_cast %24 : vector<1x1x32xf32> to vector<1x32xf32>
    %26 = vector.broadcast %25 : vector<1x32xf32> to vector<128x32xf32>
    %27 = arith.addf %23, %26 : vector<128x32xf32>
    %28 = arith.truncf %13 : vector<128x32xf32> to vector<128x32xbf16>
    %29 = vector.shape_cast %28 : vector<128x32xbf16> to vector<8x16x32xbf16>
    %30 = vector.extract_strided_slice %29 {offsets = [0, 0, 0], sizes = [8, 16, 8], strides = [1, 1, 1]} : vector<8x16x32xbf16> to vector<8x16x8xbf16>
    %31 = vector.extract_strided_slice %29 {offsets = [0, 0, 8], sizes = [8, 16, 8], strides = [1, 1, 1]} : vector<8x16x32xbf16> to vector<8x16x8xbf16>
    %32 = vector.extract_strided_slice %29 {offsets = [0, 0, 16], sizes = [8, 16, 8], strides = [1, 1, 1]} : vector<8x16x32xbf16> to vector<8x16x8xbf16>
    %33 = vector.extract_strided_slice %29 {offsets = [0, 0, 24], sizes = [8, 16, 8], strides = [1, 1, 1]} : vector<8x16x32xbf16> to vector<8x16x8xbf16>
    %34 = tpu.concatenate %30, %31, %32, %33 in 0 : vector<8x16x8xbf16>, vector<8x16x8xbf16>, vector<8x16x8xbf16>, vector<8x16x8xbf16> -> vector<32x16x8xbf16>
    %35 = arith.truncf %20 : vector<128x32xf32> to vector<128x32xbf16>
    %36 = vector.shape_cast %35 : vector<128x32xbf16> to vector<8x16x32xbf16>
    %37 = vector.extract_strided_slice %36 {offsets = [0, 0, 0], sizes = [8, 16, 8], strides = [1, 1, 1]} : vector<8x16x32xbf16> to vector<8x16x8xbf16>
    %38 = vector.extract_strided_slice %36 {offsets = [0, 0, 8], sizes = [8, 16, 8], strides = [1, 1, 1]} : vector<8x16x32xbf16> to vector<8x16x8xbf16>
    %39 = vector.extract_strided_slice %36 {offsets = [0, 0, 16], sizes = [8, 16, 8], strides = [1, 1, 1]} : vector<8x16x32xbf16> to vector<8x16x8xbf16>
    %40 = vector.extract_strided_slice %36 {offsets = [0, 0, 24], sizes = [8, 16, 8], strides = [1, 1, 1]} : vector<8x16x32xbf16> to vector<8x16x8xbf16>
    %41 = tpu.concatenate %37, %38, %39, %40 in 0 : vector<8x16x8xbf16>, vector<8x16x8xbf16>, vector<8x16x8xbf16>, vector<8x16x8xbf16> -> vector<32x16x8xbf16>
    %42 = arith.truncf %27 : vector<128x32xf32> to vector<128x32xbf16>
    %43 = vector.shape_cast %42 : vector<128x32xbf16> to vector<8x16x32xbf16>
    %44 = vector.extract_strided_slice %43 {offsets = [0, 0, 0], sizes = [8, 16, 8], strides = [1, 1, 1]} : vector<8x16x32xbf16> to vector<8x16x8xbf16>
    %45 = vector.extract_strided_slice %43 {offsets = [0, 0, 8], sizes = [8, 16, 8], strides = [1, 1, 1]} : vector<8x16x32xbf16> to vector<8x16x8xbf16>
    %46 = vector.extract_strided_slice %43 {offsets = [0, 0, 16], sizes = [8, 16, 8], strides = [1, 1, 1]} : vector<8x16x32xbf16> to vector<8x16x8xbf16>
    %47 = vector.extract_strided_slice %43 {offsets = [0, 0, 24], sizes = [8, 16, 8], strides = [1, 1, 1]} : vector<8x16x32xbf16> to vector<8x16x8xbf16>
    %48 = tpu.concatenate %44, %45, %46, %47 in 0 : vector<8x16x8xbf16>, vector<8x16x8xbf16>, vector<8x16x8xbf16>, vector<8x16x8xbf16> -> vector<32x16x8xbf16>
    "tpu.trace_start"() <{level = 10 : i32, message = "gsd,gtd->gst"}> : () -> ()
    %cst_24 = arith.constant dense<0.000000e+00> : vector<32x16x16xf32>
    %49 = tpu.matmul %34, %41, %cst_24 {dimension_numbers = #tpu.dot_dimension_numbers<[2], [2], [1], [1], [0, 0, 0, 1, 1, 1], [0], [0]>} : vector<32x16x8xbf16>, vector<32x16x8xbf16>, vector<32x16x16xf32> -> vector<32x16x16xf32>
    "tpu.trace_stop"() : () -> ()
    %cst_25 = arith.constant 0.353553385 : f32
    %50 = vector.broadcast %cst_25 : f32 to vector<32x16x16xf32>
    %51 = arith.mulf %49, %50 : vector<32x16x16xf32>
    %cst_26 = arith.constant dense<0xFF800000> : vector<32x16xf32>
    %52 = vector.multi_reduction <maximumf>, %51, %cst_26 [2] : vector<32x16x16xf32> to vector<32x16xf32>
    %53 = vector.shape_cast %52 : vector<32x16xf32> to vector<32x16x1xf32>
    %54 = vector.broadcast %53 : vector<32x16x1xf32> to vector<32x16x16xf32>
    %55 = arith.subf %51, %54 : vector<32x16x16xf32>
    %56 = math.exp %55 : vector<32x16x16xf32>
    %cst_27 = arith.constant dense<0.000000e+00> : vector<32x16xf32>
    %57 = vector.multi_reduction <add>, %56, %cst_27 [2] : vector<32x16x16xf32> to vector<32x16xf32>
    %58 = vector.shape_cast %57 : vector<32x16xf32> to vector<32x16x1xf32>
    %59 = tpu.reciprocal %58 {approx = true} : vector<32x16x1xf32> -> vector<32x16x1xf32>
    %60 = vector.broadcast %59 : vector<32x16x1xf32> to vector<32x16x16xf32>
    %61 = arith.mulf %56, %60 : vector<32x16x16xf32>
    %62 = arith.truncf %61 : vector<32x16x16xf32> to vector<32x16x16xbf16>
    "tpu.trace_start"() <{level = 10 : i32, message = "gst,gtd->gsd"}> : () -> ()
    %cst_28 = arith.constant dense<0.000000e+00> : vector<32x16x8xf32>
    %63 = tpu.matmul %62, %48, %cst_28 {dimension_numbers = #tpu.dot_dimension_numbers<[2], [1], [1], [2], [0, 0, 0, 1, 1, 2], [0], [0]>} : vector<32x16x16xbf16>, vector<32x16x8xbf16>, vector<32x16x8xf32> -> vector<32x16x8xf32>
    "tpu.trace_stop"() : () -> ()
    %64 = vector.extract_strided_slice %63 {offsets = [0, 0, 0], sizes = [8, 16, 8], strides = [1, 1, 1]} : vector<32x16x8xf32> to vector<8x16x8xf32>
    %65 = vector.extract_strided_slice %63 {offsets = [8, 0, 0], sizes = [8, 16, 8], strides = [1, 1, 1]} : vector<32x16x8xf32> to vector<8x16x8xf32>
    %66 = vector.extract_strided_slice %63 {offsets = [16, 0, 0], sizes = [8, 16, 8], strides = [1, 1, 1]} : vector<32x16x8xf32> to vector<8x16x8xf32>
    %67 = vector.extract_strided_slice %63 {offsets = [24, 0, 0], sizes = [8, 16, 8], strides = [1, 1, 1]} : vector<32x16x8xf32> to vector<8x16x8xf32>
    %68 = tpu.concatenate %64, %65, %66, %67 in 2 : vector<8x16x8xf32>, vector<8x16x8xf32>, vector<8x16x8xf32>, vector<8x16x8xf32> -> vector<8x16x32xf32>
    %69 = vector.shape_cast %68 : vector<8x16x32xf32> to vector<128x32xf32>
    %70 = arith.truncf %69 : vector<128x32xf32> to vector<128x32xbf16>
    %c0_29 = arith.constant 0 : index
    %c0_30 = arith.constant 0 : index
    %c0_31 = arith.constant 0 : index
    %71 = vector.load %arg9[%c0_29, %c0_30, %c0_31] : memref<2x32x32xbf16, #tpu.memory_space<vmem>>, vector<1x32x32xbf16>
    %72 = vector.shape_cast %71 : vector<1x32x32xbf16> to vector<32x32xbf16>
    %cst_32 = arith.constant dense<0.000000e+00> : vector<128x32xf32>
    %73 = tpu.matmul %70, %72, %cst_32 {dimension_numbers = #tpu.dot_dimension_numbers<[1], [0], [0], [1], [0, 0, 1, 1], [], []>} : vector<128x32xbf16>, vector<32x32xbf16>, vector<128x32xf32> -> vector<128x32xf32>
    %c0_33 = arith.constant 0 : index
    %c0_34 = arith.constant 0 : index
    %c0_35 = arith.constant 0 : index
    %74 = vector.load %arg10[%c0_33, %c0_34, %c0_35] : memref<2x1x32xf32, #tpu.memory_space<vmem>>, vector<1x1x32xf32>
    %75 = vector.shape_cast %74 : vector<1x1x32xf32> to vector<1x32xf32>
    %76 = vector.broadcast %75 : vector<1x32xf32> to vector<128x32xf32>
    %77 = arith.addf %73, %76 : vector<128x32xf32>
    %78 = arith.addf %5, %77 : vector<128x32xf32>
    %c0_36 = arith.constant 0 : index
    %c0_37 = arith.constant 0 : index
    %c0_38 = arith.constant 0 : index
    %79 = vector.load %arg11[%c0_36, %c0_37, %c0_38] : memref<2x1x32xf32, #tpu.memory_space<vmem>>, vector<1x1x32xf32>
    %80 = vector.shape_cast %79 : vector<1x1x32xf32> to vector<1x32xf32>
    %c0_39 = arith.constant 0 : index
    %c0_40 = arith.constant 0 : index
    %c0_41 = arith.constant 0 : index
    %81 = vector.load %arg12[%c0_39, %c0_40, %c0_41] : memref<2x1x32xf32, #tpu.memory_space<vmem>>, vector<1x1x32xf32>
    %82 = vector.shape_cast %81 : vector<1x1x32xf32> to vector<1x32xf32>
    %cst_42 = arith.constant dense<0.000000e+00> : vector<128xf32>
    %83 = vector.multi_reduction <add>, %78, %cst_42 [1] : vector<128x32xf32> to vector<128xf32>
    %84 = vector.shape_cast %83 : vector<128xf32> to vector<128x1xf32>
    %cst_43 = arith.constant 3.200000e+01 : f32
    %85 = vector.broadcast %cst_43 : f32 to vector<128x1xf32>
    %86 = arith.divf %84, %85 : vector<128x1xf32>
    %87 = vector.broadcast %86 : vector<128x1xf32> to vector<128x32xf32>
    %88 = arith.subf %78, %87 : vector<128x32xf32>
    %89 = arith.mulf %88, %88 : vector<128x32xf32>
    %cst_44 = arith.constant dense<0.000000e+00> : vector<128xf32>
    %90 = vector.multi_reduction <add>, %89, %cst_44 [1] : vector<128x32xf32> to vector<128xf32>
    %91 = vector.shape_cast %90 : vector<128xf32> to vector<128x1xf32>
    %cst_45 = arith.constant 3.200000e+01 : f32
    %92 = vector.broadcast %cst_45 : f32 to vector<128x1xf32>
    %93 = arith.divf %91, %92 : vector<128x1xf32>
    %94 = vector.broadcast %86 : vector<128x1xf32> to vector<128x32xf32>
    %95 = arith.subf %78, %94 : vector<128x32xf32>
    %cst_46 = arith.constant 9.99999974E-6 : f32
    %96 = vector.broadcast %cst_46 : f32 to vector<128x1xf32>
    %97 = arith.addf %93, %96 : vector<128x1xf32>
    %98 = math.rsqrt %97 : vector<128x1xf32>
    %99 = vector.broadcast %98 : vector<128x1xf32> to vector<128x32xf32>
    %100 = arith.mulf %95, %99 : vector<128x32xf32>
    %101 = vector.broadcast %80 : vector<1x32xf32> to vector<128x32xf32>
    %102 = arith.mulf %100, %101 : vector<128x32xf32>
    %103 = vector.broadcast %82 : vector<1x32xf32> to vector<128x32xf32>
    %104 = arith.addf %102, %103 : vector<128x32xf32>
    %105 = arith.truncf %104 : vector<128x32xf32> to vector<128x32xbf16>
    %c0_47 = arith.constant 0 : index
    %c0_48 = arith.constant 0 : index
    %c0_49 = arith.constant 0 : index
    %106 = vector.load %arg13[%c0_47, %c0_48, %c0_49] : memref<2x32x64xbf16, #tpu.memory_space<vmem>>, vector<1x32x64xbf16>
    %107 = vector.shape_cast %106 : vector<1x32x64xbf16> to vector<32x64xbf16>
    %cst_50 = arith.constant dense<0.000000e+00> : vector<128x64xf32>
    %108 = tpu.matmul %105, %107, %cst_50 {dimension_numbers = #tpu.dot_dimension_numbers<[1], [0], [0], [1], [0, 0, 1, 1], [], []>} : vector<128x32xbf16>, vector<32x64xbf16>, vector<128x64xf32> -> vector<128x64xf32>
    %c0_51 = arith.constant 0 : index
    %c0_52 = arith.constant 0 : index
    %c0_53 = arith.constant 0 : index
    %109 = vector.load %arg14[%c0_51, %c0_52, %c0_53] : memref<2x1x64xf32, #tpu.memory_space<vmem>>, vector<1x1x64xf32>
    %110 = vector.shape_cast %109 : vector<1x1x64xf32> to vector<1x64xf32>
    %111 = vector.broadcast %110 : vector<1x64xf32> to vector<128x64xf32>
    %112 = arith.addf %108, %111 : vector<128x64xf32>
    %cst_54 = arith.constant 0.000000e+00 : f32
    %113 = vector.broadcast %cst_54 : f32 to vector<128x64xf32>
    %114 = arith.maximumf %112, %113 : vector<128x64xf32>
    %115 = arith.truncf %114 : vector<128x64xf32> to vector<128x64xbf16>
    %c0_55 = arith.constant 0 : index
    %c0_56 = arith.constant 0 : index
    %c0_57 = arith.constant 0 : index
    %116 = vector.load %arg15[%c0_55, %c0_56, %c0_57] : memref<2x64x32xbf16, #tpu.memory_space<vmem>>, vector<1x64x32xbf16>
    %117 = vector.shape_cast %116 : vector<1x64x32xbf16> to vector<64x32xbf16>
    %cst_58 = arith.constant dense<0.000000e+00> : vector<128x32xf32>
    %118 = tpu.matmul %115, %117, %cst_58 {dimension_numbers = #tpu.dot_dimension_numbers<[1], [0], [0], [1], [0, 0, 1, 1], [], []>} : vector<128x64xbf16>, vector<64x32xbf16>, vector<128x32xf32> -> vector<128x32xf32>
    %c0_59 = arith.constant 0 : index
    %c0_60 = arith.constant 0 : index
    %c0_61 = arith.constant 0 : index
    %119 = vector.load %arg16[%c0_59, %c0_60, %c0_61] : memref<2x1x32xf32, #tpu.memory_space<vmem>>, vector<1x1x32xf32>
    %120 = vector.shape_cast %119 : vector<1x1x32xf32> to vector<1x32xf32>
    %121 = vector.broadcast %120 : vector<1x32xf32> to vector<128x32xf32>
    %122 = arith.addf %118, %121 : vector<128x32xf32>
    %123 = arith.addf %104, %122 : vector<128x32xf32>
    %c0_62 = arith.constant 0 : index
    %c0_63 = arith.constant 0 : index
    %c0_64 = arith.constant 0 : index
    %124 = vector.load %arg17[%c0_62, %c0_63, %c0_64] : memref<2x1x32xf32, #tpu.memory_space<vmem>>, vector<1x1x32xf32>
    %125 = vector.shape_cast %124 : vector<1x1x32xf32> to vector<1x32xf32>
    %c0_65 = arith.constant 0 : index
    %c0_66 = arith.constant 0 : index
    %c0_67 = arith.constant 0 : index
    %126 = vector.load %arg18[%c0_65, %c0_66, %c0_67] : memref<2x1x32xf32, #tpu.memory_space<vmem>>, vector<1x1x32xf32>
    %127 = vector.shape_cast %126 : vector<1x1x32xf32> to vector<1x32xf32>
    %cst_68 = arith.constant dense<0.000000e+00> : vector<128xf32>
    %128 = vector.multi_reduction <add>, %123, %cst_68 [1] : vector<128x32xf32> to vector<128xf32>
    %129 = vector.shape_cast %128 : vector<128xf32> to vector<128x1xf32>
    %cst_69 = arith.constant 3.200000e+01 : f32
    %130 = vector.broadcast %cst_69 : f32 to vector<128x1xf32>
    %131 = arith.divf %129, %130 : vector<128x1xf32>
    %132 = vector.broadcast %131 : vector<128x1xf32> to vector<128x32xf32>
    %133 = arith.subf %123, %132 : vector<128x32xf32>
    %134 = arith.mulf %133, %133 : vector<128x32xf32>
    %cst_70 = arith.constant dense<0.000000e+00> : vector<128xf32>
    %135 = vector.multi_reduction <add>, %134, %cst_70 [1] : vector<128x32xf32> to vector<128xf32>
    %136 = vector.shape_cast %135 : vector<128xf32> to vector<128x1xf32>
    %cst_71 = arith.constant 3.200000e+01 : f32
    %137 = vector.broadcast %cst_71 : f32 to vector<128x1xf32>
    %138 = arith.divf %136, %137 : vector<128x1xf32>
    %139 = vector.broadcast %131 : vector<128x1xf32> to vector<128x32xf32>
    %140 = arith.subf %123, %139 : vector<128x32xf32>
    %cst_72 = arith.constant 9.99999974E-6 : f32
    %141 = vector.broadcast %cst_72 : f32 to vector<128x1xf32>
    %142 = arith.addf %138, %141 : vector<128x1xf32>
    %143 = math.rsqrt %142 : vector<128x1xf32>
    %144 = vector.broadcast %143 : vector<128x1xf32> to vector<128x32xf32>
    %145 = arith.mulf %140, %144 : vector<128x32xf32>
    %146 = vector.broadcast %125 : vector<1x32xf32> to vector<128x32xf32>
    %147 = arith.mulf %145, %146 : vector<128x32xf32>
    %148 = vector.broadcast %127 : vector<1x32xf32> to vector<128x32xf32>
    %149 = arith.addf %147, %148 : vector<128x32xf32>
    %150 = arith.truncf %149 : vector<128x32xf32> to vector<128x32xbf16>
    %c1 = arith.constant 1 : index
    %c0_73 = arith.constant 0 : index
    %c0_74 = arith.constant 0 : index
    %151 = vector.load %arg3[%c1, %c0_73, %c0_74] : memref<2x32x32xbf16, #tpu.memory_space<vmem>>, vector<1x32x32xbf16>
    %152 = vector.shape_cast %151 : vector<1x32x32xbf16> to vector<32x32xbf16>
    %cst_75 = arith.constant dense<0.000000e+00> : vector<128x32xf32>
    %153 = tpu.matmul %150, %152, %cst_75 {dimension_numbers = #tpu.dot_dimension_numbers<[1], [0], [0], [1], [0, 0, 1, 1], [], []>} : vector<128x32xbf16>, vector<32x32xbf16>, vector<128x32xf32> -> vector<128x32xf32>
    %c1_76 = arith.constant 1 : index
    %c0_77 = arith.constant 0 : index
    %c0_78 = arith.constant 0 : index
    %154 = vector.load %arg6[%c1_76, %c0_77, %c0_78] : memref<2x1x32xf32, #tpu.memory_space<vmem>>, vector<1x1x32xf32>
    %155 = vector.shape_cast %154 : vector<1x1x32xf32> to vector<1x32xf32>
    %156 = vector.broadcast %155 : vector<1x32xf32> to vector<128x32xf32>
    %157 = arith.addf %153, %156 : vector<128x32xf32>
    %c1_79 = arith.constant 1 : index
    %c0_80 = arith.constant 0 : index
    %c0_81 = arith.constant 0 : index
    %158 = vector.load %arg4[%c1_79, %c0_80, %c0_81] : memref<2x32x32xbf16, #tpu.memory_space<vmem>>, vector<1x32x32xbf16>
    %159 = vector.shape_cast %158 : vector<1x32x32xbf16> to vector<32x32xbf16>
    %cst_82 = arith.constant dense<0.000000e+00> : vector<128x32xf32>
    %160 = tpu.matmul %150, %159, %cst_82 {dimension_numbers = #tpu.dot_dimension_numbers<[1], [0], [0], [1], [0, 0, 1, 1], [], []>} : vector<128x32xbf16>, vector<32x32xbf16>, vector<128x32xf32> -> vector<128x32xf32>
    %c1_83 = arith.constant 1 : index
    %c0_84 = arith.constant 0 : index
    %c0_85 = arith.constant 0 : index
    %161 = vector.load %arg7[%c1_83, %c0_84, %c0_85] : memref<2x1x32xf32, #tpu.memory_space<vmem>>, vector<1x1x32xf32>
    %162 = vector.shape_cast %161 : vector<1x1x32xf32> to vector<1x32xf32>
    %163 = vector.broadcast %162 : vector<1x32xf32> to vector<128x32xf32>
    %164 = arith.addf %160, %163 : vector<128x32xf32>
    %c1_86 = arith.constant 1 : index
    %c0_87 = arith.constant 0 : index
    %c0_88 = arith.constant 0 : index
    %165 = vector.load %arg5[%c1_86, %c0_87, %c0_88] : memref<2x32x32xbf16, #tpu.memory_space<vmem>>, vector<1x32x32xbf16>
    %166 = vector.shape_cast %165 : vector<1x32x32xbf16> to vector<32x32xbf16>
    %cst_89 = arith.constant dense<0.000000e+00> : vector<128x32xf32>
    %167 = tpu.matmul %150, %166, %cst_89 {dimension_numbers = #tpu.dot_dimension_numbers<[1], [0], [0], [1], [0, 0, 1, 1], [], []>} : vector<128x32xbf16>, vector<32x32xbf16>, vector<128x32xf32> -> vector<128x32xf32>
    %c1_90 = arith.constant 1 : index
    %c0_91 = arith.constant 0 : index
    %c0_92 = arith.constant 0 : index
    %168 = vector.load %arg8[%c1_90, %c0_91, %c0_92] : memref<2x1x32xf32, #tpu.memory_space<vmem>>, vector<1x1x32xf32>
    %169 = vector.shape_cast %168 : vector<1x1x32xf32> to vector<1x32xf32>
    %170 = vector.broadcast %169 : vector<1x32xf32> to vector<128x32xf32>
    %171 = arith.addf %167, %170 : vector<128x32xf32>
    %172 = arith.truncf %157 : vector<128x32xf32> to vector<128x32xbf16>
    %173 = vector.shape_cast %172 : vector<128x32xbf16> to vector<8x16x32xbf16>
    %174 = vector.extract_strided_slice %173 {offsets = [0, 0, 0], sizes = [8, 16, 8], strides = [1, 1, 1]} : vector<8x16x32xbf16> to vector<8x16x8xbf16>
    %175 = vector.extract_strided_slice %173 {offsets = [0, 0, 8], sizes = [8, 16, 8], strides = [1, 1, 1]} : vector<8x16x32xbf16> to vector<8x16x8xbf16>
    %176 = vector.extract_strided_slice %173 {offsets = [0, 0, 16], sizes = [8, 16, 8], strides = [1, 1, 1]} : vector<8x16x32xbf16> to vector<8x16x8xbf16>
    %177 = vector.extract_strided_slice %173 {offsets = [0, 0, 24], sizes = [8, 16, 8], strides = [1, 1, 1]} : vector<8x16x32xbf16> to vector<8x16x8xbf16>
    %178 = tpu.concatenate %174, %175, %176, %177 in 0 : vector<8x16x8xbf16>, vector<8x16x8xbf16>, vector<8x16x8xbf16>, vector<8x16x8xbf16> -> vector<32x16x8xbf16>
    %179 = arith.truncf %164 : vector<128x32xf32> to vector<128x32xbf16>
    %180 = vector.shape_cast %179 : vector<128x32xbf16> to vector<8x16x32xbf16>
    %181 = vector.extract_strided_slice %180 {offsets = [0, 0, 0], sizes = [8, 16, 8], strides = [1, 1, 1]} : vector<8x16x32xbf16> to vector<8x16x8xbf16>
    %182 = vector.extract_strided_slice %180 {offsets = [0, 0, 8], sizes = [8, 16, 8], strides = [1, 1, 1]} : vector<8x16x32xbf16> to vector<8x16x8xbf16>
    %183 = vector.extract_strided_slice %180 {offsets = [0, 0, 16], sizes = [8, 16, 8], strides = [1, 1, 1]} : vector<8x16x32xbf16> to vector<8x16x8xbf16>
    %184 = vector.extract_strided_slice %180 {offsets = [0, 0, 24], sizes = [8, 16, 8], strides = [1, 1, 1]} : vector<8x16x32xbf16> to vector<8x16x8xbf16>
    %185 = tpu.concatenate %181, %182, %183, %184 in 0 : vector<8x16x8xbf16>, vector<8x16x8xbf16>, vector<8x16x8xbf16>, vector<8x16x8xbf16> -> vector<32x16x8xbf16>
    %186 = arith.truncf %171 : vector<128x32xf32> to vector<128x32xbf16>
    %187 = vector.shape_cast %186 : vector<128x32xbf16> to vector<8x16x32xbf16>
    %188 = vector.extract_strided_slice %187 {offsets = [0, 0, 0], sizes = [8, 16, 8], strides = [1, 1, 1]} : vector<8x16x32xbf16> to vector<8x16x8xbf16>
    %189 = vector.extract_strided_slice %187 {offsets = [0, 0, 8], sizes = [8, 16, 8], strides = [1, 1, 1]} : vector<8x16x32xbf16> to vector<8x16x8xbf16>
    %190 = vector.extract_strided_slice %187 {offsets = [0, 0, 16], sizes = [8, 16, 8], strides = [1, 1, 1]} : vector<8x16x32xbf16> to vector<8x16x8xbf16>
    %191 = vector.extract_strided_slice %187 {offsets = [0, 0, 24], sizes = [8, 16, 8], strides = [1, 1, 1]} : vector<8x16x32xbf16> to vector<8x16x8xbf16>
    %192 = tpu.concatenate %188, %189, %190, %191 in 0 : vector<8x16x8xbf16>, vector<8x16x8xbf16>, vector<8x16x8xbf16>, vector<8x16x8xbf16> -> vector<32x16x8xbf16>
    "tpu.trace_start"() <{level = 10 : i32, message = "gsd,gtd->gst"}> : () -> ()
    %cst_93 = arith.constant dense<0.000000e+00> : vector<32x16x16xf32>
    %193 = tpu.matmul %178, %185, %cst_93 {dimension_numbers = #tpu.dot_dimension_numbers<[2], [2], [1], [1], [0, 0, 0, 1, 1, 1], [0], [0]>} : vector<32x16x8xbf16>, vector<32x16x8xbf16>, vector<32x16x16xf32> -> vector<32x16x16xf32>
    "tpu.trace_stop"() : () -> ()
    %cst_94 = arith.constant 0.353553385 : f32
    %194 = vector.broadcast %cst_94 : f32 to vector<32x16x16xf32>
    %195 = arith.mulf %193, %194 : vector<32x16x16xf32>
    %cst_95 = arith.constant dense<0xFF800000> : vector<32x16xf32>
    %196 = vector.multi_reduction <maximumf>, %195, %cst_95 [2] : vector<32x16x16xf32> to vector<32x16xf32>
    %197 = vector.shape_cast %196 : vector<32x16xf32> to vector<32x16x1xf32>
    %198 = vector.broadcast %197 : vector<32x16x1xf32> to vector<32x16x16xf32>
    %199 = arith.subf %195, %198 : vector<32x16x16xf32>
    %200 = math.exp %199 : vector<32x16x16xf32>
    %cst_96 = arith.constant dense<0.000000e+00> : vector<32x16xf32>
    %201 = vector.multi_reduction <add>, %200, %cst_96 [2] : vector<32x16x16xf32> to vector<32x16xf32>
    %202 = vector.shape_cast %201 : vector<32x16xf32> to vector<32x16x1xf32>
    %203 = tpu.reciprocal %202 {approx = true} : vector<32x16x1xf32> -> vector<32x16x1xf32>
    %204 = vector.broadcast %203 : vector<32x16x1xf32> to vector<32x16x16xf32>
    %205 = arith.mulf %200, %204 : vector<32x16x16xf32>
    %206 = arith.truncf %205 : vector<32x16x16xf32> to vector<32x16x16xbf16>
    "tpu.trace_start"() <{level = 10 : i32, message = "gst,gtd->gsd"}> : () -> ()
    %cst_97 = arith.constant dense<0.000000e+00> : vector<32x16x8xf32>
    %207 = tpu.matmul %206, %192, %cst_97 {dimension_numbers = #tpu.dot_dimension_numbers<[2], [1], [1], [2], [0, 0, 0, 1, 1, 2], [0], [0]>} : vector<32x16x16xbf16>, vector<32x16x8xbf16>, vector<32x16x8xf32> -> vector<32x16x8xf32>
    "tpu.trace_stop"() : () -> ()
    %208 = vector.extract_strided_slice %207 {offsets = [0, 0, 0], sizes = [8, 16, 8], strides = [1, 1, 1]} : vector<32x16x8xf32> to vector<8x16x8xf32>
    %209 = vector.extract_strided_slice %207 {offsets = [8, 0, 0], sizes = [8, 16, 8], strides = [1, 1, 1]} : vector<32x16x8xf32> to vector<8x16x8xf32>
    %210 = vector.extract_strided_slice %207 {offsets = [16, 0, 0], sizes = [8, 16, 8], strides = [1, 1, 1]} : vector<32x16x8xf32> to vector<8x16x8xf32>
    %211 = vector.extract_strided_slice %207 {offsets = [24, 0, 0], sizes = [8, 16, 8], strides = [1, 1, 1]} : vector<32x16x8xf32> to vector<8x16x8xf32>
    %212 = tpu.concatenate %208, %209, %210, %211 in 2 : vector<8x16x8xf32>, vector<8x16x8xf32>, vector<8x16x8xf32>, vector<8x16x8xf32> -> vector<8x16x32xf32>
    %213 = vector.shape_cast %212 : vector<8x16x32xf32> to vector<128x32xf32>
    %214 = arith.truncf %213 : vector<128x32xf32> to vector<128x32xbf16>
    %c1_98 = arith.constant 1 : index
    %c0_99 = arith.constant 0 : index
    %c0_100 = arith.constant 0 : index
    %215 = vector.load %arg9[%c1_98, %c0_99, %c0_100] : memref<2x32x32xbf16, #tpu.memory_space<vmem>>, vector<1x32x32xbf16>
    %216 = vector.shape_cast %215 : vector<1x32x32xbf16> to vector<32x32xbf16>
    %cst_101 = arith.constant dense<0.000000e+00> : vector<128x32xf32>
    %217 = tpu.matmul %214, %216, %cst_101 {dimension_numbers = #tpu.dot_dimension_numbers<[1], [0], [0], [1], [0, 0, 1, 1], [], []>} : vector<128x32xbf16>, vector<32x32xbf16>, vector<128x32xf32> -> vector<128x32xf32>
    %c1_102 = arith.constant 1 : index
    %c0_103 = arith.constant 0 : index
    %c0_104 = arith.constant 0 : index
    %218 = vector.load %arg10[%c1_102, %c0_103, %c0_104] : memref<2x1x32xf32, #tpu.memory_space<vmem>>, vector<1x1x32xf32>
    %219 = vector.shape_cast %218 : vector<1x1x32xf32> to vector<1x32xf32>
    %220 = vector.broadcast %219 : vector<1x32xf32> to vector<128x32xf32>
    %221 = arith.addf %217, %220 : vector<128x32xf32>
    %222 = arith.addf %149, %221 : vector<128x32xf32>
    %c1_105 = arith.constant 1 : index
    %c0_106 = arith.constant 0 : index
    %c0_107 = arith.constant 0 : index
    %223 = vector.load %arg11[%c1_105, %c0_106, %c0_107] : memref<2x1x32xf32, #tpu.memory_space<vmem>>, vector<1x1x32xf32>
    %224 = vector.shape_cast %223 : vector<1x1x32xf32> to vector<1x32xf32>
    %c1_108 = arith.constant 1 : index
    %c0_109 = arith.constant 0 : index
    %c0_110 = arith.constant 0 : index
    %225 = vector.load %arg12[%c1_108, %c0_109, %c0_110] : memref<2x1x32xf32, #tpu.memory_space<vmem>>, vector<1x1x32xf32>
    %226 = vector.shape_cast %225 : vector<1x1x32xf32> to vector<1x32xf32>
    %cst_111 = arith.constant dense<0.000000e+00> : vector<128xf32>
    %227 = vector.multi_reduction <add>, %222, %cst_111 [1] : vector<128x32xf32> to vector<128xf32>
    %228 = vector.shape_cast %227 : vector<128xf32> to vector<128x1xf32>
    %cst_112 = arith.constant 3.200000e+01 : f32
    %229 = vector.broadcast %cst_112 : f32 to vector<128x1xf32>
    %230 = arith.divf %228, %229 : vector<128x1xf32>
    %231 = vector.broadcast %230 : vector<128x1xf32> to vector<128x32xf32>
    %232 = arith.subf %222, %231 : vector<128x32xf32>
    %233 = arith.mulf %232, %232 : vector<128x32xf32>
    %cst_113 = arith.constant dense<0.000000e+00> : vector<128xf32>
    %234 = vector.multi_reduction <add>, %233, %cst_113 [1] : vector<128x32xf32> to vector<128xf32>
    %235 = vector.shape_cast %234 : vector<128xf32> to vector<128x1xf32>
    %cst_114 = arith.constant 3.200000e+01 : f32
    %236 = vector.broadcast %cst_114 : f32 to vector<128x1xf32>
    %237 = arith.divf %235, %236 : vector<128x1xf32>
    %238 = vector.broadcast %230 : vector<128x1xf32> to vector<128x32xf32>
    %239 = arith.subf %222, %238 : vector<128x32xf32>
    %cst_115 = arith.constant 9.99999974E-6 : f32
    %240 = vector.broadcast %cst_115 : f32 to vector<128x1xf32>
    %241 = arith.addf %237, %240 : vector<128x1xf32>
    %242 = math.rsqrt %241 : vector<128x1xf32>
    %243 = vector.broadcast %242 : vector<128x1xf32> to vector<128x32xf32>
    %244 = arith.mulf %239, %243 : vector<128x32xf32>
    %245 = vector.broadcast %224 : vector<1x32xf32> to vector<128x32xf32>
    %246 = arith.mulf %244, %245 : vector<128x32xf32>
    %247 = vector.broadcast %226 : vector<1x32xf32> to vector<128x32xf32>
    %248 = arith.addf %246, %247 : vector<128x32xf32>
    %249 = arith.truncf %248 : vector<128x32xf32> to vector<128x32xbf16>
    %c1_116 = arith.constant 1 : index
    %c0_117 = arith.constant 0 : index
    %c0_118 = arith.constant 0 : index
    %250 = vector.load %arg13[%c1_116, %c0_117, %c0_118] : memref<2x32x64xbf16, #tpu.memory_space<vmem>>, vector<1x32x64xbf16>
    %251 = vector.shape_cast %250 : vector<1x32x64xbf16> to vector<32x64xbf16>
    %cst_119 = arith.constant dense<0.000000e+00> : vector<128x64xf32>
    %252 = tpu.matmul %249, %251, %cst_119 {dimension_numbers = #tpu.dot_dimension_numbers<[1], [0], [0], [1], [0, 0, 1, 1], [], []>} : vector<128x32xbf16>, vector<32x64xbf16>, vector<128x64xf32> -> vector<128x64xf32>
    %c1_120 = arith.constant 1 : index
    %c0_121 = arith.constant 0 : index
    %c0_122 = arith.constant 0 : index
    %253 = vector.load %arg14[%c1_120, %c0_121, %c0_122] : memref<2x1x64xf32, #tpu.memory_space<vmem>>, vector<1x1x64xf32>
    %254 = vector.shape_cast %253 : vector<1x1x64xf32> to vector<1x64xf32>
    %255 = vector.broadcast %254 : vector<1x64xf32> to vector<128x64xf32>
    %256 = arith.addf %252, %255 : vector<128x64xf32>
    %cst_123 = arith.constant 0.000000e+00 : f32
    %257 = vector.broadcast %cst_123 : f32 to vector<128x64xf32>
    %258 = arith.maximumf %256, %257 : vector<128x64xf32>
    %259 = arith.truncf %258 : vector<128x64xf32> to vector<128x64xbf16>
    %c1_124 = arith.constant 1 : index
    %c0_125 = arith.constant 0 : index
    %c0_126 = arith.constant 0 : index
    %260 = vector.load %arg15[%c1_124, %c0_125, %c0_126] : memref<2x64x32xbf16, #tpu.memory_space<vmem>>, vector<1x64x32xbf16>
    %261 = vector.shape_cast %260 : vector<1x64x32xbf16> to vector<64x32xbf16>
    %cst_127 = arith.constant dense<0.000000e+00> : vector<128x32xf32>
    %262 = tpu.matmul %259, %261, %cst_127 {dimension_numbers = #tpu.dot_dimension_numbers<[1], [0], [0], [1], [0, 0, 1, 1], [], []>} : vector<128x64xbf16>, vector<64x32xbf16>, vector<128x32xf32> -> vector<128x32xf32>
    %c1_128 = arith.constant 1 : index
    %c0_129 = arith.constant 0 : index
    %c0_130 = arith.constant 0 : index
    %263 = vector.load %arg16[%c1_128, %c0_129, %c0_130] : memref<2x1x32xf32, #tpu.memory_space<vmem>>, vector<1x1x32xf32>
    %264 = vector.shape_cast %263 : vector<1x1x32xf32> to vector<1x32xf32>
    %265 = vector.broadcast %264 : vector<1x32xf32> to vector<128x32xf32>
    %266 = arith.addf %262, %265 : vector<128x32xf32>
    %267 = arith.addf %248, %266 : vector<128x32xf32>
    %c1_131 = arith.constant 1 : index
    %c0_132 = arith.constant 0 : index
    %c0_133 = arith.constant 0 : index
    %268 = vector.load %arg17[%c1_131, %c0_132, %c0_133] : memref<2x1x32xf32, #tpu.memory_space<vmem>>, vector<1x1x32xf32>
    %269 = vector.shape_cast %268 : vector<1x1x32xf32> to vector<1x32xf32>
    %c1_134 = arith.constant 1 : index
    %c0_135 = arith.constant 0 : index
    %c0_136 = arith.constant 0 : index
    %270 = vector.load %arg18[%c1_134, %c0_135, %c0_136] : memref<2x1x32xf32, #tpu.memory_space<vmem>>, vector<1x1x32xf32>
    %271 = vector.shape_cast %270 : vector<1x1x32xf32> to vector<1x32xf32>
    %cst_137 = arith.constant dense<0.000000e+00> : vector<128xf32>
    %272 = vector.multi_reduction <add>, %267, %cst_137 [1] : vector<128x32xf32> to vector<128xf32>
    %273 = vector.shape_cast %272 : vector<128xf32> to vector<128x1xf32>
    %cst_138 = arith.constant 3.200000e+01 : f32
    %274 = vector.broadcast %cst_138 : f32 to vector<128x1xf32>
    %275 = arith.divf %273, %274 : vector<128x1xf32>
    %276 = vector.broadcast %275 : vector<128x1xf32> to vector<128x32xf32>
    %277 = arith.subf %267, %276 : vector<128x32xf32>
    %278 = arith.mulf %277, %277 : vector<128x32xf32>
    %cst_139 = arith.constant dense<0.000000e+00> : vector<128xf32>
    %279 = vector.multi_reduction <add>, %278, %cst_139 [1] : vector<128x32xf32> to vector<128xf32>
    %280 = vector.shape_cast %279 : vector<128xf32> to vector<128x1xf32>
    %cst_140 = arith.constant 3.200000e+01 : f32
    %281 = vector.broadcast %cst_140 : f32 to vector<128x1xf32>
    %282 = arith.divf %280, %281 : vector<128x1xf32>
    %283 = vector.broadcast %275 : vector<128x1xf32> to vector<128x32xf32>
    %284 = arith.subf %267, %283 : vector<128x32xf32>
    %cst_141 = arith.constant 9.99999974E-6 : f32
    %285 = vector.broadcast %cst_141 : f32 to vector<128x1xf32>
    %286 = arith.addf %282, %285 : vector<128x1xf32>
    %287 = math.rsqrt %286 : vector<128x1xf32>
    %288 = vector.broadcast %287 : vector<128x1xf32> to vector<128x32xf32>
    %289 = arith.mulf %284, %288 : vector<128x32xf32>
    %290 = vector.broadcast %269 : vector<1x32xf32> to vector<128x32xf32>
    %291 = arith.mulf %289, %290 : vector<128x32xf32>
    %292 = vector.broadcast %271 : vector<1x32xf32> to vector<128x32xf32>
    %293 = arith.addf %291, %292 : vector<128x32xf32>
    %294 = arith.truncf %293 : vector<128x32xf32> to vector<128x32xbf16>
    %c0_142 = arith.constant 0 : index
    %c0_143 = arith.constant 0 : index
    %295 = vector.load %arg19[%c0_142, %c0_143] : memref<32x128xbf16, #tpu.memory_space<vmem>>, vector<32x128xbf16>
    %cst_144 = arith.constant dense<0.000000e+00> : vector<128x128xf32>
    %296 = tpu.matmul %294, %295, %cst_144 {dimension_numbers = #tpu.dot_dimension_numbers<[1], [0], [0], [1], [0, 0, 1, 1], [], []>} : vector<128x32xbf16>, vector<32x128xbf16>, vector<128x128xf32> -> vector<128x128xf32>
    %c0_145 = arith.constant 0 : index
    %c0_146 = arith.constant 0 : index
    %297 = vector.load %arg20[%c0_145, %c0_146] : memref<1x128xf32, #tpu.memory_space<vmem>>, vector<1x128xf32>
    %298 = vector.broadcast %297 : vector<1x128xf32> to vector<128x128xf32>
    %299 = arith.addf %296, %298 : vector<128x128xf32>
    %300 = vector.shape_cast %299 : vector<128x128xf32> to vector<8x16x128xf32>
    %c0_147 = arith.constant 0 : index
    %c0_148 = arith.constant 0 : index
    %c0_149 = arith.constant 0 : index
    %301 = vector.load %arg21[%c0_147, %c0_148, %c0_149] : memref<8x16x128xf32, #tpu.memory_space<vmem>>, vector<8x16x128xf32>
    tpu.vector_store %arg21[%c0_147, %c0_148, %c0_149], %300 {strides = array<i32>} : memref<8x16x128xf32, #tpu.memory_space<vmem>>, vector<8x16x128xf32>,
    return
  }
  func.func @transform_0(%arg0: i32) -> (i32, i32, i32) {
    %c0_i32 = arith.constant 0 : i32
    %c0_i32_0 = arith.constant 0 : i32
    %c0_i32_1 = arith.constant 0 : i32
    return %arg0, %c0_i32, %c0_i32_0 : i32, i32, i32
  }
  func.func @transform_1(%arg0: i32) -> (i32, i32) {
    %c0_i32 = arith.constant 0 : i32
    %c0_i32_0 = arith.constant 0 : i32
    %c0_i32_1 = arith.constant 0 : i32
    return %c0_i32, %c0_i32_0 : i32, i32
  }
  func.func @transform_2(%arg0: i32) -> (i32, i32, i32) {
    %c0_i32 = arith.constant 0 : i32
    %c0_i32_0 = arith.constant 0 : i32
    %c0_i32_1 = arith.constant 0 : i32
    %c0_i32_2 = arith.constant 0 : i32
    return %c0_i32, %c0_i32_0, %c0_i32_1 : i32, i32, i32
  }
  func.func @transform_3(%arg0: i32) -> (i32, i32, i32) {
    %c0_i32 = arith.constant 0 : i32
    %c0_i32_0 = arith.constant 0 : i32
    %c0_i32_1 = arith.constant 0 : i32
    %c0_i32_2 = arith.constant 0 : i32
    return %c0_i32, %c0_i32_0, %c0_i32_1 : i32, i32, i32
  }
  func.func @transform_4(%arg0: i32) -> (i32, i32, i32) {
    %c0_i32 = arith.constant 0 : i32
    %c0_i32_0 = arith.constant 0 : i32
    %c0_i32_1 = arith.constant 0 : i32
    %c0_i32_2 = arith.constant 0 : i32
    return %c0_i32, %c0_i32_0, %c0_i32_1 : i32, i32, i32
  }
  func.func @transform_5(%arg0: i32) -> (i32, i32, i32) {
    %c0_i32 = arith.constant 0 : i32
    %c0_i32_0 = arith.constant 0 : i32
    %c0_i32_1 = arith.constant 0 : i32
    %c0_i32_2 = arith.constant 0 : i32
    return %c0_i32, %c0_i32_0, %c0_i32_1 : i32, i32, i32
  }
  func.func @transform_6(%arg0: i32) -> (i32, i32, i32) {
    %c0_i32 = arith.constant 0 : i32
    %c0_i32_0 = arith.constant 0 : i32
    %c0_i32_1 = arith.constant 0 : i32
    %c0_i32_2 = arith.constant 0 : i32
    return %c0_i32, %c0_i32_0, %c0_i32_1 : i32, i32, i32
  }
  func.func @transform_7(%arg0: i32) -> (i32, i32, i32) {
    %c0_i32 = arith.constant 0 : i32
    %c0_i32_0 = arith.constant 0 : i32
    %c0_i32_1 = arith.constant 0 : i32
    %c0_i32_2 = arith.constant 0 : i32
    return %c0_i32, %c0_i32_0, %c0_i32_1 : i32, i32, i32
  }
  func.func @transform_8(%arg0: i32) -> (i32, i32, i32) {
    %c0_i32 = arith.constant 0 : i32
    %c0_i32_0 = arith.constant 0 : i32
    %c0_i32_1 = arith.constant 0 : i32
    %c0_i32_2 = arith.constant 0 : i32
    return %c0_i32, %c0_i32_0, %c0_i32_1 : i32, i32, i32
  }
  func.func @transform_9(%arg0: i32) -> (i32, i32, i32) {
    %c0_i32 = arith.constant 0 : i32
    %c0_i32_0 = arith.constant 0 : i32
    %c0_i32_1 = arith.constant 0 : i32
    %c0_i32_2 = arith.constant 0 : i32
    return %c0_i32, %c0_i32_0, %c0_i32_1 : i32, i32, i32
  }
  func.func @transform_10(%arg0: i32) -> (i32, i32, i32) {
    %c0_i32 = arith.constant 0 : i32
    %c0_i32_0 = arith.constant 0 : i32
    %c0_i32_1 = arith.constant 0 : i32
    %c0_i32_2 = arith.constant 0 : i32
    return %c0_i32, %c0_i32_0, %c0_i32_1 : i32, i32, i32
  }
  func.func @transform_11(%arg0: i32) -> (i32, i32, i32) {
    %c0_i32 = arith.constant 0 : i32
    %c0_i32_0 = arith.constant 0 : i32
    %c0_i32_1 = arith.constant 0 : i32
    %c0_i32_2 = arith.constant 0 : i32
    return %c0_i32, %c0_i32_0, %c0_i32_1 : i32, i32, i32
  }
  func.func @transform_12(%arg0: i32) -> (i32, i32, i32) {
    %c0_i32 = arith.constant 0 : i32
    %c0_i32_0 = arith.constant 0 : i32
    %c0_i32_1 = arith.constant 0 : i32
    %c0_i32_2 = arith.constant 0 : i32
    return %c0_i32, %c0_i32_0, %c0_i32_1 : i32, i32, i32
  }
  func.func @transform_13(%arg0: i32) -> (i32, i32, i32) {
    %c0_i32 = arith.constant 0 : i32
    %c0_i32_0 = arith.constant 0 : i32
    %c0_i32_1 = arith.constant 0 : i32
    %c0_i32_2 = arith.constant 0 : i32
    return %c0_i32, %c0_i32_0, %c0_i32_1 : i32, i32, i32
  }
  func.func @transform_14(%arg0: i32) -> (i32, i32, i32) {
    %c0_i32 = arith.constant 0 : i32
    %c0_i32_0 = arith.constant 0 : i32
    %c0_i32_1 = arith.constant 0 : i32
    %c0_i32_2 = arith.constant 0 : i32
    return %c0_i32, %c0_i32_0, %c0_i32_1 : i32, i32, i32
  }
  func.func @transform_15(%arg0: i32) -> (i32, i32, i32) {
    %c0_i32 = arith.constant 0 : i32
    %c0_i32_0 = arith.constant 0 : i32
    %c0_i32_1 = arith.constant 0 : i32
    %c0_i32_2 = arith.constant 0 : i32
    return %c0_i32, %c0_i32_0, %c0_i32_1 : i32, i32, i32
  }
  func.func @transform_16(%arg0: i32) -> (i32, i32, i32) {
    %c0_i32 = arith.constant 0 : i32
    %c0_i32_0 = arith.constant 0 : i32
    %c0_i32_1 = arith.constant 0 : i32
    %c0_i32_2 = arith.constant 0 : i32
    return %c0_i32, %c0_i32_0, %c0_i32_1 : i32, i32, i32
  }
  func.func @transform_17(%arg0: i32) -> (i32, i32, i32) {
    %c0_i32 = arith.constant 0 : i32
    %c0_i32_0 = arith.constant 0 : i32
    %c0_i32_1 = arith.constant 0 : i32
    %c0_i32_2 = arith.constant 0 : i32
    return %c0_i32, %c0_i32_0, %c0_i32_1 : i32, i32, i32
  }
  func.func @transform_18(%arg0: i32) -> (i32, i32) {
    %c0_i32 = arith.constant 0 : i32
    %c0_i32_0 = arith.constant 0 : i32
    %c0_i32_1 = arith.constant 0 : i32
    return %c0_i32, %c0_i32_0 : i32, i32
  }
  func.func @transform_19(%arg0: i32) -> (i32, i32) {
    %c0_i32 = arith.constant 0 : i32
    %c0_i32_0 = arith.constant 0 : i32
    %c0_i32_1 = arith.constant 0 : i32
    return %c0_i32, %c0_i32_0 : i32, i32
  }
  func.func @transform_20(%arg0: i32) -> (i32, i32, i32) {
    %c0_i32 = arith.constant 0 : i32
    %c0_i32_0 = arith.constant 0 : i32
    %c0_i32_1 = arith.constant 0 : i32
    return %arg0, %c0_i32, %c0_i32_0 : i32, i32, i32
  }
}

</mosaic_0001>

<bundles_post_ra>
// kernel: pos_tagger_forward.1
= control target key start
LH: loop header
LB: loop body
LE: loop exit
PB: predicated region body
PF: predicated region fallthrough
CT: control target
= control target key end

     0   :  { %s16690_s0 = inlined_call_operand.vmem [shape: f32[16,16,32], index: 0, kind: input, shape index: {}]   ;;  %s16691_s1 = inlined_call_operand.vmem [shape: f32[16,32], index: 1, kind: input, shape index: {}]   ;;  %s16692_s2 = inlined_call_operand.vmem [shape: bf16[2,32,32], index: 2, kind: input, shape index: {}]   ;;  %s16693_s3 = inlined_call_operand.vmem [shape: bf16[2,32,32], index: 3, kind: input, shape index: {}]   ;;  %s16694_s4 = inlined_call_operand.vmem [shape: bf16[2,32,32], index: 4, kind: input, shape index: {}]   ;;  %s16695_s5 = inlined_call_operand.vmem [shape: f32[2,1,32], index: 5, kind: input, shape index: {}]   ;;  %s16696_s6 = inlined_call_operand.vmem [shape: f32[2,1,32], index: 6, kind: input, shape index: {}]   ;;  %s16697_s7 = inlined_call_operand.vmem [shape: f32[2,1,32], index: 7, kind: input, shape index: {}]   ;;  %s16698_s8 = inlined_call_operand.vmem [shape: bf16[2,32,32], index: 8, kind: input, shape index: {}]   ;;  %s16699_s9 = inlined_call_operand.vmem [shape: f32[2,1,32], index: 9, kind: input, shape index: {}]   ;;  %s16700_s10 = inlined_call_operand.vmem [shape: f32[2,1,32], index: 10, kind: input, shape index: {}]   ;;  %s16701_s11 = inlined_call_operand.vmem [shape: f32[2,1,32], index: 11, kind: input, shape index: {}]   ;;  %s16702_s12 = inlined_call_operand.vmem [shape: bf16[2,32,64], index: 12, kind: input, shape index: {}]   ;;  %s16703_s13 = inlined_call_operand.vmem [shape: f32[2,1,64], index: 13, kind: input, shape index: {}]   ;;  %s16704_s14 = inlined_call_operand.vmem [shape: bf16[2,64,32], index: 14, kind: input, shape index: {}]   ;;  %s16705_s15 = inlined_call_operand.vmem [shape: f32[2,1,32], index: 15, kind: input, shape index: {}]   ;;  %s16706_s16 = inlined_call_operand.vmem [shape: f32[2,1,32], index: 16, kind: input, shape index: {}]   ;;  %s16707_s17 = inlined_call_operand.vmem [shape: f32[2,1,32], index: 17, kind: input, shape index: {}]   ;;  %s16708_s18 = inlined_call_operand.vmem [shape: bf16[32,128], index: 18, kind: input, shape index: {}]   ;;  %s16709_s19 = inlined_call_operand.vmem [shape: f32[1,128], index: 19, kind: input, shape index: {}]   ;;  %s16710_s20 = inlined_call_operand.vmem [shape: f32[16,16,128], index: 20, kind: output, shape index: {}]  }
   0x1   :  { %16820 = sst [smem:[#allocation81_spill]] %s16690_s0 }
   0x2   :  { %16821 = sst [smem:[#allocation82_spill]] %s16691_s1  ;;  %s11370_s1 = smov 0  }
   0x3   :  { %16822 = sst [smem:[#allocation83_spill]] %s16692_s2 }
   0x4   :  { %16823 = sst [smem:[#allocation84_spill]] %s16693_s3 }
   0x5   :  { %16824 = sst [smem:[#allocation85_spill]] %s16694_s4 }
   0x6 LB: > { %s9896_s22 = sadd.s32 4294967295, %s11256_s1   ;;  %p9900_p0 = scmp.ge.s32.totalorder %s11256_s1, 1  ;;  %s11256_s1 = sphi %s11370_s1, %s30_s1  }
   0x7   : > { %p564_p1 = scmp.lt.s32.totalorder %s11256_s1, 3 }
   0x9   : > { %p565_p2 = pnand %p9900_p0, %p564_p1 }
   0xb   : > { %568 = sbr.rel (%p565_p2) target bundleno = 5369 (0x14f9), region = 100 }
  0x10   : > { %s16825_s2 = sld [smem:[#allocation83_spill]]  ;;  %s9901_s27 = sshll.u32 %s9896_s22, 3  ;;  %vm701_vm0 = vcmask 261120   ;;  %v11525_v41 = vld [vmem:[%s16695_s5] ss:$0 sm:$0xff]  ;;  %vm1303_vm1 = vcmask 64512  }
  0x11   : > { %s16826_s26 = sld [smem:[#allocation84_spill]]  ;;  %p625_p3 = scmp.lt.s32.totalorder %s9901_s27, 15  ;;  %v11530_v42 = vld [vmem:[%s16696_s6] ss:$0 sm:$0xff]  ;;  %vm2194_vm2 = vcmask 130048   ;;  %vm4019_vm3 = vcmask 195584  }
  0x12   : > { %s16827_s23 = sld [smem:[#allocation82_spill]]  ;;  %s11258_s25 = smov 120  }
  0x13   : > { %s17092_s27 = smov (!%p625_p3, %s9901_s27), 15  ;;  %s16828_s4 = sld [smem:[#allocation81_spill]] }
  0x14   : > { %s16765_s22 = sshll.u32 %s17092_s27, 4  ;;  %s11259_s3 = smov 112  }
  0x15   : > { %s11260_s28 = smov 104   ;;  %s16843_s0 = sld [smem:[#allocation85_spill]] }
  0x16   : > { %v10302_v0 = vld [vmem:[%s16825_s2 + $0x8] sm:$0xff]  ;;  %v10301_v2 = vld [vmem:[%s16825_s2] sm:$0xff]  ;;  %s16766_s30 = smov 8   ;;  %s11262_s21 = smov 16  }
  0x17   : > { %v10304_v1 = vld [vmem:[%s16826_s26 + $0x8] sm:$0xff]  ;;  %v10303_v3 = vld [vmem:[%s16826_s26] sm:$0xff]  ;;  %732 = vmatpush.bf16.msra.mxu0 %v10302_v0  ;;  %s11263_s24 = smov 24  }
  0x18   : > { %801 = vmatpush.bf16.msra.mxu1 %v10304_v1  ;;  %v11395_v4 = vld [vmem:[%s16827_s23] sm:$0xff]  ;;  %v11401_v5 = vld [vmem:[%s16827_s23 + $0x8] sm:$0xff] }
  0x19   : > { %s11408_s29 = scalar_lea.vmem %s16828_s4, %s16765_s22 }
  0x1a   : > { %v639_v6 = vld [vmem:[%s11408_s29] sm:$0xff]  ;;  %v640_v7 = vld [vmem:[%s11408_s29 + $0x8] sm:$0xff]  ;;  %v641_v11 = vld [vmem:[%s11408_s29 + $0x10] sm:$0xff] }
  0x1b   : > { %733 = vmatpush.bf16.msra.mxu0 %v10301_v2  ;;  %v11413_v8 = vadd.f32 %v11395_v4, %v639_v6  ;;  %v11416_v9 = vadd.f32 %v11401_v5, %v640_v7  ;;  %v642_v12 = vld [vmem:[%s11408_s29 + $0x18] sm:$0xff]  ;;  %v11429_v13 = vadd.f32 %v11395_v4, %v641_v11  ;;  %v643_v16 = vld [vmem:[%s11408_s29 + $0x20] sm:$0xff]  ;;  %v644_v17 = vld [vmem:[%s11408_s29 + $0x28] sm:$0xff] }
  0x1c   : > { %802 = vmatpush.bf16.msra.mxu1 %v10303_v3  ;;  %v11432_v14 = vadd.f32 %v11401_v5, %v642_v12  ;;  %v11445_v18 = vadd.f32 %v11395_v4, %v643_v16  ;;  %v11448_v19 = vadd.f32 %v11401_v5, %v644_v17  ;;  %v645_v21 = vld [vmem:[%s11408_s29 + $0x30] sm:$0xff]  ;;  %v646_v22 = vld [vmem:[%s11408_s29 + $0x38] sm:$0xff]  ;;  %v647_v26 = vld [vmem:[%s11408_s29 + $0x40] sm:$0xff] }
  0x1d   : > { %16829 = vst [vmem:[#allocation2_spill] sm:$0xff] %v11413_v8  ;;  %v11420_v10 = vpack.c.bf16 %v11416_v9, %v11413_v8  ;;  %v11461_v23 = vadd.f32 %v11395_v4, %v645_v21  ;;  %v11464_v24 = vadd.f32 %v11401_v5, %v646_v22  ;;  %v648_v27 = vld [vmem:[%s11408_s29 + $0x48] sm:$0xff]  ;;  %v11477_v28 = vadd.f32 %v11395_v4, %v647_v26  ;;  %v649_v31 = vld [vmem:[%s11408_s29 + $0x50] sm:$0xff]  ;;  %v650_v32 = vld [vmem:[%s11408_s29 + $0x58] sm:$0xff] }
  0x1e   : > { %16830 = vst [vmem:[#allocation3_spill] sm:$0xff] %v11416_v9  ;;  %v11436_v15 = vpack.c.bf16 %v11432_v14, %v11429_v13  ;;  %v11452_v20 = vpack.c.bf16 %v11448_v19, %v11445_v18  ;;  %v11480_v29 = vadd.f32 %v11401_v5, %v648_v27  ;;  %v11493_v33 = vadd.f32 %v11395_v4, %v649_v31  ;;  %v651_v36 = vld [vmem:[%s11408_s29 + $0x60] sm:$0xff]  ;;  %v652_v37 = vld [vmem:[%s11408_s29 + $0x68] sm:$0xff] }
  0x1f   : > { %9915 = vmatmul.msk.bf16.vlgmr.msra.gmra.mxu0 %vm701_vm0, %v11420_v10  ;;  %9931 = vmatmul.msk.bf16.vlgmr.msra.gmra.mxu1 %vm701_vm0, %v11420_v10  ;;  %16831 = vst [vmem:[#allocation4_spill] sm:$0xff] %v11429_v13  ;;  %v11468_v25 = vpack.c.bf16 %v11464_v24, %v11461_v23  ;;  %v11496_v34 = vadd.f32 %v11401_v5, %v650_v32  ;;  %v10306_v61 = vld [vmem:[%s16843_s0 + $0x8] sm:$0xff]  ;;  %v10305_v1 = vld [vmem:[%s16843_s0] sm:$0xff] }
  0x20   : > { %16832 = vst [vmem:[#allocation5_spill] sm:$0xff] %v11432_v14  ;;  %v11484_v30 = vpack.c.bf16 %v11480_v29, %v11477_v28  ;;  %v11509_v38 = vadd.f32 %v11395_v4, %v651_v36  ;;  %v11512_v39 = vadd.f32 %v11401_v5, %v652_v37  ;;  %870 = vmatpush.bf16.msra.mxu2 %v10306_v61 }
  0x21   : > { %16833 = vst [vmem:[#allocation6_spill] sm:$0xff] %v11445_v18  ;;  %v11500_v35 = vpack.c.bf16 %v11496_v34, %v11493_v33 }
  0x22   : > { %16834 = vst [vmem:[#allocation7_spill] sm:$0xff] %v11448_v19  ;;  %v11516_v40 = vpack.c.bf16 %v11512_v39, %v11509_v38 }
  0x23   : > { %16835 = vst [vmem:[#allocation8_spill] sm:$0xff] %v11461_v23 }
  0x24   : > { %16836 = vst [vmem:[#allocation9_spill] sm:$0xff] %v11464_v24  ;;  %871 = vmatpush.bf16.msra.mxu2 %v10305_v1 }
  0x25   : > { %16837 = vst [vmem:[#allocation10_spill] sm:$0xff] %v11477_v28 }
  0x26   : > { %16838 = vst [vmem:[#allocation11_spill] sm:$0xff] %v11480_v29 }
  0x27   : > { %16839 = vst [vmem:[#allocation12_spill] sm:$0xff] %v11493_v33  ;;  %9947 = vmatmul.msk.bf16.vlgmr.msra.gmra.mxu2 %vm701_vm0, %v11420_v10 }
  0x28   : > { %16840 = vst [vmem:[#allocation13_spill] sm:$0xff] %v11496_v34 }
  0x29   : > { %16841 = vst [vmem:[#allocation14_spill] sm:$0xff] %v11509_v38 }
  0x2a   : > { %16842 = vst [vmem:[#allocation15_spill] sm:$0xff] %v11512_v39 }
  0x2f   : > { %9932 = vmatmul.msk.bf16.gmra.mxu1 %vm701_vm0, %v11436_v15  ;;  %9916 = vmatmul.msk.bf16.gmra.mxu0 %vm701_vm0, %v11436_v15 }
  0x37   : > { %9948 = vmatmul.msk.bf16.gmra.mxu2 %vm701_vm0, %v11436_v15 }
  0x3f   : > { %9933 = vmatmul.msk.bf16.gmra.mxu1 %vm701_vm0, %v11452_v20  ;;  %9917 = vmatmul.msk.bf16.gmra.mxu0 %vm701_vm0, %v11452_v20 }
  0x47   : > { %9949 = vmatmul.msk.bf16.gmra.mxu2 %vm701_vm0, %v11452_v20 }
  0x4f   : > { %9934 = vmatmul.msk.bf16.gmra.mxu1 %vm701_vm0, %v11468_v25  ;;  %9918 = vmatmul.msk.bf16.gmra.mxu0 %vm701_vm0, %v11468_v25 }
  0x57   : > { %9950 = vmatmul.msk.bf16.gmra.mxu2 %vm701_vm0, %v11468_v25 }
  0x5f   : > { %9935 = vmatmul.msk.bf16.gmra.mxu1 %vm701_vm0, %v11484_v30  ;;  %9919 = vmatmul.msk.bf16.gmra.mxu0 %vm701_vm0, %v11484_v30 }
  0x67   : > { %9951 = vmatmul.msk.bf16.gmra.mxu2 %vm701_vm0, %v11484_v30 }
  0x6f   : > { %9936 = vmatmul.msk.bf16.gmra.mxu1 %vm701_vm0, %v11500_v35  ;;  %9920 = vmatmul.msk.bf16.gmra.mxu0 %vm701_vm0, %v11500_v35 }
  0x77   : > { %9952 = vmatmul.msk.bf16.gmra.mxu2 %vm701_vm0, %v11500_v35 }
  0x7f   : > { %9937 = vmatmul.msk.bf16.gmra.mxu1 %vm701_vm0, %v11516_v40  ;;  %9921 = vmatmul.msk.bf16.gmra.mxu0 %vm701_vm0, %v11516_v40 }
  0x87   : > { %9953 = vmatmul.msk.bf16.gmra.mxu2 %vm701_vm0, %v11516_v40 }
  0x9c   : > { %v735_v43 = vpop.f32.mrf.mxu0  ;;  %v804_v44 = vpop.f32.mrf.mxu1 }
  0x9d   : > { %v736_v45 = vadd.f32 %v11525_v41, %v735_v43  ;;  %v805_v46 = vadd.f32 %v11530_v42, %v804_v44  ;;  %v653_v44 = vld [vmem:[%s11408_s29 + $0x70] sm:$0xff] }
  0x9f   : > { %v913_v47 = vpack.c.bf16 %v736_v45, %v736_v45  ;;  %v1041_v48 = vpack.c.bf16 %v805_v46, %v805_v46  ;;  %v654_v45 = vld [vmem:[%s11408_s29 + $0x78] sm:$0xff] }
  0xa1   : > { %1073 = vrot.lane.b32.xlu0 %v1041_v48, %s11258_s25  ;;  %977 = vrot.lane.b32.xlu2 %v913_v47, %s11259_s3  ;;  %v1300_v54 = vunpack.c.l.b16 %v1041_v48  ;;  %v1297_v0 = vunpack.c.l.b16 %v913_v47 }
  0xa2   : > { %945 = vrot.lane.b32.xlu1 %v913_v47, %s11258_s25 }
  0xa4   : > { %v737_v49 = vpop.f32.mrf.mxu0  ;;  %v806_v50 = vpop.f32.mrf.mxu1 }
  0xa5   : > { %v807_v51 = vadd.f32 %v11530_v42, %v806_v50  ;;  %v738_v52 = vadd.f32 %v11525_v41, %v737_v49 }
  0xa7   : > { %v1042_v53 = vpack.c.bf16 %v807_v51, %v807_v51  ;;  %v914_v56 = vpack.c.bf16 %v738_v52, %v738_v52 }
  0xa9   : > { %1105 = vrot.lane.b32.xlu0 %v1041_v48, %s11259_s3  ;;  %1137 = vrot.lane.b32.xlu2 %v1041_v48, %s11260_s28  ;;  %v1301_v55 = vunpack.c.l.b16 %v1042_v53  ;;  %v1298_v63 = vunpack.c.l.b16 %v914_v56  ;;  %v11583_v48 = vadd.f32 %v11401_v5, %v654_v45 }
  0xaa   : > { %1009 = vrot.lane.b32.xlu1 %v913_v47, %s11260_s28  ;;  %v11580_v47 = vadd.f32 %v11395_v4, %v653_v44 }
  0xab   : > { %v1302_v57 = vpack.c.b16 %v1301_v55, %v1300_v54  ;;  %v1299_v3 = vpack.c.b16 %v1298_v63, %v1297_v0  ;;  %16845 = vst [vmem:[#allocation17_spill] sm:$0xff] %v11583_v48 }
  0xac   : > { %v809_v58 = vpop.f32.mrf.mxu1  ;;  %v740_v59 = vpop.f32.mrf.mxu0  ;;  %16844 = vst [vmem:[#allocation16_spill] sm:$0xff] %v11580_v47  ;;  %v11590_v50 = vpack.c.bf16 %v11583_v48, %v11580_v47 }
  0xad   : > { %v1308_v60 = vsel %vm1303_vm1, %v1302_v57, 0  ;;  %v810_v62 = vadd.f32 %v11530_v42, %v809_v58  ;;  %v741_v11 = vadd.f32 %v11525_v41, %v740_v59 }
  0xae   : > { %1317 = vmatpush.bf16.xpose.msra.mxu3 %v1308_v60  ;;  %9938 = vmatmul.msk.bf16.gmra.mxu1 %vm701_vm0, %v11590_v50 }
  0xaf   : > { %v11553_v2 = vpack.c.bf16 %v810_v62, %v810_v62  ;;  %v11564_v22 = vpack.c.bf16 %v741_v11, %v741_v11  ;;  %9922 = vmatmul.msk.bf16.gmra.mxu0 %vm701_vm0, %v11590_v50  ;;  %9954 = vmatmul.msk.bf16.gmra.mxu2 %vm701_vm0, %v11590_v50 }
  0xb1   : > { %1075 = vrot.lane.b32.xlu0 %v1042_v53, %s11258_s25  ;;  %1011 = vrot.lane.b32.xlu2 %v914_v56, %s11260_s28  ;;  %v1327_v21 = vunpack.c.l.b16 %v11553_v2  ;;  %v1324_v37 = vunpack.c.l.b16 %v11564_v22 }
  0xb2   : > { %947 = vrot.lane.b32.xlu1 %v914_v56, %s11258_s25 }
  0xb4   : > { %v811_v6 = vpop.f32.mrf.mxu1  ;;  %v742_v7 = vpop.f32.mrf.mxu0 }
  0xb5   : > { %v812_v12 = vadd.f32 %v11530_v42, %v811_v6  ;;  %9955 = vmatmul.msk.bf16.vlgmr.msra.gmra.mxu3 %vm1303_vm1, %v1299_v3  ;;  %v743_v16 = vadd.f32 %v11525_v41, %v742_v7 }
  0xb7   : > { %v11559_v17 = vpack.c.bf16 %v812_v12, %v812_v12  ;;  %v11569_v26 = vpack.c.bf16 %v743_v16, %v743_v16 }
  0xb9   : > { %979 = vrot.lane.b32.xlu0 %v914_v56, %s11259_s3  ;;  %1077 = vrot.lane.b32.xlu2 %v11553_v2, %s11258_s25  ;;  %v1328_v27 = vunpack.c.l.b16 %v11559_v17  ;;  %v1325_v43 = vunpack.c.l.b16 %v11569_v26 }
  0xba   : > { %1107 = vrot.lane.b32.xlu1 %v1042_v53, %s11259_s3 }
  0xbb   : > { %v1329_v31 = vpack.c.b16 %v1328_v27, %v1327_v21  ;;  %v1326_v49 = vpack.c.b16 %v1325_v43, %v1324_v37 }
  0xbc   : > { %v814_v32 = vpop.f32.mrf.mxu1  ;;  %v745_v36 = vpop.f32.mrf.mxu0 }
  0xbd   : > { %v1334_v10 = vsel %vm1303_vm1, %v1329_v31, 0  ;;  %v815_v46 = vadd.f32 %v11530_v42, %v814_v32  ;;  %v746_v52 = vadd.f32 %v11525_v41, %v745_v36 }
  0xbe   : > { %1343 = vmatpush.bf16.xpose.msrb.mxu3 %v1334_v10 }
  0xbf   : > { %v11594_v51 = vpack.c.bf16 %v815_v46, %v815_v46  ;;  %v11607_v57 = vpack.c.bf16 %v746_v52, %v746_v52 }
  0xc1   : > { %1139 = vrot.lane.b32.xlu0 %v1042_v53, %s11260_s28  ;;  %1109 = vrot.lane.b32.xlu2 %v11553_v2, %s11259_s3  ;;  %v1353_v56 = vunpack.c.l.b16 %v11594_v51  ;;  %v1350_v63 = vunpack.c.l.b16 %v11607_v57 }
  0xc2   : > { %949 = vrot.lane.b32.xlu1 %v11564_v22, %s11258_s25 }
  0xc4   : > { %v816_v4 = vpop.f32.mrf.mxu1  ;;  %v747_v5 = vpop.f32.mrf.mxu0 }
  0xc5   : > { %v817_v53 = vadd.f32 %v11530_v42, %v816_v4  ;;  %9956 = vmatmul.msk.bf16.vlgmr.msrb.gmra.mxu3 %vm1303_vm1, %v1326_v49  ;;  %v748_v54 = vadd.f32 %v11525_v41, %v747_v5 }
  0xc7   : > { %v1046_v55 = vpack.c.bf16 %v817_v53, %v817_v53  ;;  %v11613_v58 = vpack.c.bf16 %v748_v54, %v748_v54 }
  0xc9   : > { %1111 = vrot.lane.b32.xlu0 %v11559_v17, %s11259_s3  ;;  %1079 = vrot.lane.b32.xlu2 %v11559_v17, %s11258_s25  ;;  %v1354_v59 = vunpack.c.l.b16 %v1046_v55  ;;  %v1351_v15 = vunpack.c.l.b16 %v11613_v58 }
  0xca   : > { %981 = vrot.lane.b32.xlu1 %v11564_v22, %s11259_s3 }
  0xcb   : > { %v1355_v60 = vpack.c.b16 %v1354_v59, %v1353_v56  ;;  %v1352_v3 = vpack.c.b16 %v1351_v15, %v1350_v63 }
  0xcc   : > { %v819_v61 = vpop.f32.mrf.mxu1  ;;  %v750_v62 = vpop.f32.mrf.mxu0 }
  0xcd   : > { %v1360_v0 = vsel %vm1303_vm1, %v1355_v60, 0  ;;  %v820_v1 = vadd.f32 %v11530_v42, %v819_v61  ;;  %v751_v21 = vadd.f32 %v11525_v41, %v750_v62 }
  0xce   : > { %1369 = vmatpush.bf16.xpose.msra.mxu3 %v1360_v0 }
  0xcf   : > { %v11626_v6 = vpack.c.bf16 %v820_v1, %v820_v1  ;;  %v919_v36 = vpack.c.bf16 %v751_v21, %v751_v21 }
  0xd1   : > { %1083 = vrot.lane.b32.xlu0 %v1046_v55, %s11258_s25  ;;  %951 = vrot.lane.b32.xlu2 %v11569_v26, %s11258_s25  ;;  %v1379_v31 = vunpack.c.l.b16 %v11626_v6  ;;  %v1376_v43 = vunpack.c.l.b16 %v919_v36 }
  0xd2   : > { %1141 = vrot.lane.b32.xlu1 %v11553_v2, %s11260_s28 }
  0xd4   : > { %v821_v7 = vpop.f32.mrf.mxu1  ;;  %v752_v11 = vpop.f32.mrf.mxu0 }
  0xd5   : > { %9957 = vmatmul.msk.bf16.vlgmr.msra.gmra.mxu3 %vm1303_vm1, %v1352_v3  ;;  %v822_v12 = vadd.f32 %v11530_v42, %v821_v7  ;;  %v753_v16 = vadd.f32 %v11525_v41, %v752_v11 }
  0xd7   : > { %v11632_v27 = vpack.c.bf16 %v822_v12, %v822_v12  ;;  %v11641_v2 = vpack.c.bf16 %v753_v16, %v753_v16 }
  0xd9   : > { %955 = vrot.lane.b32.xlu0 %v11613_v58, %s11258_s25  ;;  %983 = vrot.lane.b32.xlu2 %v11569_v26, %s11259_s3  ;;  %v1380_v32 = vunpack.c.l.b16 %v11632_v27  ;;  %v1377_v44 = vunpack.c.l.b16 %v11641_v2 }
  0xda   : > { %1013 = vrot.lane.b32.xlu1 %v11564_v22, %s11260_s28 }
  0xdb   : > { %v1381_v37 = vpack.c.b16 %v1380_v32, %v1379_v31  ;;  %v1378_v45 = vpack.c.b16 %v1377_v44, %v1376_v43 }
  0xdc   : > { %v824_v10 = vpop.f32.mrf.mxu1  ;;  %v755_v46 = vpop.f32.mrf.mxu0 }
  0xdd   : > { %v1386_v20 = vsel %vm1303_vm1, %v1381_v37, 0  ;;  %v825_v22 = vadd.f32 %v11530_v42, %v824_v10 }
  0xde   : > { %1395 = vmatpush.bf16.xpose.msrb.mxu3 %v1386_v20 }
  0xdf   : > { %v11656_v5 = vpack.c.bf16 %v825_v22, %v825_v22 }
  0xe1   : > { %1115 = vrot.lane.b32.xlu0 %v1046_v55, %s11259_s3  ;;  %1143 = vrot.lane.b32.xlu2 %v11559_v17, %s11260_s28  ;;  %v756_v17 = vadd.f32 %v11525_v41, %v755_v46  ;;  %v1405_v53 = vunpack.c.l.b16 %v11656_v5 }
  0xe2   : > { %985 = vrot.lane.b32.xlu1 %v11607_v57, %s11259_s3 }
  0xe3   : > { %v11669_v56 = vpack.c.bf16 %v756_v17, %v756_v17 }
  0xe4   : > { %v826_v49 = vpop.f32.mrf.mxu1  ;;  %v757_v59 = vpop.f32.mrf.mxu0 }
  0xe5   : > { %9958 = vmatmul.msk.bf16.vlgmr.msrb.gmra.mxu3 %vm1303_vm1, %v1378_v45  ;;  %v827_v4 = vadd.f32 %v11530_v42, %v826_v49  ;;  %v758_v61 = vadd.f32 %v11525_v41, %v757_v59 }
  0xe7   : > { %v11658_v52 = vpack.c.bf16 %v827_v4, %v827_v4  ;;  %v11673_v62 = vpack.c.bf16 %v758_v61, %v758_v61 }
  0xe9   : > { %1147 = vrot.lane.b32.xlu0 %v1046_v55, %s11260_s28  ;;  %1015 = vrot.lane.b32.xlu2 %v11569_v26, %s11260_s28  ;;  %v1406_v54 = vunpack.c.l.b16 %v11658_v52  ;;  %v1402_v55 = vunpack.c.l.b16 %v11669_v56  ;;  %v1403_v26 = vunpack.c.l.b16 %v11673_v62 }
  0xea   : > { %957 = vrot.lane.b32.xlu1 %v919_v36, %s11258_s25 }
  0xeb   : > { %v1407_v60 = vpack.c.b16 %v1406_v54, %v1405_v53  ;;  %v1404_v63 = vpack.c.b16 %v1403_v26, %v1402_v55 }
  0xec   : > { %v829_v15 = vpop.f32.mrf.mxu1  ;;  %v760_v3 = vpop.f32.mrf.mxu0 }
  0xed   : > { %v1412_v25 = vsel %vm1303_vm1, %v1407_v60, 0  ;;  %v830_v0 = vadd.f32 %v11530_v42, %v829_v15  ;;  %v761_v30 = vadd.f32 %v11525_v41, %v760_v3 }
  0xee   : > { %1421 = vmatpush.bf16.xpose.msra.mxu3 %v1412_v25 }
  0xef   : > { %v11694_v11 = vpack.c.bf16 %v830_v0, %v830_v0  ;;  %v11709_v10 = vpack.c.bf16 %v761_v30, %v761_v30 }
  0xf1   : > { %1019 = vrot.lane.b32.xlu0 %v11613_v58, %s11260_s28  ;;  %1081 = vrot.lane.b32.xlu2 %v11594_v51, %s11258_s25  ;;  %v1431_v21 = vunpack.c.l.b16 %v11694_v11  ;;  %v1428_v45 = vunpack.c.l.b16 %v11709_v10 }
  0xf2   : > { %1117 = vrot.lane.b32.xlu1 %v11626_v6, %s11259_s3 }
  0xf4   : > { %v831_v7 = vpop.f32.mrf.mxu1  ;;  %v762_v43 = vpop.f32.mrf.mxu0 }
  0xf5   : > { %9959 = vmatmul.msk.bf16.vlgmr.msra.gmra.mxu3 %vm1303_vm1, %v1404_v63  ;;  %v832_v12 = vadd.f32 %v11530_v42, %v831_v7 }
  0xf7   : > { %v11697_v16 = vpack.c.bf16 %v832_v12, %v832_v12 }
  0xf9   : > { %989 = vrot.lane.b32.xlu0 %v919_v36, %s11259_s3  ;;  %953 = vrot.lane.b32.xlu2 %v11607_v57, %s11258_s25  ;;  %v1432_v31 = vunpack.c.l.b16 %v11697_v16 }
  0xfa   : > { %1149 = vrot.lane.b32.xlu1 %v11626_v6, %s11260_s28 }
  0xfb   : > { %v11692_v1 = vpop.permute.xlu2 %977  ;;  %v1433_v37 = vpack.c.b16 %v1432_v31, %v1431_v21 }
  0xfc   : > { %v834_v17 = vpop.f32.mrf.mxu1  ;;  %v765_v60 = vpop.f32.mrf.mxu0 }
  0xfd   : > { %v1438_v44 = vsel %vm1303_vm1, %v1433_v37, 0  ;;  %v835_v54 = vadd.f32 %v11530_v42, %v834_v17 }
  0xfe   : > { %1447 = vmatpush.bf16.xpose.msrb.mxu3 %v1438_v44 }
  0xff   : > { %v11749_v40 = vpack.c.bf16 %v835_v54, %v835_v54 }
 0x101   : > { %1021 = vrot.lane.b32.xlu0 %v919_v36, %s11260_s28  ;;  %1113 = vrot.lane.b32.xlu2 %v11594_v51, %s11259_s3  ;;  %v763_v36 = vadd.f32 %v11525_v41, %v762_v43  ;;  %v1457_v15 = vunpack.c.l.b16 %v11749_v40 }
 0x102   : > { %991 = vrot.lane.b32.xlu1 %v11641_v2, %s11259_s3 }
 0x103   : > { %v11707_v32 = vpop.permute.xlu2 %1137  ;;  %v11715_v20 = vpack.c.bf16 %v763_v36, %v763_v36 }
 0x104   : > { %v836_v61 = vpop.f32.mrf.mxu1  ;;  %v767_v43 = vpop.f32.mrf.mxu0 }
 0x105   : > { %v1429_v22 = vunpack.c.l.b16 %v11715_v20  ;;  %v837_v25 = vadd.f32 %v11530_v42, %v836_v61  ;;  %v768_v36 = vadd.f32 %v11525_v41, %v767_v43 }
 0x107   : > { %v1430_v49 = vpack.c.b16 %v1429_v22, %v1428_v45  ;;  %v11757_v55 = vpack.c.bf16 %v837_v25, %v837_v25 }
 0x109   : > { %1087 = vrot.lane.b32.xlu0 %v11632_v27, %s11258_s25  ;;  %1145 = vrot.lane.b32.xlu2 %v11594_v51, %s11260_s28  ;;  %v1458_v0 = vunpack.c.l.b16 %v11757_v55 }
 0x10a   : > { %1023 = vrot.lane.b32.xlu1 %v11641_v2, %s11260_s28  ;;  %9960 = vmatmul.msk.bf16.vlgmr.msrb.gmra.mxu3 %vm1303_vm1, %v1430_v49 }
 0x10b   : > { %v11725_v46 = vpop.permute.xlu2 %1011 }
 0x111   : > { %1089 = vrot.lane.b32.xlu0 %v11656_v5, %s11258_s25  ;;  %1017 = vrot.lane.b32.xlu2 %v11607_v57, %s11260_s28 }
 0x112   : > { %1121 = vrot.lane.b32.xlu1 %v11656_v5, %s11259_s3 }
 0x113   : > { %v1074_v35 = vpop.permute.xlu0 %1073  ;;  %v1078_v51 = vpop.permute.xlu2 %1077 }
 0x114   : > { %v946_v4 = vpop.permute.xlu1 %945  ;;  %v1509_v3 = vunpack.c.l.b16 %v1074_v35  ;;  %v1535_v7 = vunpack.c.l.b16 %v1078_v51  ;;  %v11774_v35 = vpack.c.bf16 %v768_v36, %v768_v36 }
 0x116   : > { %v1455_v54 = vunpack.c.l.b16 %v11774_v35 }
 0x119   : > { %961 = vrot.lane.b32.xlu0 %v11669_v56, %s11258_s25  ;;  %987 = vrot.lane.b32.xlu2 %v11613_v58, %s11259_s3  ;;  %v766_v58 = vadd.f32 %v11525_v41, %v765_v60  ;;  %v1506_v60 = vunpack.c.l.b16 %v946_v4 }
 0x11a   : > { %1025 = vrot.lane.b32.xlu1 %v11669_v56, %s11260_s28 }
 0x11b   : > { %v11742_v57 = vpop.permute.xlu0 %1105  ;;  %v11744_v53 = vpop.permute.xlu2 %1109  ;;  %v11763_v21 = vpack.c.bf16 %v766_v58, %v766_v58 }
 0x11c   : > { %v11747_v59 = vpop.permute.xlu1 %1009 }
 0x11d   : > { %v1454_v49 = vunpack.c.l.b16 %v11763_v21 }
 0x11f   : > { %v1456_v25 = vpack.c.b16 %v1455_v54, %v1454_v49 }
 0x121   : > { %993 = vrot.lane.b32.xlu0 %v11669_v56, %s11259_s3  ;;  %1085 = vrot.lane.b32.xlu2 %v11626_v6, %s11258_s25  ;;  %v1459_v6 = vpack.c.b16 %v1458_v0, %v1457_v15 }
 0x122   : > { %1091 = vrot.lane.b32.xlu1 %v11658_v52, %s11258_s25 }
 0x123   : > { %v1076_v26 = vpop.permute.xlu0 %1075  ;;  %v1080_v63 = vpop.permute.xlu2 %1079  ;;  %v1464_v44 = vsel %vm1303_vm1, %v1459_v6, 0 }
 0x124   : > { %v1510_v12 = vunpack.c.l.b16 %v1076_v26  ;;  %v1536_v56 = vunpack.c.l.b16 %v1080_v63  ;;  %v948_v30 = vpop.permute.xlu1 %947  ;;  %1473 = vmatpush.bf16.xpose.msra.mxu3 %v1464_v44 }
 0x125   : > { %v1507_v51 = vunpack.c.l.b16 %v948_v30 }
 0x126   : > { %v1511_v31 = vpack.c.b16 %v1510_v12, %v1509_v3  ;;  %v1537_v37 = vpack.c.b16 %v1536_v56, %v1535_v7 }
 0x127   : > { %v1508_v58 = vpack.c.b16 %v1507_v51, %v1506_v60 }
 0x128   : > { %v1516_v45 = vsel %vm1303_vm1, %v1511_v31, 0  ;;  %v1542_v22 = vsel %vm1303_vm1, %v1537_v37, 0 }
 0x129   : > { %1525 = vmatpush.bf16.xpose.msrb.mxu0 %v1516_v45  ;;  %1155 = vrot.lane.b32.xlu0 %v11658_v52, %s11260_s28 }
 0x12a   : > { %959 = vrot.lane.b32.xlu2 %v11641_v2, %s11258_s25  ;;  %1551 = vmatpush.bf16.xpose.msrb.mxu1 %v1542_v22 }
 0x12b   : > { %963 = vrot.lane.b32.xlu1 %v11673_v62, %s11258_s25  ;;  %v11780_v50 = vpop.permute.xlu0 %979  ;;  %v952_v17 = vpop.permute.xlu2 %951  ;;  %9961 = vmatmul.msk.bf16.vlgmr.msra.gmra.mxu3 %vm1303_vm1, %v1456_v25 }
 0x12c   : > { %v11783_v61 = vpop.permute.xlu1 %1107  ;;  %v1533_v63 = vunpack.c.l.b16 %v952_v17  ;;  %v839_v56 = vpop.f32.mrf.mxu1 }
 0x12d   : > { %v840_v31 = vadd.f32 %v11530_v42, %v839_v56  ;;  %v770_v37 = vpop.f32.mrf.mxu0 }
 0x12e   : > { %v771_v45 = vadd.f32 %v11525_v41, %v770_v37 }
 0x130   : > { %9963 = vmatmul.msk.bf16.vlgmr.msrb.gmra.mxu0 %vm1303_vm1, %v1508_v58  ;;  %v11837_v25 = vpack.c.bf16 %v771_v45, %v771_v45 }
 0x131   : > { %965 = vrot.lane.b32.xlu0 %v11709_v10, %s11258_s25 }
 0x132   : > { %1119 = vrot.lane.b32.xlu2 %v11632_v27, %s11259_s3 }
 0x133   : > { %995 = vrot.lane.b32.xlu1 %v11673_v62, %s11259_s3  ;;  %v11793_v2 = vpop.permute.xlu0 %1139  ;;  %v11795_v4 = vpop.permute.xlu2 %983 }
 0x134   : > { %v950_v26 = vpop.permute.xlu1 %949  ;;  %v841_v43 = vpop.f32.mrf.mxu1 }
 0x135   : > { %v1532_v15 = vunpack.c.l.b16 %v950_v26 }
 0x137   : > { %v1534_v0 = vpack.c.b16 %v1533_v63, %v1532_v15 }
 0x138   : > { %v1319_v34 = vpop.f32.mrf.mxu3 }
 0x139   : > { %9964 = vmatmul.msk.bf16.vlgmr.msrb.gmra.mxu1 %vm1303_vm1, %v1534_v0  ;;  %1125 = vrot.lane.b32.xlu0 %v11694_v11, %s11259_s3 }
 0x13a   : > { %1151 = vrot.lane.b32.xlu2 %v11632_v27, %s11260_s28 }
 0x13b   : > { %1093 = vrot.lane.b32.xlu1 %v11694_v11, %s11258_s25  ;;  %v11804_v3 = vpop.permute.xlu0 %1111  ;;  %v11806_v7 = vpop.permute.xlu2 %1143 }
 0x13c   : > { %v11808_v12 = vpop.permute.xlu1 %981 }
 0x141   : > { %1157 = vrot.lane.b32.xlu0 %v11694_v11, %s11260_s28  ;;  %v842_v11 = vadd.f32 %v11530_v42, %v841_v43  ;;  %v772_v42 = vpop.f32.mrf.mxu0 }
 0x142   : > { %1153 = vrot.lane.b32.xlu2 %v11656_v5, %s11260_s28  ;;  %v11826_v5 = vpack.c.bf16 %v840_v31, %v840_v31  ;;  %v773_v58 = vadd.f32 %v11525_v41, %v772_v42 }
 0x143   : > { %1029 = vrot.lane.b32.xlu1 %v11709_v10, %s11260_s28  ;;  %v1084_v27 = vpop.permute.xlu0 %1083  ;;  %v11816_v30 = vpop.permute.xlu2 %1015  ;;  %v11831_v22 = vpack.c.bf16 %v842_v11, %v842_v11 }
 0x144   : > { %v11818_v6 = vpop.permute.xlu1 %1141  ;;  %v1562_v49 = vunpack.c.l.b16 %v1084_v27  ;;  %v1483_v60 = vunpack.c.l.b16 %v11826_v5  ;;  %v11843_v15 = vpack.c.bf16 %v773_v58, %v773_v58  ;;  %v1480_v27 = vunpack.c.l.b16 %v11837_v25 }
 0x146   : > { %v1481_v31 = vunpack.c.l.b16 %v11843_v15 }
 0x148   : > { %v1482_v45 = vpack.c.b16 %v1481_v31, %v1480_v27 }
 0x149   : > { %999 = vrot.lane.b32.xlu0 %v11715_v20, %s11259_s3 }
 0x14a   : > { %1123 = vrot.lane.b32.xlu2 %v11658_v52, %s11259_s3  ;;  %v1484_v52 = vunpack.c.l.b16 %v11831_v22 }
 0x14b   : > { %967 = vrot.lane.b32.xlu1 %v11715_v20, %s11258_s25  ;;  %v956_v36 = vpop.permute.xlu0 %955  ;;  %v1082_v44 = vpop.permute.xlu2 %1081 }
 0x14c   : > { %v1561_v51 = vunpack.c.l.b16 %v1082_v44  ;;  %v11833_v17 = vpop.permute.xlu1 %1013  ;;  %v1485_v63 = vpack.c.b16 %v1484_v52, %v1483_v60  ;;  %v1559_v37 = vunpack.c.l.b16 %v956_v36  ;;  %v11894_v52 = vpop.f32.mrf.mxu2 }
 0x14e   : > { %v1563_v54 = vpack.c.b16 %v1562_v49, %v1561_v51  ;;  %v1490_v0 = vsel %vm1303_vm1, %v1485_v63, 0 }
 0x14f   : > { %1499 = vmatpush.bf16.xpose.msrb.mxu3 %v1490_v0 }
 0x150   : > { %v1568_v26 = vsel %vm1303_vm1, %v1563_v54, 0 }
 0x151   : > { %969 = vrot.lane.b32.xlu0 %v11763_v21, %s11258_s25  ;;  %1577 = vmatpush.bf16.xpose.msrb.mxu2 %v1568_v26 }
 0x152   : > { %1027 = vrot.lane.b32.xlu2 %v11673_v62, %s11260_s28 }
 0x153   : > { %1127 = vrot.lane.b32.xlu1 %v11697_v16, %s11259_s3  ;;  %v11850_v56 = vpop.permute.xlu0 %1115  ;;  %v954_v41 = vpop.permute.xlu2 %953 }
 0x154   : > { %v1558_v43 = vunpack.c.l.b16 %v954_v41  ;;  %v11854_v11 = vpop.permute.xlu1 %985  ;;  %v11914_v31 = vpop.f32.mrf.mxu2 }
 0x156   : > { %v1560_v44 = vpack.c.b16 %v1559_v37, %v1558_v43  ;;  %9962 = vmatmul.msk.bf16.vlgmr.msrb.gmra.mxu3 %vm1303_vm1, %v1482_v45 }
 0x158   : > { %9965 = vmatmul.msk.bf16.vlgmr.msrb.gmra.mxu2 %vm1303_vm1, %v1560_v44 }
 0x159   : > { %1129 = vrot.lane.b32.xlu0 %v11749_v40, %s11259_s3 }
 0x15a   : > { %997 = vrot.lane.b32.xlu2 %v11709_v10, %s11259_s3 }
 0x15b   : > { %1159 = vrot.lane.b32.xlu1 %v11697_v16, %s11260_s28  ;;  %v11864_v62 = vpop.permute.xlu0 %1147  ;;  %v11866_v36 = vpop.permute.xlu2 %1113 }
 0x15c   : > { %v958_v49 = vpop.permute.xlu1 %957 }
 0x15d   : > { %v1584_v45 = vunpack.c.l.b16 %v958_v49 }
 0x161   : > { %1033 = vrot.lane.b32.xlu0 %v11763_v21, %s11260_s28 }
 0x162   : > { %1095 = vrot.lane.b32.xlu2 %v11697_v16, %s11258_s25 }
 0x163   : > { %1097 = vrot.lane.b32.xlu1 %v11749_v40, %s11258_s25  ;;  %v11874_v10 = vpop.permute.xlu0 %1019  ;;  %v11876_v51 = vpop.permute.xlu2 %1145 }
 0x164   : > { %v11878_v54 = vpop.permute.xlu1 %1117 }
 0x169   : > { %1003 = vrot.lane.b32.xlu0 %v11774_v35, %s11259_s3 }
 0x16a   : > { %1031 = vrot.lane.b32.xlu2 %v11715_v20, %s11260_s28 }
 0x16b   : > { %971 = vrot.lane.b32.xlu1 %v11774_v35, %s11258_s25  ;;  %v11886_v42 = vpop.permute.xlu0 %989  ;;  %v11888_v16 = vpop.permute.xlu2 %1017 }
 0x16c   : > { %v11890_v60 = vpop.permute.xlu1 %1149 }
 0x171   : > { %1163 = vrot.lane.b32.xlu0 %v11757_v55, %s11260_s28 }
 0x172   : > { %1001 = vrot.lane.b32.xlu2 %v11763_v21, %s11259_s3 }
 0x173   : > { %1131 = vrot.lane.b32.xlu1 %v11757_v55, %s11259_s3  ;;  %v11900_v20 = vpop.permute.xlu0 %1021  ;;  %v11902_v58 = vpop.permute.xlu2 %987 }
 0x174   : > { %16846 = vst [vmem:[#allocation18_spill] sm:$0xff] %v11900_v20  ;;  %v11904_v26 = vpop.permute.xlu1 %991 }
 0x179   : > { %1101 = vrot.lane.b32.xlu0 %v11826_v5, %s11258_s25 }
 0x17a   : > { %1161 = vrot.lane.b32.xlu2 %v11749_v40, %s11260_s28 }
 0x17b   : > { %1035 = vrot.lane.b32.xlu1 %v11774_v35, %s11260_s28  ;;  %v1088_v63 = vpop.permute.xlu0 %1087  ;;  %v1086_v21 = vpop.permute.xlu2 %1085 }
 0x17c   : > { %v1588_v0 = vunpack.c.l.b16 %v1088_v63  ;;  %v1587_v41 = vunpack.c.l.b16 %v1086_v21  ;;  %v11912_v27 = vpop.permute.xlu1 %1023  ;;  %v11923_v21 = vpop.f32.mrf.mxu2 }
 0x17e   : > { %v1589_v37 = vpack.c.b16 %v1588_v0, %v1587_v41 }
 0x180   : > { %v1594_v43 = vsel %vm1303_vm1, %v1589_v37, 0  ;;  %v1718_v37 = vunpack.c.l.b16 %v11783_v61 }
 0x181   : > { %1133 = vrot.lane.b32.xlu0 %v11826_v5, %s11259_s3  ;;  %1603 = vmatpush.bf16.xpose.msra.mxu3 %v1594_v43 }
 0x182   : > { %1099 = vrot.lane.b32.xlu2 %v11757_v55, %s11258_s25 }
 0x183   : > { %1165 = vrot.lane.b32.xlu1 %v11826_v5, %s11260_s28  ;;  %v1090_v40 = vpop.permute.xlu0 %1089 }
 0x184   : > { %v960_v35 = vpop.permute.xlu2 %959  ;;  %v1122_v44 = vpop.permute.xlu1 %1121 }
 0x185   : > { %v1585_v63 = vunpack.c.l.b16 %v960_v35  ;;  %v11936_v49 = vpop.f32.mrf.mxu2  ;;  %v1717_v35 = vunpack.c.l.b16 %v11742_v57 }
 0x187   : > { %v1586_v0 = vpack.c.b16 %v1585_v63, %v1584_v45  ;;  %v1719_v47 = vpack.c.b16 %v1718_v37, %v1717_v35  ;;  %v1821_v37 = vunpack.c.l.b16 %v1122_v44 }
 0x189   : > { %9966 = vmatmul.msk.bf16.vlgmr.msra.gmra.mxu3 %vm1303_vm1, %v1586_v0  ;;  %1005 = vrot.lane.b32.xlu0 %v11837_v25, %s11259_s3  ;;  %v1613_v0 = vunpack.c.l.b16 %v1090_v40  ;;  %v1724_v61 = vsel %vm1303_vm1, %v1719_v47, 0 }
 0x18a   : > { %973 = vrot.lane.b32.xlu2 %v11837_v25, %s11258_s25 }
 0x18b   : > { %1103 = vrot.lane.b32.xlu1 %v11831_v22, %s11258_s25  ;;  %v962_v55 = vpop.permute.xlu0 %961 }
 0x18c   : > { %v11932_v5 = vpop.permute.xlu2 %1119  ;;  %v11934_v41 = vpop.permute.xlu1 %1025  ;;  %v1610_v24 = vunpack.c.l.b16 %v962_v55  ;;  %v1715_v55 = vunpack.c.l.b16 %v11780_v50 }
 0x18d   : > { %v11950_v33 = vpop.f32.mrf.mxu2 }
 0x191   : > { %975 = vrot.lane.b32.xlu0 %v11843_v15, %s11258_s25 }
 0x193   : > { %1135 = vrot.lane.b32.xlu1 %v11831_v22, %s11259_s3  ;;  %v11943_v43 = vpop.permute.xlu0 %993 }
 0x194   : > { %v11946_v45 = vpop.permute.xlu2 %1151  ;;  %v1092_v63 = vpop.permute.xlu1 %1091  ;;  %v1818_v9 = vunpack.c.l.b16 %v11943_v43 }
 0x195   : > { %v1614_v48 = vunpack.c.l.b16 %v1092_v63 }
 0x197   : > { %v1615_v39 = vpack.c.b16 %v1614_v48, %v1613_v0  ;;  %v11959_v48 = vpop.f32.mrf.mxu2 }
 0x199   : > { %v1620_v38 = vsel %vm1303_vm1, %v1615_v39, 0  ;;  %v1321_v39 = vpop.f32.mrf.mxu3 }
 0x19a   : > { %1629 = vmatpush.bf16.xpose.msra.mxu0 %v1620_v38 }
 0x19b   : > { %1007 = vrot.lane.b32.xlu1 %v11843_v15, %s11259_s3  ;;  %v1156_v57 = vpop.permute.xlu0 %1155 }
 0x19c   : > { %v1154_v29 = vpop.permute.xlu2 %1153 }
 0x19d   : > { %v964_v28 = vpop.permute.xlu1 %963 }
 0x19e   : > { %v1611_v40 = vunpack.c.l.b16 %v964_v28  ;;  %v1926_v28 = vunpack.c.l.b16 %v11793_v2 }
 0x1a0   : > { %v1612_v63 = vpack.c.b16 %v1611_v40, %v1610_v24 }
 0x1a2   : > { %1733 = vmatpush.bf16.xpose.msrb.mxu0 %v1724_v61 }
 0x1a3   : > { %9967 = vmatmul.msk.bf16.vlgmr.msra.gmra.mxu0 %vm1303_vm1, %v1612_v63  ;;  %1167 = vrot.lane.b32.xlu1 %v11831_v22, %s11260_s28  ;;  %v11957_v38 = vpop.permute.xlu0 %965  ;;  %v1925_v22 = vunpack.c.l.b16 %v11707_v32  ;;  %v1714_v63 = vunpack.c.l.b16 %v11692_v1 }
 0x1a4   : > { %v1124_v47 = vpop.permute.xlu2 %1123 }
 0x1a5   : > { %v1822_v35 = vunpack.c.l.b16 %v1124_v47  ;;  %v996_v0 = vpop.permute.xlu1 %995  ;;  %v1927_v47 = vpack.c.b16 %v1926_v28, %v1925_v22  ;;  %v1716_v2 = vpack.c.b16 %v1715_v55, %v1714_v63  ;;  %v1744_v55 = vunpack.c.l.b16 %v11804_v3 }
 0x1a6   : > { %v2030_v63 = vunpack.c.l.b16 %v1156_v57 }
 0x1a7   : > { %v1823_v61 = vpack.c.b16 %v1822_v35, %v1821_v37  ;;  %v11972_v37 = vpop.f32.mrf.mxu3  ;;  %v11974_v35 = vmul.f32 0.35355338, %v1319_v34  ;;  %v1932_v32 = vsel %vm1303_vm1, %v1927_v47, 0 }
 0x1a9   : > { %v1828_v23 = vsel %vm1303_vm1, %v1823_v61, 0  ;;  %v2195_v1 = vsel %vm2194_vm2, %v11974_v35, -inf  ;;  %v11990_v61 = vmul.f32 0.35355338, %v1321_v39 }
 0x1aa   : > { %1837 = vmatpush.bf16.xpose.msra.mxu0 %v1828_v23  ;;  %v11976_v23 = vpop.f32.mrf.mxu2 }
 0x1ab   : > { %1037 = vrot.lane.b32.xlu1 %v11837_v25, %s11260_s28  ;;  %v11965_v24 = vpop.permute.xlu0 %1125  ;;  %v2198_v47 = vsel %vm2194_vm2, %v11990_v61, -inf }
 0x1ac   : > { %v11969_v40 = vpop.permute.xlu2 %1027 }
 0x1ad   : > { %v1094_v44 = vpop.permute.xlu1 %1093 }
 0x1ae   : > { %v1639_v39 = vunpack.c.l.b16 %v1094_v44 }
 0x1af   : > { %v11992_v28 = vpop.f32.mrf.mxu3 }
 0x1b2   : > { %v11994_v22 = vpop.f32.mrf.mxu2 }
 0x1b3   : > { %9971 = vmatmul.msk.bf16.vlgmr.msrb.gmra.mxu0 %vm1303_vm1, %v1716_v2  ;;  %1039 = vrot.lane.b32.xlu1 %v11843_v15, %s11260_s28  ;;  %v11984_v50 = vpop.permute.xlu0 %1157  ;;  %v2029_v15 = vunpack.c.l.b16 %v1154_v29  ;;  %v12006_v29 = vld [vmem:[%s16697_s7] ss:$0 sm:$0xff] }
 0x1b4   : > { %1941 = vmatpush.bf16.xpose.msrb.mxu0 %v1932_v32  ;;  %2196 = vmax.xlane.f32.xlu2 %v2195_v1  ;;  %v11986_v34 = vpop.permute.xlu2 %997  ;;  %v1743_v32 = vunpack.c.l.b16 %v11744_v53  ;;  %v1819_v1 = vunpack.c.l.b16 %v996_v0  ;;  %v874_v44 = vadd.f32 %v12006_v29, %v11894_v52 }
 0x1b5   : > { %v11988_v25 = vpop.permute.xlu1 %1029  ;;  %v2031_v8 = vpack.c.b16 %v2030_v63, %v2029_v15  ;;  %v1636_v63 = vunpack.c.l.b16 %v11957_v38 }
 0x1b6   : > { %v1745_v14 = vpack.c.b16 %v1744_v55, %v1743_v32  ;;  %v1820_v57 = vpack.c.b16 %v1819_v1, %v1818_v9  ;;  %v876_v55 = vadd.f32 %v12006_v29, %v11914_v31 }
 0x1b7   : > { %v12009_v20 = vpop.f32.mrf.mxu3 }
 0x1b8   : > { %v1750_v53 = vsel %vm1303_vm1, %v1745_v14, 0  ;;  %v879_v14 = vadd.f32 %v12006_v29, %v11923_v21  ;;  %v1922_v21 = vunpack.c.l.b16 %v11747_v59 }
 0x1ba   : > { %v893_v43 = vpop.f32.mrf.mxu2  ;;  %v12031_v52 = vpack.c.bf16 %v879_v14, %v879_v14 }
 0x1bb   : > { %v11999_v2 = vpop.permute.xlu0 %999  ;;  %2199 = vmax.xlane.f32.xlu0 %v2198_v47 }
 0x1bc   : > { %v1096_v19 = vpop.permute.xlu2 %1095  ;;  %16848 = vst [vmem:[#allocation20_spill] sm:$0xff] %v12031_v52 }
 0x1bd   : > { %v1640_v13 = vunpack.c.l.b16 %v1096_v19  ;;  %v968_v18 = vpop.permute.xlu1 %967  ;;  %v2036_v19 = vsel %vm1303_vm1, %v2031_v8, 0 }
 0x1be   : > { %v1637_v0 = vunpack.c.l.b16 %v968_v18  ;;  %v1847_v18 = vunpack.c.l.b16 %v11965_v24 }
 0x1bf   : > { %v1641_v3 = vpack.c.b16 %v1640_v13, %v1639_v39  ;;  %v12026_v39 = vpack.c.bf16 %v874_v44, %v874_v44  ;;  %v1923_v44 = vunpack.c.l.b16 %v11725_v46 }
 0x1c0   : > { %v1638_v32 = vpack.c.b16 %v1637_v0, %v1636_v63  ;;  %v1951_v63 = vunpack.c.l.b16 %v11818_v6  ;;  %v1741_v6 = vunpack.c.l.b16 %v11795_v4 }
 0x1c1   : > { %v1646_v47 = vsel %vm1303_vm1, %v1641_v3, 0  ;;  %16847 = vst [vmem:[#allocation19_spill] sm:$0xff] %v12026_v39  ;;  %v12028_v3 = vpack.c.bf16 %v876_v55, %v876_v55  ;;  %v1924_v59 = vpack.c.b16 %v1923_v44, %v1922_v21  ;;  %v1770_v44 = vunpack.c.l.b16 %v11850_v56 }
 0x1c2   : > { %1655 = vmatpush.bf16.xpose.msra.mxu1 %v1646_v47  ;;  %v2968_v47 = vunpack.c.l.b16 %v12026_v39 }
 0x1c3   : > { %9975 = vmatmul.msk.bf16.vlgmr.msra.gmra.mxu0 %vm1303_vm1, %v1820_v57  ;;  %v12014_v9 = vpop.permute.xlu0 %969  ;;  %v12037_v57 = vpop.f32.mrf.mxu3  ;;  %v2969_v0 = vunpack.c.l.b16 %v12028_v3 }
 0x1c4   : > { %2045 = vmatpush.bf16.xpose.msra.mxu0 %v2036_v19  ;;  %v12016_v13 = vpop.permute.xlu2 %1031  ;;  %v895_v19 = vpop.f32.mrf.mxu2 }
 0x1c5   : > { %v1128_v8 = vpop.permute.xlu1 %1127  ;;  %v896_v55 = vadd.f32 %v12006_v29, %v895_v19  ;;  %v2970_v14 = vpack.c.b16 %v2969_v0, %v2968_v47  ;;  %v1769_v0 = vunpack.c.l.b16 %v11866_v36 }
 0x1c6   : > { %v1848_v15 = vunpack.c.l.b16 %v1128_v8  ;;  %v894_v8 = vadd.f32 %v12006_v29, %v893_v43 }
 0x1c7   : > { %v1771_v36 = vpack.c.b16 %v1770_v44, %v1769_v0  ;;  %v1844_v44 = vunpack.c.l.b16 %v11986_v34 }
 0x1c8   : > { %v1849_v1 = vpack.c.b16 %v1848_v15, %v1847_v18  ;;  %v12051_v18 = vpack.c.bf16 %v896_v55, %v896_v55  ;;  %v1952_v15 = vunpack.c.l.b16 %v11806_v7  ;;  %v12065_v21 = vpack.c.bf16 %v894_v8, %v894_v8 }
 0x1c9   : > { %9968 = vmatmul.msk.bf16.vlgmr.msra.gmra.mxu1 %vm1303_vm1, %v1638_v32  ;;  %v1740_v32 = vunpack.c.l.b16 %v11808_v12  ;;  %v12070_v7 = vmul.f32 0.35355338, %v11972_v37  ;;  %v2027_v55 = vunpack.c.l.b16 %v11969_v40 }
 0x1ca   : > { %1759 = vmatpush.bf16.xpose.msrb.mxu1 %v1750_v53  ;;  %v1854_v31 = vsel %vm1303_vm1, %v1849_v1, 0  ;;  %16849 = vst [vmem:[#allocation21_spill] sm:$0xff] %v12051_v18  ;;  %v1953_v43 = vpack.c.b16 %v1952_v15, %v1951_v63  ;;  %v3072_v37 = vunpack.c.l.b16 %v12065_v21 }
 0x1cb   : > { %v12034_v38 = vpop.permute.xlu0 %1129  ;;  %16850 = vst [vmem:[#allocation22_spill] sm:$0xff] %v12065_v21  ;;  %v1742_v19 = vpack.c.b16 %v1741_v6, %v1740_v32  ;;  %v2201_v63 = vsel %vm2194_vm2, %v12070_v7, -inf  ;;  %v3073_v32 = vunpack.c.l.b16 %v12051_v18  ;;  %v2026_v6 = vunpack.c.l.b16 %v11934_v41 }
 0x1cc   : > { %1205 = vrot.lane.b32.xlu2 %v12031_v52, %s11258_s25  ;;  %v12041_v24 = vpop.permute.xlu2 %1001  ;;  %v1958_v12 = vsel %vm1303_vm1, %v1953_v43, 0 }
 0x1cd   : > { %v1160_v53 = vpop.permute.xlu1 %1159 }
 0x1ce   : > { %v2056_v40 = vunpack.c.l.b16 %v1160_v53  ;;  %v1662_v53 = vunpack.c.l.b16 %v12014_v9 }
 0x1cf   : > { %1201 = vrot.lane.b32.xlu0 %v12026_v39, %s11258_s25 }
 0x1d2   : > { %1863 = vmatpush.bf16.xpose.msra.mxu1 %v1854_v31  ;;  %v12063_v31 = vpop.f32.mrf.mxu3 }
 0x1d3   : > { %9979 = vmatmul.msk.bf16.vlgmr.msrb.gmra.mxu0 %vm1303_vm1, %v1924_v59  ;;  %v12056_v46 = vpop.permute.xlu0 %1033 }
 0x1d4   : > { %2982 = vmatpush.bf16.msrb.mxu0 %v2970_v14  ;;  %1219 = vrot.lane.b32.xlu2 %v12051_v18, %s11258_s25  ;;  %v12060_v1 = vpop.permute.xlu2 %1161 }
 0x1d5   : > { %v1098_v47 = vpop.permute.xlu1 %1097 }
 0x1d6   : > { %v1665_v8 = vunpack.c.l.b16 %v1098_v47  ;;  %v1776_v47 = vsel %vm1303_vm1, %v1771_v36, 0 }
 0x1d7   : > { %1217 = vrot.lane.b32.xlu0 %v12065_v21, %s11258_s25 }
 0x1d9   : > { %9972 = vmatmul.msk.bf16.vlgmr.msrb.gmra.mxu1 %vm1303_vm1, %v1742_v19  ;;  %v2028_v19 = vpack.c.b16 %v2027_v55, %v2026_v6 }
 0x1da   : > { %1967 = vmatpush.bf16.xpose.msrb.mxu1 %v1958_v12  ;;  %v12084_v43 = vpop.f32.mrf.mxu3  ;;  %v3074_v12 = vpack.c.b16 %v3073_v32, %v3072_v37 }
 0x1db   : > { %v12075_v4 = vpop.permute.xlu0 %1003 }
 0x1dc   : > { %v1100_v59 = vpop.permute.xlu2 %1099 }
 0x1dd   : > { %v1666_v14 = vunpack.c.l.b16 %v1100_v59  ;;  %v972_v15 = vpop.permute.xlu1 %971  ;;  %2202 = vmax.xlane.f32.xlu1 %v2201_v63  ;;  %v2055_v59 = vunpack.c.l.b16 %v11984_v50  ;;  %v1845_v63 = vunpack.c.l.b16 %v11999_v2 }
 0x1de   : > { %v1663_v0 = vunpack.c.l.b16 %v972_v15 }
 0x1df   : > { %v1667_v56 = vpack.c.b16 %v1666_v14, %v1665_v8  ;;  %v2057_v55 = vpack.c.b16 %v2056_v40, %v2055_v59  ;;  %v1873_v8 = vunpack.c.l.b16 %v12034_v38  ;;  %v1846_v32 = vpack.c.b16 %v1845_v63, %v1844_v44 }
 0x1e0   : > { %v1664_v50 = vpack.c.b16 %v1663_v0, %v1662_v53  ;;  %v881_v38 = vadd.f32 %v12006_v29, %v11936_v49  ;;  %v1948_v40 = vunpack.c.l.b16 %v11833_v17  ;;  %v2994_v63 = vunpack.c.l.b16 %v12031_v52 }
 0x1e1   : > { %v1672_v39 = vsel %vm1303_vm1, %v1667_v56, 0  ;;  %v2062_v2 = vsel %vm1303_vm1, %v2057_v55, 0  ;;  %v1977_v56 = vunpack.c.l.b16 %v11876_v51  ;;  %v1949_v49 = vunpack.c.l.b16 %v11816_v30 }
 0x1e2   : > { %1681 = vmatpush.bf16.xpose.msra.mxu2 %v1672_v39  ;;  %v12096_v14 = vpop.f32.mrf.mxu3  ;;  %v12106_v6 = vpack.c.bf16 %v881_v38, %v881_v38  ;;  %v1766_v44 = vunpack.c.l.b16 %v11854_v11  ;;  %v1796_v11 = vunpack.c.l.b16 %v11932_v5  ;;  %v12142_v5 = vmul.f32 0.35355338, %v12009_v20 }
 0x1e3   : > { %9983 = vmatmul.msk.bf16.vlgmr.msra.gmra.mxu0 %vm1303_vm1, %v2028_v19  ;;  %v12091_v41 = vpop.permute.xlu0 %1163  ;;  %v1950_v17 = vpack.c.b16 %v1949_v49, %v1948_v40 }
 0x1e4   : > { %3086 = vmatpush.bf16.msra.mxu0 %v3074_v12  ;;  %16851 = vst [vmem:[#allocation23_spill] sm:$0xff] %v12106_v6  ;;  %v1978_v12 = vunpack.c.l.b16 %v11864_v62  ;;  %v2995_v0 = vunpack.c.l.b16 %v12106_v6  ;;  %v12123_v62 = vmul.f32 0.35355338, %v11992_v28  ;;  %v974_v40 = vpop.permute.xlu2 %973 }
 0x1e5   : > { %v1132_v37 = vpop.permute.xlu1 %1131  ;;  %v1688_v49 = vunpack.c.l.b16 %v974_v40  ;;  %v898_v40 = vpop.f32.mrf.mxu2 }
 0x1e6   : > { %v1874_v39 = vunpack.c.l.b16 %v1132_v37  ;;  %v1979_v53 = vpack.c.b16 %v1978_v12, %v1977_v56  ;;  %v2204_v28 = vsel %vm2194_vm2, %v12123_v62, -inf  ;;  %v2082_v56 = vunpack.c.l.b16 %v12091_v41 }
 0x1e7   : > { %v2207_v41 = vsel %vm2194_vm2, %v12142_v5, -inf }
 0x1e8   : > { %v1875_v36 = vpack.c.b16 %v1874_v39, %v1873_v8  ;;  %v1984_v30 = vsel %vm1303_vm1, %v1979_v53, 0  ;;  %v12134_v39 = vmul.f32 0.35355338, %v12037_v57  ;;  %v2052_v53 = vunpack.c.l.b16 %v11988_v25 }
 0x1e9   : > { %9969 = vmatmul.msk.bf16.vlgmr.msra.gmra.mxu2 %vm1303_vm1, %v1664_v50  ;;  %9976 = vmatmul.msk.bf16.vlgmr.msra.gmra.mxu1 %vm1303_vm1, %v1846_v32  ;;  %v1795_v32 = vunpack.c.l.b16 %v11878_v54 }
 0x1ea   : > { %1785 = vmatpush.bf16.xpose.msrb.mxu2 %v1776_v47  ;;  %2071 = vmatpush.bf16.xpose.msra.mxu1 %v2062_v2  ;;  %v1880_v34 = vsel %vm1303_vm1, %v1875_v36, 0  ;;  %v12109_v19 = vpop.f32.mrf.mxu3  ;;  %v1767_v47 = vunpack.c.l.b16 %v11902_v58  ;;  %v2996_v58 = vpack.c.b16 %v2995_v0, %v2994_v63  ;;  %v2210_v57 = vsel %vm2194_vm2, %v12134_v39, -inf }
 0x1eb   : > { %v1102_v9 = vpop.permute.xlu0 %1101  ;;  %v1871_v63 = vunpack.c.l.b16 %v12075_v4 }
 0x1ec   : > { %v1768_v51 = vpack.c.b16 %v1767_v47, %v1766_v44  ;;  %v1691_v36 = vunpack.c.l.b16 %v1102_v9  ;;  %v2053_v9 = vunpack.c.l.b16 %v12016_v13  ;;  %v2081_v47 = vunpack.c.l.b16 %v12060_v1 }
 0x1ed   : > { %v12104_v15 = vpop.permute.xlu1 %1035  ;;  %v12157_v1 = vmul.f32 0.35355338, %v12084_v43 }
 0x1ef   : > { %v2216_v43 = vsel %vm2194_vm2, %v12157_v1, -inf }
 0x1f2   : > { %1889 = vmatpush.bf16.xpose.msra.mxu2 %v1880_v34  ;;  %v12125_v37 = vpop.f32.mrf.mxu3  ;;  %v1797_v34 = vpack.c.b16 %v1796_v11, %v1795_v32  ;;  %v2054_v11 = vpack.c.b16 %v2053_v9, %v2052_v53  ;;  %v12160_v32 = vmul.f32 0.35355338, %v12063_v31 }
 0x1f3   : > { %v1134_v59 = vpop.permute.xlu0 %1133 }
 0x1f4   : > { %v1802_v20 = vsel %vm1303_vm1, %v1797_v34, 0  ;;  %v1899_v4 = vunpack.c.l.b16 %v1134_v59  ;;  %v884_v59 = vadd.f32 %v12006_v29, %v11950_v33  ;;  %v12176_v34 = vmul.f32 0.35355338, %v12109_v19 }
 0x1f5   : > { %v12118_v55 = vpop.permute.xlu1 %1165  ;;  %v2004_v33 = vunpack.c.l.b16 %v11946_v45  ;;  %v2003_v19 = vunpack.c.l.b16 %v11890_v60  ;;  %v1975_v45 = vunpack.c.l.b16 %v11874_v10  ;;  %v12200_v60 = vmul.f32 0.35355338, %v12125_v37 }
 0x1f6   : > { %1203 = vrot.lane.b32.xlu1 %v12028_v3, %s11258_s25 }
 0x1f9   : > { %9973 = vmatmul.msk.bf16.vlgmr.msrb.gmra.mxu2 %vm1303_vm1, %v1768_v51  ;;  %9980 = vmatmul.msk.bf16.vlgmr.msrb.gmra.mxu1 %vm1303_vm1, %v1950_v17  ;;  %v1870_v17 = vunpack.c.l.b16 %v12041_v24  ;;  %v2083_v51 = vpack.c.b16 %v2082_v56, %v2081_v47  ;;  %v12183_v56 = vmul.f32 0.35355338, %v12096_v14  ;;  %v1793_v47 = vunpack.c.l.b16 %v11904_v26 }
 0x1fa   : > { %1993 = vmatpush.bf16.xpose.msrb.mxu2 %v1984_v30  ;;  %3008 = vmatpush.bf16.msrb.mxu1 %v2996_v58  ;;  %v1451_v12 = vpop.f32.mrf.mxu3 }
 0x1fb   : > { %v12131_v8 = vpop.permute.xlu0 %1005  ;;  %v2088_v25 = vsel %vm1303_vm1, %v2083_v51, 0  ;;  %v2225_v51 = vsel %vm2194_vm2, %v12200_v60, -inf }
 0x1fd   : > { %v1104_v50 = vpop.permute.xlu1 %1103  ;;  %2205 = vmax.xlane.f32.xlu2 %v2204_v28  ;;  %v1872_v28 = vpack.c.b16 %v1871_v63, %v1870_v17  ;;  %v2219_v63 = vsel %vm2194_vm2, %v12183_v56, -inf  ;;  %v1527_v17 = vpop.f32.mrf.mxu0 }
 0x1fe   : > { %v1692_v2 = vunpack.c.l.b16 %v1104_v50  ;;  %1207 = vrot.lane.b32.xlu1 %v12106_v6, %s11258_s25 }
 0x200   : > { %v1693_v38 = vpack.c.b16 %v1692_v2, %v1691_v36  ;;  %v886_v36 = vadd.f32 %v12006_v29, %v11959_v48  ;;  %v2213_v2 = vsel %vm2194_vm2, %v12160_v32, -inf  ;;  %v2222_v48 = vsel %vm2194_vm2, %v12176_v34, -inf }
 0x201   : > { %2211 = vmax.xlane.f32.xlu0 %v2210_v57 }
 0x202   : > { %v1698_v54 = vsel %vm1303_vm1, %v1693_v38, 0  ;;  %v1475_v31 = vpop.f32.mrf.mxu3  ;;  %v12178_v38 = vpack.c.bf16 %v884_v59, %v884_v59  ;;  %v12180_v57 = vpack.c.bf16 %v886_v36, %v886_v36 }
 0x203   : > { %1707 = vmatpush.bf16.xpose.msrb.mxu3 %v1698_v54  ;;  %v976_v0 = vpop.permute.xlu0 %975  ;;  %v1974_v54 = vunpack.c.l.b16 %v11888_v16  ;;  %v2005_v16 = vpack.c.b16 %v2004_v33, %v2003_v19  ;;  %v2078_v33 = vunpack.c.l.b16 %v12056_v46 }
 0x204   : > { %v1689_v44 = vunpack.c.l.b16 %v976_v0  ;;  %v3020_v9 = vunpack.c.l.b16 %v12178_v38  ;;  %v3021_v14 = vunpack.c.l.b16 %v12180_v57 }
 0x205   : > { %v1136_v13 = vpop.permute.xlu1 %1135  ;;  %2208 = vmax.xlane.f32.xlu2 %v2207_v41  ;;  %v1976_v41 = vpack.c.b16 %v1975_v45, %v1974_v54  ;;  %v2010_v10 = vsel %vm1303_vm1, %v2005_v16, 0  ;;  %v1553_v16 = vpop.f32.mrf.mxu1 }
 0x206   : > { %v1690_v58 = vpack.c.b16 %v1689_v44, %v1688_v49  ;;  %v1900_v30 = vunpack.c.l.b16 %v1136_v13  ;;  %v1792_v49 = vunpack.c.l.b16 %v11886_v42  ;;  %v12197_v44 = vmul.f32 0.35355338, %v1451_v12  ;;  %v900_v12 = vpop.f32.mrf.mxu2 }
 0x207   : > { %v3022_v26 = vpack.c.b16 %v3021_v14, %v3020_v9 }
 0x208   : > { %v1901_v50 = vpack.c.b16 %v1900_v30, %v1899_v4  ;;  %v1794_v53 = vpack.c.b16 %v1793_v47, %v1792_v49  ;;  %v2228_v42 = vsel %vm2194_vm2, %v12197_v44, -inf  ;;  %v12231_v47 = vmul.f32 0.35355338, %v1527_v17 }
 0x209   : > { %9977 = vmatmul.msk.bf16.vlgmr.msra.gmra.mxu2 %vm1303_vm1, %v1872_v28  ;;  %9984 = vmatmul.msk.bf16.vlgmr.msra.gmra.mxu1 %vm1303_vm1, %v2054_v11  ;;  %v899_v28 = vadd.f32 %v12006_v29, %v898_v40 }
 0x20a   : > { %9970 = vmatmul.msk.bf16.vlgmr.msrb.gmra.mxu3 %vm1303_vm1, %v1690_v58  ;;  %2097 = vmatpush.bf16.xpose.msra.mxu2 %v2088_v25  ;;  %v1906_v24 = vsel %vm1303_vm1, %v1901_v50, 0  ;;  %v1529_v50 = vpop.f32.mrf.mxu0  ;;  %v12216_v25 = vmul.f32 0.35355338, %v1475_v31  ;;  %v1896_v31 = vunpack.c.l.b16 %v12131_v8 }
 0x20b   : > { %1811 = vmatpush.bf16.xpose.msra.mxu3 %v1802_v20  ;;  %2217 = vmax.xlane.f32.xlu0 %v2216_v43  ;;  %v1477_v20 = vpop.f32.mrf.mxu3  ;;  %v2107_v43 = vunpack.c.l.b16 %v12118_v55  ;;  %v12227_v9 = vpack.c.bf16 %v899_v28, %v899_v28 }
 0x20c   : > { %v12211_v58 = vmul.f32 0.35355338, %v1477_v20  ;;  %v2231_v55 = vsel %vm2194_vm2, %v12216_v25, -inf }
 0x20d   : > { %2214 = vmax.xlane.f32.xlu2 %v2213_v2  ;;  %v1008_v0 = vpop.permute.xlu1 %1007  ;;  %v901_v2 = vadd.f32 %v12006_v29, %v900_v12  ;;  %v3098_v49 = vunpack.c.l.b16 %v12227_v9 }
 0x20e   : > { %v1897_v59 = vunpack.c.l.b16 %v1008_v0  ;;  %v2234_v36 = vsel %vm2194_vm2, %v12211_v58, -inf  ;;  %v903_v40 = vpop.f32.mrf.mxu2 }
 0x20f   : > { %v12234_v46 = vpack.c.bf16 %v901_v2, %v901_v2  ;;  %v904_v28 = vadd.f32 %v12006_v29, %v903_v40 }
 0x211   : > { %v3099_v17 = vunpack.c.l.b16 %v12234_v46 }
 0x213   : > { %1915 = vmatpush.bf16.xpose.msrb.mxu3 %v1906_v24  ;;  %2223 = vmax.xlane.f32.xlu0 %v2222_v48  ;;  %v1501_v37 = vpop.f32.mrf.mxu3  ;;  %v2079_v24 = vunpack.c.l.b16 %v12104_v15  ;;  %v12224_v48 = vmul.f32 0.35355338, %v1529_v50  ;;  %v2001_v50 = vunpack.c.l.b16 %v11912_v27 }
 0x214   : > { %v12209_v13 = vmul.f32 0.35355338, %v1501_v37  ;;  %v3100_v37 = vpack.c.b16 %v3099_v17, %v3098_v49 }
 0x215   : > { %2220 = vmax.xlane.f32.xlu2 %v2219_v63  ;;  %v1168_v4 = vpop.permute.xlu1 %1167  ;;  %v2080_v15 = vpack.c.b16 %v2079_v24, %v2078_v33  ;;  %v1898_v63 = vpack.c.b16 %v1897_v59, %v1896_v31  ;;  %v2246_v0 = vsel %vm2194_vm2, %v12224_v48, -inf  ;;  %v12270_v33 = vpack.c.bf16 %v904_v28, %v904_v28 }
 0x216   : > { %v2108_v30 = vunpack.c.l.b16 %v1168_v4  ;;  %v2237_v11 = vsel %vm2194_vm2, %v12209_v13, -inf  ;;  %v905_v4 = vpop.f32.mrf.mxu2  ;;  %3112 = vmatpush.bf16.msra.mxu1 %v3100_v37 }
 0x218   : > { %v2109_v54 = vpack.c.b16 %v2108_v30, %v2107_v43  ;;  %v906_v43 = vadd.f32 %v12006_v29, %v905_v4 }
 0x219   : > { %9981 = vmatmul.msk.bf16.vlgmr.msrb.gmra.mxu2 %vm1303_vm1, %v1976_v41 }
 0x21a   : > { %9974 = vmatmul.msk.bf16.vlgmr.msra.gmra.mxu3 %vm1303_vm1, %v1794_v53  ;;  %3034 = vmatpush.bf16.msrb.mxu2 %v3022_v26  ;;  %v2114_v20 = vsel %vm1303_vm1, %v2109_v54, 0  ;;  %v889_v53 = vadd.f32 %v12006_v29, %v11976_v23  ;;  %v891_v26 = vadd.f32 %v12006_v29, %v11994_v22  ;;  %v12276_v27 = vpack.c.bf16 %v906_v43, %v906_v43 }
 0x21b   : > { %2019 = vmatpush.bf16.xpose.msra.mxu3 %v2010_v10  ;;  %2229 = vmax.xlane.f32.xlu0 %v2228_v42  ;;  %v1503_v45 = vpop.f32.mrf.mxu3  ;;  %v12251_v10 = vmul.f32 0.35355338, %v1553_v16 }
 0x21c   : > { %v12242_v41 = vmul.f32 0.35355338, %v1503_v45  ;;  %v12256_v30 = vpack.c.bf16 %v889_v53, %v889_v53  ;;  %v12258_v23 = vpack.c.bf16 %v891_v26, %v891_v26  ;;  %16856 = vst [vmem:[#allocation26_spill] sm:$0xff] %v12276_v27  ;;  %v3124_v45 = vunpack.c.l.b16 %v12270_v33 }
 0x21d   : > { %2226 = vmax.xlane.f32.xlu2 %v2225_v51  ;;  %v1038_v31 = vpop.permute.xlu1 %1037 }
 0x21e   : > { %v2240_v51 = vsel %vm2194_vm2, %v12242_v41, -inf  ;;  %16852 = vst [vmem:[#allocation24_spill] sm:$0xff] %v12256_v30  ;;  %v3046_v24 = vunpack.c.l.b16 %v12256_v30  ;;  %v3047_v59 = vunpack.c.l.b16 %v12258_v23 }
 0x21f   : > { %16853 = vst [vmem:[#allocation25_spill] sm:$0xff] %v12258_v23 }
 0x223   : > { %2238 = vmax.xlane.f32.xlu0 %v2237_v11  ;;  %v2249_v11 = vsel %vm2194_vm2, %v12251_v10, -inf }
 0x225   : > { %2235 = vmax.xlane.f32.xlu2 %v2234_v36  ;;  %v16854_v36 = vld [vmem:[#allocation18_spill] sm:$0xff]  ;;  %v1040_v16 = vpop.permute.xlu1 %1039 }
 0x226   : > { %v2000_v2 = vunpack.c.l.b16 %v16854_v36  ;;  %16855 = vst [vmem:[#allocation18_spill] sm:$0xff] %v12270_v33  ;;  %v2105_v26 = vunpack.c.l.b16 %v1040_v16 }
 0x227   : > { %v2197_v19 = vpop.xlane.xlu2 %2196 }
 0x228   : > { %v2387_v14 = vsub.f32 %v11974_v35, %v2197_v19  ;;  %2232 = vmax.xlane.f32.xlu1 %v2231_v55  ;;  %v2243_v35 = vsel %vm2194_vm2, %v12231_v47, -inf  ;;  %v2002_v54 = vpack.c.b16 %v2001_v50, %v2000_v2  ;;  %v3048_v55 = vpack.c.b16 %v3047_v59, %v3046_v24 }
 0x229   : > { %9985 = vmatmul.msk.bf16.vlgmr.msra.gmra.mxu2 %vm1303_vm1, %v2080_v15  ;;  %v1555_v15 = vpop.f32.mrf.mxu1 }
 0x22a   : > { %v2451_v8 = vmul.f32 1.442695, %v2387_v14  ;;  %9978 = vmatmul.msk.bf16.vlgmr.msrb.gmra.mxu3 %vm1303_vm1, %v1898_v63  ;;  %v908_v63 = vpop.f32.mrf.mxu2 }
 0x22b   : > { %2123 = vmatpush.bf16.xpose.msrb.mxu3 %v2114_v20  ;;  %2247 = vmax.xlane.f32.xlu0 %v2246_v0  ;;  %v3125_v20 = vunpack.c.l.b16 %v12276_v27 }
 0x22c   : > { %10607 = vpow2.f32 %v2451_v8  ;;  %v12282_v8 = vmul.f32 0.35355338, %v1555_v15 }
 0x22d   : > { %2244 = vmax.xlane.f32.xlu2 %v2243_v35  ;;  %v3126_v49 = vpack.c.b16 %v3125_v20, %v3124_v45  ;;  %v909_v35 = vadd.f32 %v12006_v29, %v908_v63  ;;  %v1631_v63 = vpop.f32.mrf.mxu0 }
 0x22e   : > { %v2200_v42 = vpop.xlane.xlu0 %2199  ;;  %v2252_v0 = vsel %vm2194_vm2, %v12282_v8, -inf }
 0x22f   : > { %v2388_v12 = vsub.f32 %v11990_v61, %v2200_v42  ;;  %3138 = vmatpush.bf16.msra.mxu2 %v3126_v49  ;;  %v2104_v42 = vunpack.c.l.b16 %v1038_v31  ;;  %v12301_v36 = vpop.permute.xlu2 %1205 }
 0x230   : > { %2241 = vmax.xlane.f32.xlu1 %v2240_v51 }
 0x231   : > { %v2453_v22 = vmul.f32 1.442695, %v2388_v12  ;;  %v12289_v12 = vpack.c.bf16 %v909_v35, %v909_v35  ;;  %v2106_v51 = vpack.c.b16 %v2105_v26, %v2104_v42 }
 0x232   : > { %v12263_v61 = vpop.eup %10607  ;;  %v910_v53 = vpop.f32.mrf.mxu2 }
 0x233   : > { %10609 = vpow2.f32 %v2453_v22  ;;  %2250 = vmax.xlane.f32.xlu0 %v2249_v11  ;;  %v2579_v40 = vsel %vm2194_vm2, %v12263_v61, 0.0  ;;  %v911_v17 = vadd.f32 %v12006_v29, %v910_v53  ;;  %16857 = vst [vmem:[#allocation27_spill] sm:$0xff] %v12289_v12  ;;  %v3150_v4 = vunpack.c.l.b16 %v12289_v12  ;;  %v1605_v53 = vpop.f32.mrf.mxu3 }
 0x235   : > { %v12291_v37 = vpack.c.bf16 %v911_v17, %v911_v17 }
 0x237   : > { %16858 = vst [vmem:[#allocation28_spill] sm:$0xff] %v12291_v37  ;;  %v3151_v22 = vunpack.c.l.b16 %v12291_v37 }
 0x238   : > { %2580 = vadd.xlane.f32.xlu1 %v2579_v40 }
 0x239   : > { %v12274_v19 = vpop.eup %10609  ;;  %v3152_v11 = vpack.c.b16 %v3151_v22, %v3150_v4 }
 0x23a   : > { %9982 = vmatmul.msk.bf16.vlgmr.msra.gmra.mxu3 %vm1303_vm1, %v2002_v54  ;;  %v2582_v14 = vsel %vm2194_vm2, %v12274_v19, 0.0  ;;  %v1579_v59 = vpop.f32.mrf.mxu2 }
 0x23b   : > { %3060 = vmatpush.bf16.msra.mxu3 %v3048_v55  ;;  %2583 = vadd.xlane.f32.xlu2 %v2582_v14  ;;  %v12303_v2 = vmul.f32 0.35355338, %v1579_v59 }
 0x23d   : > { %v2255_v40 = vsel %vm2194_vm2, %v12303_v2, -inf }
 0x240   : > { %2253 = vmax.xlane.f32.xlu1 %v2252_v0 }
 0x241   : > { %v12305_v31 = vpop.permute.xlu0 %1201 }
 0x242   : > { %v1581_v42 = vpop.f32.mrf.mxu2 }
 0x243   : > { %v12322_v4 = vmul.f32 0.35355338, %v1581_v42 }
 0x249   : > { %v12311_v54 = vpop.permute.xlu0 %1217 }
 0x24a   : > { %9986 = vmatmul.msk.bf16.vlgmr.msrb.gmra.mxu3 %vm1303_vm1, %v2106_v51 }
 0x24b   : > { %3164 = vmatpush.bf16.msrb.mxu3 %v3152_v11 }
 0x250   : > { %v2203_v28 = vpop.xlane.xlu1 %2202 }
 0x251   : > { %v2389_v50 = vsub.f32 %v12070_v7, %v2203_v28  ;;  %v12309_v7 = vpop.permute.xlu2 %1219 }
 0x253   : > { %v2455_v24 = vmul.f32 1.442695, %v2389_v50  ;;  %v12329_v50 = vmul.f32 0.35355338, %v1631_v63 }
 0x255   : > { %10611 = vpow2.f32 %v2455_v24 }
 0x25b   : > { %v12297_v29 = vpop.eup %10611 }
 0x25c   : > { %v2585_v43 = vsel %vm2194_vm2, %v12297_v29, 0.0 }
 0x25d   : > { %2586 = vadd.xlane.f32.xlu2 %v2585_v43  ;;  %v2258_v43 = vsel %vm2194_vm2, %v12322_v4, -inf }
 0x265   : > { %2256 = vmax.xlane.f32.xlu2 %v2255_v40  ;;  %v1607_v40 = vpop.f32.mrf.mxu3 }
 0x270   : > { %v2206_v15 = vpop.xlane.xlu2 %2205 }
 0x271   : > { %v2390_v55 = vsub.f32 %v12123_v62, %v2206_v15  ;;  %v1633_v62 = vpop.f32.mrf.mxu0 }
 0x272   : > { %v12351_v42 = vmul.f32 0.35355338, %v1633_v62 }
 0x273   : > { %v2457_v14 = vmul.f32 1.442695, %v2390_v55 }
 0x274   : > { %v2212_v45 = vpop.xlane.xlu0 %2211 }
 0x275   : > { %10613 = vpow2.f32 %v2457_v14  ;;  %v2392_v20 = vsub.f32 %v12134_v39, %v2212_v45  ;;  %v12338_v14 = vmul.f32 0.35355338, %v1607_v40  ;;  %v2267_v45 = vsel %vm2194_vm2, %v12329_v50, -inf }
 0x277   : > { %v2461_v0 = vmul.f32 1.442695, %v2392_v20  ;;  %16859 = vst [vmem:[#allocation29_spill] sm:$0xff] %v12338_v14  ;;  %v1657_v20 = vpop.f32.mrf.mxu1 }
 0x278   : > { %v2209_v49 = vpop.xlane.xlu2 %2208 }
 0x279   : > { %10615 = vpow2.f32 %v2461_v0  ;;  %v2391_v16 = vsub.f32 %v12142_v5, %v2209_v49  ;;  %v1735_v15 = vpop.f32.mrf.mxu0  ;;  %v12342_v0 = vpop.permute.xlu1 %1203 }
 0x27b   : > { %v12316_v35 = vpop.eup %10613  ;;  %v2459_v26 = vmul.f32 1.442695, %v2391_v16 }
 0x27c   : > { %v2588_v17 = vsel %vm2194_vm2, %v12316_v35, 0.0 }
 0x27d   : > { %10617 = vpow2.f32 %v2459_v26  ;;  %2589 = vadd.xlane.f32.xlu0 %v2588_v17 }
 0x27e   : > { %v2218_v24 = vpop.xlane.xlu0 %2217 }
 0x27f   : > { %v12320_v51 = vpop.eup %10615  ;;  %v2394_v55 = vsub.f32 %v12157_v1, %v2218_v24  ;;  %v2264_v1 = vsel %vm2194_vm2, %v12338_v14, -inf }
 0x280   : > { %v2215_v39 = vpop.xlane.xlu2 %2214  ;;  %v2594_v22 = vsel %vm2194_vm2, %v12320_v51, 0.0 }
 0x281   : > { %v2393_v5 = vsub.f32 %v12160_v32, %v2215_v39  ;;  %2595 = vadd.xlane.f32.xlu2 %v2594_v22  ;;  %v12336_v32 = vmul.f32 0.35355338, %v1605_v53  ;;  %v2465_v49 = vmul.f32 1.442695, %v2394_v55  ;;  %v12353_v39 = vmul.f32 0.35355338, %v1657_v20  ;;  %v12357_v24 = vpop.permute.xlu1 %1207 }
 0x283   : > { %v12327_v11 = vpop.eup %10617  ;;  %v2463_v28 = vmul.f32 1.442695, %v2393_v5  ;;  %v2261_v26 = vsel %vm2194_vm2, %v12336_v32, -inf  ;;  %v2273_v62 = vsel %vm2194_vm2, %v12353_v39, -inf }
 0x284   : > { %v2591_v59 = vsel %vm2194_vm2, %v12327_v11, 0.0 }
 0x285   : > { %2259 = vmax.xlane.f32.xlu0 %v2258_v43  ;;  %2592 = vadd.xlane.f32.xlu1 %v2591_v59  ;;  %10619 = vpow2.f32 %v2463_v28  ;;  %v1659_v28 = vpop.f32.mrf.mxu1  ;;  %v2270_v59 = vsel %vm2194_vm2, %v12351_v42, -inf }
 0x286   : > { %10621 = vpow2.f32 %v2465_v49  ;;  %v2224_v43 = vpop.xlane.xlu0 %2223 }
 0x287   : > { %v2396_v55 = vsub.f32 %v12176_v34, %v2224_v43 }
 0x288   : > { %v2221_v63 = vpop.xlane.xlu2 %2220 }
 0x289   : > { %2268 = vmax.xlane.f32.xlu2 %v2267_v45  ;;  %v2395_v16 = vsub.f32 %v12183_v56, %v2221_v63  ;;  %v1737_v56 = vpop.f32.mrf.mxu0  ;;  %v12366_v63 = vmul.f32 0.35355338, %v1735_v15 }
 0x28b   : > { %v12349_v53 = vpop.eup %10619  ;;  %v2467_v17 = vmul.f32 1.442695, %v2395_v16  ;;  %v2469_v16 = vmul.f32 1.442695, %v2396_v55  ;;  %v2291_v34 = vsel %vm2194_vm2, %v12366_v63, -inf }
 0x28c   : > { %v2597_v22 = vsel %vm2194_vm2, %v12349_v53, 0.0  ;;  %v12363_v40 = vpop.eup %10621  ;;  %v12381_v55 = vmul.f32 0.35355338, %v1737_v56 }
 0x28d   : > { %2262 = vmax.xlane.f32.xlu0 %v2261_v26  ;;  %2265 = vmax.xlane.f32.xlu1 %v2264_v1  ;;  %10623 = vpow2.f32 %v2467_v17  ;;  %v2600_v45 = vsel %vm2194_vm2, %v12363_v40, 0.0  ;;  %v12373_v17 = vmul.f32 0.35355338, %v1659_v28  ;;  %v1761_v43 = vpop.f32.mrf.mxu1  ;;  %v1709_v52 = vpop.f32.mrf.mxu3 }
 0x28e   : > { %10625 = vpow2.f32 %v2469_v16  ;;  %v2230_v21 = vpop.xlane.xlu0 %2229 }
 0x28f   : > { %v2398_v6 = vsub.f32 %v12197_v44, %v2230_v21 }
 0x290   : > { %v2227_v5 = vpop.xlane.xlu2 %2226 }
 0x291   : > { %2598 = vadd.xlane.f32.xlu2 %v2597_v22  ;;  %v1839_v49 = vpop.f32.mrf.mxu0  ;;  %v2397_v26 = vsub.f32 %v12200_v60, %v2227_v5  ;;  %v12383_v60 = vmul.f32 0.35355338, %v1761_v43  ;;  %v2276_v5 = vsel %vm2194_vm2, %v12373_v17, -inf  ;;  %v2473_v27 = vmul.f32 1.442695, %v2398_v6 }
 0x292   : > { %v12402_v18 = vmul.f32 0.35355338, %v1839_v49 }
 0x293   : > { %v12370_v20 = vpop.eup %10623 }
 0x294   : > { %v2603_v15 = vsel %vm2194_vm2, %v12370_v20, 0.0  ;;  %16860 = vst [vmem:[#allocation30_spill] sm:$0xff] %v12402_v18 }
 0x295   : > { %2271 = vmax.xlane.f32.xlu0 %v2270_v59  ;;  %2274 = vmax.xlane.f32.xlu1 %v2273_v62  ;;  %v1683_v59 = vpop.f32.mrf.mxu2  ;;  %v2471_v62 = vmul.f32 1.442695, %v2397_v26  ;;  %v1763_v37 = vpop.f32.mrf.mxu1 }
 0x296   : > { %v12409_v14 = vmul.f32 0.35355338, %v1763_v37 }
 0x297   : > { %10627 = vpow2.f32 %v2471_v62 }
 0x298   : > { %v12375_v22 = vpop.xlane.xlu2 %2235  ;;  %v2300_v44 = vsel %vm2194_vm2, %v12409_v14, -inf }
 0x299   : > { %2601 = vadd.xlane.f32.xlu2 %v2600_v45  ;;  %v2297_v45 = vsel %vm2194_vm2, %v12383_v60, -inf  ;;  %v1841_v16 = vpop.f32.mrf.mxu0 }
 0x29a   : > { %v12395_v43 = vmul.f32 0.35355338, %v1841_v16 }
 0x29b   : > { %v2233_v1 = vpop.xlane.xlu1 %2232 }
 0x29c   : > { %v2399_v23 = vsub.f32 %v12216_v25, %v2233_v1 }
 0x29d   : > { %2292 = vmax.xlane.f32.xlu0 %v2291_v34  ;;  %2604 = vadd.xlane.f32.xlu1 %v2603_v15  ;;  %v2294_v34 = vsel %vm2194_vm2, %v12381_v55, -inf  ;;  %v12393_v15 = vpop.eup %10625  ;;  %v1685_v26 = vpop.f32.mrf.mxu2 }
 0x29e   : > { %v2606_v62 = vsel %vm2194_vm2, %v12393_v15, 0.0  ;;  %v12411_v25 = vmul.f32 0.35355338, %v1685_v26  ;;  %v1865_v37 = vpop.f32.mrf.mxu1  ;;  %v12422_v26 = vpop.xlane.xlu0 %2238 }
 0x2a0   : > { %v2245_v56 = vpop.xlane.xlu2 %2244  ;;  %v2282_v21 = vsel %vm2194_vm2, %v12411_v25, -inf }
 0x2a1   : > { %2277 = vmax.xlane.f32.xlu2 %v2276_v5  ;;  %v12399_v5 = vpop.eup %10627 }
 0x2a3   : > { %v12387_v28 = vpop.xlane.xlu1 %2241 }
 0x2a5   : > { %2298 = vmax.xlane.f32.xlu0 %v2297_v45  ;;  %2295 = vmax.xlane.f32.xlu1 %v2294_v34  ;;  %v2318_v45 = vsel %vm2194_vm2, %v12395_v43, -inf  ;;  %v2609_v34 = vsel %vm2194_vm2, %v12399_v5, 0.0  ;;  %v1787_v49 = vpop.f32.mrf.mxu2 }
 0x2a9   : > { %2607 = vadd.xlane.f32.xlu2 %v2606_v62  ;;  %v2475_v62 = vmul.f32 1.442695, %v2399_v23 }
 0x2ab   : > { %v2581_v12 = vpop.xlane.xlu1 %2580 }
 0x2ac   : > { %10629 = vrcp.f32 %v2581_v12  ;;  %v2315_v12 = vsel %vm2194_vm2, %v12402_v18, -inf }
 0x2ad   : > { %2319 = vmax.xlane.f32.xlu0 %v2318_v45  ;;  %2610 = vadd.xlane.f32.xlu1 %v2609_v34  ;;  %v12416_v34 = vmul.f32 0.35355338, %v1683_v59  ;;  %v12433_v33 = vpop.f32.mrf.mxu2 }
 0x2ae   : > { %v2584_v16 = vpop.xlane.xlu2 %2583 }
 0x2af   : > { %10631 = vrcp.f32 %v2584_v16  ;;  %v2279_v59 = vsel %vm2194_vm2, %v12416_v34, -inf }
 0x2b0   : > { %10633 = vpow2.f32 %v2475_v62  ;;  %v12425_v62 = vmul.f32 0.35355338, %v1865_v37 }
 0x2b1   : > { %2316 = vmax.xlane.f32.xlu2 %v2315_v12  ;;  %10635 = vpow2.f32 %v2473_v27 }
 0x2b2   : > { %v10630_v1 = vpop.eup %10629 }
 0x2b3   : > { %v2835_v45 = vmul.f32 %v10630_v1, %v12263_v61  ;;  %v3177_v1 = vunpack.c.l.b16 %v12342_v0  ;;  %v1711_v0 = vpop.f32.mrf.mxu3 }
 0x2b5   : > { %v10632_v23 = vpop.eup %10631  ;;  %2283 = vmax.xlane.f32.xlu0 %v2282_v21  ;;  %2301 = vmax.xlane.f32.xlu1 %v2300_v44  ;;  %v2899_v16 = vpack.c.bf16 %v2835_v45, %v2835_v45  ;;  %v3176_v44 = vunpack.c.l.b16 %v12305_v31 }
 0x2b6   : > { %v2836_v6 = vmul.f32 %v10632_v23, %v12274_v19  ;;  %v12429_v12 = vpop.eup %10633  ;;  %v2403_v19 = vsub.f32 %v12231_v47, %v2245_v56  ;;  %v2321_v23 = vsel %vm2194_vm2, %v12425_v62, -inf  ;;  %v12445_v47 = vmul.f32 0.35355338, %v1711_v0 }
 0x2b7   : > { %v2965_v18 = vunpack.c.l.b16 %v2899_v16  ;;  %v2615_v45 = vsel %vm2194_vm2, %v12429_v12, 0.0  ;;  %v12440_v37 = vpop.eup %10635  ;;  %v12443_v16 = vmul.f32 0.35355338, %v1787_v49 }
 0x2b8   : > { %v2900_v61 = vpack.c.bf16 %v2836_v6, %v2836_v6  ;;  %v3178_v6 = vpack.c.b16 %v3177_v1, %v3176_v44  ;;  %v2483_v31 = vmul.f32 1.442695, %v2403_v19  ;;  %v2612_v56 = vsel %vm2194_vm2, %v12440_v37, 0.0  ;;  %v1891_v44 = vpop.f32.mrf.mxu2 }
 0x2b9   : > { %2280 = vmax.xlane.f32.xlu2 %v2279_v59  ;;  %v2288_v49 = vsel %vm2194_vm2, %v12445_v47, -inf }
 0x2ba   : > { %v2966_v21 = vunpack.c.l.b16 %v2900_v61  ;;  %v1943_v61 = vpop.f32.mrf.mxu0  ;;  %10637 = vpow2.f32 %v2483_v31 }
 0x2bb   : > { %v12450_v1 = vmul.f32 0.35355338, %v1943_v61 }
 0x2bc   : > { %v2967_v27 = vpack.c.b16 %v2966_v21, %v2965_v18  ;;  %v2248_v18 = vpop.xlane.xlu0 %2247  ;;  %v2303_v21 = vsel %vm2194_vm2, %v12443_v16, -inf }
 0x2bd   : > { %2616 = vadd.xlane.f32.xlu0 %v2615_v45  ;;  %2322 = vmax.xlane.f32.xlu1 %v2321_v23  ;;  %v2404_v59 = vsub.f32 %v12224_v48, %v2248_v18  ;;  %v2339_v45 = vsel %vm2194_vm2, %v12450_v1, -inf  ;;  %v2402_v48 = vsub.f32 %v12242_v41, %v12387_v28  ;;  %v1813_v18 = vpop.f32.mrf.mxu3 }
 0x2be   : > { %9987 = vmatmul.msk.bf16.vlgmr.msrb.gmra.mxu0 %vm2194_vm2, %v2967_v27  ;;  %v12456_v27 = vmul.f32 0.35355338, %v1891_v44  ;;  %v12470_v61 = vmul.f32 0.35355338, %v1813_v18 }
 0x2bf   : > { %3190 = vmatpush.bf16.msrb.mxu0 %v3178_v6  ;;  %v2485_v19 = vmul.f32 1.442695, %v2404_v59  ;;  %v12464_v6 = vmul.f32 0.35355338, %v1709_v52  ;;  %v2254_v59 = vpop.xlane.xlu1 %2253  ;;  %v1867_v52 = vpop.f32.mrf.mxu1 }
 0x2c0   : > { %16861 = vst [vmem:[#allocation31_spill] sm:$0xff] %v12456_v27  ;;  %v12460_v23 = vpop.eup %10637  ;;  %v2327_v0 = vsel %vm2194_vm2, %v12456_v27, -inf  ;;  %v2406_v41 = vsub.f32 %v12282_v8, %v2254_v59  ;;  %v12477_v28 = vmul.f32 0.35355338, %v1867_v52  ;;  %v2401_v59 = vsub.f32 %v12209_v13, %v12422_v26 }
 0x2c1   : > { %2613 = vadd.xlane.f32.xlu2 %v2612_v56  ;;  %10639 = vpow2.f32 %v2485_v19  ;;  %v2627_v31 = vsel %vm2194_vm2, %v12460_v23, 0.0  ;;  %v2481_v56 = vmul.f32 1.442695, %v2402_v48  ;;  %16862 = vst [vmem:[#allocation32_spill] sm:$0xff] %v12470_v61  ;;  %v2309_v19 = vsel %vm2194_vm2, %v12470_v61, -inf }
 0x2c2   : > { %16863 = vst [vmem:[#allocation33_spill] sm:$0xff] %v12477_v28  ;;  %v2400_v48 = vsub.f32 %v12211_v58, %v12375_v22  ;;  %v2324_v8 = vsel %vm2194_vm2, %v12477_v28, -inf }
 0x2c3   : > { %10641 = vpow2.f32 %v2481_v56  ;;  %v1945_v56 = vpop.f32.mrf.mxu0 }
 0x2c4   : > { %v12493_v52 = vmul.f32 0.35355338, %v1945_v56  ;;  %v2251_v56 = vpop.xlane.xlu0 %2250 }
 0x2c5   : > { %2304 = vmax.xlane.f32.xlu1 %v2303_v21  ;;  %2289 = vmax.xlane.f32.xlu0 %v2288_v49  ;;  %v2285_v21 = vsel %vm2194_vm2, %v12464_v6, -inf  ;;  %v1815_v27 = vpop.f32.mrf.mxu3 }
 0x2c6   : > { %16865 = vst [vmem:[#allocation35_spill] sm:$0xff] %v12493_v52  ;;  %v2342_v13 = vsel %vm2194_vm2, %v12493_v52, -inf }
 0x2c7   : > { %v12474_v49 = vpop.eup %10639 }
 0x2c8   : > { %v2630_v44 = vsel %vm2194_vm2, %v12474_v49, 0.0 }
 0x2c9   : > { %2340 = vmax.xlane.f32.xlu2 %v2339_v45  ;;  %v1893_v45 = vpop.f32.mrf.mxu2  ;;  %v12489_v18 = vpop.eup %10641 }
 0x2ca   : > { %v2624_v58 = vsel %vm2194_vm2, %v12489_v18, 0.0 }
 0x2cd   : > { %2328 = vmax.xlane.f32.xlu1 %v2327_v0  ;;  %2628 = vadd.xlane.f32.xlu0 %v2627_v31  ;;  %v2489_v0 = vmul.f32 1.442695, %v2406_v41  ;;  %v12485_v31 = vmul.f32 0.35355338, %v1893_v45  ;;  %v1969_v41 = vpop.f32.mrf.mxu1 }
 0x2cf   : > { %16864 = vst [vmem:[#allocation34_spill] sm:$0xff] %v12485_v31  ;;  %10643 = vpow2.f32 %v2489_v0  ;;  %v2330_v22 = vsel %vm2194_vm2, %v12485_v31, -inf }
 0x2d0   : > { %v2587_v45 = vpop.xlane.xlu2 %2586 }
 0x2d1   : > { %2286 = vmax.xlane.f32.xlu2 %v2285_v21  ;;  %v2477_v21 = vmul.f32 1.442695, %v2400_v48 }
 0x2d3   : > { %10645 = vpow2.f32 %v2477_v21 }
 0x2d5   : > { %2631 = vadd.xlane.f32.xlu1 %v2630_v44  ;;  %2310 = vmax.xlane.f32.xlu0 %v2309_v19  ;;  %v2479_v44 = vmul.f32 1.442695, %v2401_v59  ;;  %v12499_v19 = vmul.f32 0.35355338, %v1969_v41  ;;  %v12503_v26 = vpop.eup %10643 }
 0x2d6   : > { %v2636_v0 = vsel %vm2194_vm2, %v12503_v26, 0.0 }
 0x2d7   : > { %16866 = vst [vmem:[#allocation36_spill] sm:$0xff] %v12499_v19  ;;  %10647 = vpow2.f32 %v2479_v44  ;;  %v2345_v48 = vsel %vm2194_vm2, %v12499_v19, -inf  ;;  %v2405_v44 = vsub.f32 %v12251_v10, %v2251_v56 }
 0x2d8   : > { %10649 = vrcp.f32 %v2587_v45  ;;  %v12523_v45 = vmul.f32 0.35355338, %v1815_v27 }
 0x2d9   : > { %2325 = vmax.xlane.f32.xlu2 %v2324_v8  ;;  %v12509_v8 = vpop.eup %10645 }
 0x2da   : > { %v2618_v59 = vsel %vm2194_vm2, %v12509_v8, 0.0  ;;  %v2312_v52 = vsel %vm2194_vm2, %v12523_v45, -inf }
 0x2dd   : > { %2625 = vadd.xlane.f32.xlu1 %v2624_v58  ;;  %2331 = vmax.xlane.f32.xlu0 %v2330_v22  ;;  %v12513_v21 = vpop.eup %10647  ;;  %v12516_v58 = vmul.f32 0.35355338, %v12433_v33  ;;  %v2257_v22 = vpop.xlane.xlu2 %2256 }
 0x2de   : > { %v2621_v41 = vsel %vm2194_vm2, %v12513_v21, 0.0 }
 0x2e1   : > { %2343 = vmax.xlane.f32.xlu2 %v2342_v13 }
 0x2e5   : > { %2346 = vmax.xlane.f32.xlu1 %v2345_v48  ;;  %2637 = vadd.xlane.f32.xlu0 %v2636_v0  ;;  %v2306_v48 = vsel %vm2194_vm2, %v12516_v58, -inf  ;;  %v10650_v0 = vpop.eup %10649 }
 0x2e6   : > { %v2837_v33 = vmul.f32 %v10650_v0, %v12297_v29  ;;  %v3203_v29 = vunpack.c.l.b16 %v12357_v24 }
 0x2e9   : > { %2619 = vadd.xlane.f32.xlu2 %v2618_v59  ;;  %v2487_v59 = vmul.f32 1.442695, %v2405_v44 }
 0x2ed   : > { %2622 = vadd.xlane.f32.xlu0 %v2621_v41  ;;  %v2901_v41 = vpack.c.bf16 %v2837_v33, %v2837_v33 }
 0x2f0   : > { %v2590_v13 = vpop.xlane.xlu0 %2589 }
 0x2f1   : > { %10651 = vrcp.f32 %v2590_v13  ;;  %2307 = vmax.xlane.f32.xlu2 %v2306_v48 }
 0x2f4   : > { %v2596_v19 = vpop.xlane.xlu2 %2595 }
 0x2f5   : > { %10653 = vrcp.f32 %v2596_v19  ;;  %v2991_v19 = vunpack.c.l.b16 %v2901_v41 }
 0x2f6   : > { %10655 = vpow2.f32 %v2487_v59 }
 0x2f7   : > { %v10652_v31 = vpop.eup %10651 }
 0x2f8   : > { %v2838_v10 = vmul.f32 %v10652_v31, %v12316_v35  ;;  %v2260_v56 = vpop.xlane.xlu0 %2259  ;;  %v2593_v61 = vpop.xlane.xlu1 %2592  ;;  %v3202_v31 = vunpack.c.l.b16 %v12301_v36 }
 0x2f9   : > { %v2408_v13 = vsub.f32 %v12322_v4, %v2260_v56  ;;  %10657 = vrcp.f32 %v2593_v61  ;;  %2313 = vmax.xlane.f32.xlu2 %v2312_v52  ;;  %v2407_v52 = vsub.f32 %v12303_v2, %v2257_v22  ;;  %v1971_v56 = vpop.f32.mrf.mxu1 }
 0x2fa   : > { %v2902_v27 = vpack.c.bf16 %v2838_v10, %v2838_v10  ;;  %v3204_v61 = vpack.c.b16 %v3203_v29, %v3202_v31  ;;  %v12548_v22 = vmul.f32 0.35355338, %v1971_v56 }
 0x2fb   : > { %v10654_v44 = vpop.eup %10653  ;;  %v2493_v48 = vmul.f32 1.442695, %v2408_v13  ;;  %v2491_v2 = vmul.f32 1.442695, %v2407_v52 }
 0x2fc   : > { %v2992_v0 = vunpack.c.l.b16 %v2902_v27  ;;  %v2840_v59 = vmul.f32 %v10654_v44, %v12320_v51  ;;  %v2269_v33 = vpop.xlane.xlu2 %2268  ;;  %v12532_v35 = vpop.eup %10655 }
 0x2fd   : > { %10659 = vpow2.f32 %v2493_v48  ;;  %v2633_v36 = vsel %vm2194_vm2, %v12532_v35, 0.0  ;;  %v1917_v44 = vpop.f32.mrf.mxu3 }
 0x2fe   : > { %v2993_v28 = vpack.c.b16 %v2992_v0, %v2991_v19  ;;  %1209 = vrot.lane.b32.xlu1 %v12178_v38, %s11258_s25  ;;  %v2904_v24 = vpack.c.bf16 %v2840_v59, %v2840_v59  ;;  %v2411_v0 = vsub.f32 %v12329_v50, %v2269_v33  ;;  %10661 = vpow2.f32 %v2491_v2 }
 0x2ff   : > { %v10658_v4 = vpop.eup %10657  ;;  %v12553_v59 = vmul.f32 0.35355338, %v1917_v44 }
 0x300   : > { %v2839_v41 = vmul.f32 %v10658_v4, %v12327_v11  ;;  %9988 = vmatmul.msk.bf16.vlgmr.msrb.gmra.mxu1 %vm2194_vm2, %v2993_v28  ;;  %v12540_v51 = vpop.xlane.xlu0 %2262  ;;  %v12542_v10 = vpop.xlane.xlu1 %2265  ;;  %v3018_v11 = vunpack.c.l.b16 %v2904_v24  ;;  %v2499_v52 = vmul.f32 1.442695, %v2411_v0 }
 0x301   : > { %3216 = vmatpush.bf16.msrb.mxu1 %v3204_v61  ;;  %2634 = vadd.xlane.f32.xlu2 %v2633_v36  ;;  %16867 = vst [vmem:[#allocation37_spill] sm:$0xff] %v12553_v59  ;;  %v2348_v61 = vsel %vm2194_vm2, %v12548_v22, -inf  ;;  %v2333_v24 = vsel %vm2194_vm2, %v12553_v59, -inf }
 0x302   : > { %v2903_v13 = vpack.c.bf16 %v2839_v41, %v2839_v41 }
 0x303   : > { %v12546_v27 = vpop.eup %10659 }
 0x304   : > { %v3017_v29 = vunpack.c.l.b16 %v2903_v13  ;;  %v2642_v28 = vsel %vm2194_vm2, %v12546_v27, 0.0  ;;  %v2599_v48 = vpop.xlane.xlu2 %2598  ;;  %v12560_v36 = vpop.eup %10661 }
 0x305   : > { %2643 = vadd.xlane.f32.xlu0 %v2642_v28  ;;  %10663 = vrcp.f32 %v2599_v48  ;;  %v1919_v50 = vpop.f32.mrf.mxu3  ;;  %v2639_v2 = vsel %vm2194_vm2, %v12560_v36, 0.0 }
 0x306   : > { %v3019_v19 = vpack.c.b16 %v3018_v11, %v3017_v29  ;;  %10665 = vpow2.f32 %v2499_v52  ;;  %v12562_v56 = vmul.f32 0.35355338, %v1919_v50 }
 0x308   : > { %9989 = vmatmul.msk.bf16.vlgmr.msrb.gmra.mxu2 %vm2194_vm2, %v3019_v19  ;;  %v2272_v31 = vpop.xlane.xlu0 %2271  ;;  %v2275_v4 = vpop.xlane.xlu1 %2274  ;;  %16868 = vst [vmem:[#allocation38_spill] sm:$0xff] %v12562_v56  ;;  %v2336_v48 = vsel %vm2194_vm2, %v12562_v56, -inf }
 0x309   : > { %2349 = vmax.xlane.f32.xlu2 %v2348_v61  ;;  %v2413_v29 = vsub.f32 %v12353_v39, %v2275_v4  ;;  %v1995_v61 = vpop.f32.mrf.mxu2 }
 0x30b   : > { %v10664_v33 = vpop.eup %10663  ;;  %v2503_v50 = vmul.f32 1.442695, %v2413_v29 }
 0x30c   : > { %v2602_v41 = vpop.xlane.xlu2 %2601  ;;  %v2841_v11 = vmul.f32 %v10664_v33, %v12349_v53  ;;  %v12570_v28 = vpop.eup %10665 }
 0x30d   : > { %2334 = vmax.xlane.f32.xlu0 %v2333_v24  ;;  %10667 = vrcp.f32 %v2602_v41  ;;  %v2412_v24 = vsub.f32 %v12351_v42, %v2272_v31  ;;  %v2651_v4 = vsel %vm2194_vm2, %v12570_v28, 0.0 }
 0x30e   : > { %v2905_v52 = vpack.c.bf16 %v2841_v11, %v2841_v11 }
 0x30f   : > { %v2501_v59 = vmul.f32 1.442695, %v2412_v24 }
 0x310   : > { %v12564_v13 = vpop.xlane.xlu0 %2292  ;;  %v2605_v44 = vpop.xlane.xlu1 %2604  ;;  %v3043_v56 = vunpack.c.l.b16 %v2905_v52 }
 0x311   : > { %2640 = vadd.xlane.f32.xlu2 %v2639_v2  ;;  %v12576_v2 = vmul.f32 0.35355338, %v1995_v61  ;;  %10669 = vrcp.f32 %v2605_v44 }
 0x312   : > { %10671 = vpow2.f32 %v2503_v50 }
 0x313   : > { %v10668_v0 = vpop.eup %10667  ;;  %10673 = vpow2.f32 %v2501_v59 }
 0x314   : > { %v2278_v19 = vpop.xlane.xlu2 %2277  ;;  %v2842_v41 = vmul.f32 %v10668_v0, %v12363_v40  ;;  %v2351_v40 = vsel %vm2194_vm2, %v12576_v2, -inf }
 0x315   : > { %2337 = vmax.xlane.f32.xlu0 %v2336_v48  ;;  %v2414_v29 = vsub.f32 %v12373_v17, %v2278_v19 }
 0x316   : > { %v2906_v53 = vpack.c.bf16 %v2842_v41, %v2842_v41 }
 0x317   : > { %v10670_v0 = vpop.eup %10669 }
 0x318   : > { %v12578_v33 = vpop.xlane.xlu0 %2298  ;;  %v2296_v39 = vpop.xlane.xlu1 %2295  ;;  %v3044_v48 = vunpack.c.l.b16 %v2906_v53 }
 0x319   : > { %2652 = vadd.xlane.f32.xlu2 %v2651_v4  ;;  %v2420_v42 = vsub.f32 %v12381_v55, %v2296_v39  ;;  %v12589_v24 = vpop.eup %10671  ;;  %v2843_v55 = vmul.f32 %v10670_v0, %v12370_v20 }
 0x31a   : > { %v3045_v31 = vpack.c.b16 %v3044_v48, %v3043_v56  ;;  %v2505_v56 = vmul.f32 1.442695, %v2414_v29  ;;  %v12592_v41 = vpop.eup %10673  ;;  %v2657_v59 = vsel %vm2194_vm2, %v12589_v24, 0.0  ;;  %v3281_v29 = vunpack.c.l.b16 %v12309_v7 }
 0x31b   : > { %v2517_v44 = vmul.f32 1.442695, %v2420_v42  ;;  %v2907_v50 = vpack.c.bf16 %v2843_v55, %v2843_v55  ;;  %v2654_v39 = vsel %vm2194_vm2, %v12592_v41, 0.0 }
 0x31c   : > { %v2608_v11 = vpop.xlane.xlu2 %2607  ;;  %9990 = vmatmul.msk.bf16.vlgmr.msra.gmra.mxu3 %vm2194_vm2, %v3045_v31  ;;  %v3280_v31 = vunpack.c.l.b16 %v12311_v54 }
 0x31d   : > { %2352 = vmax.xlane.f32.xlu0 %v2351_v40  ;;  %10675 = vrcp.f32 %v2608_v11  ;;  %v3069_v40 = vunpack.c.l.b16 %v2907_v50 }
 0x31e   : > { %10677 = vpow2.f32 %v2517_v44 }
 0x31f   : > { %10679 = vpow2.f32 %v2505_v56  ;;  %v3282_v56 = vpack.c.b16 %v3281_v29, %v3280_v31 }
 0x320   : > { %v12587_v61 = vpop.xlane.xlu0 %2319  ;;  %v2611_v52 = vpop.xlane.xlu1 %2610 }
 0x321   : > { %10681 = vrcp.f32 %v2611_v52 }
 0x323   : > { %v10676_v19 = vpop.eup %10675 }
 0x324   : > { %v12596_v17 = vpop.xlane.xlu2 %2316  ;;  %v2844_v53 = vmul.f32 %v10676_v19, %v12393_v15  ;;  %v12603_v42 = vpop.eup %10677 }
 0x325   : > { %2658 = vadd.xlane.f32.xlu0 %v2657_v59  ;;  %v12607_v0 = vpop.eup %10679  ;;  %v2678_v15 = vsel %vm2194_vm2, %v12603_v42, 0.0  ;;  %v1997_v19 = vpop.f32.mrf.mxu2 }
 0x326   : > { %v2908_v4 = vpack.c.bf16 %v2844_v53, %v2844_v53  ;;  %v2660_v54 = vsel %vm2194_vm2, %v12607_v0, 0.0 }
 0x328   : > { %v2284_v20 = vpop.xlane.xlu0 %2283  ;;  %2655 = vadd.xlane.f32.xlu1 %v2654_v39  ;;  %v12601_v48 = vpop.xlane.xlu1 %2301  ;;  %v3070_v11 = vunpack.c.l.b16 %v2908_v4  ;;  %v12621_v39 = vmul.f32 0.35355338, %v1997_v19 }
 0x329   : > { %v10682_v4 = vpop.eup %10681  ;;  %v2416_v31 = vsub.f32 %v12411_v25, %v2284_v20  ;;  %v2421_v20 = vsub.f32 %v12383_v60, %v12578_v33  ;;  %v2422_v33 = vsub.f32 %v12409_v14, %v12601_v48 }
 0x32a   : > { %v3071_v44 = vpack.c.b16 %v3070_v11, %v3069_v40  ;;  %16869 = vst [vmem:[#allocation39_spill] sm:$0xff] %v12621_v39  ;;  %v2354_v52 = vsel %vm2194_vm2, %v12621_v39, -inf  ;;  %v2845_v29 = vmul.f32 %v10682_v4, %v12399_v5 }
 0x32c   : > { %v2281_v55 = vpop.xlane.xlu2 %2280  ;;  %9991 = vmatmul.msk.bf16.vlgmr.msra.gmra.mxu0 %vm2194_vm2, %v3071_v44  ;;  %v2509_v44 = vmul.f32 1.442695, %v2416_v31  ;;  %v2519_v31 = vmul.f32 1.442695, %v2421_v20  ;;  %v2521_v20 = vmul.f32 1.442695, %v2422_v33 }
 0x32d   : > { %2679 = vadd.xlane.f32.xlu0 %v2678_v15  ;;  %v2415_v59 = vsub.f32 %v12416_v34, %v2281_v55  ;;  %3294 = vmatpush.bf16.msra.mxu0 %v3282_v56 }
 0x32f   : > { %v2507_v53 = vmul.f32 1.442695, %v2415_v59  ;;  %v2909_v59 = vpack.c.bf16 %v2845_v29, %v2845_v29 }
 0x330   : > { %v12615_v7 = vpop.xlane.xlu0 %2616  ;;  %2661 = vadd.xlane.f32.xlu1 %v2660_v54  ;;  %v12617_v50 = vpop.xlane.xlu1 %2322 }
 0x331   : > { %1211 = vrot.lane.b32.xlu2 %v12180_v57, %s11258_s25  ;;  %10683 = vpow2.f32 %v2507_v53 }
 0x334   : > { %v2614_v34 = vpop.xlane.xlu2 %2613 }
 0x335   : > { %10685 = vrcp.f32 %v2614_v34  ;;  %v3095_v34 = vunpack.c.l.b16 %v2909_v59 }
 0x336   : > { %10687 = vpow2.f32 %v2509_v44  ;;  %v2419_v44 = vsub.f32 %v12366_v63, %v12564_v13 }
 0x337   : > { %v12631_v15 = vpop.eup %10683 }
 0x338   : > { %2355 = vmax.xlane.f32.xlu1 %v2354_v52  ;;  %v12626_v40 = vpop.xlane.xlu1 %2304  ;;  %v12628_v11 = vpop.xlane.xlu0 %2289  ;;  %v2663_v54 = vsel %vm2194_vm2, %v12631_v15, 0.0 }
 0x33b   : > { %v10686_v55 = vpop.eup %10685 }
 0x33c   : > { %v12633_v56 = vpop.xlane.xlu2 %2340  ;;  %v2846_v25 = vmul.f32 %v10686_v55, %v12440_v37  ;;  %v12644_v37 = vpop.eup %10687 }
 0x33d   : > { %v2666_v29 = vsel %vm2194_vm2, %v12644_v37, 0.0 }
 0x33e   : > { %v2910_v19 = vpack.c.bf16 %v2846_v25, %v2846_v25 }
 0x340   : > { %2664 = vadd.xlane.f32.xlu1 %v2663_v54  ;;  %v12640_v53 = vpop.xlane.xlu1 %2328  ;;  %v2629_v5 = vpop.xlane.xlu0 %2628  ;;  %v3096_v4 = vunpack.c.l.b16 %v2910_v19  ;;  %v2515_v54 = vmul.f32 1.442695, %v2419_v44 }
 0x341   : > { %1223 = vrot.lane.b32.xlu0 %v12234_v46, %s11258_s25  ;;  %10689 = vrcp.f32 %v2629_v5 }
 0x342   : > { %v3097_v52 = vpack.c.b16 %v3096_v4, %v3095_v34  ;;  %10691 = vpow2.f32 %v2519_v31 }
 0x344   : > { %v12646_v60 = vpop.xlane.xlu2 %2286  ;;  %9992 = vmatmul.msk.bf16.vlgmr.msra.gmra.mxu1 %vm2194_vm2, %v3097_v52 }
 0x347   : > { %v10690_v25 = vpop.eup %10689 }
 0x348   : > { %2667 = vadd.xlane.f32.xlu1 %v2666_v29  ;;  %v2632_v55 = vpop.xlane.xlu1 %2631  ;;  %v12655_v59 = vpop.xlane.xlu0 %2310  ;;  %v2851_v14 = vmul.f32 %v10690_v25, %v12460_v23 }
 0x349   : > { %10693 = vrcp.f32 %v2632_v55  ;;  %v12657_v19 = vpop.eup %10691 }
 0x34a   : > { %10695 = vpow2.f32 %v2521_v20  ;;  %v2681_v48 = vsel %vm2194_vm2, %v12657_v19, 0.0  ;;  %v2915_v13 = vpack.c.bf16 %v2851_v14, %v2851_v14  ;;  %v2409_v20 = vsub.f32 %v12336_v32, %v12540_v51 }
 0x34b   : > { %10697 = vpow2.f32 %v2515_v54  ;;  %v2428_v32 = vsub.f32 %v12395_v43, %v12587_v61 }
 0x34c   : > { %v12659_v5 = vpop.xlane.xlu2 %2325  ;;  %v3173_v29 = vunpack.c.l.b16 %v2915_v13  ;;  %10699 = vrcp.f32 %v12615_v7 }
 0x34f   : > { %v10694_v34 = vpop.eup %10693 }
 0x350   : > { %2682 = vadd.xlane.f32.xlu1 %v2681_v48  ;;  %v12664_v63 = vpop.xlane.xlu0 %2331  ;;  %v2852_v4 = vmul.f32 %v10694_v34, %v12474_v49  ;;  %v12667_v52 = vpop.eup %10695  ;;  %v2495_v48 = vmul.f32 1.442695, %v2409_v20 }
 0x351   : > { %v12671_v23 = vpop.eup %10697  ;;  %v2684_v25 = vsel %vm2194_vm2, %v12667_v52, 0.0  ;;  %v2626_v54 = vpop.xlane.xlu1 %2625 }
 0x352   : > { %v2916_v31 = vpack.c.bf16 %v2852_v4, %v2852_v4  ;;  %v2675_v14 = vsel %vm2194_vm2, %v12671_v23, 0.0  ;;  %10701 = vrcp.f32 %v2626_v54  ;;  %v10700_v13 = vpop.eup %10699 }
 0x353   : > { %v2847_v51 = vmul.f32 %v10700_v13, %v12429_v12 }
 0x354   : > { %v12669_v33 = vpop.xlane.xlu2 %2343  ;;  %v3174_v44 = vunpack.c.l.b16 %v2916_v31 }
 0x356   : > { %v3175_v55 = vpack.c.b16 %v3174_v44, %v3173_v29 }
 0x358   : > { %2685 = vadd.xlane.f32.xlu1 %v2684_v25  ;;  %v2638_v49 = vpop.xlane.xlu0 %2637  ;;  %9995 = vmatmul.msk.bf16.vlgmr.msrb.gmra.mxu0 %vm2194_vm2, %v3175_v55  ;;  %v10702_v31 = vpop.eup %10701  ;;  %v2533_v55 = vmul.f32 1.442695, %v2428_v32  ;;  %v2911_v25 = vpack.c.bf16 %v2847_v51, %v2847_v51 }
 0x359   : > { %v2850_v29 = vmul.f32 %v10702_v31, %v12489_v18 }
 0x35a   : > { %2676 = vadd.xlane.f32.xlu2 %v2675_v14  ;;  %v3121_v43 = vunpack.c.l.b16 %v2911_v25 }
 0x35c   : > { %v2620_v34 = vpop.xlane.xlu2 %2619 }
 0x35d   : > { %10703 = vrcp.f32 %v2620_v34  ;;  %v2914_v34 = vpack.c.bf16 %v2850_v29, %v2850_v29 }
 0x35e   : > { %10705 = vpow2.f32 %v2495_v48 }
 0x360   : > { %v2623_v4 = vpop.xlane.xlu0 %2622 }
 0x361   : > { %10707 = vrcp.f32 %v2623_v4  ;;  %v3148_v4 = vunpack.c.l.b16 %v2914_v34 }
 0x362   : > { %10709 = vpow2.f32 %v2533_v55  ;;  %v16870_v55 = vld [vmem:[#allocation19_spill] sm:$0xff] }
 0x363   : > { %v10704_v7 = vpop.eup %10703  ;;  %10711 = vrcp.f32 %v2638_v49 }
 0x364   : > { %v12685_v44 = vpop.xlane.xlu2 %2307  ;;  %v2848_v20 = vmul.f32 %v10704_v7, %v12509_v8  ;;  %v12688_v54 = vpop.eup %10705 }
 0x365   : > { %v2645_v18 = vsel %vm2194_vm2, %v12688_v54, 0.0 }
 0x366   : > { %v2912_v48 = vpack.c.bf16 %v2848_v20, %v2848_v20 }
 0x367   : > { %v10708_v14 = vpop.eup %10707 }
 0x368   : > { %v2849_v39 = vmul.f32 %v10708_v14, %v12513_v21  ;;  %v3122_v12 = vunpack.c.l.b16 %v2912_v48  ;;  %v12696_v51 = vpop.eup %10709 }
 0x369   : > { %v2702_v21 = vsel %vm2194_vm2, %v12696_v51, 0.0  ;;  %v10712_v7 = vpop.eup %10711 }
 0x36a   : > { %v2913_v61 = vpack.c.bf16 %v2849_v39, %v2849_v39  ;;  %v3123_v13 = vpack.c.b16 %v3122_v12, %v3121_v43  ;;  %v2854_v29 = vmul.f32 %v10712_v7, %v12503_v26 }
 0x36b   : > { %2646 = vadd.xlane.f32.xlu0 %v2645_v18  ;;  %v16871_v18 = vld [vmem:[#allocation18_spill] sm:$0xff] }
 0x36c   : > { %v3147_v31 = vunpack.c.l.b16 %v2913_v61  ;;  %v12693_v32 = vpop.xlane.xlu2 %2313  ;;  %9993 = vmatmul.msk.bf16.vlgmr.msra.gmra.mxu2 %vm2194_vm2, %v3123_v13  ;;  %v2918_v25 = vpack.c.bf16 %v2854_v29, %v2854_v29  ;;  %v12716_v13 = vpop.f32.mrf.mxu3  ;;  %v2423_v29 = vsub.f32 %v12443_v16, %v12626_v40  ;;  %v2429_v16 = vsub.f32 %v12425_v62, %v12617_v50  ;;  %v16875_v40 = vld [vmem:[#allocation29_spill] sm:$0xff]  ;;  %v16876_v50 = vld [vmem:[#allocation23_spill] sm:$0xff] }
 0x36e   : > { %v3149_v8 = vpack.c.b16 %v3148_v4, %v3147_v31  ;;  %v3200_v34 = vunpack.c.l.b16 %v2918_v25 }
 0x370   : > { %9994 = vmatmul.msk.bf16.vlgmr.msrb.gmra.mxu3 %vm2194_vm2, %v3149_v8 }
 0x371   : > { %1213 = vrot.lane.b32.xlu1 %v12256_v30, %s11258_s25 }
 0x372   : > { %1221 = vrot.lane.b32.xlu2 %v12227_v9, %s11258_s25 }
 0x373   : > { %2703 = vadd.xlane.f32.xlu0 %v2702_v21 }
 0x374   : > { %v2635_v39 = vpop.xlane.xlu2 %2634 }
 0x375   : > { %10713 = vrcp.f32 %v2635_v39  ;;  %v16872_v39 = vld [vmem:[#allocation26_spill] sm:$0xff] }
 0x378   : > { %v2644_v61 = vpop.xlane.xlu0 %2643 }
 0x37a   : > { %1233 = vrot.lane.b32.xlu2 %v16870_v55, %s11259_s3 }
 0x37b   : > { %v10714_v49 = vpop.eup %10713 }
 0x37c   : > { %v2853_v20 = vmul.f32 %v10714_v49, %v12532_v35  ;;  %v12709_v14 = vpop.xlane.xlu2 %2349  ;;  %v12718_v35 = vpop.xlane.xlu1 %2346 }
 0x37e   : > { %v2917_v48 = vpack.c.bf16 %v2853_v20, %v2853_v20  ;;  %v2023_v20 = vpop.f32.mrf.mxu3 }
 0x380   : > { %v3199_v43 = vunpack.c.l.b16 %v2917_v48 }
 0x382   : > { %v3201_v12 = vpack.c.b16 %v3200_v34, %v3199_v43  ;;  %1235 = vrot.lane.b32.xlu2 %v12028_v3, %s11259_s3  ;;  %v2523_v43 = vmul.f32 1.442695, %v2423_v29 }
 0x384   : > { %9996 = vmatmul.msk.bf16.vlgmr.msrb.gmra.mxu1 %vm2194_vm2, %v3201_v12  ;;  %v2641_v26 = vpop.xlane.xlu2 %2640  ;;  %v1210_v49 = vpop.permute.xlu1 %1209 }
 0x385   : > { %10715 = vrcp.f32 %v2641_v26  ;;  %v3228_v12 = vunpack.c.l.b16 %v1210_v49  ;;  %v12726_v26 = vmul.f32 0.35355338, %v2023_v20  ;;  %v2535_v49 = vmul.f32 1.442695, %v2429_v16 }
 0x386   : > { %10717 = vrcp.f32 %v2644_v61 }
 0x387   : > { %1225 = vrot.lane.b32.xlu0 %v16871_v18, %s11258_s25  ;;  %16873 = vst [vmem:[#allocation19_spill] sm:$0xff] %v12726_v26 }
 0x38b   : > { %v10716_v4 = vpop.eup %10715 }
 0x38c   : > { %v2653_v31 = vpop.xlane.xlu2 %2652  ;;  %v10718_v8 = vpop.eup %10717  ;;  %v2855_v21 = vmul.f32 %v10716_v4, %v12560_v36  ;;  %v16874_v4 = vld [vmem:[#allocation20_spill] sm:$0xff] }
 0x38d   : > { %v2856_v7 = vmul.f32 %v10718_v8, %v12546_v27  ;;  %10719 = vrcp.f32 %v2653_v31  ;;  %v2410_v8 = vsub.f32 %v16875_v40, %v12542_v10 }
 0x38e   : > { %v2919_v25 = vpack.c.bf16 %v2855_v21, %v2855_v21  ;;  %10721 = vpow2.f32 %v2523_v43 }
 0x38f   : > { %1227 = vrot.lane.b32.xlu0 %v16872_v39, %s11258_s25  ;;  %v2920_v48 = vpack.c.bf16 %v2856_v7, %v2856_v7  ;;  %v2360_v7 = vsel %vm2194_vm2, %v12726_v26, -inf }
 0x390   : > { %v3225_v30 = vunpack.c.l.b16 %v2919_v25  ;;  %v2497_v25 = vmul.f32 1.442695, %v2410_v8  ;;  %v16878_v8 = vld [vmem:[#allocation22_spill] sm:$0xff] }
 0x391   : > { %v3226_v27 = vunpack.c.l.b16 %v2920_v48  ;;  %v16877_v48 = vld [vmem:[#allocation30_spill] sm:$0xff] }
 0x393   : > { %v3227_v21 = vpack.c.b16 %v3226_v27, %v3225_v30  ;;  %v10720_v31 = vpop.eup %10719  ;;  %v2435_v30 = vsub.f32 %v12450_v1, %v12633_v56 }
 0x394   : > { %v1212_v34 = vpop.permute.xlu2 %1211  ;;  %v12737_v20 = vpop.eup %10721  ;;  %v2859_v62 = vmul.f32 %v10720_v31, %v12570_v28 }
 0x395   : > { %v3229_v61 = vunpack.c.l.b16 %v1212_v34  ;;  %v2427_v34 = vsub.f32 %v16877_v48, %v12596_v17  ;;  %v2687_v43 = vsel %vm2194_vm2, %v12737_v20, 0.0 }
 0x397   : > { %v3230_v36 = vpack.c.b16 %v3229_v61, %v3228_v12  ;;  %1237 = vrot.lane.b32.xlu0 %v16874_v4, %s11259_s3  ;;  %v12748_v12 = vpop.xlane.xlu0 %2334  ;;  %v2923_v61 = vpack.c.bf16 %v2859_v62, %v2859_v62  ;;  %v2531_v16 = vmul.f32 1.442695, %v2427_v34 }
 0x399   : > { %3242 = vmatpush.bf16.msrb.mxu2 %v3230_v36  ;;  %v2547_v36 = vmul.f32 1.442695, %v2435_v30  ;;  %v3277_v1 = vunpack.c.l.b16 %v2923_v61 }
 0x39b   : > { %v2656_v29 = vpop.xlane.xlu1 %2655  ;;  %2361 = vmax.xlane.f32.xlu1 %v2360_v7 }
 0x39c   : > { %10723 = vrcp.f32 %v2656_v29  ;;  %9997 = vmatmul.msk.bf16.vlgmr.msrb.gmra.mxu2 %vm2194_vm2, %v3227_v21 }
 0x39d   : > { %10725 = vpow2.f32 %v2535_v49  ;;  %v16879_v49 = vld [vmem:[#allocation21_spill] sm:$0xff] }
 0x39e   : > { %10727 = vpow2.f32 %v2497_v25 }
 0x39f   : > { %1239 = vrot.lane.b32.xlu0 %v16876_v50, %s11259_s3  ;;  %10729 = vpow2.f32 %v2547_v36  ;;  %v12762_v29 = vpop.xlane.xlu0 %2337 }
 0x3a0   : > { %10731 = vpow2.f32 %v2531_v16  ;;  %v16881_v16 = vld [vmem:[#allocation25_spill] sm:$0xff] }
 0x3a2   : > { %v10724_v10 = vpop.eup %10723 }
 0x3a3   : > { %v2860_v28 = vmul.f32 %v10724_v10, %v12592_v41  ;;  %2688 = vadd.xlane.f32.xlu1 %v2687_v43  ;;  %v12751_v40 = vpop.eup %10725  ;;  %v2662_v34 = vpop.xlane.xlu1 %2661  ;;  %v2417_v43 = vsub.f32 %v12464_v6, %v12646_v60 }
 0x3a4   : > { %v12755_v17 = vpop.eup %10727  ;;  %v2705_v7 = vsel %vm2194_vm2, %v12751_v40, 0.0  ;;  %10733 = vrcp.f32 %v2662_v34 }
 0x3a5   : > { %v2924_v27 = vpack.c.bf16 %v2860_v28, %v2860_v28  ;;  %v2648_v41 = vsel %vm2194_vm2, %v12755_v17, 0.0  ;;  %v12764_v31 = vpop.eup %10729  ;;  %v2511_v61 = vmul.f32 1.442695, %v2417_v43 }
 0x3a6   : > { %v12768_v25 = vpop.eup %10731  ;;  %v2723_v62 = vsel %vm2194_vm2, %v12764_v31, 0.0 }
 0x3a7   : > { %v3278_v56 = vunpack.c.l.b16 %v2924_v27  ;;  %1249 = vrot.lane.b32.xlu0 %v16878_v8, %s11259_s3  ;;  %v2699_v30 = vsel %vm2194_vm2, %v12768_v25, 0.0  ;;  %v12774_v10 = vpop.xlane.xlu0 %2352  ;;  %v16880_v27 = vld [vmem:[#allocation27_spill] sm:$0xff] }
 0x3a9   : > { %v3279_v21 = vpack.c.b16 %v3278_v56, %v3277_v1 }
 0x3aa   : > { %v10734_v36 = vpop.eup %10733 }
 0x3ab   : > { %9999 = vmatmul.msk.bf16.vlgmr.msra.gmra.mxu0 %vm2194_vm2, %v3279_v21  ;;  %2706 = vadd.xlane.f32.xlu1 %v2705_v7  ;;  %v2862_v21 = vmul.f32 %v10734_v36, %v12607_v0  ;;  %v12788_v8 = vpop.xlane.xlu1 %2355 }
 0x3ac   : > { %2649 = vadd.xlane.f32.xlu2 %v2648_v41 }
 0x3ad   : > { %v2926_v41 = vpack.c.bf16 %v2862_v21, %v2862_v21 }
 0x3af   : > { %1251 = vrot.lane.b32.xlu0 %v16879_v49, %s11259_s3  ;;  %v2659_v48 = vpop.xlane.xlu0 %2658  ;;  %v3304_v43 = vunpack.c.l.b16 %v2926_v41 }
 0x3b0   : > { %10735 = vrcp.f32 %v2659_v48 }
 0x3b1   : > { %10737 = vpow2.f32 %v2511_v61 }
 0x3b3   : > { %2724 = vadd.xlane.f32.xlu1 %v2723_v62  ;;  %v2665_v41 = vpop.xlane.xlu1 %2664 }
 0x3b4   : > { %2700 = vadd.xlane.f32.xlu2 %v2699_v30 }
 0x3b6   : > { %v10736_v56 = vpop.eup %10735 }
 0x3b7   : > { %v2680_v28 = vpop.xlane.xlu0 %2679  ;;  %v2861_v7 = vmul.f32 %v10736_v56, %v12589_v24  ;;  %v12786_v6 = vpop.eup %10737 }
 0x3b8   : > { %v2669_v24 = vsel %vm2194_vm2, %v12786_v6, 0.0 }
 0x3b9   : > { %v2925_v60 = vpack.c.bf16 %v2861_v7, %v2861_v7 }
 0x3bb   : > { %v3303_v0 = vunpack.c.l.b16 %v2925_v60 }
 0x3bd   : > { %v3305_v36 = vpack.c.b16 %v3304_v43, %v3303_v0 }
 0x3bf   : > { %v1224_v62 = vpop.permute.xlu0 %1223 }
 0x3c0   : > { %v3307_v48 = vunpack.c.l.b16 %v1224_v62 }
 0x3cc   : > { %1229 = vrot.lane.b32.xlu1 %v16880_v27, %s11258_s25  ;;  %1215 = vrot.lane.b32.xlu2 %v16881_v16, %s11258_s25 }
 0x3cd   : > { %v2677_v1 = vpop.xlane.xlu2 %2676 }
 0x3ce   : > { %10739 = vrcp.f32 %v2677_v1 }
 0x3cf   : > { %10741 = vrcp.f32 %v2680_v28 }
 0x3d4   : > { %1243 = vrot.lane.b32.xlu1 %v12180_v57, %s11259_s3  ;;  %v10740_v56 = vpop.eup %10739 }
 0x3d5   : > { %v1222_v30 = vpop.permute.xlu2 %1221  ;;  %v10742_v1 = vpop.eup %10741  ;;  %v2867_v7 = vmul.f32 %v10740_v56, %v12671_v23  ;;  %v12805_v23 = vmul.f32 0.35355338, %v12716_v13 }
 0x3d6   : > { %v3306_v34 = vunpack.c.l.b16 %v1222_v30  ;;  %v2868_v28 = vmul.f32 %v10742_v1, %v12603_v42 }
 0x3d7   : > { %v2931_v62 = vpack.c.bf16 %v2867_v7, %v2867_v7 }
 0x3d8   : > { %v3308_v61 = vpack.c.b16 %v3307_v48, %v3306_v34  ;;  %v2932_v30 = vpack.c.bf16 %v2868_v28, %v2868_v28 }
 0x3d9   : > { %2670 = vadd.xlane.f32.xlu0 %v2669_v24 }
 0x3da   : > { %3320 = vmatpush.bf16.msra.mxu1 %v3308_v61  ;;  %v3381_v61 = vunpack.c.l.b16 %v2931_v62  ;;  %v3382_v0 = vunpack.c.l.b16 %v2932_v30 }
 0x3dc   : > { %1265 = vrot.lane.b32.xlu1 %v16870_v55, %s11260_s28  ;;  %v2418_v55 = vsub.f32 %v12445_v47, %v12628_v11  ;;  %v3383_v26 = vpack.c.b16 %v3382_v0, %v3381_v61  ;;  %v2426_v47 = vsub.f32 %v12523_v45, %v12693_v32  ;;  %v2357_v11 = vsel %vm2194_vm2, %v12805_v23, -inf }
 0x3dd   : > { %v1234_v21 = vpop.permute.xlu2 %1233  ;;  %10000 = vmatmul.msk.bf16.vlgmr.msra.gmra.mxu1 %vm2194_vm2, %v3305_v36  ;;  %v2668_v36 = vpop.xlane.xlu1 %2667 }
 0x3de   : > { %v3384_v60 = vunpack.c.l.b16 %v1234_v21  ;;  %v12797_v43 = vpop.xlane.xlu0 %2646  ;;  %v2513_v42 = vmul.f32 1.442695, %v2418_v55  ;;  %10743 = vrcp.f32 %v2668_v36  ;;  %v2424_v21 = vsub.f32 %v12516_v58, %v12685_v44  ;;  %v16882_v58 = vld [vmem:[#allocation33_spill] sm:$0xff] }
 0x3df   : > { %v2529_v7 = vmul.f32 1.442695, %v2426_v47  ;;  %v2430_v44 = vsub.f32 %v16882_v58, %v12659_v5 }
 0x3e0   : > { %10745 = vpow2.f32 %v2513_v42  ;;  %v2525_v13 = vmul.f32 1.442695, %v2424_v21 }
 0x3e1   : > { %10747 = vrcp.f32 %v2665_v41 }
 0x3e2   : > { %10749 = vpow2.f32 %v2525_v13 }
 0x3e3   : > { %10751 = vpow2.f32 %v2529_v7  ;;  %v2047_v7 = vpop.f32.mrf.mxu0 }
 0x3e5   : > { %v1236_v48 = vpop.permute.xlu2 %1235  ;;  %v2683_v1 = vpop.xlane.xlu1 %2682 }
 0x3e6   : > { %v3385_v34 = vunpack.c.l.b16 %v1236_v48  ;;  %v12807_v56 = vpop.xlane.xlu0 %2703  ;;  %v2537_v48 = vmul.f32 1.442695, %v2430_v44 }
 0x3e8   : > { %v3386_v24 = vpack.c.b16 %v3385_v34, %v3384_v60 }
 0x3ea   : > { %3398 = vmatpush.bf16.msrb.mxu0 %v3386_v24 }
 0x3ed   : > { %1241 = vrot.lane.b32.xlu0 %v12178_v38, %s11259_s3  ;;  %10003 = vmatmul.msk.bf16.vlgmr.msrb.gmra.mxu0 %vm2194_vm2, %v3383_v26  ;;  %v10744_v26 = vpop.eup %10743  ;;  %v2686_v34 = vpop.xlane.xlu1 %2685 }
 0x3ee   : > { %v12817_v28 = vpop.eup %10745  ;;  %v2864_v45 = vmul.f32 %v10744_v26, %v12644_v37  ;;  %10753 = vrcp.f32 %v2686_v34  ;;  %v16883_v37 = vld [vmem:[#allocation35_spill] sm:$0xff] }
 0x3ef   : > { %v10748_v30 = vpop.eup %10747  ;;  %v2672_v32 = vsel %vm2194_vm2, %v12817_v28, 0.0  ;;  %10755 = vpow2.f32 %v2537_v48  ;;  %v2436_v42 = vsub.f32 %v16883_v37, %v12669_v33 }
 0x3f0   : > { %v2863_v41 = vmul.f32 %v10748_v30, %v12631_v15  ;;  %v2928_v60 = vpack.c.bf16 %v2864_v45, %v2864_v45  ;;  %v12825_v61 = vpop.eup %10749  ;;  %v2438_v15 = vsub.f32 %v12548_v22, %v12709_v14  ;;  %10757 = vrcp.f32 %v2683_v1 }
 0x3f1   : > { %v12827_v55 = vpop.eup %10751  ;;  %v12839_v22 = vmul.f32 0.35355338, %v2047_v7 }
 0x3f2   : > { %v2927_v24 = vpack.c.bf16 %v2863_v41, %v2863_v41  ;;  %v3330_v21 = vunpack.c.l.b16 %v2928_v60  ;;  %v2696_v26 = vsel %vm2194_vm2, %v12827_v55, 0.0  ;;  %v2553_v58 = vmul.f32 1.442695, %v2438_v15  ;;  %v16884_v41 = vld [vmem:[#allocation32_spill] sm:$0xff] }
 0x3f3   : > { %v2425_v48 = vsub.f32 %v16884_v41, %v12655_v59  ;;  %v2363_v34 = vsel %vm2194_vm2, %v12839_v22, -inf }
 0x3f4   : > { %v3329_v13 = vunpack.c.l.b16 %v2927_v24  ;;  %v10754_v33 = vpop.eup %10753 }
 0x3f5   : > { %1255 = vrot.lane.b32.xlu0 %v12234_v46, %s11259_s3  ;;  %2358 = vmax.xlane.f32.xlu2 %v2357_v11  ;;  %v2690_v11 = vsel %vm2194_vm2, %v12825_v61, 0.0  ;;  %v12837_v44 = vpop.eup %10755  ;;  %v2870_v45 = vmul.f32 %v10754_v33, %v12667_v52 }
 0x3f6   : > { %v3331_v30 = vpack.c.b16 %v3330_v21, %v3329_v13  ;;  %v10758_v1 = vpop.eup %10757 }
 0x3f7   : > { %v2869_v60 = vmul.f32 %v10758_v1, %v12657_v19  ;;  %v2934_v24 = vpack.c.bf16 %v2870_v45, %v2870_v45  ;;  %v16885_v19 = vld [vmem:[#allocation34_spill] sm:$0xff] }
 0x3f9   : > { %v1226_v62 = vpop.permute.xlu0 %1225  ;;  %v3408_v15 = vunpack.c.l.b16 %v2934_v24  ;;  %v1214_v24 = vpop.permute.xlu1 %1213 }
 0x3fa   : > { %v3332_v5 = vunpack.c.l.b16 %v1226_v62  ;;  %v2549_v62 = vmul.f32 1.442695, %v2436_v42 }
 0x3fc   : > { %10759 = vpow2.f32 %v2549_v62 }
 0x3fd   : > { %2673 = vadd.xlane.f32.xlu2 %v2672_v32  ;;  %10761 = vpow2.f32 %v2553_v58  ;;  %v2708_v32 = vsel %vm2194_vm2, %v12837_v44, 0.0  ;;  %v16886_v58 = vld [vmem:[#allocation36_spill] sm:$0xff] }
 0x401   : > { %v1228_v0 = vpop.permute.xlu0 %1227 }
 0x402   : > { %v3333_v36 = vunpack.c.l.b16 %v1228_v0  ;;  %v12850_v0 = vpop.eup %10759 }
 0x403   : > { %v12852_v37 = vpop.eup %10761  ;;  %v2726_v59 = vsel %vm2194_vm2, %v12850_v0, 0.0 }
 0x404   : > { %v3334_v47 = vpack.c.b16 %v3333_v36, %v3332_v5  ;;  %v2527_v5 = vmul.f32 1.442695, %v2425_v48  ;;  %v2933_v36 = vpack.c.bf16 %v2869_v60, %v2869_v60 }
 0x405   : > { %2691 = vadd.xlane.f32.xlu2 %v2690_v11  ;;  %v2432_v11 = vsub.f32 %v16885_v19, %v12664_v63  ;;  %v16887_v19 = vld [vmem:[#allocation28_spill] sm:$0xff] }
 0x406   : > { %3346 = vmatpush.bf16.msra.mxu2 %v3334_v47  ;;  %2697 = vadd.xlane.f32.xlu1 %v2696_v26  ;;  %10763 = vpow2.f32 %v2527_v5  ;;  %v3407_v13 = vunpack.c.l.b16 %v2933_v36  ;;  %v2732_v26 = vsel %vm2194_vm2, %v12852_v37, 0.0 }
 0x407   : > { %v2541_v62 = vmul.f32 1.442695, %v2432_v11 }
 0x408   : > { %v3409_v7 = vpack.c.b16 %v3408_v15, %v3407_v13 }
 0x409   : > { %10001 = vmatmul.msk.bf16.vlgmr.msra.gmra.mxu2 %vm2194_vm2, %v3331_v30  ;;  %v1238_v14 = vpop.permute.xlu0 %1237  ;;  %10765 = vpow2.f32 %v2541_v62 }
 0x40a   : > { %v3410_v42 = vunpack.c.l.b16 %v1238_v14  ;;  %v2437_v14 = vsub.f32 %v16886_v58, %v12718_v35 }
 0x40c   : > { %v12861_v33 = vpop.eup %10763  ;;  %v2551_v45 = vmul.f32 1.442695, %v2437_v14 }
 0x40d   : > { %2709 = vadd.xlane.f32.xlu2 %v2708_v32  ;;  %v2693_v63 = vsel %vm2194_vm2, %v12861_v33, 0.0 }
 0x40e   : > { %2364 = vmax.xlane.f32.xlu1 %v2363_v34 }
 0x40f   : > { %v12869_v60 = vpop.eup %10765 }
 0x410   : > { %v2714_v5 = vsel %vm2194_vm2, %v12869_v60, 0.0 }
 0x411   : > { %v1240_v52 = vpop.permute.xlu0 %1239 }
 0x412   : > { %v3411_v21 = vunpack.c.l.b16 %v1240_v52 }
 0x414   : > { %v3412_v47 = vpack.c.b16 %v3411_v21, %v3410_v42 }
 0x415   : > { %2727 = vadd.xlane.f32.xlu2 %v2726_v59 }
 0x416   : > { %3424 = vmatpush.bf16.msrb.mxu1 %v3412_v47  ;;  %2733 = vadd.xlane.f32.xlu1 %v2732_v26  ;;  %v12878_v47 = vpop.xlane.xlu1 %2361 }
 0x419   : > { %10004 = vmatmul.msk.bf16.vlgmr.msrb.gmra.mxu1 %vm2194_vm2, %v3409_v7  ;;  %v1250_v30 = vpop.permute.xlu0 %1249 }
 0x41a   : > { %v3488_v41 = vunpack.c.l.b16 %v1250_v30 }
 0x41f   : > { %2694 = vadd.xlane.f32.xlu0 %v2693_v63  ;;  %v2650_v1 = vpop.xlane.xlu2 %2649 }
 0x420   : > { %10767 = vrcp.f32 %v2650_v1 }
 0x421   : > { %10769 = vrcp.f32 %v12797_v43  ;;  %v1252_v32 = vpop.permute.xlu0 %1251 }
 0x422   : > { %10771 = vrcp.f32 %v12807_v56  ;;  %v3489_v48 = vunpack.c.l.b16 %v1252_v32 }
 0x423   : > { %10773 = vpow2.f32 %v2551_v45 }
 0x424   : > { %v3490_v34 = vpack.c.b16 %v3489_v48, %v3488_v41 }
 0x426   : > { %v10768_v35 = vpop.eup %10767  ;;  %3502 = vmatpush.bf16.msra.mxu0 %v3490_v34 }
 0x427   : > { %v10770_v36 = vpop.eup %10769  ;;  %2715 = vadd.xlane.f32.xlu0 %v2714_v5  ;;  %v2701_v52 = vpop.xlane.xlu2 %2700  ;;  %v2858_v43 = vmul.f32 %v10768_v35, %v12755_v17  ;;  %v16888_v5 = vld [vmem:[#allocation31_spill] sm:$0xff] }
 0x428   : > { %v10772_v42 = vpop.eup %10771  ;;  %10775 = vrcp.f32 %v2701_v52  ;;  %v2857_v21 = vmul.f32 %v10770_v36, %v12688_v54  ;;  %v2431_v36 = vsub.f32 %v16888_v5, %v12640_v53 }
 0x429   : > { %v12874_v56 = vpop.eup %10773  ;;  %v2876_v15 = vmul.f32 %v10772_v42, %v12696_v51  ;;  %v2922_v59 = vpack.c.bf16 %v2858_v43, %v2858_v43  ;;  %v3254_v51 = vunpack.c.l.b16 %v1214_v24 }
 0x42a   : > { %v2729_v13 = vsel %vm2194_vm2, %v12874_v56, 0.0  ;;  %v2921_v26 = vpack.c.bf16 %v2857_v21, %v2857_v21  ;;  %v2539_v42 = vmul.f32 1.442695, %v2431_v36 }
 0x42b   : > { %v2940_v7 = vpack.c.bf16 %v2876_v15, %v2876_v15  ;;  %v3252_v30 = vunpack.c.l.b16 %v2922_v59 }
 0x42c   : > { %v3251_v63 = vunpack.c.l.b16 %v2921_v26  ;;  %v16889_v26 = vld [vmem:[#allocation37_spill] sm:$0xff] }
 0x42d   : > { %1231 = vrot.lane.b32.xlu2 %v16887_v19, %s11258_s25  ;;  %v3486_v1 = vunpack.c.l.b16 %v2940_v7  ;;  %v2433_v7 = vsub.f32 %v16889_v26, %v12748_v12 }
 0x42e   : > { %v10776_v11 = vpop.eup %10775  ;;  %v3253_v32 = vpack.c.b16 %v3252_v30, %v3251_v63  ;;  %v16890_v63 = vld [vmem:[#allocation39_spill] sm:$0xff] }
 0x42f   : > { %v2875_v17 = vmul.f32 %v10776_v11, %v12768_v25  ;;  %2730 = vadd.xlane.f32.xlu0 %v2729_v13  ;;  %1257 = vrot.lane.b32.xlu1 %v16871_v18, %s11259_s3  ;;  %v1216_v54 = vpop.permute.xlu2 %1215  ;;  %v2689_v25 = vpop.xlane.xlu1 %2688  ;;  %v2440_v12 = vsub.f32 %v16890_v63, %v12788_v8 }
 0x430   : > { %v3255_v62 = vunpack.c.l.b16 %v1216_v54 }
 0x431   : > { %v2939_v58 = vpack.c.bf16 %v2875_v17, %v2875_v17 }
 0x432   : > { %v3256_v14 = vpack.c.b16 %v3255_v62, %v3254_v51  ;;  %v2049_v51 = vpop.f32.mrf.mxu0  ;;  %v2543_v62 = vmul.f32 1.442695, %v2433_v7 }
 0x433   : > { %v3485_v45 = vunpack.c.l.b16 %v2939_v58 }
 0x434   : > { %3268 = vmatpush.bf16.msra.mxu3 %v3256_v14  ;;  %v12927_v14 = vmul.f32 0.35355338, %v2049_v51 }
 0x435   : > { %v3487_v41 = vpack.c.b16 %v3486_v1, %v3485_v45  ;;  %1253 = vrot.lane.b32.xlu2 %v12227_v9, %s11259_s3  ;;  %v2557_v45 = vmul.f32 1.442695, %v2440_v12 }
 0x436   : > { %v2366_v1 = vsel %vm2194_vm2, %v12927_v14, -inf }
 0x437   : > { %1271 = vrot.lane.b32.xlu1 %v16876_v50, %s11260_s28  ;;  %9998 = vmatmul.msk.bf16.vlgmr.msra.gmra.mxu3 %vm2194_vm2, %v3253_v32  ;;  %v12895_v48 = vpop.xlane.xlu1 %2706  ;;  %v2439_v50 = vsub.f32 %v12576_v2, %v12774_v10 }
 0x438   : > { %10007 = vmatmul.msk.bf16.vlgmr.msra.gmra.mxu0 %vm2194_vm2, %v3487_v41 }
 0x439   : > { %v2555_v24 = vmul.f32 1.442695, %v2439_v50 }
 0x43b   : > { %10777 = vpow2.f32 %v2555_v24 }
 0x43c   : > { %10779 = vpow2.f32 %v2539_v42 }
 0x43d   : > { %1267 = vrot.lane.b32.xlu2 %v12028_v3, %s11260_s28  ;;  %v12909_v3 = vpop.f32.mrf.mxu1  ;;  %10781 = vpow2.f32 %v2543_v62 }
 0x43e   : > { %10783 = vpow2.f32 %v2557_v45 }
 0x43f   : > { %v12899_v34 = vpop.xlane.xlu1 %2724  ;;  %10785 = vrcp.f32 %v2689_v25 }
 0x441   : > { %v12911_v43 = vpop.eup %10777 }
 0x442   : > { %v2735_v2 = vsel %vm2194_vm2, %v12911_v43, 0.0  ;;  %v12915_v13 = vpop.eup %10779 }
 0x443   : > { %1247 = vrot.lane.b32.xlu0 %v16881_v16, %s11259_s3  ;;  %v2711_v54 = vsel %vm2194_vm2, %v12915_v13, 0.0  ;;  %v12933_v41 = vpop.eup %10781 }
 0x444   : > { %v2717_v50 = vsel %vm2194_vm2, %v12933_v41, 0.0  ;;  %v12937_v24 = vpop.eup %10783 }
 0x445   : > { %v2075_v10 = vpop.f32.mrf.mxu1  ;;  %v10786_v36 = vpop.eup %10785  ;;  %v2738_v42 = vsel %vm2194_vm2, %v12937_v24, 0.0 }
 0x446   : > { %v12919_v17 = vmul.f32 0.35355338, %v2075_v10  ;;  %v2871_v8 = vmul.f32 %v10786_v36, %v12737_v20  ;;  %v16891_v20 = vld [vmem:[#allocation24_spill] sm:$0xff] }
 0x447   : > { %v12905_v35 = vpop.permute.xlu1 %1229 }
 0x448   : > { %v2372_v58 = vsel %vm2194_vm2, %v12919_v17, -inf  ;;  %v3358_v12 = vunpack.c.l.b16 %v12905_v35 }
 0x44b   : > { %1259 = vrot.lane.b32.xlu0 %v16872_v39, %s11259_s3 }
 0x44c   : > { %v2671_v52 = vpop.xlane.xlu0 %2670 }
 0x44f   : > { %v1244_v21 = vpop.permute.xlu1 %1243 }
 0x450   : > { %v3437_v59 = vunpack.c.l.b16 %v1244_v21 }
 0x457   : > { %v1266_v35 = vpop.permute.xlu1 %1265 }
 0x45f   : > { %v1242_v15 = vpop.permute.xlu0 %1241 }
 0x460   : > { %v3436_v11 = vunpack.c.l.b16 %v1242_v15  ;;  %v2935_v15 = vpack.c.bf16 %v2871_v8, %v2871_v8 }
 0x461   : > { %2736 = vadd.xlane.f32.xlu1 %v2735_v2 }
 0x462   : > { %v3438_v53 = vpack.c.b16 %v3437_v59, %v3436_v11  ;;  %v3433_v2 = vunpack.c.l.b16 %v2935_v15 }
 0x464   : > { %3450 = vmatpush.bf16.msrb.mxu2 %v3438_v53 }
 0x466   : > { %2712 = vadd.xlane.f32.xlu2 %v2711_v54 }
 0x468   : > { %v12923_v30 = vpop.xlane.xlu2 %2358 }
 0x469   : > { %2373 = vmax.xlane.f32.xlu1 %v2372_v58 }
 0x46e   : > { %2367 = vmax.xlane.f32.xlu2 %v2366_v1  ;;  %v1256_v1 = vpop.permute.xlu0 %1255 }
 0x46f   : > { %v3515_v15 = vunpack.c.l.b16 %v1256_v1 }
 0x470   : > { %v2674_v32 = vpop.xlane.xlu2 %2673 }
 0x475   : > { %2718 = vadd.xlane.f32.xlu0 %v2717_v50 }
 0x478   : > { %v2692_v5 = vpop.xlane.xlu2 %2691 }
 0x479   : > { %10787 = vrcp.f32 %v2692_v5 }
 0x47a   : > { %10789 = vrcp.f32 %v2674_v32 }
 0x47b   : > { %10791 = vrcp.f32 %v2671_v52 }
 0x47d   : > { %2739 = vadd.xlane.f32.xlu0 %v2738_v42 }
 0x47f   : > { %v10788_v21 = vpop.eup %10787 }
 0x480   : > { %v2872_v59 = vmul.f32 %v10788_v21, %v12825_v61  ;;  %v2710_v25 = vpop.xlane.xlu2 %2709  ;;  %v10790_v26 = vpop.eup %10789 }
 0x481   : > { %v10792_v54 = vpop.eup %10791  ;;  %10793 = vrcp.f32 %v2710_v25  ;;  %v2866_v61 = vmul.f32 %v10790_v26, %v12817_v28 }
 0x482   : > { %v2936_v11 = vpack.c.bf16 %v2872_v59, %v2872_v59  ;;  %1273 = vrot.lane.b32.xlu1 %v12178_v38, %s11260_s28  ;;  %10795 = vrcp.f32 %v12895_v48  ;;  %v2865_v51 = vmul.f32 %v10792_v54, %v12786_v6  ;;  %v2698_v54 = vpop.xlane.xlu1 %2697 }
 0x483   : > { %v2930_v38 = vpack.c.bf16 %v2866_v61, %v2866_v61 }
 0x484   : > { %v3434_v10 = vunpack.c.l.b16 %v2936_v11  ;;  %v2929_v62 = vpack.c.bf16 %v2865_v51, %v2865_v51 }
 0x485   : > { %v3356_v45 = vunpack.c.l.b16 %v2930_v38 }
 0x486   : > { %v3435_v53 = vpack.c.b16 %v3434_v10, %v3433_v2  ;;  %1245 = vrot.lane.b32.xlu2 %v16891_v20, %s11259_s3  ;;  %v3355_v32 = vunpack.c.l.b16 %v2929_v62  ;;  %v16892_v62 = vld [vmem:[#allocation38_spill] sm:$0xff] }
 0x487   : > { %v10794_v52 = vpop.eup %10793 }
 0x488   : > { %v2728_v7 = vpop.xlane.xlu2 %2727  ;;  %10005 = vmatmul.msk.bf16.vlgmr.msrb.gmra.mxu2 %vm2194_vm2, %v3435_v53  ;;  %v10796_v63 = vpop.eup %10795  ;;  %v2878_v48 = vmul.f32 %v10794_v52, %v12837_v44  ;;  %v3357_v50 = vpack.c.b16 %v3356_v45, %v3355_v32 }
 0x489   : > { %10797 = vrcp.f32 %v2728_v7 }
 0x48a   : > { %10799 = vrcp.f32 %v12899_v34  ;;  %v2942_v5 = vpack.c.bf16 %v2878_v48, %v2878_v48  ;;  %v12972_v1 = vpop.xlane.xlu1 %2364  ;;  %v12976_v48 = vpop.f32.mrf.mxu2 }
 0x48c   : > { %v3512_v34 = vunpack.c.l.b16 %v2942_v5 }
 0x48e   : > { %1269 = vrot.lane.b32.xlu2 %v16874_v4, %s11260_s28  ;;  %v2877_v4 = vmul.f32 %v10796_v63, %v12751_v40  ;;  %v2441_v40 = vsub.f32 %v12805_v23, %v12923_v30 }
 0x48f   : > { %v10798_v36 = vpop.eup %10797 }
 0x490   : > { %v1232_v58 = vpop.permute.xlu2 %1231  ;;  %v2941_v8 = vpack.c.bf16 %v2877_v4, %v2877_v4  ;;  %v10800_v21 = vpop.eup %10799  ;;  %v2884_v25 = vmul.f32 %v10798_v36, %v12850_v0  ;;  %v2559_v53 = vmul.f32 1.442695, %v2441_v40 }
 0x491   : > { %1261 = vrot.lane.b32.xlu0 %v16880_v27, %s11259_s3  ;;  %v3359_v28 = vunpack.c.l.b16 %v1232_v58  ;;  %v2883_v10 = vmul.f32 %v10800_v21, %v12764_v31  ;;  %v2434_v58 = vsub.f32 %v16892_v62, %v12762_v29 }
 0x492   : > { %v2695_v59 = vpop.xlane.xlu0 %2694  ;;  %v3511_v2 = vunpack.c.l.b16 %v2941_v8  ;;  %v2948_v7 = vpack.c.bf16 %v2884_v25, %v2884_v25  ;;  %10801 = vpow2.f32 %v2559_v53  ;;  %v2734_v29 = vpop.xlane.xlu1 %2733 }
 0x493   : > { %v3360_v6 = vpack.c.b16 %v3359_v28, %v3358_v12  ;;  %v2947_v61 = vpack.c.bf16 %v2883_v10, %v2883_v10  ;;  %v2545_v12 = vmul.f32 1.442695, %v2434_v58  ;;  %v2101_v5 = vpop.f32.mrf.mxu2 }
 0x494   : > { %v3513_v26 = vpack.c.b16 %v3512_v34, %v3511_v2  ;;  %v3590_v23 = vunpack.c.l.b16 %v2948_v7  ;;  %v12985_v8 = vmul.f32 0.35355338, %v2101_v5 }
 0x495   : > { %3372 = vmatpush.bf16.msrb.mxu3 %v3360_v6  ;;  %v3589_v0 = vunpack.c.l.b16 %v2947_v61  ;;  %10803 = vpow2.f32 %v2545_v12 }
 0x496   : > { %v2378_v40 = vsel %vm2194_vm2, %v12985_v8, -inf }
 0x497   : > { %v3591_v31 = vpack.c.b16 %v3590_v23, %v3589_v0 }
 0x498   : > { %v1254_v42 = vpop.permute.xlu2 %1253  ;;  %10002 = vmatmul.msk.bf16.vlgmr.msrb.gmra.mxu3 %vm2194_vm2, %v3357_v50  ;;  %v12969_v63 = vpop.eup %10801  ;;  %v12983_v50 = vmul.f32 0.35355338, %v12909_v3 }
 0x499   : > { %1275 = vrot.lane.b32.xlu0 %v12180_v57, %s11260_s28  ;;  %v3514_v44 = vunpack.c.l.b16 %v1254_v42  ;;  %v3592_v57 = vunpack.c.l.b16 %v1266_v35  ;;  %v2741_v28 = vsel %vm2194_vm2, %v12969_v63, 0.0 }
 0x49a   : > { %v2716_v30 = vpop.xlane.xlu0 %2715 }
 0x49b   : > { %v3516_v11 = vpack.c.b16 %v3515_v15, %v3514_v44  ;;  %v12978_v6 = vpop.eup %10803  ;;  %v2369_v15 = vsel %vm2194_vm2, %v12983_v50, -inf  ;;  %10805 = vrcp.f32 %v2716_v30 }
 0x49c   : > { %v2720_v32 = vsel %vm2194_vm2, %v12978_v6, 0.0  ;;  %10807 = vrcp.f32 %v2695_v59 }
 0x49d   : > { %3528 = vmatpush.bf16.msra.mxu1 %v3516_v11 }
 0x4a0   : > { %v1268_v51 = vpop.permute.xlu2 %1267  ;;  %10008 = vmatmul.msk.bf16.vlgmr.msra.gmra.mxu1 %vm2194_vm2, %v3513_v26 }
 0x4a1   : > { %v3593_v38 = vunpack.c.l.b16 %v1268_v51  ;;  %v1258_v36 = vpop.permute.xlu1 %1257  ;;  %v10806_v34 = vpop.eup %10805 }
 0x4a2   : > { %v2731_v45 = vpop.xlane.xlu0 %2730  ;;  %v3540_v42 = vunpack.c.l.b16 %v1258_v36  ;;  %v2880_v25 = vmul.f32 %v10806_v34, %v12869_v60  ;;  %v10808_v11 = vpop.eup %10807 }
 0x4a3   : > { %v3594_v52 = vpack.c.b16 %v3593_v38, %v3592_v57 }
 0x4a5   : > { %3606 = vmatpush.bf16.msrb.mxu0 %v3594_v52 }
 0x4a8   : > { %10011 = vmatmul.msk.bf16.vlgmr.msrb.gmra.mxu0 %vm2194_vm2, %v3591_v31 }
 0x4a9   : > { %v1272_v12 = vpop.permute.xlu1 %1271 }
 0x4ac   : > { %2742 = vadd.xlane.f32.xlu1 %v2741_v28 }
 0x4b5   : > { %v1248_v4 = vpop.permute.xlu0 %1247 }
 0x4b7   : > { %2721 = vadd.xlane.f32.xlu2 %v2720_v32 }
 0x4bd   : > { %v1260_v35 = vpop.permute.xlu0 %1259 }
 0x4be   : > { %v3541_v21 = vunpack.c.l.b16 %v1260_v35 }
 0x4bf   : > { %2370 = vmax.xlane.f32.xlu2 %v2369_v15 }
 0x4c0   : > { %v3542_v44 = vpack.c.b16 %v3541_v21, %v3540_v42  ;;  %v16893_v42 = vld [vmem:[#allocation19_spill] sm:$0xff] }
 0x4c2   : > { %3554 = vmatpush.bf16.msra.mxu2 %v3542_v44 }
 0x4c3   : > { %2379 = vmax.xlane.f32.xlu0 %v2378_v40 }
 0x4c5   : > { %1279 = vrot.lane.b32.xlu1 %v16881_v16, %s11260_s28  ;;  %v2944_v16 = vpack.c.bf16 %v2880_v25, %v2880_v25 }
 0x4c7   : > { %v3538_v7 = vunpack.c.l.b16 %v2944_v16 }
 0x4cd   : > { %1283 = vrot.lane.b32.xlu1 %v16879_v49, %s11260_s28 }
 0x4d4   : > { %v2737_v44 = vpop.xlane.xlu1 %2736 }
 0x4d7   : > { %1277 = vrot.lane.b32.xlu0 %v16891_v20, %s11260_s28  ;;  %1263 = vrot.lane.b32.xlu2 %v16887_v19, %s11259_s3  ;;  %v2873_v20 = vmul.f32 %v10808_v11, %v12861_v33 }
 0x4d9   : > { %v2713_v3 = vpop.xlane.xlu2 %2712  ;;  %v2937_v51 = vpack.c.bf16 %v2873_v20, %v2873_v20 }
 0x4da   : > { %10809 = vrcp.f32 %v2713_v3  ;;  %v13014_v3 = vmul.f32 0.35355338, %v12976_v48 }
 0x4db   : > { %10811 = vrcp.f32 %v2698_v54  ;;  %v3459_v52 = vunpack.c.l.b16 %v2937_v51 }
 0x4dc   : > { %10813 = vrcp.f32 %v2731_v45  ;;  %v13022_v11 = vpop.xlane.xlu1 %2373 }
 0x4dd   : > { %10815 = vrcp.f32 %v2734_v29 }
 0x4e0   : > { %v10810_v2 = vpop.eup %10809 }
 0x4e1   : > { %v2879_v10 = vmul.f32 %v10810_v2, %v12915_v13  ;;  %v2368_v49 = vpop.xlane.xlu2 %2367  ;;  %v10812_v53 = vpop.eup %10811  ;;  %v3463_v13 = vunpack.c.l.b16 %v1248_v4  ;;  %v3619_v4 = vunpack.c.l.b16 %v1272_v12 }
 0x4e2   : > { %v2874_v59 = vmul.f32 %v10812_v53, %v12827_v55  ;;  %v10814_v57 = vpop.eup %10813  ;;  %v2444_v28 = vsub.f32 %v12927_v14, %v2368_v49  ;;  %v2125_v53 = vpop.f32.mrf.mxu3 }
 0x4e3   : > { %v2943_v26 = vpack.c.bf16 %v2879_v10, %v2879_v10  ;;  %v10816_v23 = vpop.eup %10815  ;;  %v2885_v0 = vmul.f32 %v10814_v57, %v12874_v56 }
 0x4e4   : > { %v2938_v60 = vpack.c.bf16 %v2874_v59, %v2874_v59  ;;  %v2886_v58 = vmul.f32 %v10816_v23, %v12852_v37  ;;  %v2565_v56 = vmul.f32 1.442695, %v2444_v28  ;;  %v2442_v37 = vsub.f32 %v16893_v42, %v12878_v47  ;;  %v16894_v42 = vld [vmem:[#allocation22_spill] sm:$0xff] }
 0x4e5   : > { %v3537_v61 = vunpack.c.l.b16 %v2943_v26  ;;  %v2949_v31 = vpack.c.bf16 %v2885_v0, %v2885_v0  ;;  %v2375_v47 = vsel %vm2194_vm2, %v13014_v3, -inf  ;;  %v2443_v23 = vsub.f32 %v12839_v22, %v12972_v1 }
 0x4e6   : > { %v3460_v62 = vunpack.c.l.b16 %v2938_v60  ;;  %v2950_v29 = vpack.c.bf16 %v2886_v58, %v2886_v58  ;;  %10817 = vpow2.f32 %v2565_v56  ;;  %v2561_v14 = vmul.f32 1.442695, %v2442_v37  ;;  %v13047_v58 = vpop.f32.mrf.mxu0 }
 0x4e7   : > { %v3539_v54 = vpack.c.b16 %v3538_v7, %v3537_v61  ;;  %v3615_v36 = vunpack.c.l.b16 %v2949_v31  ;;  %v13030_v61 = vmul.f32 0.35355338, %v2125_v53  ;;  %v2563_v0 = vmul.f32 1.442695, %v2443_v23  ;;  %v13050_v31 = vpop.f32.mrf.mxu1  ;;  %v13072_v53 = vpop.f32.mrf.mxu2 }
 0x4e8   : > { %v3461_v55 = vpack.c.b16 %v3460_v62, %v3459_v52  ;;  %v13007_v45 = vpop.xlane.xlu0 %2718  ;;  %v3616_v21 = vunpack.c.l.b16 %v2950_v29 }
 0x4e9   : > { %v1246_v38 = vpop.permute.xlu2 %1245  ;;  %10009 = vmatmul.msk.bf16.vlgmr.msra.gmra.mxu2 %vm2194_vm2, %v3539_v54 }
 0x4ea   : > { %v3462_v30 = vunpack.c.l.b16 %v1246_v38  ;;  %v3617_v15 = vpack.c.b16 %v3616_v21, %v3615_v36 }
 0x4ec   : > { %v3464_v33 = vpack.c.b16 %v3463_v13, %v3462_v30  ;;  %v13016_v34 = vpop.eup %10817  ;;  %v2127_v30 = vpop.f32.mrf.mxu3 }
 0x4ed   : > { %v2750_v25 = vsel %vm2194_vm2, %v13016_v34, 0.0 }
 0x4ee   : > { %3476 = vmatpush.bf16.msra.mxu3 %v3464_v33  ;;  %v13036_v33 = vmul.f32 0.35355338, %v2127_v30 }
 0x4ef   : > { %v13057_v56 = vpop.f32.mrf.mxu1 }
 0x4f0   : > { %v2740_v40 = vpop.xlane.xlu0 %2739  ;;  %v2384_v22 = vsel %vm2194_vm2, %v13036_v33, -inf }
 0x4f1   : > { %v1270_v32 = vpop.permute.xlu2 %1269  ;;  %10006 = vmatmul.msk.bf16.vlgmr.msra.gmra.mxu3 %vm2194_vm2, %v3461_v55  ;;  %10819 = vrcp.f32 %v2740_v40 }
 0x4f2   : > { %v3618_v5 = vunpack.c.l.b16 %v1270_v32  ;;  %10821 = vpow2.f32 %v2561_v14 }
 0x4f3   : > { %10823 = vrcp.f32 %v2737_v44 }
 0x4f4   : > { %v3620_v35 = vpack.c.b16 %v3619_v4, %v3618_v5  ;;  %v1274_v7 = vpop.permute.xlu1 %1273  ;;  %10825 = vpow2.f32 %v2563_v0 }
 0x4f5   : > { %v3644_v57 = vunpack.c.l.b16 %v1274_v7 }
 0x4f6   : > { %3632 = vmatpush.bf16.msrb.mxu1 %v3620_v35 }
 0x4f7   : > { %v10820_v2 = vpop.eup %10819 }
 0x4f8   : > { %v13024_v16 = vpop.eup %10821  ;;  %v2888_v49 = vmul.f32 %v10820_v2, %v12937_v24 }
 0x4f9   : > { %10012 = vmatmul.msk.bf16.vlgmr.msrb.gmra.mxu1 %vm2194_vm2, %v3617_v15  ;;  %v10824_v10 = vpop.eup %10823  ;;  %v2744_v26 = vsel %vm2194_vm2, %v13024_v16, 0.0 }
 0x4fa   : > { %v2887_v20 = vmul.f32 %v10824_v10, %v12911_v43  ;;  %v2952_v59 = vpack.c.bf16 %v2888_v49, %v2888_v49  ;;  %v2381_v43 = vsel %vm2194_vm2, %v13030_v61, -inf  ;;  %v13043_v1 = vpop.eup %10825 }
 0x4fb   : > { %v2747_v62 = vsel %vm2194_vm2, %v13043_v1, 0.0 }
 0x4fc   : > { %v2951_v51 = vpack.c.bf16 %v2887_v20, %v2887_v20  ;;  %v3642_v38 = vunpack.c.l.b16 %v2952_v59 }
 0x4fe   : > { %v3641_v13 = vunpack.c.l.b16 %v2951_v51 }
 0x500   : > { %2376 = vmax.xlane.f32.xlu2 %v2375_v47  ;;  %v3643_v52 = vpack.c.b16 %v3642_v38, %v3641_v13  ;;  %v13082_v38 = vpop.f32.mrf.mxu2 }
 0x501   : > { %2751 = vadd.xlane.f32.xlu0 %v2750_v25  ;;  %v13067_v25 = vpop.f32.mrf.mxu1 }
 0x503   : > { %v1262_v48 = vpop.permute.xlu0 %1261 }
 0x504   : > { %v3566_v15 = vunpack.c.l.b16 %v1262_v48 }
 0x508   : > { %2745 = vadd.xlane.f32.xlu2 %v2744_v26 }
 0x509   : > { %v13074_v26 = vpop.f32.mrf.mxu1 }
 0x50b   : > { %v1276_v54 = vpop.permute.xlu0 %1275 }
 0x50c   : > { %v3645_v60 = vunpack.c.l.b16 %v1276_v54 }
 0x50e   : > { %v3646_v24 = vpack.c.b16 %v3645_v60, %v3644_v57  ;;  %v2446_v57 = vsub.f32 %v12919_v17, %v13022_v11 }
 0x510   : > { %3658 = vmatpush.bf16.msrb.mxu2 %v3646_v24  ;;  %2382 = vmax.xlane.f32.xlu2 %v2381_v43  ;;  %v2569_v23 = vmul.f32 1.442695, %v2446_v57  ;;  %v13089_v43 = vpop.f32.mrf.mxu2 }
 0x511   : > { %v13080_v60 = vpop.f32.mrf.mxu1 }
 0x513   : > { %10013 = vmatmul.msk.bf16.vlgmr.msrb.gmra.mxu2 %vm2194_vm2, %v3643_v52 }
 0x515   : > { %1285 = vrot.lane.b32.xlu0 %v12227_v9, %s11260_s28  ;;  %v13052_v9 = vpop.f32.mrf.mxu0 }
 0x518   : > { %2385 = vmax.xlane.f32.xlu2 %v2384_v22  ;;  %v13105_v22 = vpop.f32.mrf.mxu2 }
 0x519   : > { %v13091_v52 = vpop.f32.mrf.mxu1 }
 0x51d   : > { %v13059_v35 = vpop.f32.mrf.mxu0 }
 0x51f   : > { %v2743_v47 = vpop.xlane.xlu1 %2742 }
 0x520   : > { %2748 = vadd.xlane.f32.xlu2 %v2747_v62 }
 0x525   : > { %v13069_v49 = vpop.f32.mrf.mxu0 }
 0x52a   : > { %v2722_v55 = vpop.xlane.xlu2 %2721 }
 0x52b   : > { %10827 = vrcp.f32 %v2722_v55 }
 0x52c   : > { %10829 = vrcp.f32 %v13007_v45 }
 0x52d   : > { %v13076_v59 = vpop.f32.mrf.mxu0 }
 0x531   : > { %v10828_v12 = vpop.eup %10827 }
 0x532   : > { %v2371_v28 = vpop.xlane.xlu2 %2370  ;;  %v10830_v29 = vpop.eup %10829  ;;  %v2882_v4 = vmul.f32 %v10828_v12, %v12978_v6 }
 0x533   : > { %v2445_v32 = vsub.f32 %v12983_v50, %v2371_v28  ;;  %v2881_v36 = vmul.f32 %v10830_v29, %v12933_v41  ;;  %v13111_v12 = vpop.f32.mrf.mxu2 }
 0x534   : > { %v2946_v45 = vpack.c.bf16 %v2882_v4, %v2882_v4  ;;  %v13118_v4 = vpop.f32.mrf.mxu3 }
 0x535   : > { %v2567_v5 = vmul.f32 1.442695, %v2445_v32  ;;  %v2945_v37 = vpack.c.bf16 %v2881_v36, %v2881_v36  ;;  %v13084_v24 = vpop.f32.mrf.mxu0 }
 0x536   : > { %v3564_v14 = vunpack.c.l.b16 %v2946_v45  ;;  %v2380_v10 = vpop.xlane.xlu0 %2379 }
 0x537   : > { %10831 = vpow2.f32 %v2567_v5  ;;  %v3563_v40 = vunpack.c.l.b16 %v2945_v37  ;;  %v1280_v48 = vpop.permute.xlu1 %1279  ;;  %v2448_v13 = vsub.f32 %v12985_v8, %v2380_v10  ;;  %v13101_v8 = vpop.f32.mrf.mxu1 }
 0x538   : > { %1281 = vrot.lane.b32.xlu2 %v16894_v42, %s11260_s28  ;;  %v3671_v7 = vunpack.c.l.b16 %v1280_v48  ;;  %10833 = vpow2.f32 %v2569_v23 }
 0x539   : > { %v3565_v2 = vpack.c.b16 %v3564_v14, %v3563_v40  ;;  %v2573_v30 = vmul.f32 1.442695, %v2448_v13 }
 0x53a   : > { %v1264_v21 = vpop.permute.xlu2 %1263 }
 0x53b   : > { %v3567_v44 = vunpack.c.l.b16 %v1264_v21  ;;  %10835 = vpow2.f32 %v2573_v30  ;;  %v13122_v45 = vpop.f32.mrf.mxu2 }
 0x53c   : > { %10837 = vrcp.f32 %v2743_v47 }
 0x53d   : > { %v13063_v50 = vpop.eup %10831  ;;  %v3568_v6 = vpack.c.b16 %v3567_v44, %v3566_v15  ;;  %v13093_v0 = vpop.f32.mrf.mxu0 }
 0x53e   : > { %v2753_v41 = vsel %vm2194_vm2, %v13063_v50, 0.0  ;;  %v13095_v17 = vpop.eup %10833  ;;  %v13126_v44 = vpop.f32.mrf.mxu3 }
 0x53f   : > { %2754 = vadd.xlane.f32.xlu1 %v2753_v41  ;;  %3580 = vmatpush.bf16.msrb.mxu3 %v3568_v6  ;;  %v2756_v11 = vsel %vm2194_vm2, %v13095_v17, 0.0  ;;  %v13113_v28 = vpop.f32.mrf.mxu1 }
 0x542   : > { %10010 = vmatmul.msk.bf16.vlgmr.msrb.gmra.mxu3 %vm2194_vm2, %v3565_v2 }
 0x543   : > { %v13128_v14 = vpop.f32.mrf.mxu2 }
 0x545   : > { %v13107_v62 = vpop.f32.mrf.mxu0 }
 0x547   : > { %v13120_v5 = vpop.f32.mrf.mxu1 }
 0x549   : > { %v1278_v20 = vpop.permute.xlu0 %1277 }
 0x54a   : > { %v3670_v51 = vunpack.c.l.b16 %v1278_v20 }
 0x54b   : > { %v13145_v13 = vpop.f32.mrf.mxu2 }
 0x54c   : > { %v3672_v54 = vpack.c.b16 %v3671_v7, %v3670_v51  ;;  %v13141_v51 = vpop.f32.mrf.mxu3 }
 0x54e   : > { %3684 = vmatpush.bf16.msra.mxu3 %v3672_v54 }
 0x54f   : > { %v13133_v40 = vpop.f32.mrf.mxu1 }
 0x557   : > { %v13143_v23 = vpop.f32.mrf.mxu1 }
 0x558   : > { %1287 = vrot.lane.b32.xlu1 %v12234_v46, %s11260_s28  ;;  %v13103_v46 = vpop.eup %10835 }
 0x559   : > { %v2762_v55 = vsel %vm2194_vm2, %v13103_v46, 0.0  ;;  %v10838_v21 = vpop.eup %10837 }
 0x560   : > { %1291 = vrot.lane.b32.xlu1 %v16872_v39, %s11260_s28  ;;  %v13115_v39 = vpop.f32.mrf.mxu0 }
 0x561   : > { %2757 = vadd.xlane.f32.xlu2 %v2756_v11 }
 0x568   : > { %v3402_v42 = vpop.f32.mrf.mxu0 }
 0x569   : > { %2763 = vadd.xlane.f32.xlu2 %v2762_v55 }
 0x570   : > { %v13135_v41 = vpop.f32.mrf.mxu0 }
 0x573   : > { %v2377_v29 = vpop.xlane.xlu2 %2376 }
 0x574   : > { %v2447_v32 = vsub.f32 %v13014_v3, %v2377_v29  ;;  %v2889_v3 = vmul.f32 %v10838_v21, %v12969_v63  ;;  %v13162_v21 = vpop.f32.mrf.mxu1 }
 0x576   : > { %v2571_v36 = vmul.f32 1.442695, %v2447_v32  ;;  %v2953_v2 = vpack.c.bf16 %v2889_v3, %v2889_v3  ;;  %v10346_v32 = vpack.i.bf16 %v13084_v24, %v13076_v59  ;;  %v10351_v59 = vpack.i.bf16 %v3402_v42, %v13115_v39 }
 0x578   : > { %10839 = vpow2.f32 %v2571_v36  ;;  %v3667_v54 = vunpack.c.l.b16 %v2953_v2 }
 0x57b   : > { %v2746_v37 = vpop.xlane.xlu2 %2745 }
 0x57c   : > { %10841 = vrcp.f32 %v2746_v37  ;;  %v3452_v37 = vpop.f32.mrf.mxu2 }
 0x57e   : > { %v13124_v15 = vpop.eup %10839 }
 0x57f   : > { %v2759_v6 = vsel %vm2194_vm2, %v13124_v15, 0.0 }
 0x580   : > { %2760 = vadd.xlane.f32.xlu0 %v2759_v6 }
 0x581   : > { %1289 = vrot.lane.b32.xlu2 %v16871_v18, %s11260_s28  ;;  %v13149_v18 = vpop.f32.mrf.mxu0 }
 0x582   : > { %v10842_v47 = vpop.eup %10841 }
 0x583   : > { %v2890_v10 = vmul.f32 %v10842_v47, %v13024_v16  ;;  %v2383_v48 = vpop.xlane.xlu2 %2382  ;;  %v2752_v16 = vpop.xlane.xlu0 %2751 }
 0x584   : > { %v2449_v20 = vsub.f32 %v13030_v61, %v2383_v48  ;;  %v1284_v48 = vpop.permute.xlu1 %1283 }
 0x585   : > { %v2954_v7 = vpack.c.bf16 %v2890_v10, %v2890_v10  ;;  %v3697_v39 = vunpack.c.l.b16 %v1284_v48 }
 0x586   : > { %v2575_v63 = vmul.f32 1.442695, %v2449_v20 }
 0x587   : > { %v3668_v57 = vunpack.c.l.b16 %v2954_v7  ;;  %v3634_v7 = vpop.f32.mrf.mxu1 }
 0x588   : > { %10843 = vpow2.f32 %v2575_v63  ;;  %v3454_v63 = vpop.f32.mrf.mxu2 }
 0x589   : > { %v3669_v30 = vpack.c.b16 %v3668_v57, %v3667_v54  ;;  %1293 = vrot.lane.b32.xlu2 %v16880_v27, %s11260_s28  ;;  %10845 = vrcp.f32 %v2752_v16  ;;  %v13159_v27 = vpop.f32.mrf.mxu3  ;;  %v10381_v48 = vpack.i.bf16 %v3454_v63, %v3452_v37  ;;  %v10406_v37 = vpack.i.bf16 %v13107_v62, %v13093_v0 }
 0x58a   : > { %v10436_v62 = vpack.i.bf16 %v13145_v13, %v13128_v14  ;;  %v10426_v14 = vpack.i.bf16 %v13162_v21, %v13143_v23 }
 0x58b   : > { %10014 = vmatmul.msk.bf16.vlgmr.msra.gmra.mxu3 %vm2194_vm2, %v3669_v30  ;;  %v2386_v61 = vpop.xlane.xlu2 %2385 }
 0x58c   : > { %v2450_v11 = vsub.f32 %v13036_v33, %v2386_v61  ;;  %v3608_v33 = vpop.f32.mrf.mxu0 }
 0x58e   : > { %v13153_v55 = vpop.eup %10843  ;;  %v2577_v29 = vmul.f32 1.442695, %v2450_v11 }
 0x58f   : > { %v2765_v36 = vsel %vm2194_vm2, %v13153_v55, 0.0  ;;  %v10846_v6 = vpop.eup %10845 }
 0x590   : > { %10847 = vpow2.f32 %v2577_v29  ;;  %2766 = vadd.xlane.f32.xlu1 %v2765_v36  ;;  %v2892_v24 = vmul.f32 %v10846_v6, %v13016_v34  ;;  %v13173_v6 = vpop.f32.mrf.mxu2 }
 0x591   : > { %10347 = vrot.lane.b32.xlu2 %v10346_v32, %s16766_s30  ;;  %v3270_v10 = vpop.f32.mrf.mxu3 }
 0x592   : > { %v2956_v54 = vpack.c.bf16 %v2892_v24, %v2892_v24 }
 0x593   : > { %v2749_v3 = vpop.xlane.xlu2 %2748 }
 0x594   : > { %10849 = vrcp.f32 %v2749_v3  ;;  %v3610_v16 = vpop.f32.mrf.mxu0  ;;  %v3694_v29 = vunpack.c.l.b16 %v2956_v54 }
 0x595   : > { %v10356_v11 = vpack.i.bf16 %v3610_v16, %v3608_v33 }
 0x596   : > { %v13164_v47 = vpop.eup %10847 }
 0x597   : > { %v2768_v2 = vsel %vm2194_vm2, %v13164_v47, 0.0 }
 0x598   : > { %2769 = vadd.xlane.f32.xlu0 %v2768_v2  ;;  %v3558_v2 = vpop.f32.mrf.mxu2 }
 0x599   : > { %10352 = vrot.lane.b32.xlu2 %v10351_v59, %s11262_s21  ;;  %v3272_v3 = vpop.f32.mrf.mxu3  ;;  %v10366_v59 = vpack.i.bf16 %v13133_v40, %v13120_v5 }
 0x59a   : > { %v10850_v20 = vpop.eup %10849  ;;  %v10391_v40 = vpack.i.bf16 %v3272_v3, %v3270_v10  ;;  %v10421_v10 = vpack.i.bf16 %v13113_v28, %v13101_v8  ;;  %v10411_v8 = vpack.i.bf16 %v13149_v18, %v13135_v41 }
 0x59b   : > { %v2891_v57 = vmul.f32 %v10850_v20, %v13043_v1  ;;  %v1282_v30 = vpop.permute.xlu2 %1281  ;;  %v3636_v1 = vpop.f32.mrf.mxu1  ;;  %v10361_v20 = vpack.i.bf16 %v13091_v52, %v13080_v60 }
 0x59c   : > { %v3696_v42 = vunpack.c.l.b16 %v1282_v30  ;;  %v10371_v24 = vpack.i.bf16 %v3636_v1, %v3634_v7  ;;  %v10376_v7 = vpack.i.bf16 %v13122_v45, %v13111_v12  ;;  %v1286_v30 = vpop.permute.xlu0 %1285  ;;  %v10441_v1 = vpack.i.bf16 %v3558_v2, %v13173_v6  ;;  %v10307_v6 = vld [vmem:[%s16698_s8] sm:$0xff] }
 0x59d   : > { %v2955_v34 = vpack.c.bf16 %v2891_v57, %v2891_v57  ;;  %v3722_v16 = vunpack.c.l.b16 %v1286_v30 }
 0x59e   : > { %v3698_v61 = vpack.c.b16 %v3697_v39, %v3696_v42 }
 0x59f   : > { %v3693_v32 = vunpack.c.l.b16 %v2955_v34 }
 0x5a0   : > { %3710 = vmatpush.bf16.msra.mxu0 %v3698_v61  ;;  %v3660_v5 = vpop.f32.mrf.mxu2 }
 0x5a1   : > { %v3695_v36 = vpack.c.b16 %v3694_v29, %v3693_v32  ;;  %10357 = vrot.lane.b32.xlu2 %v10356_v11, %s11263_s24  ;;  %v3374_v33 = vpop.f32.mrf.mxu3 }
 0x5a3   : > { %10015 = vmatmul.msk.bf16.vlgmr.msra.gmra.mxu0 %vm2194_vm2, %v3695_v36 }
 0x5a8   : > { %v3662_v63 = vpop.f32.mrf.mxu2 }
 0x5a9   : > { %10367 = vrot.lane.b32.xlu1 %v10366_v59, %s11262_s21  ;;  %10372 = vrot.lane.b32.xlu2 %v10371_v24, %s11263_s24  ;;  %v3376_v54 = vpop.f32.mrf.mxu3  ;;  %v10386_v60 = vpack.i.bf16 %v3662_v63, %v3660_v5  ;;  %v10308_v24 = vld [vmem:[%s16698_s8 + $0x8] sm:$0xff] }
 0x5aa   : > { %v10451_v34 = vpack.i.bf16 %v3376_v54, %v3374_v33  ;;  %4094 = vmatpush.bf16.msrb.mxu0 %v10308_v24 }
 0x5ac   : > { %1295 = vrot.lane.b32.xlu0 %v16887_v19, %s11260_s28 }
 0x5ae   : > { %4095 = vmatpush.bf16.msrb.mxu0 %v10307_v6 }
 0x5b1   : > { %10382 = vrot.lane.b32.xlu2 %v10381_v48, %s11262_s21  ;;  %v3478_v19 = vpop.f32.mrf.mxu3 }
 0x5b2   : > { %v2755_v52 = vpop.xlane.xlu1 %2754 }
 0x5b3   : > { %10851 = vrcp.f32 %v2755_v52 }
 0x5b4   : > { %10362 = vrot.lane.b32.xlu0 %v10361_v20, %s16766_s30 }
 0x5b9   : > { %10392 = vrot.lane.b32.xlu2 %v10391_v40, %s16766_s30  ;;  %v3480_v57 = vpop.f32.mrf.mxu3  ;;  %v10852_v42 = vpop.eup %10851 }
 0x5ba   : > { %v10396_v12 = vpack.i.bf16 %v3480_v57, %v3478_v19  ;;  %v2893_v61 = vmul.f32 %v10852_v42, %v13063_v50 }
 0x5bc   : > { %10377 = vrot.lane.b32.xlu0 %v10376_v7, %s16766_s30  ;;  %v2957_v11 = vpack.c.bf16 %v2893_v61, %v2893_v61 }
 0x5be   : > { %v3719_v36 = vunpack.c.l.b16 %v2957_v11 }
 0x5c1   : > { %10407 = vrot.lane.b32.xlu2 %v10406_v37, %s16766_s30 }
 0x5c4   : > { %10387 = vrot.lane.b32.xlu0 %v10386_v60, %s11263_s24 }
 0x5c5   : > { %v3582_v18 = vpop.f32.mrf.mxu3 }
 0x5c9   : > { %10422 = vrot.lane.b32.xlu2 %v10421_v10, %s16766_s30 }
 0x5ca   : > { %v1288_v45 = vpop.permute.xlu1 %1287 }
 0x5cb   : > { %v3723_v39 = vunpack.c.l.b16 %v1288_v45 }
 0x5cc   : > { %10397 = vrot.lane.b32.xlu0 %v10396_v12, %s11262_s21 }
 0x5cd   : > { %v3724_v0 = vpack.c.b16 %v3723_v39, %v3722_v16  ;;  %v3584_v33 = vpop.f32.mrf.mxu3 }
 0x5ce   : > { %v10456_v2 = vpack.i.bf16 %v3584_v33, %v3582_v18 }
 0x5cf   : > { %3736 = vmatpush.bf16.msra.mxu1 %v3724_v0 }
 0x5d1   : > { %10437 = vrot.lane.b32.xlu2 %v10436_v62, %s16766_s30 }
 0x5d2   : > { %v1292_v59 = vpop.permute.xlu1 %1291 }
 0x5d3   : > { %v3749_v23 = vunpack.c.l.b16 %v1292_v59 }
 0x5d4   : > { %10412 = vrot.lane.b32.xlu0 %v10411_v8, %s11262_s21  ;;  %v2758_v28 = vpop.xlane.xlu2 %2757 }
 0x5d5   : > { %10853 = vrcp.f32 %v2758_v28 }
 0x5d9   : > { %10452 = vrot.lane.b32.xlu2 %v10451_v34, %s16766_s30 }
 0x5db   : > { %v10854_v13 = vpop.eup %10853 }
 0x5dc   : > { %v2894_v29 = vmul.f32 %v10854_v13, %v13095_v17  ;;  %10427 = vrot.lane.b32.xlu0 %v10426_v14, %s11262_s21  ;;  %v2764_v41 = vpop.xlane.xlu2 %2763 }
 0x5dd   : > { %10855 = vrcp.f32 %v2764_v41 }
 0x5de   : > { %v2958_v32 = vpack.c.bf16 %v2894_v29, %v2894_v29 }
 0x5e0   : > { %v3720_v3 = vunpack.c.l.b16 %v2958_v32 }
 0x5e2   : > { %v3721_v50 = vpack.c.b16 %v3720_v3, %v3719_v36 }
 0x5e3   : > { %v10856_v5 = vpop.eup %10855 }
 0x5e4   : > { %10442 = vrot.lane.b32.xlu0 %v10441_v1, %s11262_s21  ;;  %10016 = vmatmul.msk.bf16.vlgmr.msra.gmra.mxu1 %vm2194_vm2, %v3721_v50  ;;  %v1290_v17 = vpop.permute.xlu2 %1289  ;;  %v2896_v7 = vmul.f32 %v10856_v5, %v13103_v46 }
 0x5e5   : > { %v3748_v21 = vunpack.c.l.b16 %v1290_v17 }
 0x5e6   : > { %v2960_v37 = vpack.c.bf16 %v2896_v7, %v2896_v7 }
 0x5e7   : > { %v3750_v48 = vpack.c.b16 %v3749_v23, %v3748_v21 }
 0x5e8   : > { %v3746_v10 = vunpack.c.l.b16 %v2960_v37 }
 0x5e9   : > { %3762 = vmatpush.bf16.msra.mxu2 %v3750_v48 }
 0x5ec   : > { %10457 = vrot.lane.b32.xlu0 %v10456_v2, %s11262_s21  ;;  %v1294_v20 = vpop.permute.xlu2 %1293 }
 0x5ed   : > { %v3774_v50 = vunpack.c.l.b16 %v1294_v20 }
 0x5f3   : > { %v2761_v54 = vpop.xlane.xlu0 %2760 }
 0x5f4   : > { %10857 = vrcp.f32 %v2761_v54  ;;  %v10348_v40 = vpop.permute.xlu2 %10347 }
 0x5f5   : > { %v10350_v12 = vunpack.i.h.bf16 %v10348_v40  ;;  %v10349_v45 = vunpack.i.l.bf16 %v10348_v40 }
 0x5f7   : > { %v3988_v46 = vsel %vm1303_vm1, %v13052_v9, %v10350_v12  ;;  %v3987_v62 = vsel %vm1303_vm1, %v13047_v58, %v10349_v45 }
 0x5fa   : > { %v10858_v19 = vpop.eup %10857 }
 0x5fb   : > { %v2895_v63 = vmul.f32 %v10858_v19, %v13124_v15 }
 0x5fc   : > { %v10353_v60 = vpop.permute.xlu2 %10352 }
 0x5fd   : > { %v2959_v52 = vpack.c.bf16 %v2895_v63, %v2895_v63  ;;  %v10355_v16 = vunpack.i.h.bf16 %v10353_v60  ;;  %v10354_v39 = vunpack.i.l.bf16 %v10353_v60 }
 0x5ff   : > { %v3745_v57 = vunpack.c.l.b16 %v2959_v52  ;;  %v4003_v28 = vsel %vm2194_vm2, %v3987_v62, %v10354_v39  ;;  %v4004_v42 = vsel %vm2194_vm2, %v3988_v46, %v10355_v16 }
 0x601   : > { %v3747_v30 = vpack.c.b16 %v3746_v10, %v3745_v57 }
 0x603   : > { %10017 = vmatmul.msk.bf16.vlgmr.msra.gmra.mxu2 %vm2194_vm2, %v3747_v30  ;;  %v2767_v11 = vpop.xlane.xlu1 %2766 }
 0x604   : > { %v10358_v0 = vpop.permute.xlu2 %10357 }
 0x605   : > { %v10360_v15 = vunpack.i.h.bf16 %v10358_v0  ;;  %v10359_v8 = vunpack.i.l.bf16 %v10358_v0 }
 0x607   : > { %v4020_v34 = vsel %vm4019_vm3, %v4003_v28, %v10359_v8  ;;  %v4021_v61 = vsel %vm4019_vm3, %v4004_v42, %v10360_v15 }
 0x608   : > { %v4036_v14 = vpack.c.bf16 %v4021_v61, %v4020_v34 }
 0x60a   : > { %10027 = vmatmul.msk.bf16.vlgmr.msrb.gmra.mxu0 %vm701_vm0, %v4036_v14 }
 0x60b   : > { %v2770_v13 = vpop.xlane.xlu0 %2769 }
 0x60c   : > { %10859 = vrcp.f32 %v2770_v13  ;;  %v10373_v6 = vpop.permute.xlu2 %10372 }
 0x60d   : > { %10861 = vrcp.f32 %v2767_v11  ;;  %v10375_v40 = vunpack.i.h.bf16 %v10373_v6  ;;  %v10374_v37 = vunpack.i.l.bf16 %v10373_v6 }
 0x60e   : > { %v3686_v29 = vpop.f32.mrf.mxu3 }
 0x612   : > { %v10860_v9 = vpop.eup %10859 }
 0x613   : > { %v10862_v41 = vpop.eup %10861  ;;  %v2898_v32 = vmul.f32 %v10860_v9, %v13164_v47  ;;  %v13259_v9 = vld [vmem:[%s16699_s9] ss:$0 sm:$0xff] }
 0x614   : > { %v2897_v36 = vmul.f32 %v10862_v41, %v13153_v55  ;;  %v10383_v39 = vpop.permute.xlu2 %10382 }
 0x615   : > { %v2962_v3 = vpack.c.bf16 %v2898_v32, %v2898_v32  ;;  %v10385_v46 = vunpack.i.h.bf16 %v10383_v39  ;;  %v10384_v62 = vunpack.i.l.bf16 %v10383_v39 }
 0x616   : > { %v3688_v58 = vpop.f32.mrf.mxu3  ;;  %v2961_v1 = vpack.c.bf16 %v2897_v36, %v2897_v36 }
 0x617   : > { %v10401_v18 = vpack.i.bf16 %v3688_v58, %v3686_v29  ;;  %v3772_v17 = vunpack.c.l.b16 %v2962_v3 }
 0x618   : > { %v3771_v33 = vunpack.c.l.b16 %v2961_v1 }
 0x619   : > { %10402 = vrot.lane.b32.xlu1 %v10401_v18, %s11263_s24 }
 0x61a   : > { %v3773_v48 = vpack.c.b16 %v3772_v17, %v3771_v33 }
 0x61b   : > { %v10368_v2 = vpop.permute.xlu1 %10367 }
 0x61c   : > { %v10370_v55 = vunpack.i.h.bf16 %v10368_v2  ;;  %v10369_v7 = vunpack.i.l.bf16 %v10368_v2 }
 0x61e   : > { %v1296_v59 = vpop.permute.xlu0 %1295 }
 0x61f   : > { %v3775_v24 = vunpack.c.l.b16 %v1296_v59 }
 0x620   : > { %v3712_v23 = vpop.f32.mrf.mxu0 }
 0x621   : > { %v3776_v21 = vpack.c.b16 %v3775_v24, %v3774_v50  ;;  %v16895_v50 = vld [vmem:[#allocation2_spill] sm:$0xff] }
 0x623   : > { %3788 = vmatpush.bf16.msrb.mxu3 %v3776_v21 }
 0x626   : > { %v10363_v54 = vpop.permute.xlu0 %10362  ;;  %10018 = vmatmul.msk.bf16.vlgmr.msrb.gmra.mxu3 %vm2194_vm2, %v3773_v48 }
 0x627   : > { %v10365_v47 = vunpack.i.h.bf16 %v10363_v54  ;;  %v10364_v5 = vunpack.i.l.bf16 %v10363_v54 }
 0x628   : > { %v3714_v19 = vpop.f32.mrf.mxu0 }
 0x629   : > { %v3990_v20 = vsel %vm1303_vm1, %v13057_v56, %v10365_v47  ;;  %v3989_v63 = vsel %vm1303_vm1, %v13050_v31, %v10364_v5  ;;  %v10416_v60 = vpack.i.bf16 %v3714_v19, %v3712_v23  ;;  %v16896_v19 = vld [vmem:[#allocation3_spill] sm:$0xff] }
 0x62a   : > { %v4006_v52 = vsel %vm2194_vm2, %v3990_v20, %v10370_v55  ;;  %v4005_v10 = vsel %vm2194_vm2, %v3989_v63, %v10369_v7 }
 0x62b   : > { %10417 = vrot.lane.b32.xlu1 %v10416_v60, %s11263_s24  ;;  %v4022_v57 = vsel %vm4019_vm3, %v4005_v10, %v10374_v37  ;;  %v4023_v30 = vsel %vm4019_vm3, %v4006_v52, %v10375_v40 }
 0x62c   : > { %v4037_v12 = vpack.c.bf16 %v4023_v30, %v4022_v57 }
 0x62e   : > { %v10378_v45 = vpop.permute.xlu0 %10377  ;;  %10028 = vmatmul.msk.bf16.gmra.mxu0 %vm701_vm0, %v4037_v12 }
 0x62f   : > { %v10380_v16 = vunpack.i.h.bf16 %v10378_v45  ;;  %v10379_v56 = vunpack.i.l.bf16 %v10378_v45 }
 0x631   : > { %v3992_v31 = vsel %vm1303_vm1, %v13082_v38, %v10380_v16  ;;  %v3991_v0 = vsel %vm1303_vm1, %v13072_v53, %v10379_v56  ;;  %v10393_v53 = vpop.permute.xlu2 %10392 }
 0x632   : > { %v4007_v42 = vsel %vm2194_vm2, %v3991_v0, %v10384_v62  ;;  %v4008_v34 = vsel %vm2194_vm2, %v3992_v31, %v10385_v46  ;;  %v10395_v18 = vunpack.i.h.bf16 %v10393_v53  ;;  %v10394_v36 = vunpack.i.l.bf16 %v10393_v53 }
 0x634   : > { %v3994_v17 = vsel %vm1303_vm1, %v13126_v44, %v10395_v18  ;;  %v3993_v21 = vsel %vm1303_vm1, %v13118_v4, %v10394_v36  ;;  %v16899_v36 = vld [vmem:[#allocation4_spill] sm:$0xff] }
 0x636   : > { %v10388_v15 = vpop.permute.xlu0 %10387 }
 0x637   : > { %v10390_v8 = vunpack.i.h.bf16 %v10388_v15  ;;  %v10389_v28 = vunpack.i.l.bf16 %v10388_v15 }
 0x639   : > { %v4024_v61 = vsel %vm4019_vm3, %v4007_v42, %v10389_v28  ;;  %v4025_v14 = vsel %vm4019_vm3, %v4008_v34, %v10390_v8  ;;  %v10408_v63 = vpop.permute.xlu2 %10407 }
 0x63a   : > { %v4038_v13 = vpack.c.bf16 %v4025_v14, %v4024_v61  ;;  %v10410_v52 = vunpack.i.h.bf16 %v10408_v63  ;;  %v10409_v10 = vunpack.i.l.bf16 %v10408_v63  ;;  %v16897_v61 = vld [vmem:[#allocation5_spill] sm:$0xff] }
 0x63c   : > { %v3996_v45 = vsel %vm1303_vm1, %v13069_v49, %v10410_v52  ;;  %v3995_v16 = vsel %vm1303_vm1, %v13059_v35, %v10409_v10 }
 0x63e   : > { %10029 = vmatmul.msk.bf16.gmra.mxu0 %vm701_vm0, %v4038_v13  ;;  %v10398_v58 = vpop.permute.xlu0 %10397 }
 0x63f   : > { %v10400_v1 = vunpack.i.h.bf16 %v10398_v58  ;;  %v10399_v59 = vunpack.i.l.bf16 %v10398_v58 }
 0x641   : > { %v4009_v2 = vsel %vm2194_vm2, %v3993_v21, %v10399_v59  ;;  %v4010_v54 = vsel %vm2194_vm2, %v3994_v17, %v10400_v1  ;;  %v10423_v18 = vpop.permute.xlu2 %10422 }
 0x642   : > { %v10425_v59 = vunpack.i.h.bf16 %v10423_v18 }
 0x646   : > { %v10413_v60 = vpop.permute.xlu0 %10412 }
 0x647   : > { %v10415_v57 = vunpack.i.h.bf16 %v10413_v60  ;;  %v10414_v30 = vunpack.i.l.bf16 %v10413_v60 }
 0x649   : > { %v4011_v31 = vsel %vm2194_vm2, %v3995_v16, %v10414_v30  ;;  %v4012_v0 = vsel %vm2194_vm2, %v3996_v45, %v10415_v57  ;;  %v10438_v63 = vpop.permute.xlu2 %10437 }
 0x64a   : > { %v10440_v16 = vunpack.i.h.bf16 %v10438_v63 }
 0x651   : > { %v10453_v30 = vpop.permute.xlu2 %10452 }
 0x661   : > { %v3738_v38 = vpop.f32.mrf.mxu1 }
 0x669   : > { %v3740_v11 = vpop.f32.mrf.mxu1 }
 0x66a   : > { %v10431_v29 = vpack.i.bf16 %v3740_v11, %v3738_v38 }
 0x66c   : > { %10432 = vrot.lane.b32.xlu1 %v10431_v29, %s11263_s24  ;;  %v16898_v29 = vld [vmem:[#allocation6_spill] sm:$0xff] }
 0x686   : > { %v3764_v41 = vpop.f32.mrf.mxu2 }
 0x687   : > { %v4097_v32 = vpop.f32.mrf.mxu0 }
 0x688   : > { %v4098_v3 = vadd.f32 %v13259_v9, %v4097_v32  ;;  %v10428_v32 = vpop.permute.xlu0 %10427 }
 0x689   : > { %v10430_v17 = vunpack.i.h.bf16 %v10428_v32 }
 0x68a   : > { %v13263_v24 = vadd.f32 %v4098_v3, %v16895_v50  ;;  %v10424_v50 = vunpack.i.l.bf16 %v10423_v18 }
 0x68b   : > { %v10403_v23 = vpop.permute.xlu1 %10402 }
 0x68c   : > { %v10405_v33 = vunpack.i.h.bf16 %v10403_v23  ;;  %v10404_v48 = vunpack.i.l.bf16 %v10403_v23  ;;  %v4155_v6 = vsel %vm701_vm0, %v13263_v24, 0.0  ;;  %v10429_v23 = vunpack.i.l.bf16 %v10428_v32 }
 0x68d   : > { %4156 = vadd.xlane.f32.xlu2 %v4155_v6  ;;  %v3998_v6 = vsel %vm1303_vm1, %v13074_v26, %v10425_v59 }
 0x68e   : > { %v4026_v47 = vsel %vm4019_vm3, %v4009_v2, %v10404_v48  ;;  %v4027_v5 = vsel %vm4019_vm3, %v4010_v54, %v10405_v33  ;;  %v3766_v40 = vpop.f32.mrf.mxu2  ;;  %v3997_v2 = vsel %vm1303_vm1, %v13067_v25, %v10424_v50  ;;  %v11264_v25 = vmov 32.0  }
 0x68f   : > { %v10446_v44 = vpack.i.bf16 %v3766_v40, %v3764_v41  ;;  %v4099_v55 = vpop.f32.mrf.mxu0  ;;  %v4039_v7 = vpack.c.bf16 %v4027_v5, %v4026_v47  ;;  %v4013_v5 = vsel %vm2194_vm2, %v3997_v2, %v10429_v23  ;;  %v4014_v40 = vsel %vm2194_vm2, %v3998_v6, %v10430_v17  ;;  %v16903_v23 = vld [vmem:[#allocation9_spill] sm:$0xff] }
 0x690   : > { %v4100_v4 = vadd.f32 %v13259_v9, %v4099_v55  ;;  %10863 = vrcp.f32 %v11264_v25  ;;  %v10443_v10 = vpop.permute.xlu0 %10442  ;;  %v10455_v2 = vunpack.i.h.bf16 %v10453_v30 }
 0x691   : > { %10447 = vrot.lane.b32.xlu1 %v10446_v44, %s11263_s24  ;;  %10030 = vmatmul.msk.bf16.gmra.mxu0 %vm701_vm0, %v4039_v7  ;;  %v16900_v7 = vld [vmem:[#allocation7_spill] sm:$0xff] }
 0x692   : > { %v13279_v37 = vadd.f32 %v4100_v4, %v16896_v19 }
 0x694   : > { %v4158_v20 = vsel %vm701_vm0, %v13279_v37, 0.0 }
 0x695   : > { %4159 = vadd.xlane.f32.xlu0 %v4158_v20 }
 0x696   : > { %v10864_v20 = vpop.eup %10863 }
 0x697   : > { %v4204_v60 = vmul.f32 32.0, %v10864_v20  ;;  %vm4208_vm4 = vweird.f32 %v10864_v20 }
 0x699   : > { %v4205_v52 = vsub.f32 1.0, %v4204_v60 }
 0x69b   : > { %v4206_v57 = vmul.f32 %v10864_v20, %v4205_v52 }
 0x69d   : > { %v10418_v12 = vpop.permute.xlu1 %10417 }
 0x69e   : > { %v10420_v56 = vunpack.i.h.bf16 %v10418_v12  ;;  %v10419_v39 = vunpack.i.l.bf16 %v10418_v12  ;;  %v4207_v12 = vadd.f32 %v10864_v20, %v4206_v57 }
 0x6a0   : > { %v4028_v46 = vsel %vm4019_vm3, %v4011_v31, %v10419_v39  ;;  %v4029_v62 = vsel %vm4019_vm3, %v4012_v0, %v10420_v56  ;;  %v13326_v45 = vsel %vm4208_vm4, %v10864_v20, %v4207_v12  ;;  %v10439_v56 = vunpack.i.l.bf16 %v10438_v63  ;;  %v10458_v39 = vpop.permute.xlu0 %10457 }
 0x6a1   : > { %v4040_v15 = vpack.c.bf16 %v4029_v62, %v4028_v46  ;;  %16901 = vst [vmem:[#allocation18_spill] sm:$0xff] %v13326_v45  ;;  %v10445_v0 = vunpack.i.h.bf16 %v10443_v10  ;;  %v10444_v46 = vunpack.i.l.bf16 %v10443_v10 }
 0x6a3   : > { %10031 = vmatmul.msk.bf16.gmra.mxu0 %vm701_vm0, %v4040_v15 }
 0x6a9   : > { %v3790_v8 = vpop.f32.mrf.mxu3 }
 0x6ab   : > { %v4102_v28 = vpop.f32.mrf.mxu0 }
 0x6ac   : > { %v4103_v41 = vadd.f32 %v13259_v9, %v4102_v28  ;;  %v4000_v28 = vsel %vm1303_vm1, %v13105_v22, %v10440_v16 }
 0x6ae   : > { %v13307_v3 = vadd.f32 %v4103_v41, %v16899_v36 }
 0x6b0   : > { %v4161_v33 = vsel %vm701_vm0, %v13307_v3, 0.0 }
 0x6b1   : > { %v3792_v42 = vpop.f32.mrf.mxu3 }
 0x6b2   : > { %v10461_v49 = vpack.i.bf16 %v3792_v42, %v3790_v8  ;;  %v3999_v42 = vsel %vm1303_vm1, %v13089_v43, %v10439_v56 }
 0x6b3   : > { %v4104_v34 = vpop.f32.mrf.mxu0 }
 0x6b4   : > { %v4105_v35 = vadd.f32 %v13259_v9, %v4104_v34  ;;  %10462 = vrot.lane.b32.xlu1 %v10461_v49, %s11263_s24 }
 0x6b6   : > { %v13295_v14 = vadd.f32 %v4105_v35, %v16897_v61  ;;  %v4015_v35 = vsel %vm2194_vm2, %v3999_v42, %v10444_v46  ;;  %v4016_v61 = vsel %vm2194_vm2, %v4000_v28, %v10445_v0 }
 0x6b8   : > { %v4164_v13 = vsel %vm701_vm0, %v13295_v14, 0.0 }
 0x6b9   : > { %4165 = vadd.xlane.f32.xlu2 %v4164_v13 }
 0x6bb   : > { %v4107_v38 = vpop.f32.mrf.mxu0 }
 0x6bc   : > { %v4108_v11 = vadd.f32 %v13259_v9, %v4107_v38 }
 0x6be   : > { %v13301_v53 = vadd.f32 %v4108_v11, %v16898_v29 }
 0x6c0   : > { %v4167_v58 = vsel %vm701_vm0, %v13301_v53, 0.0 }
 0x6c1   : > { %4168 = vadd.xlane.f32.xlu0 %v4167_v58 }
 0x6c3   : > { %v4109_v1 = vpop.f32.mrf.mxu0 }
 0x6c4   : > { %v4110_v21 = vadd.f32 %v13259_v9, %v4109_v1  ;;  %v16902_v1 = vld [vmem:[#allocation8_spill] sm:$0xff] }
 0x6c6   : > { %v13321_v4 = vadd.f32 %v4110_v21, %v16900_v7 }
 0x6c8   : > { %v4170_v26 = vsel %vm701_vm0, %v13321_v4, 0.0 }
 0x6de   : > { %v10433_v48 = vpop.permute.xlu1 %10432  ;;  %4162 = vadd.xlane.f32.xlu1 %v4161_v33 }
 0x6df   : > { %v10435_v54 = vunpack.i.h.bf16 %v10433_v48  ;;  %v10434_v47 = vunpack.i.l.bf16 %v10433_v48 }
 0x6e1   : > { %v4030_v44 = vsel %vm4019_vm3, %v4013_v5, %v10434_v47  ;;  %v4031_v55 = vsel %vm4019_vm3, %v4014_v40, %v10435_v54  ;;  %v10454_v54 = vunpack.i.l.bf16 %v10453_v30  ;;  %v16904_v47 = vld [vmem:[#allocation10_spill] sm:$0xff]  ;;  %v10460_v40 = vunpack.i.h.bf16 %v10458_v39 }
 0x6e2   : > { %v4041_v19 = vpack.c.bf16 %v4031_v55, %v4030_v44  ;;  %v10459_v44 = vunpack.i.l.bf16 %v10458_v39 }
 0x6e4   : > { %10032 = vmatmul.msk.bf16.gmra.mxu0 %vm701_vm0, %v4041_v19  ;;  %v4002_v19 = vsel %vm1303_vm1, %v13159_v27, %v10455_v2 }
 0x6e5   : > { %v4018_v60 = vsel %vm2194_vm2, %v4002_v19, %v10460_v40 }
 0x6e6   : > { %4171 = vadd.xlane.f32.xlu1 %v4170_v26  ;;  %v4001_v26 = vsel %vm1303_vm1, %v13141_v51, %v10454_v54 }
 0x6e7   : > { %v4017_v63 = vsel %vm2194_vm2, %v4001_v26, %v10459_v44 }
 0x700   : > { %v4157_v31 = vpop.xlane.xlu2 %4156 }
 0x701   : > { %v4210_v62 = vmul.f32 %v13326_v45, %v4157_v31 }
 0x703   : > { %v13330_v15 = vsub.f32 %v13263_v24, %v4210_v62  ;;  %v10448_v8 = vpop.permute.xlu1 %10447 }
 0x704   : > { %v10450_v49 = vunpack.i.h.bf16 %v10448_v8  ;;  %v10449_v34 = vunpack.i.l.bf16 %v10448_v8 }
 0x705   : > { %v4242_v13 = vmul.f32 %v13330_v15, %v13330_v15 }
 0x706   : > { %v4032_v38 = vsel %vm4019_vm3, %v4015_v35, %v10449_v34  ;;  %v4033_v24 = vsel %vm4019_vm3, %v4016_v61, %v10450_v49 }
 0x707   : > { %v4258_v11 = vsel %vm701_vm0, %v4242_v13, 0.0  ;;  %v4042_v29 = vpack.c.bf16 %v4033_v24, %v4032_v38  ;;  %v16905_v13 = vld [vmem:[#allocation11_spill] sm:$0xff] }
 0x708   : > { %v4160_v22 = vpop.xlane.xlu0 %4159  ;;  %4259 = vadd.xlane.f32.xlu2 %v4258_v11 }
 0x709   : > { %v4211_v43 = vmul.f32 %v13326_v45, %v4160_v22  ;;  %10033 = vmatmul.msk.bf16.gmra.mxu0 %vm701_vm0, %v4042_v29 }
 0x70b   : > { %v13346_v58 = vsub.f32 %v13279_v37, %v4211_v43  ;;  %v16906_v43 = vld [vmem:[#allocation12_spill] sm:$0xff] }
 0x70d   : > { %v4243_v41 = vmul.f32 %v13346_v58, %v13346_v58 }
 0x70e   : > { %v4112_v18 = vpop.f32.mrf.mxu0 }
 0x70f   : > { %v4113_v32 = vadd.f32 %v13259_v9, %v4112_v18  ;;  %v4261_v36 = vsel %vm701_vm0, %v4243_v41, 0.0 }
 0x710   : > { %4262 = vadd.xlane.f32.xlu0 %v4261_v36  ;;  %v16907_v36 = vld [vmem:[#allocation13_spill] sm:$0xff] }
 0x711   : > { %v13353_v59 = vadd.f32 %v4113_v32, %v16902_v1 }
 0x713   : > { %v4173_v50 = vsel %vm701_vm0, %v13353_v59, 0.0 }
 0x714   : > { %4174 = vadd.xlane.f32.xlu1 %v4173_v50 }
 0x716   : > { %v4114_v17 = vpop.f32.mrf.mxu0 }
 0x717   : > { %v4115_v37 = vadd.f32 %v13259_v9, %v4114_v17 }
 0x719   : > { %v13359_v21 = vadd.f32 %v4115_v37, %v16903_v23  ;;  %v10310_v37 = vld [vmem:[%s16702_s12 + $0x8] sm:$0xff] }
 0x71a   : > { %4610 = vmatpush.bf16.msrb.mxu1 %v10310_v37 }
 0x71b   : > { %v4176_v33 = vsel %vm701_vm0, %v13359_v21, 0.0 }
 0x71c   : > { %4177 = vadd.xlane.f32.xlu2 %v4176_v33 }
 0x720   : > { %v4117_v48 = vpop.f32.mrf.mxu0 }
 0x721   : > { %v4118_v6 = vadd.f32 %v13259_v9, %v4117_v48  ;;  %v10309_v48 = vld [vmem:[%s16702_s12] sm:$0xff] }
 0x722   : > { %4611 = vmatpush.bf16.msrb.mxu1 %v10309_v48 }
 0x723   : > { %v13365_v5 = vadd.f32 %v4118_v6, %v16904_v47 }
 0x725   : > { %v4179_v55 = vsel %vm701_vm0, %v13365_v5, 0.0 }
 0x726   : > { %v10463_v7 = vpop.permute.xlu1 %10462  ;;  %4180 = vadd.xlane.f32.xlu2 %v4179_v55 }
 0x727   : > { %v10465_v25 = vunpack.i.h.bf16 %v10463_v7  ;;  %v10464_v20 = vunpack.i.l.bf16 %v10463_v7 }
 0x728   : > { %v4119_v28 = vpop.f32.mrf.mxu0 }
 0x729   : > { %v4034_v52 = vsel %vm4019_vm3, %v4017_v63, %v10464_v20  ;;  %v4035_v10 = vsel %vm4019_vm3, %v4018_v60, %v10465_v25  ;;  %v4120_v49 = vadd.f32 %v13259_v9, %v4119_v28  ;;  %v16908_v25 = vld [vmem:[#allocation14_spill] sm:$0xff] }
 0x72a   : > { %v4043_v57 = vpack.c.bf16 %v4035_v10, %v4034_v52 }
 0x72b   : > { %v13405_v38 = vadd.f32 %v4120_v49, %v16905_v13 }
 0x72c   : > { %10034 = vmatmul.msk.bf16.gmra.mxu0 %vm701_vm0, %v4043_v57  ;;  %v4166_v30 = vpop.xlane.xlu2 %4165 }
 0x72d   : > { %v4213_v12 = vmul.f32 %v13326_v45, %v4166_v30  ;;  %v4182_v24 = vsel %vm701_vm0, %v13405_v38, 0.0 }
 0x72f   : > { %v13380_v27 = vsub.f32 %v13295_v14, %v4213_v12 }
 0x731   : > { %v4245_v51 = vmul.f32 %v13380_v27, %v13380_v27 }
 0x733   : > { %v4267_v16 = vsel %vm701_vm0, %v4245_v51, 0.0 }
 0x734   : > { %v4169_v56 = vpop.xlane.xlu0 %4168  ;;  %4268 = vadd.xlane.f32.xlu1 %v4267_v16 }
 0x735   : > { %v4214_v39 = vmul.f32 %v13326_v45, %v4169_v56 }
 0x737   : > { %v13387_v31 = vsub.f32 %v13301_v53, %v4214_v39 }
 0x739   : > { %v4246_v0 = vmul.f32 %v13387_v31, %v13387_v31 }
 0x73b   : > { %v4270_v46 = vsel %vm701_vm0, %v4246_v0, 0.0 }
 0x73c   : > { %4271 = vadd.xlane.f32.xlu1 %v4270_v46 }
 0x751   : > { %v4163_v14 = vpop.xlane.xlu1 %4162 }
 0x752   : > { %v4212_v62 = vmul.f32 %v13326_v45, %v4163_v14 }
 0x754   : > { %v13394_v8 = vsub.f32 %v13307_v3, %v4212_v62  ;;  %v16909_v62 = vld [vmem:[#allocation15_spill] sm:$0xff] }
 0x756   : > { %v4244_v42 = vmul.f32 %v13394_v8, %v13394_v8 }
 0x758   : > { %v4264_v53 = vsel %vm701_vm0, %v4244_v42, 0.0 }
 0x759   : > { %v4172_v34 = vpop.xlane.xlu1 %4171  ;;  %4265 = vadd.xlane.f32.xlu0 %v4264_v53 }
 0x75a   : > { %v4215_v35 = vmul.f32 %v13326_v45, %v4172_v34 }
 0x75c   : > { %v13402_v61 = vsub.f32 %v13321_v4, %v4215_v35  ;;  %v13458_v35 = vld [vmem:[%s16700_s10] ss:$0 sm:$0xff] }
 0x75e   : > { %v4247_v3 = vmul.f32 %v13402_v61, %v13402_v61 }
 0x760   : > { %v4273_v11 = vsel %vm701_vm0, %v4247_v3, 0.0 }
 0x761   : > { %v4122_v29 = vpop.f32.mrf.mxu0  ;;  %4183 = vadd.xlane.f32.xlu0 %v4182_v24  ;;  %4274 = vadd.xlane.f32.xlu2 %v4273_v11 }
 0x762   : > { %v4123_v22 = vadd.f32 %v13259_v9, %v4122_v29 }
 0x764   : > { %v13414_v41 = vadd.f32 %v4123_v22, %v16906_v43  ;;  %v13467_v22 = vld [vmem:[%s16701_s11] ss:$0 sm:$0xff] }
 0x766   : > { %v4185_v4 = vsel %vm701_vm0, %v13414_v41, 0.0 }
 0x769   : > { %v4124_v18 = vpop.f32.mrf.mxu0  ;;  %4186 = vadd.xlane.f32.xlu0 %v4185_v4 }
 0x76a   : > { %v4125_v32 = vadd.f32 %v13259_v9, %v4124_v18 }
 0x76c   : > { %v13420_v1 = vadd.f32 %v4125_v32, %v16907_v36 }
 0x76e   : > { %v4188_v50 = vsel %vm701_vm0, %v13420_v1, 0.0 }
 0x76f   : > { %4189 = vadd.xlane.f32.xlu1 %v4188_v50 }
 0x77b   : > { %v4260_v17 = vpop.xlane.xlu2 %4259 }
 0x77c   : > { %v4306_v23 = vmul.f32 %v4260_v17, %v13326_v45 }
 0x77e   : > { %v4322_v33 = vadd.f32 1e-05, %v4306_v23 }
 0x780   : > { %10865 = vrsqrt.f32 %v4322_v33  ;;  %vm4344_vm6 = vweird.f32 %v4322_v33 }
 0x783   : > { %v4263_v6 = vpop.xlane.xlu0 %4262 }
 0x784   : > { %v4307_v2 = vmul.f32 %v4263_v6, %v13326_v45 }
 0x786   : > { %v10866_v54 = vpop.eup %10865  ;;  %v4323_v47 = vadd.f32 1e-05, %v4307_v2  ;;  %v4127_v40 = vpop.f32.mrf.mxu0 }
 0x787   : > { %v4339_v44 = vmul.f32 %v10866_v54, %v4322_v33  ;;  %v4128_v55 = vadd.f32 %v13259_v9, %v4127_v40  ;;  %v4175_v7 = vpop.xlane.xlu1 %4174  ;;  %vm4345_vm5 = vweird.f32 %v10866_v54  ;;  %v16910_v33 = vld [vmem:[#allocation16_spill] sm:$0xff]  ;;  %v16911_v40 = vld [vmem:[#allocation17_spill] sm:$0xff] }
 0x788   : > { %10867 = vrsqrt.f32 %v4323_v47  ;;  %v4216_v19 = vmul.f32 %v13326_v45, %v4175_v7  ;;  %vm4346_vm7 = vmor %vm4344_vm6, %vm4345_vm5  ;;  %vm4354_vm9 = vweird.f32 %v4323_v47 }
 0x789   : > { %v4340_v26 = vmul.f32 %v10866_v54, %v4339_v44  ;;  %v13435_v20 = vadd.f32 %v4128_v55, %v16908_v25 }
 0x78a   : > { %v13438_v63 = vsub.f32 %v13353_v59, %v4216_v19 }
 0x78b   : > { %v4341_v60 = vmul.f32 0.5, %v4340_v26  ;;  %v4191_v52 = vsel %vm701_vm0, %v13435_v20, 0.0 }
 0x78c   : > { %4192 = vadd.xlane.f32.xlu1 %v4191_v52  ;;  %v4248_v10 = vmul.f32 %v13438_v63, %v13438_v63 }
 0x78d   : > { %v4342_v57 = vsub.f32 1.5, %v4341_v60 }
 0x78e   : > { %v10868_v30 = vpop.eup %10867  ;;  %v4129_v12 = vpop.f32.mrf.mxu0  ;;  %v4276_v51 = vsel %vm701_vm0, %v4248_v10, 0.0 }
 0x78f   : > { %v4343_v16 = vmul.f32 %v10866_v54, %v4342_v57  ;;  %v4349_v56 = vmul.f32 %v10868_v30, %v4323_v47  ;;  %v4130_v39 = vadd.f32 %v13259_v9, %v4129_v12  ;;  %4277 = vadd.xlane.f32.xlu2 %v4276_v51  ;;  %v4178_v59 = vpop.xlane.xlu2 %4177  ;;  %vm4355_vm8 = vweird.f32 %v10868_v30 }
 0x790   : > { %v4217_v0 = vmul.f32 %v13326_v45, %v4178_v59  ;;  %vm4356_vm10 = vmor %vm4354_vm9, %vm4355_vm8 }
 0x791   : > { %v4350_v46 = vmul.f32 %v10868_v30, %v4349_v56  ;;  %v13451_v28 = vadd.f32 %v4130_v39, %v16909_v62  ;;  %v4347_v42 = vsel %vm4346_vm7, %v10866_v54, %v4343_v16 }
 0x792   : > { %v13448_v14 = vsub.f32 %v13359_v21, %v4217_v0  ;;  %v4498_v13 = vmul.f32 %v4347_v42, %v13330_v15 }
 0x793   : > { %v4351_v49 = vmul.f32 0.5, %v4350_v46  ;;  %v4194_v21 = vsel %vm701_vm0, %v13451_v28, 0.0 }
 0x794   : > { %v4249_v53 = vmul.f32 %v13448_v14, %v13448_v14  ;;  %v4517_v43 = vmul.f32 %v13458_v35, %v4498_v13 }
 0x795   : > { %v4352_v34 = vsub.f32 1.5, %v4351_v49 }
 0x796   : > { %v4279_v3 = vsel %vm701_vm0, %v4249_v53, 0.0  ;;  %v13477_v36 = vadd.f32 %v13467_v22, %v4517_v43 }
 0x797   : > { %v4353_v24 = vmul.f32 %v10868_v30, %v4352_v34  ;;  %4195 = vadd.xlane.f32.xlu2 %v4194_v21  ;;  %4280 = vadd.xlane.f32.xlu0 %v4279_v3 }
 0x799   : > { %v4357_v11 = vsel %vm4356_vm10, %v10868_v30, %v4353_v24  ;;  %v4181_v29 = vpop.xlane.xlu2 %4180 }
 0x79a   : > { %v4499_v15 = vmul.f32 %v4357_v11, %v13346_v58  ;;  %v4218_v4 = vmul.f32 %v13326_v45, %v4181_v29 }
 0x79c   : > { %v4518_v18 = vmul.f32 %v13458_v35, %v4499_v15  ;;  %v13474_v32 = vsub.f32 %v13365_v5, %v4218_v4 }
 0x79e   : > { %v13480_v50 = vadd.f32 %v13467_v22, %v4518_v18  ;;  %v4250_v17 = vmul.f32 %v13474_v32, %v13474_v32 }
 0x7a0   : > { %v4552_v37 = vpack.c.bf16 %v13480_v50, %v13477_v36  ;;  %v4282_v58 = vsel %vm701_vm0, %v4250_v17, 0.0 }
 0x7a1   : > { %4283 = vadd.xlane.f32.xlu0 %v4282_v58 }
 0x7a2   : > { %10043 = vmatmul.msk.bf16.vlgmr.msrb.gmra.mxu1 %vm701_vm0, %v4552_v37 }
 0x7a7   : > { %v4269_v47 = vpop.xlane.xlu1 %4268 }
 0x7a8   : > { %v4309_v7 = vmul.f32 %v4269_v47, %v13326_v45 }
 0x7a9   : > { %v4132_v23 = vpop.f32.mrf.mxu0 }
 0x7aa   : > { %v4133_v5 = vadd.f32 %v13259_v9, %v4132_v23  ;;  %v4325_v19 = vadd.f32 1e-05, %v4309_v7 }
 0x7ac   : > { %v13490_v48 = vadd.f32 %v4133_v5, %v16910_v33  ;;  %10869 = vrsqrt.f32 %v4325_v19  ;;  %vm4374_vm12 = vweird.f32 %v4325_v19 }
 0x7ae   : > { %v4197_v6 = vsel %vm701_vm0, %v13490_v48, 0.0 }
 0x7af   : > { %4198 = vadd.xlane.f32.xlu2 %v4197_v6  ;;  %v4272_v26 = vpop.xlane.xlu1 %4271 }
 0x7b0   : > { %v4310_v60 = vmul.f32 %v4272_v26, %v13326_v45 }
 0x7b1   : > { %v4134_v2 = vpop.f32.mrf.mxu0 }
 0x7b2   : > { %v4135_v54 = vadd.f32 %v13259_v9, %v4134_v2  ;;  %v10870_v25 = vpop.eup %10869  ;;  %v13502_v10 = vadd.f32 1e-05, %v4310_v60 }
 0x7b3   : > { %v4369_v52 = vmul.f32 %v10870_v25, %v4325_v19  ;;  %vm4375_vm11 = vweird.f32 %v10870_v25 }
 0x7b4   : > { %v13496_v44 = vadd.f32 %v4135_v54, %v16911_v40  ;;  %10871 = vrsqrt.f32 %v13502_v10  ;;  %vm4376_vm13 = vmor %vm4374_vm12, %vm4375_vm11  ;;  %vm4384_vm9 = vweird.f32 %v13502_v10 }
 0x7b5   : > { %v4370_v9 = vmul.f32 %v10870_v25, %v4369_v52 }
 0x7b6   : > { %v4200_v55 = vsel %vm701_vm0, %v13496_v44, 0.0 }
 0x7b7   : > { %4201 = vadd.xlane.f32.xlu0 %v4200_v55  ;;  %v4371_v51 = vmul.f32 0.5, %v4370_v9 }
 0x7b9   : > { %v4372_v16 = vsub.f32 1.5, %v4371_v51 }
 0x7ba   : > { %v13506_v59 = vpop.eup %10871 }
 0x7bb   : > { %v4373_v53 = vmul.f32 %v10870_v25, %v4372_v16  ;;  %v4379_v34 = vmul.f32 %v13506_v59, %v13502_v10  ;;  %vm4385_vm6 = vweird.f32 %v13506_v59 }
 0x7bc   : > { %vm4386_vm10 = vmor %vm4384_vm9, %vm4385_vm6 }
 0x7bd   : > { %v4377_v11 = vsel %vm4376_vm13, %v10870_v25, %v4373_v53 }
 0x7be   : > { %v4501_v17 = vmul.f32 %v4377_v11, %v13380_v27 }
 0x7cc   : > { %v4266_v57 = vpop.xlane.xlu0 %4265 }
 0x7cd   : > { %v4308_v30 = vmul.f32 %v4266_v57, %v13326_v45 }
 0x7cf   : > { %v4324_v12 = vadd.f32 1e-05, %v4308_v30 }
 0x7d1   : > { %10873 = vrsqrt.f32 %v4324_v12  ;;  %vm4364_vm15 = vweird.f32 %v4324_v12 }
 0x7d4   : > { %v4184_v56 = vpop.xlane.xlu0 %4183  ;;  %v4275_v39 = vpop.xlane.xlu2 %4274 }
 0x7d5   : > { %v4219_v0 = vmul.f32 %v13326_v45, %v4184_v56  ;;  %v4311_v46 = vmul.f32 %v4275_v39, %v13326_v45 }
 0x7d7   : > { %v10874_v62 = vpop.eup %10873  ;;  %v13511_v42 = vsub.f32 %v13405_v38, %v4219_v0  ;;  %v4327_v49 = vadd.f32 1e-05, %v4311_v46  ;;  %v4380_v38 = vmul.f32 %v13506_v59, %v4379_v34 }
 0x7d8   : > { %v4359_v13 = vmul.f32 %v10874_v62, %v4324_v12  ;;  %vm4365_vm14 = vweird.f32 %v10874_v62 }
 0x7d9   : > { %10875 = vrsqrt.f32 %v4327_v49  ;;  %v4251_v21 = vmul.f32 %v13511_v42, %v13511_v42  ;;  %v4381_v58 = vmul.f32 0.5, %v4380_v38  ;;  %vm4366_vm4 = vmor %vm4364_vm15, %vm4365_vm14  ;;  %vm4394_vm7 = vweird.f32 %v4327_v49 }
 0x7da   : > { %v4360_v3 = vmul.f32 %v10874_v62, %v4359_v13  ;;  %v10313_v13 = vld [vmem:[%s16704_s14 + $0x10] sm:$0xff] }
 0x7db   : > { %v4285_v24 = vsel %vm701_vm0, %v4251_v21, 0.0  ;;  %v4382_v55 = vsub.f32 1.5, %v4381_v58 }
 0x7dc   : > { %v4361_v29 = vmul.f32 0.5, %v4360_v3  ;;  %v4187_v43 = vpop.xlane.xlu0 %4186  ;;  %4286 = vadd.xlane.f32.xlu1 %v4285_v24 }
 0x7dd   : > { %v4220_v15 = vmul.f32 %v13326_v45, %v4187_v43  ;;  %v4383_v9 = vmul.f32 %v13506_v59, %v4382_v55 }
 0x7de   : > { %v4362_v4 = vsub.f32 1.5, %v4361_v29 }
 0x7df   : > { %v10876_v18 = vpop.eup %10875  ;;  %v13522_v37 = vsub.f32 %v13414_v41, %v4220_v15  ;;  %v4520_v41 = vmul.f32 %v13458_v35, %v4501_v17  ;;  %v4387_v51 = vsel %vm4386_vm10, %v13506_v59, %v4383_v9  ;;  %v10311_v15 = vld [vmem:[%s16704_s14] sm:$0xff] }
 0x7e0   : > { %v4363_v23 = vmul.f32 %v10874_v62, %v4362_v4  ;;  %v4389_v5 = vmul.f32 %v10876_v18, %v4327_v49  ;;  %vm4395_vm5 = vweird.f32 %v10876_v18  ;;  %v4502_v56 = vmul.f32 %v4387_v51, %v13387_v31  ;;  %v10314_v31 = vld [vmem:[%s16704_s14 + $0x18] sm:$0xff] }
 0x7e1   : > { %v4252_v33 = vmul.f32 %v13522_v37, %v13522_v37  ;;  %v13540_v52 = vadd.f32 %v13467_v22, %v4520_v41  ;;  %vm4396_vm8 = vmor %vm4394_vm7, %vm4395_vm5  ;;  %4742 = vmatpush.bf16.msrb.mxu2 %v10314_v31  ;;  %vm4713_vm5 = vcmask 523264  }
 0x7e2   : > { %v4367_v6 = vsel %vm4366_vm4, %v10874_v62, %v4363_v23  ;;  %v4390_v2 = vmul.f32 %v10876_v18, %v4389_v5  ;;  %v4190_v54 = vpop.xlane.xlu1 %4189  ;;  %v4521_v0 = vmul.f32 %v13458_v35, %v4502_v56 }
 0x7e3   : > { %v4500_v47 = vmul.f32 %v4367_v6, %v13394_v8  ;;  %v4221_v40 = vmul.f32 %v13326_v45, %v4190_v54  ;;  %v4288_v27 = vsel %vm701_vm0, %v4252_v33, 0.0 }
 0x7e4   : > { %v4391_v7 = vmul.f32 0.5, %v4390_v2  ;;  %4289 = vadd.xlane.f32.xlu1 %v4288_v27  ;;  %v13558_v10 = vadd.f32 %v13467_v22, %v4521_v0 }
 0x7e5   : > { %v13531_v19 = vsub.f32 %v13420_v1, %v4221_v40  ;;  %v4519_v26 = vmul.f32 %v13458_v35, %v4500_v47  ;;  %4743 = vmatpush.bf16.msrb.mxu2 %v10313_v13 }
 0x7e6   : > { %v4392_v25 = vsub.f32 1.5, %v4391_v7 }
 0x7e7   : > { %v4253_v60 = vmul.f32 %v13531_v19, %v13531_v19  ;;  %v13537_v8 = vadd.f32 %v13467_v22, %v4519_v26 }
 0x7e8   : > { %v4393_v57 = vmul.f32 %v10876_v18, %v4392_v25 }
 0x7e9   : > { %v4291_v1 = vsel %vm701_vm0, %v4253_v60, 0.0  ;;  %v4553_v30 = vpack.c.bf16 %v13540_v52, %v13537_v8 }
 0x7ea   : > { %v4397_v12 = vsel %vm4396_vm8, %v10876_v18, %v4393_v57  ;;  %4292 = vadd.xlane.f32.xlu2 %v4291_v1 }
 0x7eb   : > { %10044 = vmatmul.msk.bf16.gmra.mxu1 %vm701_vm0, %v4553_v30  ;;  %v4503_v16 = vmul.f32 %v4397_v12, %v13402_v61  ;;  %v13597_v30 = vld [vmem:[%s16703_s13] ss:$0 sm:$0xff] }
 0x7ed   : > { %v4522_v39 = vmul.f32 %v13458_v35, %v4503_v16 }
 0x7ef   : > { %v13555_v46 = vadd.f32 %v13467_v22, %v4522_v39 }
 0x7f1   : > { %v4554_v62 = vpack.c.bf16 %v13555_v46, %v13558_v10 }
 0x7fb   : > { %10045 = vmatmul.msk.bf16.gmra.mxu1 %vm701_vm0, %v4554_v62 }
 0x7ff   : > { %v4193_v59 = vpop.xlane.xlu1 %4192 }
 0x800   : > { %v4222_v61 = vmul.f32 %v13326_v45, %v4193_v59 }
 0x802   : > { %v13568_v49 = vsub.f32 %v13435_v20, %v4222_v61  ;;  %v4278_v53 = vpop.xlane.xlu2 %4277  ;;  %v10312_v20 = vld [vmem:[%s16704_s14 + $0x8] sm:$0xff] }
 0x803   : > { %v4312_v34 = vmul.f32 %v4278_v53, %v13326_v45  ;;  %4744 = vmatpush.bf16.msrb.mxu2 %v10312_v20 }
 0x804   : > { %v4254_v21 = vmul.f32 %v13568_v49, %v13568_v49 }
 0x805   : > { %v4328_v3 = vadd.f32 1e-05, %v4312_v34 }
 0x806   : > { %v4294_v24 = vsel %vm701_vm0, %v4254_v21, 0.0 }
 0x807   : > { %10877 = vrsqrt.f32 %v4328_v3  ;;  %4295 = vadd.xlane.f32.xlu0 %v4294_v24  ;;  %4745 = vmatpush.bf16.msrb.mxu2 %v10311_v15  ;;  %vm4404_vm12 = vweird.f32 %v4328_v3 }
 0x80a   : > { %v4281_v11 = vpop.xlane.xlu0 %4280  ;;  %v4196_v38 = vpop.xlane.xlu2 %4195 }
 0x80b   : > { %v4313_v29 = vmul.f32 %v4281_v11, %v13326_v45  ;;  %v4223_v43 = vmul.f32 %v13326_v45, %v4196_v38 }
 0x80d   : > { %v10878_v4 = vpop.eup %10877  ;;  %v4329_v18 = vadd.f32 1e-05, %v4313_v29  ;;  %v13586_v17 = vsub.f32 %v13451_v28, %v4223_v43 }
 0x80e   : > { %v4399_v58 = vmul.f32 %v10878_v4, %v4328_v3  ;;  %vm4405_vm11 = vweird.f32 %v10878_v4 }
 0x80f   : > { %10879 = vrsqrt.f32 %v4329_v18  ;;  %v4255_v23 = vmul.f32 %v13586_v17, %v13586_v17  ;;  %vm4406_vm13 = vmor %vm4404_vm12, %vm4405_vm11  ;;  %vm4414_vm15 = vweird.f32 %v4329_v18 }
 0x810   : > { %v4400_v5 = vmul.f32 %v10878_v4, %v4399_v58 }
 0x811   : > { %v4297_v33 = vsel %vm701_vm0, %v4255_v23, 0.0 }
 0x812   : > { %v4401_v6 = vmul.f32 0.5, %v4400_v5  ;;  %4298 = vadd.xlane.f32.xlu1 %v4297_v33 }
 0x814   : > { %v4402_v2 = vsub.f32 1.5, %v4401_v6  ;;  %v4284_v1 = vpop.xlane.xlu0 %4283 }
 0x815   : > { %v10880_v54 = vpop.eup %10879  ;;  %v4314_v11 = vmul.f32 %v4284_v1, %v13326_v45 }
 0x816   : > { %v4403_v47 = vmul.f32 %v10878_v4, %v4402_v2  ;;  %v4409_v40 = vmul.f32 %v10880_v54, %v4329_v18  ;;  %vm4415_vm14 = vweird.f32 %v10880_v54 }
 0x817   : > { %vm4416_vm4 = vmor %vm4414_vm15, %vm4415_vm14  ;;  %v4330_v38 = vadd.f32 1e-05, %v4314_v11 }
 0x818   : > { %v4410_v27 = vmul.f32 %v10880_v54, %v4409_v40  ;;  %v4407_v28 = vsel %vm4406_vm13, %v10878_v4, %v4403_v47 }
 0x819   : > { %v4504_v7 = vmul.f32 %v4407_v28, %v13438_v63  ;;  %10881 = vrsqrt.f32 %v4330_v38  ;;  %vm4424_vm7 = vweird.f32 %v4330_v38 }
 0x81a   : > { %v4411_v41 = vmul.f32 0.5, %v4410_v27 }
 0x81b   : > { %v4523_v57 = vmul.f32 %v13458_v35, %v4504_v7 }
 0x81c   : > { %v4412_v55 = vsub.f32 1.5, %v4411_v41 }
 0x81d   : > { %v13605_v56 = vadd.f32 %v13467_v22, %v4523_v57 }
 0x81e   : > { %v4413_v26 = vmul.f32 %v10880_v54, %v4412_v55 }
 0x81f   : > { %v4613_v25 = vpop.f32.mrf.mxu1  ;;  %v10882_v29 = vpop.eup %10881 }
 0x820   : > { %v4417_v60 = vsel %vm4416_vm4, %v10880_v54, %v4413_v26  ;;  %v4614_v39 = vadd.f32 %v13597_v30, %v4613_v25  ;;  %v4419_v43 = vmul.f32 %v10882_v29, %v4330_v38  ;;  %vm4425_vm6 = vweird.f32 %v10882_v29 }
 0x821   : > { %v4505_v9 = vmul.f32 %v4417_v60, %v13448_v14  ;;  %vm4426_vm8 = vmor %vm4424_vm7, %vm4425_vm6 }
 0x822   : > { %v4199_v12 = vpop.xlane.xlu2 %4198  ;;  %v4653_v61 = vmax.f32 %v4614_v39, 0.0  ;;  %v4420_v15 = vmul.f32 %v10882_v29, %v4419_v43 }
 0x823   : > { %v4224_v51 = vmul.f32 %v13326_v45, %v4199_v12  ;;  %v4524_v63 = vmul.f32 %v13458_v35, %v4505_v9 }
 0x824   : > { %v4421_v58 = vmul.f32 0.5, %v4420_v15 }
 0x825   : > { %v13602_v16 = vsub.f32 %v13490_v48, %v4224_v51  ;;  %v13608_v14 = vadd.f32 %v13467_v22, %v4524_v63 }
 0x826   : > { %v4422_v23 = vsub.f32 1.5, %v4421_v58 }
 0x827   : > { %v4615_v0 = vpop.f32.mrf.mxu1  ;;  %v4555_v62 = vpack.c.bf16 %v13608_v14, %v13605_v56  ;;  %v4256_v59 = vmul.f32 %v13602_v16, %v13602_v16 }
 0x828   : > { %v4616_v31 = vadd.f32 %v13597_v30, %v4615_v0  ;;  %v4423_v54 = vmul.f32 %v10882_v29, %v4422_v23 }
 0x829   : > { %10046 = vmatmul.msk.bf16.gmra.mxu1 %vm701_vm0, %v4555_v62  ;;  %v4300_v48 = vsel %vm701_vm0, %v4256_v59, 0.0 }
 0x82a   : > { %v4654_v53 = vmax.f32 %v4616_v31, 0.0  ;;  %v4202_v34 = vpop.xlane.xlu0 %4201  ;;  %4301 = vadd.xlane.f32.xlu2 %v4300_v48  ;;  %v4427_v41 = vsel %vm4426_vm8, %v10882_v29, %v4423_v54 }
 0x82b   : > { %v4225_v13 = vmul.f32 %v13326_v45, %v4202_v34  ;;  %v4506_v60 = vmul.f32 %v4427_v41, %v13474_v32 }
 0x82c   : > { %v4669_v21 = vpack.c.bf16 %v4654_v53, %v4653_v61 }
 0x82d   : > { %v13620_v3 = vsub.f32 %v13496_v44, %v4225_v13  ;;  %v4525_v63 = vmul.f32 %v13458_v35, %v4506_v60 }
 0x82e   : > { %10067 = vmatmul.msk.bf16.vlgmr.msrb.gmra.mxu2 %vm4713_vm5, %v4669_v21 }
 0x82f   : > { %v4257_v24 = vmul.f32 %v13620_v3, %v13620_v3  ;;  %v13635_v32 = vadd.f32 %v13467_v22, %v4525_v63 }
 0x831   : > { %v4303_v20 = vsel %vm701_vm0, %v4257_v24, 0.0 }
 0x832   : > { %4304 = vadd.xlane.f32.xlu0 %v4303_v20 }
 0x84f   : > { %v4287_v4 = vpop.xlane.xlu1 %4286 }
 0x850   : > { %v4315_v18 = vmul.f32 %v4287_v4, %v13326_v45 }
 0x852   : > { %v4331_v44 = vadd.f32 1e-05, %v4315_v18 }
 0x854   : > { %10883 = vrsqrt.f32 %v4331_v44  ;;  %vm4434_vm10 = vweird.f32 %v4331_v44 }
 0x857   : > { %v4290_v5 = vpop.xlane.xlu1 %4289 }
 0x858   : > { %v4316_v33 = vmul.f32 %v4290_v5, %v13326_v45 }
 0x85a   : > { %v10884_v6 = vpop.eup %10883  ;;  %v4332_v2 = vadd.f32 1e-05, %v4316_v33 }
 0x85b   : > { %v4429_v47 = vmul.f32 %v10884_v6, %v4331_v44  ;;  %vm4435_vm9 = vweird.f32 %v10884_v6 }
 0x85c   : > { %10885 = vrsqrt.f32 %v4332_v2  ;;  %vm4436_vm11 = vmor %vm4434_vm10, %vm4435_vm9  ;;  %vm4444_vm13 = vweird.f32 %v4332_v2 }
 0x85d   : > { %v4430_v40 = vmul.f32 %v10884_v6, %v4429_v47  ;;  %v4293_v27 = vpop.xlane.xlu2 %4292 }
 0x85e   : > { %v4317_v28 = vmul.f32 %v4293_v27, %v13326_v45 }
 0x85f   : > { %v4431_v55 = vmul.f32 0.5, %v4430_v40 }
 0x860   : > { %v4333_v7 = vadd.f32 1e-05, %v4317_v28 }
 0x861   : > { %v4432_v26 = vsub.f32 1.5, %v4431_v55 }
 0x862   : > { %v10886_v25 = vpop.eup %10885  ;;  %10887 = vrsqrt.f32 %v4333_v7  ;;  %vm4454_vm4 = vweird.f32 %v4333_v7 }
 0x863   : > { %v4433_v9 = vmul.f32 %v10884_v6, %v4432_v26  ;;  %v4439_v57 = vmul.f32 %v10886_v25, %v4332_v2  ;;  %vm4445_vm12 = vweird.f32 %v10886_v25 }
 0x864   : > { %vm4446_vm14 = vmor %vm4444_vm13, %vm4445_vm12 }
 0x865   : > { %v4437_v1 = vsel %vm4436_vm11, %v10884_v6, %v4433_v9  ;;  %v4440_v12 = vmul.f32 %v10886_v25, %v4439_v57 }
 0x866   : > { %v4507_v51 = vmul.f32 %v4437_v1, %v13511_v42 }
 0x867   : > { %v4441_v39 = vmul.f32 0.5, %v4440_v12 }
 0x868   : > { %v10888_v0 = vpop.eup %10887  ;;  %v4618_v62 = vpop.f32.mrf.mxu1  ;;  %v4526_v59 = vmul.f32 %v13458_v35, %v4507_v51 }
 0x869   : > { %v4442_v31 = vsub.f32 1.5, %v4441_v39  ;;  %v4449_v48 = vmul.f32 %v10888_v0, %v4333_v7  ;;  %vm4455_vm15 = vweird.f32 %v10888_v0  ;;  %v4619_v20 = vadd.f32 %v13597_v30, %v4618_v62 }
 0x86a   : > { %v13638_v61 = vadd.f32 %v13467_v22, %v4526_v59  ;;  %vm4456_vm6 = vmor %vm4454_vm4, %vm4455_vm15 }
 0x86b   : > { %v4443_v53 = vmul.f32 %v10886_v25, %v4442_v31  ;;  %v4450_v34 = vmul.f32 %v10888_v0, %v4449_v48  ;;  %v4655_v4 = vmax.f32 %v4619_v20, 0.0 }
 0x86c   : > { %v4556_v42 = vpack.c.bf16 %v13638_v61, %v13635_v32 }
 0x86d   : > { %v4451_v13 = vmul.f32 0.5, %v4450_v34  ;;  %v4447_v21 = vsel %vm4446_vm14, %v10886_v25, %v4443_v53 }
 0x86e   : > { %10047 = vmatmul.msk.bf16.gmra.mxu1 %vm701_vm0, %v4556_v42  ;;  %v4508_v43 = vmul.f32 %v4447_v21, %v13522_v37 }
 0x86f   : > { %v4452_v24 = vsub.f32 1.5, %v4451_v13 }
 0x870   : > { %v4620_v11 = vpop.f32.mrf.mxu1  ;;  %v4527_v23 = vmul.f32 %v13458_v35, %v4508_v43 }
 0x871   : > { %v4453_v38 = vmul.f32 %v10888_v0, %v4452_v24  ;;  %v4621_v29 = vadd.f32 %v13597_v30, %v4620_v11 }
 0x872   : > { %v13654_v37 = vadd.f32 %v13467_v22, %v4527_v23 }
 0x873   : > { %v4457_v15 = vsel %vm4456_vm6, %v10888_v0, %v4453_v38  ;;  %v4656_v18 = vmax.f32 %v4621_v29, 0.0 }
 0x874   : > { %v4509_v44 = vmul.f32 %v4457_v15, %v13531_v19 }
 0x875   : > { %v4670_v58 = vpack.c.bf16 %v4656_v18, %v4655_v4 }
 0x876   : > { %v4528_v5 = vmul.f32 %v13458_v35, %v4509_v44 }
 0x877   : > { %10068 = vmatmul.msk.bf16.gmra.mxu2 %vm4713_vm5, %v4670_v58 }
 0x878   : > { %v4623_v33 = vpop.f32.mrf.mxu1  ;;  %v13651_v6 = vadd.f32 %v13467_v22, %v4528_v5 }
 0x879   : > { %v4624_v40 = vadd.f32 %v13597_v30, %v4623_v33 }
 0x87a   : > { %v4296_v2 = vpop.xlane.xlu0 %4295  ;;  %v4557_v19 = vpack.c.bf16 %v13651_v6, %v13654_v37 }
 0x87b   : > { %v4318_v54 = vmul.f32 %v4296_v2, %v13326_v45  ;;  %v4657_v41 = vmax.f32 %v4624_v40, 0.0 }
 0x87d   : > { %v4334_v47 = vadd.f32 1e-05, %v4318_v54  ;;  %v13683_v54 = vld [vmem:[%s16705_s15] ss:$0 sm:$0xff] }
 0x87e   : > { %10048 = vmatmul.msk.bf16.gmra.mxu1 %vm701_vm0, %v4557_v19 }
 0x87f   : > { %10889 = vrsqrt.f32 %v4334_v47  ;;  %vm4464_vm8 = vweird.f32 %v4334_v47 }
 0x880   : > { %v4625_v27 = vpop.f32.mrf.mxu1 }
 0x881   : > { %v4626_v28 = vadd.f32 %v13597_v30, %v4625_v27 }
 0x883   : > { %v4658_v55 = vmax.f32 %v4626_v28, 0.0 }
 0x885   : > { %v10890_v7 = vpop.eup %10889  ;;  %v4671_v26 = vpack.c.bf16 %v4658_v55, %v4657_v41  ;;  %v4299_v25 = vpop.xlane.xlu1 %4298 }
 0x886   : > { %v4459_v60 = vmul.f32 %v10890_v7, %v4334_v47  ;;  %v4319_v9 = vmul.f32 %v4299_v25, %v13326_v45  ;;  %vm4465_vm7 = vweird.f32 %v10890_v7 }
 0x887   : > { %10069 = vmatmul.msk.bf16.gmra.mxu2 %vm4713_vm5, %v4671_v26  ;;  %vm4466_vm9 = vmor %vm4464_vm8, %vm4465_vm7 }
 0x888   : > { %v4460_v57 = vmul.f32 %v10890_v7, %v4459_v60  ;;  %v4335_v1 = vadd.f32 1e-05, %v4319_v9 }
 0x88a   : > { %v4461_v12 = vmul.f32 0.5, %v4460_v57  ;;  %10891 = vrsqrt.f32 %v4335_v1  ;;  %vm4474_vm11 = vweird.f32 %v4335_v1 }
 0x88c   : > { %v4462_v51 = vsub.f32 1.5, %v4461_v12 }
 0x88e   : > { %v4463_v39 = vmul.f32 %v10890_v7, %v4462_v51 }
 0x890   : > { %v10892_v63 = vpop.eup %10891  ;;  %v4467_v59 = vsel %vm4466_vm9, %v10890_v7, %v4463_v39 }
 0x891   : > { %v4469_v0 = vmul.f32 %v10892_v63, %v4335_v1  ;;  %vm4475_vm10 = vweird.f32 %v10892_v63  ;;  %v4510_v53 = vmul.f32 %v4467_v59, %v13568_v49 }
 0x892   : > { %vm4476_vm12 = vmor %vm4474_vm11, %vm4475_vm10 }
 0x893   : > { %v4470_v62 = vmul.f32 %v10892_v63, %v4469_v0  ;;  %v4529_v21 = vmul.f32 %v13458_v35, %v4510_v53 }
 0x895   : > { %v4471_v31 = vmul.f32 0.5, %v4470_v62  ;;  %v13670_v29 = vadd.f32 %v13467_v22, %v4529_v21 }
 0x897   : > { %v4472_v48 = vsub.f32 1.5, %v4471_v31 }
 0x899   : > { %v4473_v34 = vmul.f32 %v10892_v63, %v4472_v48 }
 0x89b   : > { %v4477_v42 = vsel %vm4476_vm12, %v10892_v63, %v4473_v34 }
 0x89c   : > { %v4511_v13 = vmul.f32 %v4477_v42, %v13586_v17 }
 0x89d   : > { %v4302_v24 = vpop.xlane.xlu2 %4301 }
 0x89e   : > { %v4320_v20 = vmul.f32 %v4302_v24, %v13326_v45  ;;  %v4530_v11 = vmul.f32 %v13458_v35, %v4511_v13 }
 0x8a0   : > { %v4336_v38 = vadd.f32 1e-05, %v4320_v20  ;;  %v13673_v43 = vadd.f32 %v13467_v22, %v4530_v11 }
 0x8a2   : > { %10893 = vrsqrt.f32 %v4336_v38  ;;  %v4558_v49 = vpack.c.bf16 %v13673_v43, %v13670_v29  ;;  %vm4484_vm14 = vweird.f32 %v4336_v38 }
 0x8a4   : > { %10049 = vmatmul.msk.bf16.gmra.mxu1 %vm701_vm0, %v4558_v49 }
 0x8a5   : > { %v4305_v17 = vpop.xlane.xlu0 %4304 }
 0x8a6   : > { %v4321_v15 = vmul.f32 %v4305_v17, %v13326_v45  ;;  %v4628_v4 = vpop.f32.mrf.mxu1 }
 0x8a7   : > { %v4629_v33 = vadd.f32 %v13597_v30, %v4628_v4 }
 0x8a8   : > { %v10894_v18 = vpop.eup %10893  ;;  %v4337_v44 = vadd.f32 1e-05, %v4321_v15 }
 0x8a9   : > { %v4479_v58 = vmul.f32 %v10894_v18, %v4336_v38  ;;  %vm4485_vm13 = vweird.f32 %v10894_v18  ;;  %v4659_v41 = vmax.f32 %v4629_v33, 0.0 }
 0x8aa   : > { %10895 = vrsqrt.f32 %v4337_v44  ;;  %vm4486_vm15 = vmor %vm4484_vm14, %vm4485_vm13  ;;  %vm4494_vm6 = vweird.f32 %v4337_v44 }
 0x8ab   : > { %v4480_v23 = vmul.f32 %v10894_v18, %v4479_v58 }
 0x8ad   : > { %v4481_v5 = vmul.f32 0.5, %v4480_v23 }
 0x8ae   : > { %v4630_v2 = vpop.f32.mrf.mxu1 }
 0x8af   : > { %v4482_v19 = vsub.f32 1.5, %v4481_v5  ;;  %v4631_v47 = vadd.f32 %v13597_v30, %v4630_v2 }
 0x8b0   : > { %v10896_v40 = vpop.eup %10895 }
 0x8b1   : > { %v4483_v27 = vmul.f32 %v10894_v18, %v4482_v19  ;;  %v4489_v28 = vmul.f32 %v10896_v40, %v4337_v44  ;;  %v4660_v55 = vmax.f32 %v4631_v47, 0.0  ;;  %v4747_v7 = vpop.f32.mrf.mxu2  ;;  %vm4495_vm4 = vweird.f32 %v10896_v40 }
 0x8b2   : > { %v4748_v26 = vadd.f32 %v13683_v54, %v4747_v7  ;;  %vm4496_vm7 = vmor %vm4494_vm6, %vm4495_vm4 }
 0x8b3   : > { %v4490_v25 = vmul.f32 %v10896_v40, %v4489_v28  ;;  %v4672_v60 = vpack.c.bf16 %v4660_v55, %v4659_v41  ;;  %v4487_v57 = vsel %vm4486_vm15, %v10894_v18, %v4483_v27 }
 0x8b4   : > { %v13688_v9 = vadd.f32 %v4748_v26, %v13477_v36  ;;  %v4512_v63 = vmul.f32 %v4487_v57, %v13602_v16 }
 0x8b5   : > { %v4491_v1 = vmul.f32 0.5, %v4490_v25  ;;  %10070 = vmatmul.msk.bf16.gmra.mxu2 %vm4713_vm5, %v4672_v60 }
 0x8b6   : > { %v4805_v12 = vsel %vm701_vm0, %v13688_v9, 0.0  ;;  %v4531_v48 = vmul.f32 %v13458_v35, %v4512_v63 }
 0x8b7   : > { %v4492_v51 = vsub.f32 1.5, %v4491_v1  ;;  %4806 = vadd.xlane.f32.xlu1 %v4805_v12 }
 0x8b8   : > { %v13704_v16 = vadd.f32 %v13467_v22, %v4531_v48 }
 0x8b9   : > { %v4493_v39 = vmul.f32 %v10896_v40, %v4492_v51  ;;  %v4749_v0 = vpop.f32.mrf.mxu2 }
 0x8ba   : > { %v4750_v62 = vadd.f32 %v13683_v54, %v4749_v0 }
 0x8bb   : > { %v4497_v36 = vsel %vm4496_vm7, %v10896_v40, %v4493_v39 }
 0x8bc   : > { %v4513_v59 = vmul.f32 %v4497_v36, %v13620_v3  ;;  %v13697_v31 = vadd.f32 %v4750_v62, %v13480_v50 }
 0x8be   : > { %v4808_v53 = vsel %vm701_vm0, %v13697_v31, 0.0  ;;  %v4532_v34 = vmul.f32 %v13458_v35, %v4513_v59 }
 0x8bf   : > { %4809 = vadd.xlane.f32.xlu2 %v4808_v53 }
 0x8c0   : > { %v13707_v42 = vadd.f32 %v13467_v22, %v4532_v34 }
 0x8c2   : > { %v4559_v3 = vpack.c.bf16 %v13707_v42, %v13704_v16 }
 0x8c4   : > { %10050 = vmatmul.msk.bf16.gmra.mxu1 %vm701_vm0, %v4559_v3 }
 0x8eb   : > { %v4633_v50 = vpop.f32.mrf.mxu1 }
 0x8ec   : > { %v4634_v13 = vadd.f32 %v13597_v30, %v4633_v50 }
 0x8ee   : > { %v4661_v20 = vmax.f32 %v4634_v13, 0.0 }
 0x8f3   : > { %v4635_v21 = vpop.f32.mrf.mxu1 }
 0x8f4   : > { %v4636_v24 = vadd.f32 %v13597_v30, %v4635_v21 }
 0x8f6   : > { %v4662_v35 = vmax.f32 %v4636_v24, 0.0 }
 0x8f8   : > { %v4673_v11 = vpack.c.bf16 %v4662_v35, %v4661_v20 }
 0x8fa   : > { %v4752_v38 = vpop.f32.mrf.mxu2  ;;  %10071 = vmatmul.msk.bf16.gmra.mxu2 %vm4713_vm5, %v4673_v11 }
 0x8fb   : > { %v4753_v22 = vadd.f32 %v13683_v54, %v4752_v38  ;;  %v4638_v49 = vpop.f32.mrf.mxu1 }
 0x8fc   : > { %v4639_v4 = vadd.f32 %v13597_v30, %v4638_v49 }
 0x8fd   : > { %v13717_v17 = vadd.f32 %v4753_v22, %v13537_v8 }
 0x8fe   : > { %v4663_v33 = vmax.f32 %v4639_v4, 0.0 }
 0x8ff   : > { %v4811_v15 = vsel %vm701_vm0, %v13717_v17, 0.0 }
 0x900   : > { %4812 = vadd.xlane.f32.xlu0 %v4811_v15 }
 0x902   : > { %v4754_v18 = vpop.f32.mrf.mxu2 }
 0x903   : > { %v4755_v44 = vadd.f32 %v13683_v54, %v4754_v18  ;;  %v4640_v58 = vpop.f32.mrf.mxu1 }
 0x904   : > { %v4641_v23 = vadd.f32 %v13597_v30, %v4640_v58 }
 0x905   : > { %v13725_v5 = vadd.f32 %v4755_v44, %v13540_v52 }
 0x906   : > { %v4664_v2 = vmax.f32 %v4641_v23, 0.0 }
 0x907   : > { %v4814_v8 = vsel %vm701_vm0, %v13725_v5, 0.0 }
 0x908   : > { %v4674_v19 = vpack.c.bf16 %v4664_v2, %v4663_v33  ;;  %4815 = vadd.xlane.f32.xlu1 %v4814_v8 }
 0x90a   : > { %v4757_v47 = vpop.f32.mrf.mxu2  ;;  %10072 = vmatmul.msk.bf16.gmra.mxu2 %vm4713_vm5, %v4674_v19 }
 0x90b   : > { %v4758_v40 = vadd.f32 %v13683_v54, %v4757_v47 }
 0x90d   : > { %v13732_v27 = vadd.f32 %v4758_v40, %v13558_v10 }
 0x90f   : > { %v4817_v28 = vsel %vm701_vm0, %v13732_v27, 0.0 }
 0x910   : > { %4818 = vadd.xlane.f32.xlu2 %v4817_v28 }
 0x912   : > { %v4759_v52 = vpop.f32.mrf.mxu2 }
 0x913   : > { %v4760_v41 = vadd.f32 %v13683_v54, %v4759_v52 }
 0x915   : > { %v13738_v55 = vadd.f32 %v4760_v41, %v13555_v46 }
 0x917   : > { %v4820_v7 = vsel %vm701_vm0, %v13738_v55, 0.0 }
 0x918   : > { %4821 = vadd.xlane.f32.xlu0 %v4820_v7 }
 0x921   : > { %v4643_v26 = vpop.f32.mrf.mxu1 }
 0x922   : > { %v4644_v25 = vadd.f32 %v13597_v30, %v4643_v26 }
 0x924   : > { %v4665_v57 = vmax.f32 %v4644_v25, 0.0 }
 0x929   : > { %v4645_v60 = vpop.f32.mrf.mxu1 }
 0x92a   : > { %v4646_v10 = vadd.f32 %v13597_v30, %v4645_v60 }
 0x92c   : > { %v4666_v1 = vmax.f32 %v4646_v10, 0.0 }
 0x92e   : > { %v4675_v12 = vpack.c.bf16 %v4666_v1, %v4665_v57 }
 0x930   : > { %10073 = vmatmul.msk.bf16.gmra.mxu2 %vm4713_vm5, %v4675_v12 }
 0x932   : > { %v4810_v22 = vpop.xlane.xlu2 %4809 }
 0x933   : > { %v4854_v15 = vmul.f32 %v4810_v22, %v13326_v45 }
 0x935   : > { %v13778_v18 = vsub.f32 %v13697_v31, %v4854_v15  ;;  %v4807_v31 = vpop.xlane.xlu1 %4806 }
 0x936   : > { %v4853_v26 = vmul.f32 %v4807_v31, %v13326_v45 }
 0x937   : > { %v4886_v23 = vmul.f32 %v13778_v18, %v13778_v18 }
 0x938   : > { %v4762_v51 = vpop.f32.mrf.mxu2 }
 0x939   : > { %v4763_v63 = vadd.f32 %v13683_v54, %v4762_v51  ;;  %v4904_v2 = vsel %vm701_vm0, %v4886_v23, 0.0  ;;  %v10318_v51 = vld [vmem:[%s16826_s26 + $0x18] sm:$0xff] }
 0x93a   : > { %5326 = vmatpush.bf16.msra.mxu0 %v10318_v51 }
 0x93b   : > { %v13747_v46 = vadd.f32 %v4763_v63, %v13605_v56 }
 0x93d   : > { %v4823_v39 = vsel %vm701_vm0, %v13747_v46, 0.0 }
 0x93e   : > { %4824 = vadd.xlane.f32.xlu0 %v4823_v39 }
 0x940   : > { %v4764_v0 = vpop.f32.mrf.mxu2 }
 0x941   : > { %v4765_v62 = vadd.f32 %v13683_v54, %v4764_v0  ;;  %v4648_v36 = vpop.f32.mrf.mxu1  ;;  %v10320_v0 = vld [vmem:[%s16843_s0 + $0x18] sm:$0xff] }
 0x942   : > { %v4649_v53 = vadd.f32 %v13597_v30, %v4648_v36  ;;  %5397 = vmatpush.bf16.msra.mxu1 %v10320_v0 }
 0x943   : > { %v13753_v59 = vadd.f32 %v4765_v62, %v13608_v14 }
 0x944   : > { %v4667_v3 = vmax.f32 %v4649_v53, 0.0 }
 0x945   : > { %v4826_v48 = vsel %vm701_vm0, %v13753_v59, 0.0 }
 0x946   : > { %4827 = vadd.xlane.f32.xlu1 %v4826_v48 }
 0x949   : > { %v4650_v34 = vpop.f32.mrf.mxu1 }
 0x94a   : > { %v4651_v56 = vadd.f32 %v13597_v30, %v4650_v34 }
 0x94c   : > { %v4668_v50 = vmax.f32 %v4651_v56, 0.0 }
 0x94e   : > { %v4676_v13 = vpack.c.bf16 %v4668_v50, %v4667_v3 }
 0x950   : > { %10074 = vmatmul.msk.bf16.gmra.mxu2 %vm4713_vm5, %v4676_v13 }
 0x973   : > { %v4813_v39 = vpop.xlane.xlu0 %4812 }
 0x97b   : > { %v4816_v8 = vpop.xlane.xlu1 %4815 }
 0x97c   : > { %v4856_v47 = vmul.f32 %v4816_v8, %v13326_v45 }
 0x97d   : > { %v4767_v21 = vpop.f32.mrf.mxu2 }
 0x97e   : > { %v4768_v24 = vadd.f32 %v13683_v54, %v4767_v21  ;;  %v4855_v21 = vmul.f32 %v4813_v39, %v13326_v45 }
 0x980   : > { %v13762_v14 = vadd.f32 %v4768_v24, %v13635_v32 }
 0x982   : > { %v4829_v20 = vsel %vm701_vm0, %v13762_v14, 0.0 }
 0x983   : > { %4830 = vadd.xlane.f32.xlu1 %v4829_v20  ;;  %v4819_v41 = vpop.xlane.xlu2 %4818 }
 0x984   : > { %v4857_v25 = vmul.f32 %v4819_v41, %v13326_v45 }
 0x985   : > { %v4769_v35 = vpop.f32.mrf.mxu2 }
 0x986   : > { %v4770_v11 = vadd.f32 %v13683_v54, %v4769_v35  ;;  %v13813_v57 = vsub.f32 %v13732_v27, %v4857_v25 }
 0x988   : > { %v13768_v30 = vadd.f32 %v4770_v11, %v13638_v61 }
 0x98a   : > { %v4832_v38 = vsel %vm701_vm0, %v13768_v30, 0.0 }
 0x98b   : > { %4833 = vadd.xlane.f32.xlu2 %v4832_v38  ;;  %v4822_v62 = vpop.xlane.xlu0 %4821 }
 0x98c   : > { %v4858_v48 = vmul.f32 %v4822_v62, %v13326_v45 }
 0x98d   : > { %v4772_v49 = vpop.f32.mrf.mxu2 }
 0x98e   : > { %v4773_v32 = vadd.f32 %v13683_v54, %v4772_v49  ;;  %v13836_v56 = vsub.f32 %v13738_v55, %v4858_v48  ;;  %v13849_v55 = vsub.f32 %v13717_v17, %v4855_v21 }
 0x990   : > { %v13775_v4 = vadd.f32 %v4773_v32, %v13654_v37  ;;  %v4890_v35 = vmul.f32 %v13836_v56, %v13836_v56  ;;  %v4887_v17 = vmul.f32 %v13849_v55, %v13849_v55 }
 0x992   : > { %v4835_v61 = vsel %vm701_vm0, %v13775_v4, 0.0  ;;  %v4916_v38 = vsel %vm701_vm0, %v4890_v35, 0.0  ;;  %v4907_v32 = vsel %vm701_vm0, %v4887_v17, 0.0 }
 0x993   : > { %4836 = vadd.xlane.f32.xlu2 %v4835_v61 }
 0x995   : > { %v4774_v44 = vpop.f32.mrf.mxu2 }
 0x996   : > { %v4775_v58 = vadd.f32 %v13683_v54, %v4774_v44 }
 0x998   : > { %v13786_v33 = vadd.f32 %v4775_v58, %v13651_v6  ;;  %v13797_v6 = vsub.f32 %v13725_v5, %v4856_v47  ;;  %v13810_v5 = vsub.f32 %v13688_v9, %v4853_v26  ;;  %v4889_v9 = vmul.f32 %v13813_v57, %v13813_v57 }
 0x99a   : > { %v4838_v37 = vsel %vm701_vm0, %v13786_v33, 0.0  ;;  %v4888_v10 = vmul.f32 %v13797_v6, %v13797_v6  ;;  %v4913_v63 = vsel %vm701_vm0, %v4889_v9, 0.0 }
 0x99b   : > { %4839 = vadd.xlane.f32.xlu0 %v4838_v37  ;;  %4905 = vadd.xlane.f32.xlu2 %v4904_v2 }
 0x99c   : > { %v4910_v12 = vsel %vm701_vm0, %v4888_v10, 0.0  ;;  %v10319_v10 = vld [vmem:[%s16843_s0 + $0x10] sm:$0xff] }
 0x99d   : > { %5398 = vmatpush.bf16.msra.mxu1 %v10319_v10 }
 0x9b1   : > { %v4825_v50 = vpop.xlane.xlu0 %4824 }
 0x9b2   : > { %v4859_v24 = vmul.f32 %v4825_v50, %v13326_v45  ;;  %v10315_v50 = vld [vmem:[%s16825_s2 + $0x10] sm:$0xff] }
 0x9b3   : > { %v4777_v19 = vpop.f32.mrf.mxu2 }
 0x9b4   : > { %v4778_v40 = vadd.f32 %v13683_v54, %v4777_v19  ;;  %v13852_v11 = vsub.f32 %v13747_v46, %v4859_v24 }
 0x9b6   : > { %v13794_v28 = vadd.f32 %v4778_v40, %v13670_v29 }
 0x9b8   : > { %v4841_v52 = vsel %vm701_vm0, %v13794_v28, 0.0 }
 0x9b9   : > { %4842 = vadd.xlane.f32.xlu0 %v4841_v52  ;;  %v4828_v49 = vpop.xlane.xlu1 %4827 }
 0x9bb   : > { %v4779_v7 = vpop.f32.mrf.mxu2 }
 0x9bc   : > { %v4780_v60 = vadd.f32 %v13683_v54, %v4779_v7  ;;  %v10317_v7 = vld [vmem:[%s16826_s26 + $0x10] sm:$0xff] }
 0x9bd   : > { %5327 = vmatpush.bf16.msra.mxu0 %v10317_v7  ;;  %v13945_v7 = vld [vmem:[%s16707_s17] ss:$0 sm:$0xff] }
 0x9be   : > { %v13807_v29 = vadd.f32 %v4780_v60, %v13673_v43  ;;  %v4885_v43 = vmul.f32 %v13810_v5, %v13810_v5 }
 0x9c0   : > { %v4844_v1 = vsel %vm701_vm0, %v13807_v29, 0.0  ;;  %v4901_v27 = vsel %vm701_vm0, %v4885_v43, 0.0 }
 0x9c1   : > { %4845 = vadd.xlane.f32.xlu1 %v4844_v1  ;;  %4911 = vadd.xlane.f32.xlu0 %v4910_v12 }
 0x9c9   : > { %4902 = vadd.xlane.f32.xlu1 %v4901_v27  ;;  %4914 = vadd.xlane.f32.xlu0 %v4913_v63 }
 0x9d3   : > { %v4782_v36 = vpop.f32.mrf.mxu2 }
 0x9d4   : > { %v4783_v53 = vadd.f32 %v13683_v54, %v4782_v36  ;;  %v10316_v36 = vld [vmem:[%s16825_s2 + $0x18] sm:$0xff] }
 0x9d5   : > { %5255 = vmatpush.bf16.msra.mxu3 %v10316_v36 }
 0x9d6   : > { %v13833_v34 = vadd.f32 %v4783_v53, %v13704_v16 }
 0x9d8   : > { %v4847_v3 = vsel %vm701_vm0, %v13833_v34, 0.0 }
 0x9d9   : > { %4848 = vadd.xlane.f32.xlu1 %v4847_v3  ;;  %5256 = vmatpush.bf16.msra.mxu3 %v10315_v50 }
 0x9db   : > { %v4784_v13 = vpop.f32.mrf.mxu2 }
 0x9dc   : > { %v4785_v20 = vadd.f32 %v13683_v54, %v4784_v13  ;;  %v4860_v54 = vmul.f32 %v4828_v49, %v13326_v45 }
 0x9de   : > { %v13846_v16 = vadd.f32 %v4785_v20, %v13707_v42  ;;  %v4891_v42 = vmul.f32 %v13852_v11, %v13852_v11  ;;  %v13863_v15 = vsub.f32 %v13753_v59, %v4860_v54 }
 0x9e0   : > { %v4850_v22 = vsel %vm701_vm0, %v13846_v16, 0.0  ;;  %v4919_v46 = vsel %vm701_vm0, %v4891_v42, 0.0  ;;  %v4892_v61 = vmul.f32 %v13863_v15, %v13863_v15 }
 0x9e1   : > { %4917 = vadd.xlane.f32.xlu1 %v4916_v38  ;;  %4851 = vadd.xlane.f32.xlu2 %v4850_v22 }
 0x9e2   : > { %v4922_v44 = vsel %vm701_vm0, %v4892_v61, 0.0 }
 0x9e9   : > { %4920 = vadd.xlane.f32.xlu1 %v4919_v46  ;;  %4908 = vadd.xlane.f32.xlu2 %v4907_v32 }
 0x9f1   : > { %4923 = vadd.xlane.f32.xlu2 %v4922_v44 }
 0x9f6   : > { %v4831_v58 = vpop.xlane.xlu1 %4830 }
 0x9f7   : > { %v4861_v23 = vmul.f32 %v4831_v58, %v13326_v45 }
 0x9f9   : > { %v13872_v37 = vsub.f32 %v13762_v14, %v4861_v23 }
 0x9fb   : > { %v4893_v59 = vmul.f32 %v13872_v37, %v13872_v37 }
 0x9fd   : > { %v4925_v2 = vsel %vm701_vm0, %v4893_v59, 0.0 }
 0x9fe   : > { %4926 = vadd.xlane.f32.xlu2 %v4925_v2  ;;  %v4834_v31 = vpop.xlane.xlu2 %4833 }
 0x9ff   : > { %v4862_v8 = vmul.f32 %v4834_v31, %v13326_v45  ;;  %v13933_v31 = vld [vmem:[%s16706_s16] ss:$0 sm:$0xff] }
 0xa01   : > { %v13879_v19 = vsub.f32 %v13768_v30, %v4862_v8 }
 0xa03   : > { %v4894_v47 = vmul.f32 %v13879_v19, %v13879_v19 }
 0xa05   : > { %v4928_v40 = vsel %vm701_vm0, %v4894_v47, 0.0 }
 0xa06   : > { %4929 = vadd.xlane.f32.xlu0 %v4928_v40  ;;  %v4837_v14 = vpop.xlane.xlu2 %4836 }
 0xa07   : > { %v4863_v52 = vmul.f32 %v4837_v14, %v13326_v45 }
 0xa09   : > { %v13886_v41 = vsub.f32 %v13775_v4, %v4863_v52 }
 0xa0b   : > { %v4895_v30 = vmul.f32 %v13886_v41, %v13886_v41 }
 0xa0d   : > { %v4931_v26 = vsel %vm701_vm0, %v4895_v30, 0.0 }
 0xa0e   : > { %v4840_v25 = vpop.xlane.xlu0 %4839  ;;  %4932 = vadd.xlane.f32.xlu0 %v4931_v26  ;;  %v4906_v51 = vpop.xlane.xlu2 %4905 }
 0xa0f   : > { %v4864_v60 = vmul.f32 %v4840_v25, %v13326_v45  ;;  %v4950_v43 = vmul.f32 %v4906_v51, %v13326_v45 }
 0xa11   : > { %v13899_v4 = vsub.f32 %v13786_v33, %v4864_v60  ;;  %v4966_v9 = vadd.f32 1e-05, %v4950_v43 }
 0xa13   : > { %v4896_v1 = vmul.f32 %v13899_v4, %v13899_v4  ;;  %10897 = vrsqrt.f32 %v4966_v9  ;;  %vm4997_vm9 = vweird.f32 %v4966_v9 }
 0xa15   : > { %v4934_v12 = vsel %vm701_vm0, %v4896_v1, 0.0 }
 0xa16   : > { %4935 = vadd.xlane.f32.xlu1 %v4934_v12 }
 0xa19   : > { %v10898_v48 = vpop.eup %10897 }
 0xa1a   : > { %vm4998_vm8 = vweird.f32 %v10898_v48 }
 0xa1b   : > { %vm4999_vm10 = vmor %vm4997_vm9, %vm4998_vm8 }
 0xa2c   : > { %v4843_v27 = vpop.xlane.xlu0 %4842 }
 0xa2d   : > { %v4865_v63 = vmul.f32 %v4843_v27, %v13326_v45 }
 0xa2f   : > { %v13907_v39 = vsub.f32 %v13794_v28, %v4865_v63  ;;  %v4992_v28 = vmul.f32 %v10898_v48, %v4966_v9 }
 0xa31   : > { %v4897_v33 = vmul.f32 %v13907_v39, %v13907_v39  ;;  %v4993_v24 = vmul.f32 %v10898_v48, %v4992_v28 }
 0xa33   : > { %v4937_v0 = vsel %vm701_vm0, %v4897_v33, 0.0  ;;  %v4994_v22 = vmul.f32 0.5, %v4993_v24 }
 0xa34   : > { %v4846_v62 = vpop.xlane.xlu1 %4845  ;;  %4938 = vadd.xlane.f32.xlu2 %v4937_v0  ;;  %v4912_v49 = vpop.xlane.xlu0 %4911 }
 0xa35   : > { %v4866_v53 = vmul.f32 %v4846_v62, %v13326_v45  ;;  %v4952_v17 = vmul.f32 %v4912_v49, %v13326_v45 }
 0xa37   : > { %v13917_v3 = vsub.f32 %v13807_v29, %v4866_v53  ;;  %v4995_v29 = vsub.f32 1.5, %v4994_v22  ;;  %v13927_v44 = vadd.f32 1e-05, %v4952_v17 }
 0xa39   : > { %v4898_v13 = vmul.f32 %v13917_v3, %v13917_v3  ;;  %v4996_v42 = vmul.f32 %v10898_v48, %v4995_v29  ;;  %vm5017_vm15 = vweird.f32 %v13927_v44 }
 0xa3b   : > { %v4940_v21 = vsel %vm701_vm0, %v4898_v13, 0.0  ;;  %v5000_v61 = vsel %vm4999_vm10, %v10898_v48, %v4996_v42 }
 0xa3c   : > { %v4903_v20 = vpop.xlane.xlu1 %4902  ;;  %4941 = vadd.xlane.f32.xlu0 %v4940_v21  ;;  %v5142_v8 = vmul.f32 %v5000_v61, %v13778_v18  ;;  %v4915_v10 = vpop.xlane.xlu0 %4914 }
 0xa3d   : > { %v4949_v35 = vmul.f32 %v4903_v20, %v13326_v45  ;;  %v4953_v27 = vmul.f32 %v4915_v10, %v13326_v45 }
 0xa3e   : > { %v5161_v30 = vmul.f32 %v13933_v31, %v5142_v8 }
 0xa3f   : > { %v4965_v38 = vadd.f32 1e-05, %v4949_v35 }
 0xa40   : > { %v13954_v43 = vadd.f32 %v13945_v7, %v5161_v30 }
 0xa41   : > { %10899 = vrsqrt.f32 %v4965_v38  ;;  %vm4987_vm12 = vweird.f32 %v4965_v38 }
 0xa42   : > { %10901 = vrsqrt.f32 %v13927_v44  ;;  %16912 = vst [vmem:[#allocation26_spill] sm:$0xff] %v13954_v43 }
 0xa47   : > { %v10900_v54 = vpop.eup %10899 }
 0xa48   : > { %v4982_v46 = vmul.f32 %v10900_v54, %v4965_v38  ;;  %vm4988_vm11 = vweird.f32 %v10900_v54  ;;  %v10902_v12 = vpop.eup %10901 }
 0xa49   : > { %vm4989_vm13 = vmor %vm4987_vm12, %vm4988_vm11  ;;  %v5012_v63 = vmul.f32 %v10902_v12, %v13927_v44  ;;  %vm5018_vm14 = vweird.f32 %v10902_v12 }
 0xa4a   : > { %v4983_v32 = vmul.f32 %v10900_v54, %v4982_v46  ;;  %vm5019_vm4 = vmor %vm5017_vm15, %vm5018_vm14 }
 0xa4b   : > { %v5013_v53 = vmul.f32 %v10902_v12, %v5012_v63 }
 0xa4c   : > { %v4984_v58 = vmul.f32 0.5, %v4983_v32  ;;  %v4849_v23 = vpop.xlane.xlu1 %4848 }
 0xa4d   : > { %v4867_v59 = vmul.f32 %v4849_v23, %v13326_v45  ;;  %v5014_v13 = vmul.f32 0.5, %v5013_v53 }
 0xa4e   : > { %v4985_v2 = vsub.f32 1.5, %v4984_v58 }
 0xa4f   : > { %v13937_v47 = vsub.f32 %v13833_v34, %v4867_v59  ;;  %v5015_v20 = vsub.f32 1.5, %v5014_v13 }
 0xa50   : > { %v4986_v40 = vmul.f32 %v10900_v54, %v4985_v2 }
 0xa51   : > { %v4899_v14 = vmul.f32 %v13937_v47, %v13937_v47  ;;  %v5016_v42 = vmul.f32 %v10902_v12, %v5015_v20 }
 0xa52   : > { %v4990_v52 = vsel %vm4989_vm13, %v10900_v54, %v4986_v40 }
 0xa53   : > { %v5141_v18 = vmul.f32 %v4990_v52, %v13810_v5  ;;  %v4943_v34 = vsel %vm701_vm0, %v4899_v14, 0.0  ;;  %v5020_v59 = vsel %vm5019_vm4, %v10902_v12, %v5016_v42 }
 0xa54   : > { %4944 = vadd.xlane.f32.xlu1 %v4943_v34  ;;  %v4918_v26 = vpop.xlane.xlu1 %4917  ;;  %v4852_v25 = vpop.xlane.xlu2 %4851  ;;  %v5144_v52 = vmul.f32 %v5020_v59, %v13797_v6 }
 0xa55   : > { %v5160_v60 = vmul.f32 %v13933_v31, %v5141_v18  ;;  %v4868_v1 = vmul.f32 %v4852_v25, %v13326_v45  ;;  %v4954_v51 = vmul.f32 %v4918_v26, %v13326_v45 }
 0xa57   : > { %v13957_v9 = vadd.f32 %v13945_v7, %v5160_v60  ;;  %v13960_v5 = vsub.f32 %v13846_v16, %v4868_v1  ;;  %v13968_v62 = vadd.f32 1e-05, %v4954_v51  ;;  %v13973_v16 = vadd.f32 1e-05, %v4953_v27 }
 0xa58   : > { %v5163_v60 = vmul.f32 %v13933_v31, %v5144_v52 }
 0xa59   : > { %16913 = vst [vmem:[#allocation20_spill] sm:$0xff] %v13957_v9  ;;  %v5195_v33 = vpack.c.bf16 %v13954_v43, %v13957_v9  ;;  %v4900_v0 = vmul.f32 %v13960_v5, %v13960_v5  ;;  %10903 = vrsqrt.f32 %v13968_v62  ;;  %vm5037_vm11 = vweird.f32 %v13968_v62 }
 0xa5a   : > { %10905 = vrsqrt.f32 %v13973_v16  ;;  %vm5027_vm13 = vweird.f32 %v13973_v16 }
 0xa5b   : > { %10088 = vmatmul.msk.bf16.vlgmr.msra.gmra.mxu3 %vm701_vm0, %v5195_v33  ;;  %10109 = vmatmul.msk.bf16.vlgmr.msra.gmra.mxu0 %vm701_vm0, %v5195_v33  ;;  %v4946_v36 = vsel %vm701_vm0, %v4900_v0, 0.0 }
 0xa5c   : > { %10130 = vmatmul.msk.bf16.vlgmr.msra.gmra.mxu1 %vm701_vm0, %v5195_v33  ;;  %4947 = vadd.xlane.f32.xlu2 %v4946_v36  ;;  %v4909_v48 = vpop.xlane.xlu2 %4908  ;;  %v4921_v35 = vpop.xlane.xlu1 %4920 }
 0xa5d   : > { %v4951_v28 = vmul.f32 %v4909_v48, %v13326_v45  ;;  %v4955_v54 = vmul.f32 %v4921_v35, %v13326_v45 }
 0xa5f   : > { %v4967_v50 = vadd.f32 1e-05, %v4951_v28  ;;  %v13979_v21 = vpop.eup %10903  ;;  %v13993_v23 = vadd.f32 1e-05, %v4955_v54 }
 0xa60   : > { %v13981_v38 = vpop.eup %10905  ;;  %v5032_v29 = vmul.f32 %v13979_v21, %v13968_v62  ;;  %vm5038_vm9 = vweird.f32 %v13979_v21 }
 0xa61   : > { %10907 = vrsqrt.f32 %v4967_v50  ;;  %v5022_v17 = vmul.f32 %v13981_v38, %v13973_v16  ;;  %vm5007_vm7 = vweird.f32 %v4967_v50  ;;  %vm5028_vm10 = vweird.f32 %v13981_v38  ;;  %vm5039_vm12 = vmor %vm5037_vm11, %vm5038_vm9 }
 0xa62   : > { %v5033_v61 = vmul.f32 %v13979_v21, %v5032_v29  ;;  %vm5029_vm14 = vmor %vm5027_vm13, %vm5028_vm10 }
 0xa63   : > { %v5023_v2 = vmul.f32 %v13981_v38, %v5022_v17 }
 0xa64   : > { %v4924_v24 = vpop.xlane.xlu2 %4923  ;;  %v5034_v40 = vmul.f32 0.5, %v5033_v61 }
 0xa65   : > { %v4956_v22 = vmul.f32 %v4924_v24, %v13326_v45  ;;  %v5024_v44 = vmul.f32 0.5, %v5023_v2 }
 0xa66   : > { %v5035_v18 = vsub.f32 1.5, %v5034_v40 }
 0xa67   : > { %v10908_v49 = vpop.eup %10907  ;;  %v13989_v32 = vadd.f32 1e-05, %v4956_v22  ;;  %v5025_v10 = vsub.f32 1.5, %v5024_v44 }
 0xa68   : > { %v5002_v46 = vmul.f32 %v10908_v49, %v4967_v50  ;;  %vm5008_vm6 = vweird.f32 %v10908_v49  ;;  %v5036_v51 = vmul.f32 %v13979_v21, %v5035_v18 }
 0xa69   : > { %10909 = vrsqrt.f32 %v13989_v32  ;;  %vm5009_vm8 = vmor %vm5007_vm7, %vm5008_vm6  ;;  %v5026_v0 = vmul.f32 %v13981_v38, %v5025_v10  ;;  %vm5057_vm6 = vweird.f32 %v13989_v32 }
 0xa6a   : > { %v5003_v58 = vmul.f32 %v10908_v49, %v5002_v46  ;;  %10911 = vrsqrt.f32 %v13993_v23  ;;  %v5040_v50 = vsel %vm5039_vm12, %v13979_v21, %v5036_v51 }
 0xa6b   : > { %v5030_v20 = vsel %vm5029_vm14, %v13981_v38, %v5026_v0  ;;  %v5146_v16 = vmul.f32 %v5040_v50, %v13836_v56 }
 0xa6c   : > { %v5004_v8 = vmul.f32 0.5, %v5003_v58  ;;  %v5145_v22 = vmul.f32 %v5030_v20, %v13813_v57 }
 0xa6e   : > { %v5005_v14 = vsub.f32 1.5, %v5004_v8  ;;  %v5164_v38 = vmul.f32 %v13933_v31, %v5145_v22 }
 0xa6f   : > { %v13999_v26 = vpop.eup %10909 }
 0xa70   : > { %v5006_v30 = vmul.f32 %v10908_v49, %v5005_v14  ;;  %v14003_v12 = vpop.eup %10911  ;;  %v5052_v27 = vmul.f32 %v13999_v26, %v13989_v32  ;;  %vm5058_vm15 = vweird.f32 %v13999_v26  ;;  %v14054_v2 = vadd.f32 %v13945_v7, %v5164_v38 }
 0xa71   : > { %v4927_v1 = vpop.xlane.xlu2 %4926  ;;  %v5042_v36 = vmul.f32 %v14003_v12, %v13993_v23  ;;  %vm5048_vm4 = vweird.f32 %v14003_v12  ;;  %vm5059_vm7 = vmor %vm5057_vm6, %vm5058_vm15 }
 0xa72   : > { %v5010_v34 = vsel %vm5009_vm8, %v10908_v49, %v5006_v30  ;;  %v4957_v63 = vmul.f32 %v4927_v1, %v13326_v45  ;;  %v5053_v13 = vmul.f32 %v13999_v26, %v5052_v27  ;;  %v5165_v49 = vmul.f32 %v13933_v31, %v5146_v16  ;;  %16917 = vst [vmem:[#allocation21_spill] sm:$0xff] %v14054_v2 }
 0xa73   : > { %v5143_v25 = vmul.f32 %v5010_v34, %v13849_v55  ;;  %v14015_v55 = vadd.f32 %v13945_v7, %v5163_v60  ;;  %v5043_v35 = vmul.f32 %v14003_v12, %v5042_v36  ;;  %vm5047_vm8 = vweird.f32 %v13993_v23 }
 0xa74   : > { %v14028_v24 = vadd.f32 1e-05, %v4957_v63  ;;  %v5054_v21 = vmul.f32 0.5, %v5053_v13  ;;  %v14046_v56 = vadd.f32 %v13945_v7, %v5165_v49  ;;  %vm5049_vm9 = vmor %vm5047_vm8, %vm5048_vm4 }
 0xa75   : > { %v5162_v6 = vmul.f32 %v13933_v31, %v5143_v25  ;;  %16915 = vst [vmem:[#allocation23_spill] sm:$0xff] %v14015_v55  ;;  %v5044_v29 = vmul.f32 0.5, %v5043_v35 }
 0xa76   : > { %v5055_v54 = vsub.f32 1.5, %v5054_v21  ;;  %16916 = vst [vmem:[#allocation30_spill] sm:$0xff] %v14046_v56  ;;  %v5197_v44 = vpack.c.bf16 %v14046_v56, %v14054_v2  ;;  %vm5067_vm14 = vweird.f32 %v14028_v24 }
 0xa77   : > { %v14012_v33 = vadd.f32 %v13945_v7, %v5162_v6  ;;  %v5045_v17 = vsub.f32 1.5, %v5044_v29 }
 0xa78   : > { %v5056_v58 = vmul.f32 %v13999_v26, %v5055_v54 }
 0xa79   : > { %16914 = vst [vmem:[#allocation29_spill] sm:$0xff] %v14012_v33  ;;  %v4930_v48 = vpop.xlane.xlu0 %4929  ;;  %v5196_v28 = vpack.c.bf16 %v14015_v55, %v14012_v33  ;;  %v5046_v8 = vmul.f32 %v14003_v12, %v5045_v17 }
 0xa7a   : > { %v4958_v53 = vmul.f32 %v4930_v48, %v13326_v45  ;;  %v5060_v30 = vsel %vm5059_vm7, %v13999_v26, %v5056_v58 }
 0xa7b   : > { %10089 = vmatmul.msk.bf16.gmra.mxu3 %vm701_vm0, %v5196_v28  ;;  %10110 = vmatmul.msk.bf16.gmra.mxu0 %vm701_vm0, %v5196_v28  ;;  %v5050_v32 = vsel %vm5049_vm9, %v14003_v12, %v5046_v8  ;;  %v5148_v10 = vmul.f32 %v5060_v30, %v13863_v15 }
 0xa7c   : > { %v14030_v62 = vadd.f32 1e-05, %v4958_v53  ;;  %10131 = vmatmul.msk.bf16.gmra.mxu1 %vm701_vm0, %v5196_v28  ;;  %v5147_v26 = vmul.f32 %v5050_v32, %v13852_v11 }
 0xa7d   : > { %v5167_v6 = vmul.f32 %v13933_v31, %v5148_v10 }
 0xa7e   : > { %10913 = vrsqrt.f32 %v14030_v62  ;;  %v5166_v63 = vmul.f32 %v13933_v31, %v5147_v26  ;;  %vm5077_vm12 = vweird.f32 %v14030_v62 }
 0xa7f   : > { %10915 = vrsqrt.f32 %v14028_v24  ;;  %v14075_v12 = vadd.f32 %v13945_v7, %v5167_v6 }
 0xa80   : > { %v14080_v11 = vadd.f32 %v13945_v7, %v5166_v63 }
 0xa81   : > { %v4933_v46 = vpop.xlane.xlu0 %4932  ;;  %16918 = vst [vmem:[#allocation27_spill] sm:$0xff] %v14075_v12 }
 0xa82   : > { %v4959_v59 = vmul.f32 %v4933_v46, %v13326_v45  ;;  %16919 = vst [vmem:[#allocation25_spill] sm:$0xff] %v14080_v11  ;;  %v5198_v50 = vpack.c.bf16 %v14075_v12, %v14080_v11 }
 0xa84   : > { %v14042_v42 = vpop.eup %10913  ;;  %v4975_v34 = vadd.f32 1e-05, %v4959_v59 }
 0xa85   : > { %v10916_v61 = vpop.eup %10915  ;;  %v5072_v57 = vmul.f32 %v14042_v42, %v14030_v62  ;;  %vm5078_vm10 = vweird.f32 %v14042_v42 }
 0xa86   : > { %v5062_v40 = vmul.f32 %v10916_v61, %v14028_v24  ;;  %vm5068_vm11 = vweird.f32 %v10916_v61  ;;  %vm5079_vm13 = vmor %vm5077_vm12, %vm5078_vm10  ;;  %vm5087_vm9 = vweird.f32 %v4975_v34 }
 0xa87   : > { %v5073_v18 = vmul.f32 %v14042_v42, %v5072_v57  ;;  %vm5069_vm15 = vmor %vm5067_vm14, %vm5068_vm11 }
 0xa88   : > { %v5063_v60 = vmul.f32 %v10916_v61, %v5062_v40 }
 0xa89   : > { %v4936_v14 = vpop.xlane.xlu1 %4935  ;;  %v5074_v23 = vmul.f32 0.5, %v5073_v18 }
 0xa8a   : > { %v4960_v52 = vmul.f32 %v4936_v14, %v13326_v45  ;;  %v5064_v1 = vmul.f32 0.5, %v5063_v60 }
 0xa8b   : > { %10090 = vmatmul.msk.bf16.gmra.mxu3 %vm701_vm0, %v5197_v44  ;;  %10111 = vmatmul.msk.bf16.gmra.mxu0 %vm701_vm0, %v5197_v44  ;;  %v5075_v51 = vsub.f32 1.5, %v5074_v23 }
 0xa8c   : > { %v4976_v25 = vadd.f32 1e-05, %v4960_v52  ;;  %10132 = vmatmul.msk.bf16.gmra.mxu1 %vm701_vm0, %v5197_v44  ;;  %v5065_v0 = vsub.f32 1.5, %v5064_v1 }
 0xa8d   : > { %v5076_v48 = vmul.f32 %v14042_v42, %v5075_v51 }
 0xa8e   : > { %10917 = vrsqrt.f32 %v4976_v25  ;;  %v5066_v53 = vmul.f32 %v10916_v61, %v5065_v0  ;;  %vm5097_vm7 = vweird.f32 %v4976_v25 }
 0xa8f   : > { %10919 = vrsqrt.f32 %v4975_v34  ;;  %v5080_v13 = vsel %vm5079_vm13, %v14042_v42, %v5076_v48 }
 0xa90   : > { %v5070_v35 = vsel %vm5069_vm15, %v10916_v61, %v5066_v53  ;;  %v5150_v62 = vmul.f32 %v5080_v13, %v13879_v19 }
 0xa91   : > { %v5149_v22 = vmul.f32 %v5070_v35, %v13872_v37 }
 0xa92   : > { %v5169_v24 = vmul.f32 %v13933_v31, %v5150_v62 }
 0xa93   : > { %v5168_v54 = vmul.f32 %v13933_v31, %v5149_v22 }
 0xa94   : > { %v10918_v27 = vpop.eup %10917  ;;  %v14095_v38 = vadd.f32 %v13945_v7, %v5169_v24 }
 0xa95   : > { %v10920_v36 = vpop.eup %10919  ;;  %v5092_v15 = vmul.f32 %v10918_v27, %v4976_v25  ;;  %vm5098_vm4 = vweird.f32 %v10918_v27  ;;  %v14099_v19 = vadd.f32 %v13945_v7, %v5168_v54 }
 0xa96   : > { %v5082_v28 = vmul.f32 %v10920_v36, %v4975_v34  ;;  %16920 = vst [vmem:[#allocation33_spill] sm:$0xff] %v14095_v38  ;;  %vm5088_vm6 = vweird.f32 %v10920_v36  ;;  %vm5099_vm8 = vmor %vm5097_vm7, %vm5098_vm4 }
 0xa97   : > { %v5093_v20 = vmul.f32 %v10918_v27, %v5092_v15  ;;  %16921 = vst [vmem:[#allocation35_spill] sm:$0xff] %v14099_v19  ;;  %v5199_v57 = vpack.c.bf16 %v14095_v38, %v14099_v19  ;;  %vm5089_vm10 = vmor %vm5087_vm9, %vm5088_vm6 }
 0xa98   : > { %v5083_v16 = vmul.f32 %v10920_v36, %v5082_v28 }
 0xa99   : > { %v5094_v21 = vmul.f32 0.5, %v5093_v20 }
 0xa9a   : > { %v5084_v29 = vmul.f32 0.5, %v5083_v16 }
 0xa9b   : > { %10091 = vmatmul.msk.bf16.gmra.mxu3 %vm701_vm0, %v5198_v50  ;;  %10112 = vmatmul.msk.bf16.gmra.mxu0 %vm701_vm0, %v5198_v50  ;;  %v5095_v49 = vsub.f32 1.5, %v5094_v21 }
 0xa9c   : > { %10133 = vmatmul.msk.bf16.gmra.mxu1 %vm701_vm0, %v5198_v50  ;;  %v5085_v42 = vsub.f32 1.5, %v5084_v29 }
 0xa9d   : > { %v5096_v17 = vmul.f32 %v10918_v27, %v5095_v49 }
 0xa9e   : > { %v5086_v58 = vmul.f32 %v10920_v36, %v5085_v42  ;;  %v14142_v42 = vld [vmem:[%s16696_s6 + $0x1] ss:$0 sm:$0xff] }
 0xa9f   : > { %v5100_v59 = vsel %vm5099_vm8, %v10918_v27, %v5096_v17 }
 0xaa0   : > { %v5090_v8 = vsel %vm5089_vm10, %v10920_v36, %v5086_v58  ;;  %v5152_v40 = vmul.f32 %v5100_v59, %v13899_v4  ;;  %v14148_v59 = vld [vmem:[%s16697_s7 + $0x1] ss:$0 sm:$0xff] }
 0xaa1   : > { %v5151_v52 = vmul.f32 %v5090_v8, %v13886_v41 }
 0xaa2   : > { %v5171_v34 = vmul.f32 %v13933_v31, %v5152_v40 }
 0xaa3   : > { %v5170_v32 = vmul.f32 %v13933_v31, %v5151_v52 }
 0xaa4   : > { %v14112_v10 = vadd.f32 %v13945_v7, %v5171_v34 }
 0xaa5   : > { %v14115_v4 = vadd.f32 %v13945_v7, %v5170_v32 }
 0xaa6   : > { %16922 = vst [vmem:[#allocation32_spill] sm:$0xff] %v14112_v10 }
 0xaa7   : > { %v4939_v46 = vpop.xlane.xlu2 %4938  ;;  %16923 = vst [vmem:[#allocation34_spill] sm:$0xff] %v14115_v4  ;;  %v5200_v1 = vpack.c.bf16 %v14112_v10, %v14115_v4 }
 0xaa8   : > { %v4961_v61 = vmul.f32 %v4939_v46, %v13326_v45 }
 0xaaa   : > { %v4977_v37 = vadd.f32 1e-05, %v4961_v61 }
 0xaab   : > { %10092 = vmatmul.msk.bf16.gmra.mxu3 %vm701_vm0, %v5199_v57  ;;  %10113 = vmatmul.msk.bf16.gmra.mxu0 %vm701_vm0, %v5199_v57 }
 0xaac   : > { %10921 = vrsqrt.f32 %v4977_v37  ;;  %10134 = vmatmul.msk.bf16.gmra.mxu1 %vm701_vm0, %v5199_v57  ;;  %vm5107_vm12 = vweird.f32 %v4977_v37 }
 0xaaf   : > { %v4942_v14 = vpop.xlane.xlu0 %4941 }
 0xab0   : > { %v4962_v44 = vmul.f32 %v4942_v14, %v13326_v45 }
 0xab2   : > { %v10922_v30 = vpop.eup %10921  ;;  %v4978_v18 = vadd.f32 1e-05, %v4962_v44 }
 0xab3   : > { %v5102_v25 = vmul.f32 %v10922_v30, %v4977_v37  ;;  %vm5108_vm11 = vweird.f32 %v10922_v30 }
 0xab4   : > { %10923 = vrsqrt.f32 %v4978_v18  ;;  %vm5109_vm13 = vmor %vm5107_vm12, %vm5108_vm11  ;;  %vm5117_vm15 = vweird.f32 %v4978_v18 }
 0xab5   : > { %v5103_v60 = vmul.f32 %v10922_v30, %v5102_v25 }
 0xab7   : > { %v5104_v23 = vmul.f32 0.5, %v5103_v60  ;;  %v14157_v60 = vld [vmem:[%s16695_s5 + $0x1] ss:$0 sm:$0xff] }
 0xab9   : > { %v5105_v26 = vsub.f32 1.5, %v5104_v23 }
 0xaba   : > { %v10924_v41 = vpop.eup %10923 }
 0xabb   : > { %v5106_v6 = vmul.f32 %v10922_v30, %v5105_v26  ;;  %v5112_v51 = vmul.f32 %v10924_v41, %v4978_v18  ;;  %10093 = vmatmul.msk.bf16.gmra.mxu3 %vm701_vm0, %v5200_v1  ;;  %10114 = vmatmul.msk.bf16.gmra.mxu0 %vm701_vm0, %v5200_v1  ;;  %vm5118_vm14 = vweird.f32 %v10924_v41 }
 0xabc   : > { %10135 = vmatmul.msk.bf16.gmra.mxu1 %vm701_vm0, %v5200_v1  ;;  %vm5119_vm4 = vmor %vm5117_vm15, %vm5118_vm14 }
 0xabd   : > { %v5113_v27 = vmul.f32 %v10924_v41, %v5112_v51  ;;  %v5110_v63 = vsel %vm5109_vm13, %v10922_v30, %v5106_v6 }
 0xabe   : > { %v5153_v48 = vmul.f32 %v5110_v63, %v13907_v39 }
 0xabf   : > { %v5114_v0 = vmul.f32 0.5, %v5113_v27 }
 0xac0   : > { %v5172_v50 = vmul.f32 %v13933_v31, %v5153_v48 }
 0xac1   : > { %v5115_v36 = vsub.f32 1.5, %v5114_v0 }
 0xac2   : > { %v14128_v62 = vadd.f32 %v13945_v7, %v5172_v50 }
 0xac3   : > { %v5116_v15 = vmul.f32 %v10924_v41, %v5115_v36 }
 0xac4   : > { %16924 = vst [vmem:[#allocation36_spill] sm:$0xff] %v14128_v62 }
 0xac5   : > { %v5120_v53 = vsel %vm5119_vm4, %v10924_v41, %v5116_v15 }
 0xac6   : > { %v5154_v28 = vmul.f32 %v5120_v53, %v13917_v3 }
 0xac7   : > { %v4945_v13 = vpop.xlane.xlu1 %4944 }
 0xac8   : > { %v4963_v20 = vmul.f32 %v4945_v13, %v13326_v45  ;;  %v5173_v35 = vmul.f32 %v13933_v31, %v5154_v28 }
 0xaca   : > { %v4979_v16 = vadd.f32 1e-05, %v4963_v20  ;;  %v14131_v21 = vadd.f32 %v13945_v7, %v5173_v35 }
 0xacc   : > { %16925 = vst [vmem:[#allocation28_spill] sm:$0xff] %v14131_v21  ;;  %10925 = vrsqrt.f32 %v4979_v16  ;;  %v5201_v39 = vpack.c.bf16 %v14131_v21, %v14128_v62  ;;  %vm5127_vm7 = vweird.f32 %v4979_v16 }
 0xace   : > { %10094 = vmatmul.msk.bf16.gmra.mxu3 %vm701_vm0, %v5201_v39  ;;  %10115 = vmatmul.msk.bf16.gmra.mxu0 %vm701_vm0, %v5201_v39 }
 0xacf   : > { %10136 = vmatmul.msk.bf16.gmra.mxu1 %vm701_vm0, %v5201_v39  ;;  %v4948_v3 = vpop.xlane.xlu2 %4947 }
 0xad0   : > { %v4964_v22 = vmul.f32 %v4948_v3, %v13326_v45 }
 0xad2   : > { %v10926_v29 = vpop.eup %10925  ;;  %v4980_v24 = vadd.f32 1e-05, %v4964_v22 }
 0xad3   : > { %v5122_v49 = vmul.f32 %v10926_v29, %v4979_v16  ;;  %vm5128_vm6 = vweird.f32 %v10926_v29 }
 0xad4   : > { %10927 = vrsqrt.f32 %v4980_v24  ;;  %vm5129_vm8 = vmor %vm5127_vm7, %vm5128_vm6  ;;  %vm5137_vm10 = vweird.f32 %v4980_v24 }
 0xad5   : > { %v5123_v54 = vmul.f32 %v10926_v29, %v5122_v49 }
 0xad7   : > { %v5124_v17 = vmul.f32 0.5, %v5123_v54 }
 0xad8   : > { %v5329_v46 = vpop.f32.mrf.mxu0 }
 0xad9   : > { %v5125_v61 = vsub.f32 1.5, %v5124_v17  ;;  %v5330_v58 = vadd.f32 %v14142_v42, %v5329_v46  ;;  %v5400_v37 = vpop.f32.mrf.mxu1 }
 0xada   : > { %v10928_v57 = vpop.eup %10927  ;;  %v5401_v44 = vadd.f32 %v14148_v59, %v5400_v37 }
 0xadb   : > { %v5126_v8 = vmul.f32 %v10926_v29, %v5125_v61  ;;  %v5132_v40 = vmul.f32 %v10928_v57, %v4980_v24  ;;  %v5568_v14 = vpack.c.bf16 %v5330_v58, %v5330_v58  ;;  %vm5138_vm9 = vweird.f32 %v10928_v57 }
 0xadc   : > { %v5696_v1 = vpack.c.bf16 %v5401_v44, %v5401_v44  ;;  %vm5139_vm11 = vmor %vm5137_vm10, %vm5138_vm9 }
 0xadd   : > { %v5133_v52 = vmul.f32 %v10928_v57, %v5132_v40  ;;  %5632 = vrot.lane.b32.xlu1 %v5568_v14, %s11259_s3  ;;  %5600 = vrot.lane.b32.xlu0 %v5568_v14, %s11258_s25  ;;  %v5130_v18 = vsel %vm5129_vm8, %v10926_v29, %v5126_v8  ;;  %v5827_v48 = vunpack.c.l.b16 %v5568_v14 }
 0xade   : > { %5664 = vrot.lane.b32.xlu2 %v5568_v14, %s11260_s28  ;;  %v5258_v30 = vpop.f32.mrf.mxu3  ;;  %v5155_v41 = vmul.f32 %v5130_v18, %v13937_v47  ;;  %v7493_v53 = vunpack.c.l.b16 %v5696_v1 }
 0xadf   : > { %v5134_v34 = vmul.f32 0.5, %v5133_v52  ;;  %v5259_v36 = vadd.f32 %v14157_v60, %v5258_v30 }
 0xae0   : > { %v5331_v25 = vpop.f32.mrf.mxu0  ;;  %v5174_v50 = vmul.f32 %v13933_v31, %v5155_v41 }
 0xae1   : > { %v5135_v32 = vsub.f32 1.5, %v5134_v34  ;;  %v5332_v23 = vadd.f32 %v14142_v42, %v5331_v25  ;;  %v5402_v26 = vpop.f32.mrf.mxu1  ;;  %v5440_v3 = vpack.c.bf16 %v5259_v36, %v5259_v36 }
 0xae2   : > { %v5403_v6 = vadd.f32 %v14148_v59, %v5402_v26 }
 0xae3   : > { %v5136_v51 = vmul.f32 %v10928_v57, %v5135_v32  ;;  %v5569_v27 = vpack.c.bf16 %v5332_v23, %v5332_v23  ;;  %v5824_v17 = vunpack.c.l.b16 %v5440_v3 }
 0xae4   : > { %v14162_v63 = vpack.c.bf16 %v5403_v6, %v5403_v6 }
 0xae5   : > { %v5140_v0 = vsel %vm5139_vm11, %v10928_v57, %v5136_v51  ;;  %5760 = vrot.lane.b32.xlu1 %v5696_v1, %s11259_s3  ;;  %5666 = vrot.lane.b32.xlu0 %v5569_v27, %s11260_s28  ;;  %v5828_v15 = vunpack.c.l.b16 %v5569_v27 }
 0xae6   : > { %v5156_v47 = vmul.f32 %v5140_v0, %v13960_v5  ;;  %5728 = vrot.lane.b32.xlu2 %v5696_v1, %s11258_s25  ;;  %v5260_v28 = vpop.f32.mrf.mxu3  ;;  %v7494_v13 = vunpack.c.l.b16 %v14162_v63  ;;  %v14177_v5 = vadd.f32 %v13945_v7, %v5174_v50 }
 0xae7   : > { %v5261_v20 = vadd.f32 %v14157_v60, %v5260_v28  ;;  %v5829_v35 = vpack.c.b16 %v5828_v15, %v5827_v48 }
 0xae8   : > { %v5175_v16 = vmul.f32 %v13933_v31, %v5156_v47  ;;  %v14173_v39 = vpack.c.b16 %v7494_v13, %v7493_v53  ;;  %16926 = vst [vmem:[#allocation31_spill] sm:$0xff] %v14177_v5 }
 0xae9   : > { %v5441_v22 = vpack.c.bf16 %v5261_v20, %v5261_v20  ;;  %v5834_v29 = vsel %vm1303_vm1, %v5829_v35, 0 }
 0xaea   : > { %5843 = vmatpush.bf16.xpose.msra.mxu2 %v5834_v29  ;;  %v14180_v24 = vadd.f32 %v13945_v7, %v5175_v16 }
 0xaeb   : > { %v5825_v49 = vunpack.c.l.b16 %v5441_v22 }
 0xaec   : > { %16927 = vst [vmem:[#allocation37_spill] sm:$0xff] %v14180_v24  ;;  %v5202_v54 = vpack.c.bf16 %v14180_v24, %v14177_v5 }
 0xaed   : > { %5792 = vrot.lane.b32.xlu1 %v5696_v1, %s11260_s28  ;;  %5794 = vrot.lane.b32.xlu0 %v14162_v63, %s11260_s28  ;;  %v5826_v31 = vpack.c.b16 %v5825_v49, %v5824_v17 }
 0xaee   : > { %5472 = vrot.lane.b32.xlu2 %v5440_v3, %s11258_s25  ;;  %10095 = vmatmul.msk.bf16.gmra.mxu3 %vm701_vm0, %v5202_v54 }
 0xaef   : > { %10116 = vmatmul.msk.bf16.gmra.mxu0 %vm701_vm0, %v5202_v54  ;;  %10137 = vmatmul.msk.bf16.gmra.mxu1 %vm701_vm0, %v5202_v54 }
 0xaf1   : > { %10138 = vmatmul.msk.bf16.vlgmr.msra.gmra.mxu2 %vm1303_vm1, %v5826_v31 }
 0xaf5   : > { %5474 = vrot.lane.b32.xlu0 %v5441_v22, %s11258_s25  ;;  %5504 = vrot.lane.b32.xlu1 %v5440_v3, %s11259_s3 }
 0xaf6   : > { %5634 = vrot.lane.b32.xlu2 %v5569_v27, %s11259_s3 }
 0xaf8   : > { %v5334_v7 = vpop.f32.mrf.mxu0 }
 0xaf9   : > { %v5405_v46 = vpop.f32.mrf.mxu1  ;;  %v5335_v61 = vadd.f32 %v14142_v42, %v5334_v7 }
 0xafa   : > { %v5406_v58 = vadd.f32 %v14148_v59, %v5405_v46 }
 0xafb   : > { %v14199_v8 = vpack.c.bf16 %v5335_v61, %v5335_v61 }
 0xafc   : > { %v14202_v52 = vpack.c.bf16 %v5406_v58, %v5406_v58 }
 0xafd   : > { %5536 = vrot.lane.b32.xlu1 %v5440_v3, %s11260_s28  ;;  %v5853_v25 = vunpack.c.l.b16 %v14199_v8 }
 0xafe   : > { %5506 = vrot.lane.b32.xlu2 %v5441_v22, %s11259_s3  ;;  %v5263_v37 = vpop.f32.mrf.mxu3  ;;  %v7519_v23 = vunpack.c.l.b16 %v14202_v52 }
 0xaff   : > { %v5264_v34 = vadd.f32 %v14157_v60, %v5263_v37 }
 0xb00   : > { %v5336_v57 = vpop.f32.mrf.mxu0 }
 0xb01   : > { %v5337_v40 = vadd.f32 %v14142_v42, %v5336_v57  ;;  %v5407_v14 = vpop.f32.mrf.mxu1  ;;  %v14221_v0 = vpack.c.bf16 %v5264_v34, %v5264_v34 }
 0xb02   : > { %v5408_v44 = vadd.f32 %v14148_v59, %v5407_v14 }
 0xb03   : > { %v14205_v30 = vpack.c.bf16 %v5337_v40, %v5337_v40  ;;  %v5850_v47 = vunpack.c.l.b16 %v14221_v0 }
 0xb04   : > { %v14207_v18 = vpack.c.bf16 %v5408_v44, %v5408_v44 }
 0xb05   : > { %5602 = vrot.lane.b32.xlu1 %v5569_v27, %s11258_s25  ;;  %5638 = vrot.lane.b32.xlu0 %v14205_v30, %s11259_s3  ;;  %v5854_v32 = vunpack.c.l.b16 %v14205_v30 }
 0xb06   : > { %5538 = vrot.lane.b32.xlu2 %v5441_v22, %s11260_s28  ;;  %v5265_v26 = vpop.f32.mrf.mxu3  ;;  %v7520_v41 = vunpack.c.l.b16 %v14207_v18 }
 0xb07   : > { %v5266_v1 = vadd.f32 %v14157_v60, %v5265_v26  ;;  %v5855_v6 = vpack.c.b16 %v5854_v32, %v5853_v25 }
 0xb08   : > { %v5339_v51 = vpop.f32.mrf.mxu0  ;;  %v14219_v27 = vpack.c.b16 %v7520_v41, %v7519_v23 }
 0xb09   : > { %v14223_v36 = vpack.c.bf16 %v5266_v1, %v5266_v1  ;;  %v5860_v48 = vsel %vm1303_vm1, %v5855_v6, 0  ;;  %v5340_v53 = vadd.f32 %v14142_v42, %v5339_v51  ;;  %v5410_v32 = vpop.f32.mrf.mxu1 }
 0xb0a   : > { %5869 = vmatpush.bf16.xpose.msrb.mxu3 %v5860_v48  ;;  %v5411_v6 = vadd.f32 %v14148_v59, %v5410_v32 }
 0xb0b   : > { %v5851_v15 = vunpack.c.l.b16 %v14223_v36  ;;  %v14235_v20 = vpack.c.bf16 %v5340_v53, %v5340_v53 }
 0xb0c   : > { %v14287_v53 = vpack.c.bf16 %v5411_v6, %v5411_v6 }
 0xb0d   : > { %5730 = vrot.lane.b32.xlu1 %v14162_v63, %s11258_s25  ;;  %5734 = vrot.lane.b32.xlu0 %v14207_v18, %s11258_s25  ;;  %v5852_v50 = vpack.c.b16 %v5851_v15, %v5850_v47  ;;  %v5879_v22 = vunpack.c.l.b16 %v14235_v20 }
 0xb0e   : > { %5636 = vrot.lane.b32.xlu2 %v14199_v8, %s11259_s3  ;;  %v5268_v28 = vpop.f32.mrf.mxu3 }
 0xb0f   : > { %v5269_v3 = vadd.f32 %v14157_v60, %v5268_v28 }
 0xb10   : > { %v5341_v13 = vpop.f32.mrf.mxu0 }
 0xb11   : > { %v5342_v35 = vadd.f32 %v14142_v42, %v5341_v13  ;;  %10139 = vmatmul.msk.bf16.vlgmr.msrb.gmra.mxu3 %vm1303_vm1, %v5852_v50  ;;  %v14251_v7 = vpack.c.bf16 %v5269_v3, %v5269_v3 }
 0xb13   : > { %v14239_v16 = vpack.c.bf16 %v5342_v35, %v5342_v35  ;;  %v5876_v58 = vunpack.c.l.b16 %v14251_v7 }
 0xb15   : > { %5762 = vrot.lane.b32.xlu1 %v14162_v63, %s11259_s3  ;;  %5798 = vrot.lane.b32.xlu0 %v14207_v18, %s11260_s28  ;;  %v5880_v29 = vunpack.c.l.b16 %v14239_v16 }
 0xb16   : > { %5732 = vrot.lane.b32.xlu2 %v14202_v52, %s11258_s25  ;;  %v5270_v49 = vpop.f32.mrf.mxu3 }
 0xb17   : > { %v5271_v54 = vadd.f32 %v14157_v60, %v5270_v49  ;;  %v5881_v17 = vpack.c.b16 %v5880_v29, %v5879_v22 }
 0xb18   : > { %v5344_v31 = vpop.f32.mrf.mxu0 }
 0xb19   : > { %v14253_v63 = vpack.c.bf16 %v5271_v54, %v5271_v54  ;;  %v5886_v46 = vsel %vm1303_vm1, %v5881_v17, 0  ;;  %v5345_v37 = vadd.f32 %v14142_v42, %v5344_v31 }
 0xb1a   : > { %5895 = vmatpush.bf16.xpose.msrb.mxu2 %v5886_v46 }
 0xb1b   : > { %v5877_v61 = vunpack.c.l.b16 %v14253_v63  ;;  %v14265_v44 = vpack.c.bf16 %v5345_v37, %v5345_v37 }
 0xb1d   : > { %5604 = vrot.lane.b32.xlu1 %v14199_v8, %s11258_s25  ;;  %5478 = vrot.lane.b32.xlu0 %v14223_v36, %s11258_s25  ;;  %v5878_v40 = vpack.c.b16 %v5877_v61, %v5876_v58  ;;  %v5905_v26 = vunpack.c.l.b16 %v14265_v44 }
 0xb1e   : > { %5764 = vrot.lane.b32.xlu2 %v14202_v52, %s11259_s3  ;;  %v5273_v57 = vpop.f32.mrf.mxu3 }
 0xb1f   : > { %v5274_v23 = vadd.f32 %v14157_v60, %v5273_v57 }
 0xb20   : > { %v5346_v14 = vpop.f32.mrf.mxu0 }
 0xb21   : > { %v5347_v34 = vadd.f32 %v14142_v42, %v5346_v14  ;;  %10140 = vmatmul.msk.bf16.vlgmr.msrb.gmra.mxu2 %vm1303_vm1, %v5878_v40 }
 0xb23   : > { %v14269_v25 = vpack.c.bf16 %v5347_v34, %v5347_v34 }
 0xb25   : > { %5668 = vrot.lane.b32.xlu1 %v14199_v8, %s11260_s28  ;;  %5608 = vrot.lane.b32.xlu0 %v14235_v20, %s11258_s25  ;;  %v5906_v41 = vunpack.c.l.b16 %v14269_v25  ;;  %v14282_v8 = vpack.c.bf16 %v5274_v23, %v5274_v23  ;;  %v5412_v23 = vpop.f32.mrf.mxu1 }
 0xb26   : > { %5796 = vrot.lane.b32.xlu2 %v14202_v52, %s11260_s28  ;;  %v5275_v1 = vpop.f32.mrf.mxu3  ;;  %v5413_v6 = vadd.f32 %v14148_v59, %v5412_v23 }
 0xb27   : > { %v5276_v51 = vadd.f32 %v14157_v60, %v5275_v1  ;;  %v5907_v48 = vpack.c.b16 %v5906_v41, %v5905_v26  ;;  %v5902_v50 = vunpack.c.l.b16 %v14282_v8 }
 0xb28   : > { %v5349_v15 = vpop.f32.mrf.mxu0 }
 0xb29   : > { %v14284_v47 = vpack.c.bf16 %v5276_v51, %v5276_v51  ;;  %v5912_v52 = vsel %vm1303_vm1, %v5907_v48, 0  ;;  %v5350_v13 = vadd.f32 %v14142_v42, %v5349_v15 }
 0xb2a   : > { %5921 = vmatpush.bf16.xpose.msra.mxu3 %v5912_v52 }
 0xb2b   : > { %v5903_v28 = vunpack.c.l.b16 %v14284_v47  ;;  %v14298_v29 = vpack.c.bf16 %v5350_v13, %v5350_v13 }
 0xb2d   : > { %5508 = vrot.lane.b32.xlu1 %v14221_v0, %s11259_s3  ;;  %5800 = vrot.lane.b32.xlu0 %v14287_v53, %s11260_s28  ;;  %v5904_v3 = vpack.c.b16 %v5903_v28, %v5902_v50  ;;  %v5931_v31 = vunpack.c.l.b16 %v14298_v29  ;;  %v14337_v50 = vpack.c.bf16 %v5413_v6, %v5413_v6 }
 0xb2e   : > { %5476 = vrot.lane.b32.xlu2 %v14221_v0, %s11258_s25  ;;  %v5278_v35 = vpop.f32.mrf.mxu3 }
 0xb2f   : > { %v5279_v17 = vadd.f32 %v14157_v60, %v5278_v35 }
 0xb30   : > { %v5351_v22 = vpop.f32.mrf.mxu0 }
 0xb31   : > { %v5352_v49 = vadd.f32 %v14142_v42, %v5351_v22  ;;  %10141 = vmatmul.msk.bf16.vlgmr.msra.gmra.mxu3 %vm1303_vm1, %v5904_v3 }
 0xb33   : > { %v14302_v54 = vpack.c.bf16 %v5352_v49, %v5352_v49 }
 0xb35   : > { %5540 = vrot.lane.b32.xlu1 %v14221_v0, %s11260_s28  ;;  %5642 = vrot.lane.b32.xlu0 %v14239_v16, %s11259_s3  ;;  %v5932_v46 = vunpack.c.l.b16 %v14302_v54  ;;  %v14316_v0 = vpack.c.bf16 %v5279_v17, %v5279_v17 }
 0xb36   : > { %5606 = vrot.lane.b32.xlu2 %v14205_v30, %s11258_s25  ;;  %v5280_v61 = vpop.f32.mrf.mxu3 }
 0xb37   : > { %v5281_v58 = vadd.f32 %v14157_v60, %v5280_v61  ;;  %v5933_v57 = vpack.c.b16 %v5932_v46, %v5931_v31  ;;  %v5928_v26 = vunpack.c.l.b16 %v14316_v0 }
 0xb38   : > { %v14314_v37 = vpop.permute.xlu2 %5664  ;;  %v5354_v40 = vpop.f32.mrf.mxu0 }
 0xb39   : > { %v14318_v14 = vpack.c.bf16 %v5281_v58, %v5281_v58  ;;  %v5938_v34 = vsel %vm1303_vm1, %v5933_v57, 0  ;;  %v5355_v41 = vadd.f32 %v14142_v42, %v5354_v40 }
 0xb3a   : > { %5947 = vmatpush.bf16.xpose.msra.mxu2 %v5938_v34 }
 0xb3b   : > { %v5929_v32 = vunpack.c.l.b16 %v14318_v14  ;;  %v14333_v52 = vpack.c.bf16 %v5355_v41, %v5355_v41 }
 0xb3d   : > { %5736 = vrot.lane.b32.xlu1 %v14287_v53, %s11258_s25  ;;  %5674 = vrot.lane.b32.xlu0 %v14239_v16, %s11260_s28  ;;  %v5930_v51 = vpack.c.b16 %v5929_v32, %v5928_v26  ;;  %v5957_v35 = vunpack.c.l.b16 %v14333_v52 }
 0xb3e   : > { %5670 = vrot.lane.b32.xlu2 %v14205_v30, %s11260_s28  ;;  %v5283_v1 = vpop.f32.mrf.mxu3 }
 0xb3f   : > { %v5284_v30 = vadd.f32 %v14157_v60, %v5283_v1 }
 0xb40   : > { %v14331_v48 = vpop.permute.xlu2 %5728  ;;  %v5356_v15 = vpop.f32.mrf.mxu0 }
 0xb41   : > { %v5357_v28 = vadd.f32 %v14142_v42, %v5356_v15  ;;  %10142 = vmatmul.msk.bf16.vlgmr.msra.gmra.mxu2 %vm1303_vm1, %v5930_v51  ;;  %v14353_v46 = vpack.c.bf16 %v5284_v30, %v5284_v30 }
 0xb43   : > { %v14339_v13 = vpack.c.bf16 %v5357_v28, %v5357_v28  ;;  %v5954_v40 = vunpack.c.l.b16 %v14353_v46 }
 0xb45   : > { %5480 = vrot.lane.b32.xlu1 %v14251_v7, %s11258_s25  ;;  %5738 = vrot.lane.b32.xlu0 %v14337_v50, %s11258_s25  ;;  %v5958_v3 = vunpack.c.l.b16 %v14339_v13 }
 0xb46   : > { %5766 = vrot.lane.b32.xlu2 %v14207_v18, %s11259_s3  ;;  %v5285_v22 = vpop.f32.mrf.mxu3 }
 0xb47   : > { %v5286_v49 = vadd.f32 %v14157_v60, %v5285_v22  ;;  %v5959_v31 = vpack.c.b16 %v5958_v3, %v5957_v35 }
 0xb48   : > { %v14351_v17 = vpop.permute.xlu2 %5472 }
 0xb49   : > { %v14355_v61 = vpack.c.bf16 %v5286_v49, %v5286_v49  ;;  %v5964_v58 = vsel %vm1303_vm1, %v5959_v31, 0 }
 0xb4a   : > { %5973 = vmatpush.bf16.xpose.msrb.mxu3 %v5964_v58 }
 0xb4b   : > { %v5359_v57 = vpop.f32.mrf.mxu0  ;;  %v5955_v18 = vunpack.c.l.b16 %v14355_v61 }
 0xb4c   : > { %v5360_v23 = vadd.f32 %v14142_v42, %v5359_v57 }
 0xb4d   : > { %5512 = vrot.lane.b32.xlu1 %v14251_v7, %s11259_s3  ;;  %5802 = vrot.lane.b32.xlu0 %v14337_v50, %s11260_s28  ;;  %v5956_v32 = vpack.c.b16 %v5955_v18, %v5954_v40 }
 0xb4e   : > { %5510 = vrot.lane.b32.xlu2 %v14223_v36, %s11259_s3  ;;  %v14370_v30 = vpack.c.bf16 %v5360_v23, %v5360_v23 }
 0xb4f   : > { %v5633_v34 = vpop.permute.xlu1 %5632  ;;  %v14367_v51 = vpop.permute.xlu0 %5600 }
 0xb50   : > { %v6243_v26 = vunpack.c.l.b16 %v5633_v34  ;;  %v5635_v41 = vpop.permute.xlu2 %5634  ;;  %v5983_v57 = vunpack.c.l.b16 %v14370_v30 }
 0xb51   : > { %v6244_v1 = vunpack.c.l.b16 %v5635_v41  ;;  %v5288_v6 = vpop.f32.mrf.mxu3  ;;  %10143 = vmatmul.msk.bf16.vlgmr.msrb.gmra.mxu3 %vm1303_vm1, %v5956_v32  ;;  %v5415_v41 = vpop.f32.mrf.mxu1 }
 0xb52   : > { %v5289_v31 = vadd.f32 %v14157_v60, %v5288_v6 }
 0xb53   : > { %v6245_v15 = vpack.c.b16 %v6244_v1, %v6243_v26  ;;  %v5361_v28 = vpop.f32.mrf.mxu0 }
 0xb54   : > { %v5362_v35 = vadd.f32 %v14142_v42, %v5361_v28  ;;  %v14388_v32 = vpack.c.bf16 %v5289_v31, %v5289_v31 }
 0xb55   : > { %5610 = vrot.lane.b32.xlu1 %v14239_v16, %s11258_s25  ;;  %v6250_v3 = vsel %vm1303_vm1, %v6245_v15, 0  ;;  %5546 = vrot.lane.b32.xlu0 %v14253_v63, %s11260_s28  ;;  %v5416_v15 = vadd.f32 %v14148_v59, %v5415_v41 }
 0xb56   : > { %v14376_v22 = vpack.c.bf16 %v5362_v35, %v5362_v35  ;;  %5542 = vrot.lane.b32.xlu2 %v14223_v36, %s11260_s28  ;;  %6259 = vmatpush.bf16.xpose.msrb.mxu0 %v6250_v3  ;;  %v5980_v28 = vunpack.c.l.b16 %v14388_v32 }
 0xb57   : > { %v14382_v49 = vpop.permute.xlu1 %5760  ;;  %v14390_v23 = vpop.permute.xlu0 %5666  ;;  %v14408_v31 = vpack.c.bf16 %v5416_v15, %v5416_v15 }
 0xb58   : > { %16928 = vst [vmem:[#allocation39_spill] sm:$0xff] %v14382_v49  ;;  %v5507_v58 = vpop.permute.xlu2 %5506  ;;  %v5984_v16 = vunpack.c.l.b16 %v14376_v22 }
 0xb59   : > { %v5290_v18 = vpop.f32.mrf.mxu3  ;;  %v5417_v19 = vpop.f32.mrf.mxu1 }
 0xb5a   : > { %v5291_v40 = vadd.f32 %v14157_v60, %v5290_v18  ;;  %v5985_v34 = vpack.c.b16 %v5984_v16, %v5983_v57  ;;  %v6241_v18 = vunpack.c.l.b16 %v5507_v58 }
 0xb5c   : > { %v14392_v26 = vpack.c.bf16 %v5291_v40, %v5291_v40  ;;  %v5990_v36 = vsel %vm1303_vm1, %v5985_v34, 0 }
 0xb5d   : > { %5770 = vrot.lane.b32.xlu1 %v14337_v50, %s11259_s3  ;;  %5999 = vmatpush.bf16.xpose.msrb.mxu2 %v5990_v36 }
 0xb5e   : > { %v5981_v1 = vunpack.c.l.b16 %v14392_v26  ;;  %5640 = vrot.lane.b32.xlu2 %v14235_v20, %s11259_s3  ;;  %5612 = vrot.lane.b32.xlu0 %v14265_v44, %s11258_s25 }
 0xb5f   : > { %v14402_v6 = vpop.permute.xlu1 %5792  ;;  %v14413_v57 = vpop.permute.xlu0 %5794 }
 0xb60   : > { %16929 = vst [vmem:[#allocation24_spill] sm:$0xff] %v14402_v6  ;;  %v14406_v35 = vpop.permute.xlu2 %5538  ;;  %v5982_v3 = vpack.c.b16 %v5981_v1, %v5980_v28 }
 0xb61   : > { %16930 = vst [vmem:[#allocation38_spill] sm:$0xff] %v14413_v57 }
 0xb64   : > { %10144 = vmatmul.msk.bf16.vlgmr.msrb.gmra.mxu2 %vm1303_vm1, %v5982_v3 }
 0xb65   : > { %5644 = vrot.lane.b32.xlu1 %v14265_v44, %s11259_s3 }
 0xb66   : > { %5672 = vrot.lane.b32.xlu2 %v14235_v20, %s11260_s28  ;;  %5740 = vrot.lane.b32.xlu0 %v14408_v31, %s11258_s25 }
 0xb67   : > { %v5505_v16 = vpop.permute.xlu1 %5504  ;;  %v5475_v1 = vpop.permute.xlu0 %5474 }
 0xb68   : > { %v6240_v40 = vunpack.c.l.b16 %v5505_v16  ;;  %v5637_v34 = vpop.permute.xlu2 %5636  ;;  %v6033_v12 = vunpack.c.l.b16 %v5475_v1 }
 0xb69   : > { %v6269_v5 = vunpack.c.l.b16 %v5637_v34 }
 0xb6a   : > { %v6242_v36 = vpack.c.b16 %v6241_v18, %v6240_v40 }
 0xb6c   : > { %v5364_v41 = vpop.f32.mrf.mxu0  ;;  %10154 = vmatmul.msk.bf16.vlgmr.msrb.gmra.mxu0 %vm1303_vm1, %v6242_v36  ;;  %v6035_v36 = vunpack.c.l.b16 %v14367_v51 }
 0xb6d   : > { %5676 = vrot.lane.b32.xlu1 %v14265_v44, %s11260_s28  ;;  %v5365_v58 = vadd.f32 %v14142_v42, %v5364_v41 }
 0xb6e   : > { %5768 = vrot.lane.b32.xlu2 %v14287_v53, %s11259_s3  ;;  %5772 = vrot.lane.b32.xlu0 %v14408_v31, %s11259_s3 }
 0xb6f   : > { %v14426_v20 = vpop.permute.xlu1 %5536  ;;  %v14431_v16 = vpack.c.bf16 %v5365_v58, %v5365_v58 }
 0xb70   : > { %v14428_v15 = vpop.permute.xlu2 %5732 }
 0xb71   : > { %v5293_v28 = vpop.f32.mrf.mxu3  ;;  %v6009_v21 = vunpack.c.l.b16 %v14431_v16 }
 0xb74   : > { %v5366_v3 = vpop.f32.mrf.mxu0 }
 0xb75   : > { %v5367_v18 = vadd.f32 %v14142_v42, %v5366_v3  ;;  %5484 = vrot.lane.b32.xlu1 %v14282_v8, %s11258_s25 }
 0xb76   : > { %5544 = vrot.lane.b32.xlu2 %v14251_v7, %s11260_s28  ;;  %5516 = vrot.lane.b32.xlu0 %v14282_v8, %s11259_s3  ;;  %v5294_v7 = vadd.f32 %v14157_v60, %v5293_v28 }
 0xb77   : > { %v14440_v44 = vpack.c.bf16 %v5367_v18, %v5367_v18  ;;  %v5603_v40 = vpop.permute.xlu1 %5602  ;;  %v5639_v24 = vpop.permute.xlu0 %5638 }
 0xb78   : > { %v6036_v41 = vunpack.c.l.b16 %v5603_v40  ;;  %v14443_v58 = vpop.permute.xlu2 %5764  ;;  %v6270_v42 = vunpack.c.l.b16 %v5639_v24  ;;  %v14456_v28 = vpack.c.bf16 %v5294_v7, %v5294_v7 }
 0xb79   : > { %16931 = vst [vmem:[#allocation19_spill] sm:$0xff] %v14443_v58  ;;  %v5295_v3 = vpop.f32.mrf.mxu3  ;;  %v6010_v62 = vunpack.c.l.b16 %v14440_v44 }
 0xb7a   : > { %v6037_v10 = vpack.c.b16 %v6036_v41, %v6035_v36  ;;  %v5296_v18 = vadd.f32 %v14157_v60, %v5295_v3  ;;  %v6271_v4 = vpack.c.b16 %v6270_v42, %v6269_v5  ;;  %v6006_v1 = vunpack.c.l.b16 %v14456_v28 }
 0xb7b   : > { %v6011_v38 = vpack.c.b16 %v6010_v62, %v6009_v21  ;;  %v5418_v62 = vadd.f32 %v14148_v59, %v5417_v19  ;;  %v5420_v19 = vpop.f32.mrf.mxu1 }
 0xb7c   : > { %v14449_v51 = vpack.c.bf16 %v5296_v18, %v5296_v18  ;;  %v6042_v40 = vsel %vm1303_vm1, %v6037_v10, 0  ;;  %v6276_v34 = vsel %vm1303_vm1, %v6271_v4, 0  ;;  %v5421_v42 = vadd.f32 %v14148_v59, %v5420_v19 }
 0xb7d   : > { %5614 = vrot.lane.b32.xlu1 %v14269_v25, %s11258_s25  ;;  %v6016_v24 = vsel %vm1303_vm1, %v6011_v38, 0  ;;  %6051 = vmatpush.bf16.xpose.msra.mxu2 %v6042_v40  ;;  %v6032_v38 = vunpack.c.l.b16 %v14351_v17  ;;  %v14472_v36 = vpack.c.bf16 %v5418_v62, %v5418_v62 }
 0xb7e   : > { %5482 = vrot.lane.b32.xlu2 %v14253_v63, %s11258_s25  ;;  %5548 = vrot.lane.b32.xlu0 %v14282_v8, %s11260_s28  ;;  %v6007_v21 = vunpack.c.l.b16 %v14449_v51  ;;  %v14487_v3 = vpack.c.bf16 %v5421_v42, %v5421_v42 }
 0xb7f   : > { %6025 = vmatpush.bf16.xpose.msra.mxu3 %v6016_v24  ;;  %6285 = vmatpush.bf16.xpose.msrb.mxu1 %v6276_v34  ;;  %v14463_v10 = vpop.permute.xlu1 %5730  ;;  %v14467_v4 = vpop.permute.xlu0 %5734  ;;  %v6034_v5 = vpack.c.b16 %v6033_v12, %v6032_v38 }
 0xb80   : > { %v14469_v60 = vpop.permute.xlu2 %5796  ;;  %v6008_v8 = vpack.c.b16 %v6007_v21, %v6006_v1 }
 0xb81   : > { %16932 = vst [vmem:[#allocation22_spill] sm:$0xff] %v14469_v60 }
 0xb84   : > { %10146 = vmatmul.msk.bf16.vlgmr.msra.gmra.mxu2 %vm1303_vm1, %v6034_v5 }
 0xb85   : > { %5742 = vrot.lane.b32.xlu1 %v14472_v36, %s11258_s25 }
 0xb86   : > { %10145 = vmatmul.msk.bf16.vlgmr.msra.gmra.mxu3 %vm1303_vm1, %v6008_v8  ;;  %5514 = vrot.lane.b32.xlu2 %v14253_v63, %s11259_s3 }
 0xb87   : > { %5806 = vrot.lane.b32.xlu0 %v14472_v36, %s11260_s28  ;;  %v14482_v12 = vpop.permute.xlu1 %5762  ;;  %v14484_v17 = vpop.permute.xlu0 %5798 }
 0xb88   : > { %16933 = vst [vmem:[#allocation2_spill] sm:$0xff] %v14482_v12  ;;  %v5477_v41 = vpop.permute.xlu2 %5476 }
 0xb89   : > { %16934 = vst [vmem:[#allocation3_spill] sm:$0xff] %v14484_v17  ;;  %v6058_v8 = vunpack.c.l.b16 %v5477_v41 }
 0xb8d   : > { %5518 = vrot.lane.b32.xlu1 %v14284_v47, %s11259_s3 }
 0xb8e   : > { %5804 = vrot.lane.b32.xlu2 %v14408_v31, %s11260_s28 }
 0xb8f   : > { %5808 = vrot.lane.b32.xlu0 %v14487_v3, %s11260_s28  ;;  %v5605_v63 = vpop.permute.xlu1 %5604  ;;  %v5479_v18 = vpop.permute.xlu0 %5478 }
 0xb90   : > { %v6061_v7 = vunpack.c.l.b16 %v5605_v63  ;;  %v5607_v40 = vpop.permute.xlu2 %5606  ;;  %v6059_v38 = vunpack.c.l.b16 %v5479_v18 }
 0xb91   : > { %v6062_v24 = vunpack.c.l.b16 %v5607_v40 }
 0xb92   : > { %v6060_v19 = vpack.c.b16 %v6059_v38, %v6058_v8 }
 0xb93   : > { %v6063_v34 = vpack.c.b16 %v6062_v24, %v6061_v7 }
 0xb95   : > { %5550 = vrot.lane.b32.xlu1 %v14284_v47, %s11260_s28  ;;  %v6068_v62 = vsel %vm1303_vm1, %v6063_v34, 0 }
 0xb96   : > { %5646 = vrot.lane.b32.xlu2 %v14269_v25, %s11259_s3  ;;  %6077 = vmatpush.bf16.xpose.msrb.mxu3 %v6068_v62  ;;  %v5422_v62 = vpop.f32.mrf.mxu1 }
 0xb97   : > { %5488 = vrot.lane.b32.xlu0 %v14316_v0, %s11258_s25  ;;  %v14502_v21 = vpop.permute.xlu1 %5668  ;;  %v5609_v5 = vpop.permute.xlu0 %5608  ;;  %v5423_v38 = vadd.f32 %v14148_v59, %v5422_v62 }
 0xb98   : > { %v14504_v1 = vpop.permute.xlu2 %5670  ;;  %v6087_v45 = vunpack.c.l.b16 %v5609_v5 }
 0xb9d   : > { %10147 = vmatmul.msk.bf16.vlgmr.msrb.gmra.mxu3 %vm1303_vm1, %v6060_v19  ;;  %5648 = vrot.lane.b32.xlu1 %v14298_v29, %s11259_s3 }
 0xb9e   : > { %5678 = vrot.lane.b32.xlu2 %v14269_v25, %s11260_s28 }
 0xb9f   : > { %5520 = vrot.lane.b32.xlu0 %v14316_v0, %s11259_s3  ;;  %v5509_v42 = vpop.permute.xlu1 %5508  ;;  %v14513_v63 = vpop.permute.xlu0 %5800 }
 0xba0   : > { %16935 = vst [vmem:[#allocation5_spill] sm:$0xff] %v14513_v63  ;;  %v14515_v7 = vpop.permute.xlu2 %5766  ;;  %v6266_v40 = vunpack.c.l.b16 %v5509_v42 }
 0xba1   : > { %16936 = vst [vmem:[#allocation6_spill] sm:$0xff] %v14515_v7 }
 0xba5   : > { %5744 = vrot.lane.b32.xlu1 %v14487_v3, %s11258_s25 }
 0xba6   : > { %5774 = vrot.lane.b32.xlu2 %v14472_v36, %s11259_s3 }
 0xba7   : > { %5618 = vrot.lane.b32.xlu0 %v14302_v54, %s11258_s25  ;;  %v14523_v41 = vpop.permute.xlu1 %5540  ;;  %v14525_v25 = vpop.permute.xlu0 %5642 }
 0xba8   : > { %v5511_v18 = vpop.permute.xlu2 %5510 }
 0xba9   : > { %v6267_v24 = vunpack.c.l.b16 %v5511_v18  ;;  %v14541_v18 = vpack.c.bf16 %v5423_v38, %v5423_v38  ;;  %v5425_v38 = vpop.f32.mrf.mxu1 }
 0xbaa   : > { %v5426_v11 = vadd.f32 %v14148_v59, %v5425_v38 }
 0xbab   : > { %v6268_v34 = vpack.c.b16 %v6267_v24, %v6266_v40 }
 0xbac   : > { %v14576_v43 = vpack.c.bf16 %v5426_v11, %v5426_v11 }
 0xbad   : > { %10155 = vmatmul.msk.bf16.vlgmr.msrb.gmra.mxu1 %vm1303_vm1, %v6268_v34  ;;  %5552 = vrot.lane.b32.xlu1 %v14316_v0, %s11260_s28 }
 0xbae   : > { %5486 = vrot.lane.b32.xlu2 %v14284_v47, %s11258_s25  ;;  %16940 = vst [vmem:[#allocation9_spill] sm:$0xff] %v14576_v43 }
 0xbaf   : > { %5682 = vrot.lane.b32.xlu0 %v14302_v54, %s11260_s28  ;;  %v14535_v8 = vpop.permute.xlu1 %5736  ;;  %v14537_v19 = vpop.permute.xlu0 %5674 }
 0xbb0   : > { %16937 = vst [vmem:[#allocation4_spill] sm:$0xff] %v14535_v8  ;;  %v14539_v42 = vpop.permute.xlu2 %5542 }
 0xbb5   : > { %5810 = vrot.lane.b32.xlu1 %v14541_v18, %s11260_s28 }
 0xbb6   : > { %5616 = vrot.lane.b32.xlu2 %v14298_v29, %s11258_s25 }
 0xbb7   : > { %5746 = vrot.lane.b32.xlu0 %v14541_v18, %s11258_s25  ;;  %v5481_v47 = vpop.permute.xlu1 %5480  ;;  %v14549_v0 = vpop.permute.xlu0 %5738 }
 0xbb8   : > { %v14551_v40 = vpop.permute.xlu2 %5640 }
 0xbbd   : > { %5490 = vrot.lane.b32.xlu1 %v14318_v14, %s11258_s25 }
 0xbbe   : > { %5680 = vrot.lane.b32.xlu2 %v14298_v29, %s11260_s28 }
 0xbbf   : > { %5652 = vrot.lane.b32.xlu0 %v14333_v52, %s11259_s3  ;;  %v14559_v24 = vpop.permute.xlu1 %5512  ;;  %v14561_v34 = vpop.permute.xlu0 %5802 }
 0xbc0   : > { %16938 = vst [vmem:[#allocation7_spill] sm:$0xff] %v14561_v34  ;;  %v14563_v62 = vpop.permute.xlu2 %5672 }
 0xbc5   : > { %5522 = vrot.lane.b32.xlu1 %v14318_v14, %s11259_s3 }
 0xbc6   : > { %5776 = vrot.lane.b32.xlu2 %v14487_v3, %s11259_s3 }
 0xbc7   : > { %5684 = vrot.lane.b32.xlu0 %v14333_v52, %s11260_s28  ;;  %v5611_v29 = vpop.permute.xlu1 %5610  ;;  %v14572_v56 = vpop.permute.xlu0 %5546 }
 0xbc8   : > { %v6088_v2 = vunpack.c.l.b16 %v5611_v29  ;;  %v14574_v55 = vpop.permute.xlu2 %5768 }
 0xbc9   : > { %16939 = vst [vmem:[#allocation8_spill] sm:$0xff] %v14574_v55 }
 0xbca   : > { %v6089_v33 = vpack.c.b16 %v6088_v2, %v6087_v45  ;;  %v6084_v2 = vunpack.c.l.b16 %v5481_v47  ;;  %v5427_v47 = vpop.f32.mrf.mxu1 }
 0xbcc   : > { %v6094_v9 = vsel %vm1303_vm1, %v6089_v33, 0 }
 0xbcd   : > { %5748 = vrot.lane.b32.xlu1 %v14576_v43, %s11258_s25  ;;  %6103 = vmatpush.bf16.xpose.msrb.mxu2 %v6094_v9 }
 0xbce   : > { %5650 = vrot.lane.b32.xlu2 %v14302_v54, %s11259_s3 }
 0xbcf   : > { %5780 = vrot.lane.b32.xlu0 %v14576_v43, %s11259_s3  ;;  %v14585_v5 = vpop.permute.xlu1 %5770 }
 0xbd0   : > { %16941 = vst [vmem:[#allocation10_spill] sm:$0xff] %v14585_v5  ;;  %v5613_v38 = vpop.permute.xlu0 %5612  ;;  %v14587_v29 = vpop.permute.xlu2 %5544 }
 0xbd1   : > { %v6113_v6 = vunpack.c.l.b16 %v5613_v38 }
 0xbd5   : > { %5556 = vrot.lane.b32.xlu1 %v14353_v46, %s11260_s28 }
 0xbd6   : > { %5778 = vrot.lane.b32.xlu2 %v14541_v18, %s11259_s3 }
 0xbd7   : > { %5492 = vrot.lane.b32.xlu0 %v14353_v46, %s11258_s25  ;;  %v14595_v45 = vpop.permute.xlu1 %5644 }
 0xbd8   : > { %v14597_v9 = vpop.permute.xlu0 %5740  ;;  %v5483_v33 = vpop.permute.xlu2 %5482 }
 0xbd9   : > { %16942 = vst [vmem:[#allocation11_spill] sm:$0xff] %v14597_v9  ;;  %v6085_v11 = vunpack.c.l.b16 %v5483_v33 }
 0xbdb   : > { %v6086_v54 = vpack.c.b16 %v6085_v11, %v6084_v2  ;;  %v5430_v11 = vpop.f32.mrf.mxu1 }
 0xbdd   : > { %10148 = vmatmul.msk.bf16.vlgmr.msrb.gmra.mxu2 %vm1303_vm1, %v6086_v54  ;;  %5654 = vrot.lane.b32.xlu1 %v14339_v13, %s11259_s3  ;;  %v5428_v54 = vadd.f32 %v14148_v59, %v5427_v47 }
 0xbde   : > { %5554 = vrot.lane.b32.xlu2 %v14318_v14, %s11260_s28 }
 0xbdf   : > { %5622 = vrot.lane.b32.xlu0 %v14339_v13, %s11258_s25  ;;  %v14606_v63 = vpop.permute.xlu1 %5676  ;;  %v14636_v58 = vpack.c.bf16 %v5428_v54, %v5428_v54 }
 0xbe0   : > { %v14608_v34 = vpop.permute.xlu0 %5772  ;;  %v14610_v57 = vpop.permute.xlu2 %5514 }
 0xbe1   : > { %16943 = vst [vmem:[#allocation12_spill] sm:$0xff] %v14608_v34 }
 0xbe2   : > { %16946 = vst [vmem:[#allocation15_spill] sm:$0xff] %v14636_v58 }
 0xbe3   : > { %v5432_v34 = vpop.f32.mrf.mxu1 }
 0xbe5   : > { %5686 = vrot.lane.b32.xlu1 %v14339_v13, %s11260_s28  ;;  %v5431_v13 = vadd.f32 %v14148_v59, %v5430_v11 }
 0xbe6   : > { %5620 = vrot.lane.b32.xlu2 %v14333_v52, %s11258_s25 }
 0xbe7   : > { %5526 = vrot.lane.b32.xlu0 %v14355_v61, %s11259_s3  ;;  %v5485_v14 = vpop.permute.xlu1 %5484  ;;  %v14634_v5 = vpack.c.bf16 %v5431_v13, %v5431_v13 }
 0xbe8   : > { %v14618_v33 = vpop.permute.xlu0 %5516  ;;  %v14620_v2 = vpop.permute.xlu2 %5804  ;;  %v6110_v54 = vunpack.c.l.b16 %v5485_v14 }
 0xbe9   : > { %16944 = vst [vmem:[#allocation13_spill] sm:$0xff] %v14620_v2 }
 0xbea   : > { %16945 = vst [vmem:[#allocation14_spill] sm:$0xff] %v14634_v5 }
 0xbed   : > { %5494 = vrot.lane.b32.xlu1 %v14355_v61, %s11258_s25 }
 0xbee   : > { %5524 = vrot.lane.b32.xlu2 %v14353_v46, %s11259_s3 }
 0xbef   : > { %5656 = vrot.lane.b32.xlu0 %v14370_v30, %s11259_s3  ;;  %v5615_v52 = vpop.permute.xlu1 %5614 }
 0xbf0   : > { %v14630_v60 = vpop.permute.xlu0 %5548  ;;  %v6114_v17 = vunpack.c.l.b16 %v5615_v52  ;;  %v14632_v2 = vpop.permute.xlu2 %5646 }
 0xbf2   : > { %v6115_v55 = vpack.c.b16 %v6114_v17, %v6113_v6 }
 0xbf4   : > { %v6120_v46 = vsel %vm1303_vm1, %v6115_v55, 0 }
 0xbf5   : > { %5784 = vrot.lane.b32.xlu1 %v14634_v5, %s11259_s3  ;;  %6129 = vmatpush.bf16.xpose.msra.mxu3 %v6120_v46 }
 0xbf6   : > { %5750 = vrot.lane.b32.xlu2 %v14636_v58, %s11258_s25 }
 0xbf7   : > { %5496 = vrot.lane.b32.xlu0 %v14388_v32, %s11258_s25  ;;  %v14645_v38 = vpop.permute.xlu1 %5742 }
 0xbf8   : > { %16947 = vst [vmem:[#allocation16_spill] sm:$0xff] %v14645_v38  ;;  %v14647_v47 = vpop.permute.xlu2 %5678 }
 0xbf9   : > { %v14649_v6 = vpop.permute.xlu0 %5806 }
 0xbfa   : > { %16948 = vst [vmem:[#allocation17_spill] sm:$0xff] %v14649_v6 }
 0xbfd   : > { %5658 = vrot.lane.b32.xlu1 %v14376_v22, %s11259_s3 }
 0xbfe   : > { %5782 = vrot.lane.b32.xlu2 %v14636_v58, %s11259_s3 }
 0xbff   : > { %5560 = vrot.lane.b32.xlu0 %v14388_v32, %s11260_s28  ;;  %v14657_v55 = vpop.permute.xlu1 %5518 }
 0xc00   : > { %v14659_v17 = vpop.permute.xlu2 %5774 }
 0xc01   : > { %16949 = vst [vmem:[#allocation40_spill] sm:$0xff] %v14659_v17  ;;  %v14661_v11 = vpop.permute.xlu0 %5808  ;;  %v5433_v17 = vadd.f32 %v14148_v59, %v5432_v34 }
 0xc02   : > { %16950 = vst [vmem:[#allocation41_spill] sm:$0xff] %v14661_v11 }
 0xc05   : > { %5498 = vrot.lane.b32.xlu1 %v14392_v26, %s11258_s25 }
 0xc06   : > { %5558 = vrot.lane.b32.xlu2 %v14355_v61, %s11260_s28 }
 0xc07   : > { %5626 = vrot.lane.b32.xlu0 %v14376_v22, %s11258_s25  ;;  %v14669_v13 = vpop.permute.xlu1 %5550 }
 0xc08   : > { %v5487_v52 = vpop.permute.xlu2 %5486 }
 0xc09   : > { %v5489_v46 = vpop.permute.xlu0 %5488  ;;  %v6111_v6 = vunpack.c.l.b16 %v5487_v52  ;;  %v5435_v52 = vpop.f32.mrf.mxu1 }
 0xc0b   : > { %v6112_v7 = vpack.c.b16 %v6111_v6, %v6110_v54  ;;  %v14681_v6 = vpack.c.bf16 %v5433_v17, %v5433_v17 }
 0xc0d   : > { %10149 = vmatmul.msk.bf16.vlgmr.msra.gmra.mxu3 %vm1303_vm1, %v6112_v7  ;;  %5562 = vrot.lane.b32.xlu1 %v14392_v26, %s11260_s28  ;;  %16951 = vst [vmem:[#allocation42_spill] sm:$0xff] %v14681_v6  ;;  %v5436_v7 = vadd.f32 %v14148_v59, %v5435_v52 }
 0xc0e   : > { %5624 = vrot.lane.b32.xlu2 %v14370_v30, %s11258_s25 }
 0xc0f   : > { %5690 = vrot.lane.b32.xlu0 %v14376_v22, %s11260_s28  ;;  %v5649_v61 = vpop.permute.xlu1 %5648  ;;  %v14692_v9 = vpack.c.bf16 %v5436_v7, %v5436_v7  ;;  %v6451_v7 = vunpack.c.l.b16 %v14314_v37 }
 0xc10   : > { %v5617_v11 = vpop.permute.xlu2 %5616 }
 0xc11   : > { %v14679_v14 = vpop.permute.xlu0 %5520  ;;  %v6139_v49 = vunpack.c.l.b16 %v5617_v11  ;;  %16953 = vst [vmem:[#allocation44_spill] sm:$0xff] %v14692_v9  ;;  %v5437_v8 = vpop.f32.mrf.mxu1 }
 0xc15   : > { %5692 = vrot.lane.b32.xlu1 %v14431_v16, %s11260_s28 }
 0xc16   : > { %5688 = vrot.lane.b32.xlu2 %v14370_v30, %s11260_s28 }
 0xc17   : > { %5754 = vrot.lane.b32.xlu0 %v14681_v6, %s11258_s25  ;;  %v14690_v22 = vpop.permute.xlu1 %5744 }
 0xc18   : > { %16952 = vst [vmem:[#allocation43_spill] sm:$0xff] %v14690_v22  ;;  %v5681_v54 = vpop.permute.xlu2 %5680 }
 0xc19   : > { %v5619_v34 = vpop.permute.xlu0 %5618 }
 0xc1a   : > { %v6140_v12 = vunpack.c.l.b16 %v5619_v34 }
 0xc1c   : > { %v6141_v17 = vpack.c.b16 %v6140_v12, %v6139_v49  ;;  %v6452_v49 = vunpack.c.l.b16 %v14390_v23 }
 0xc1d   : > { %5756 = vrot.lane.b32.xlu1 %v14692_v9, %s11258_s25 }
 0xc1e   : > { %5752 = vrot.lane.b32.xlu2 %v14634_v5, %s11258_s25  ;;  %v6146_v59 = vsel %vm1303_vm1, %v6141_v17, 0  ;;  %v6347_v17 = vunpack.c.l.b16 %v5649_v61  ;;  %v6453_v22 = vpack.c.b16 %v6452_v49, %v6451_v7 }
 0xc1f   : > { %5786 = vrot.lane.b32.xlu0 %v14681_v6, %s11259_s3  ;;  %6155 = vmatpush.bf16.xpose.msra.mxu2 %v6146_v59  ;;  %v14701_v30 = vpop.permute.xlu1 %5552 }
 0xc20   : > { %v14703_v52 = vpop.permute.xlu2 %5776  ;;  %v6458_v23 = vsel %vm1303_vm1, %v6453_v22, 0  ;;  %v6555_v22 = vunpack.c.l.b16 %v5681_v54 }
 0xc21   : > { %16954 = vst [vmem:[#allocation45_spill] sm:$0xff] %v14703_v52  ;;  %v5683_v11 = vpop.permute.xlu0 %5682 }
 0xc25   : > { %5788 = vrot.lane.b32.xlu1 %v14692_v9, %s11259_s3 }
 0xc26   : > { %5528 = vrot.lane.b32.xlu2 %v14388_v32, %s11259_s3 }
 0xc27   : > { %5530 = vrot.lane.b32.xlu0 %v14392_v26, %s11259_s3  ;;  %v14712_v12 = vpop.permute.xlu1 %5810  ;;  %v11249_v26 = vld [vmem:[%s16697_s7 + $0x1] ss:$0 sm:$0xff] }
 0xc28   : > { %16955 = vst [vmem:[#allocation46_spill] sm:$0xff] %v14712_v12  ;;  %v5651_v34 = vpop.permute.xlu2 %5650  ;;  %v5438_v61 = vadd.f32 %v11249_v26, %v5437_v8 }
 0xc29   : > { %v14715_v59 = vpop.permute.xlu0 %5746  ;;  %v6348_v52 = vunpack.c.l.b16 %v5651_v34 }
 0xc2a   : > { %16956 = vst [vmem:[#allocation47_spill] sm:$0xff] %v14715_v59 }
 0xc2b   : > { %v6349_v38 = vpack.c.b16 %v6348_v52, %v6347_v17  ;;  %v6136_v52 = vunpack.c.l.b16 %v5489_v46  ;;  %v14730_v17 = vpack.c.bf16 %v5438_v61, %v5438_v61  ;;  %v6344_v46 = vunpack.c.l.b16 %v14679_v14 }
 0xc2d   : > { %5564 = vrot.lane.b32.xlu1 %v14456_v28, %s11260_s28  ;;  %v6354_v32 = vsel %vm1303_vm1, %v6349_v38, 0  ;;  %16958 = vst [vmem:[#allocation49_spill] sm:$0xff] %v14730_v17 }
 0xc2e   : > { %5500 = vrot.lane.b32.xlu2 %v14456_v28, %s11258_s25  ;;  %6363 = vmatpush.bf16.xpose.msra.mxu0 %v6354_v32  ;;  %v6556_v32 = vunpack.c.l.b16 %v5683_v11 }
 0xc2f   : > { %5628 = vrot.lane.b32.xlu0 %v14431_v16, %s11258_s25  ;;  %v5491_v37 = vpop.permute.xlu1 %5490 }
 0xc30   : > { %v6137_v49 = vunpack.c.l.b16 %v5491_v37  ;;  %v14728_v38 = vpop.permute.xlu2 %5778 }
 0xc31   : > { %v5653_v7 = vpop.permute.xlu0 %5652  ;;  %16957 = vst [vmem:[#allocation48_spill] sm:$0xff] %v14728_v38 }
 0xc32   : > { %v6138_v34 = vpack.c.b16 %v6137_v49, %v6136_v52  ;;  %v6448_v49 = vunpack.c.l.b16 %v14426_v20 }
 0xc34   : > { %10150 = vmatmul.msk.bf16.vlgmr.msra.gmra.mxu2 %vm1303_vm1, %v6138_v34 }
 0xc35   : > { %5630 = vrot.lane.b32.xlu1 %v14440_v44, %s11258_s25 }
 0xc36   : > { %6467 = vmatpush.bf16.xpose.msrb.mxu0 %v6458_v23  ;;  %5790 = vrot.lane.b32.xlu2 %v14730_v17, %s11259_s3  ;;  %v6557_v23 = vpack.c.b16 %v6556_v32, %v6555_v22  ;;  %v6449_v32 = vunpack.c.l.b16 %v14406_v35  ;;  %v6373_v35 = vunpack.c.l.b16 %v5653_v7 }
 0xc37   : > { %5660 = vrot.lane.b32.xlu0 %v14431_v16, %s11259_s3  ;;  %v5523_v8 = vpop.permute.xlu1 %5522 }
 0xc38   : > { %v6345_v37 = vunpack.c.l.b16 %v5523_v8  ;;  %v5555_v11 = vpop.permute.xlu2 %5554  ;;  %v6562_v52 = vsel %vm1303_vm1, %v6557_v23, 0  ;;  %v6450_v8 = vpack.c.b16 %v6449_v32, %v6448_v49  ;;  %v6478_v23 = vunpack.c.l.b16 %v14504_v1  ;;  %v14766_v49 = vpop.f32.mrf.mxu3 }
 0xc39   : > { %v5685_v26 = vpop.permute.xlu0 %5684 }
 0xc3a   : > { %v6346_v61 = vpack.c.b16 %v6345_v37, %v6344_v46  ;;  %v6477_v46 = vunpack.c.l.b16 %v14502_v21 }
 0xc3c   : > { %10158 = vmatmul.msk.bf16.vlgmr.msra.gmra.mxu0 %vm1303_vm1, %v6346_v61  ;;  %v6479_v61 = vpack.c.b16 %v6478_v23, %v6477_v46  ;;  %v6552_v23 = vunpack.c.l.b16 %v14701_v30 }
 0xc3d   : > { %5662 = vrot.lane.b32.xlu1 %v14440_v44, %s11259_s3 }
 0xc3e   : > { %6571 = vmatpush.bf16.xpose.msra.mxu0 %v6562_v52  ;;  %v6484_v38 = vsel %vm1303_vm1, %v6479_v61, 0 }
 0xc3f   : > { %5532 = vrot.lane.b32.xlu0 %v14456_v28, %s11259_s3  ;;  %v14746_v16 = vpop.permute.xlu1 %5748  ;;  %v5845_v28 = vpop.f32.mrf.mxu2 }
 0xc40   : > { %16959 = vst [vmem:[#allocation50_spill] sm:$0xff] %v14746_v16  ;;  %v5621_v14 = vpop.permute.xlu2 %5620 }
 0xc41   : > { %v14748_v54 = vpop.permute.xlu0 %5780  ;;  %v6165_v32 = vunpack.c.l.b16 %v5621_v14  ;;  %v7598_v14 = vunpack.c.l.b16 %v14541_v18 }
 0xc42   : > { %16960 = vst [vmem:[#allocation51_spill] sm:$0xff] %v14748_v54  ;;  %v6553_v54 = vunpack.c.l.b16 %v5555_v11 }
 0xc44   : > { %v6554_v61 = vpack.c.b16 %v6553_v54, %v6552_v23 }
 0xc45   : > { %5694 = vrot.lane.b32.xlu1 %v14440_v44, %s11260_s28 }
 0xc47   : > { %5758 = vrot.lane.b32.xlu0 %v14730_v17, %s11258_s25  ;;  %v14755_v34 = vpop.permute.xlu1 %5556  ;;  %v5847_v1 = vpop.f32.mrf.mxu2 }
 0xc48   : > { %v5525_v20 = vpop.permute.xlu2 %5524 }
 0xc49   : > { %v5493_v22 = vpop.permute.xlu0 %5492  ;;  %v6370_v11 = vunpack.c.l.b16 %v5525_v20 }
 0xc4c   : > { %10162 = vmatmul.msk.bf16.vlgmr.msrb.gmra.mxu0 %vm1303_vm1, %v6450_v8 }
 0xc4d   : > { %7507 = vmatpush.bf16.msrb.mxu0 %v14173_v39  ;;  %5534 = vrot.lane.b32.xlu1 %v14449_v51, %s11259_s3  ;;  %s17090_s3 = sshll.u32 %s17092_s27, 4 }
 0xc4e   : > { %s16621_s4 = scalar_lea.vmem %s16710_s20, %s17090_s3 }
 0xc4f   : > { %5502 = vrot.lane.b32.xlu0 %v14449_v51, %s11258_s25  ;;  %v5655_v44 = vpop.permute.xlu1 %5654  ;;  %s17069_s25 = smov 8  }
 0xc50   : > { %v6374_v37 = vunpack.c.l.b16 %v5655_v44  ;;  %v6581_v44 = vunpack.c.l.b16 %v5685_v26  ;;  %v6162_v26 = vunpack.c.l.b16 %v5493_v22  ;;  %v6475_v22 = vunpack.c.l.b16 %v14539_v42 }
 0xc51   : > { %v5623_v52 = vpop.permute.xlu0 %5622 }
 0xc52   : > { %v6375_v21 = vpack.c.b16 %v6374_v37, %v6373_v35  ;;  %v6166_v8 = vunpack.c.l.b16 %v5623_v52  ;;  %v7597_v37 = vunpack.c.l.b16 %v14487_v3  ;;  %v14776_v52 = vmul.f32 0.35355338, %v5845_v28 }
 0xc54   : > { %v6167_v12 = vpack.c.b16 %v6166_v8, %v6165_v32  ;;  %v6380_v39 = vsel %vm1303_vm1, %v6375_v21, 0  ;;  %v5873_v8 = vpop.f32.mrf.mxu3  ;;  %v6720_v3 = vsel %vm2194_vm2, %v14776_v52, -inf }
 0xc55   : > { %5566 = vrot.lane.b32.xlu1 %v14449_v51, %s11260_s28  ;;  %6389 = vmatpush.bf16.xpose.msra.mxu1 %v6380_v39  ;;  %v14778_v51 = vpop.permute.xlu2 %5750  ;;  %v5897_v39 = vpop.f32.mrf.mxu2  ;;  %v14787_v20 = vmul.f32 0.35355338, %v5873_v8 }
 0xc56   : > { %v6172_v7 = vsel %vm1303_vm1, %v6167_v12, 0  ;;  %16961 = vst [vmem:[#allocation52_spill] sm:$0xff] %v14778_v51  ;;  %v14832_v16 = vmul.f32 0.35355338, %v5897_v39 }
 0xc57   : > { %6181 = vmatpush.bf16.xpose.msrb.mxu3 %v6172_v7  ;;  %v5687_v46 = vpop.permute.xlu1 %5686 }
 0xc58   : > { %v6582_v35 = vunpack.c.l.b16 %v5687_v46 }
 0xc59   : > { %v5527_v32 = vpop.permute.xlu0 %5526 }
 0xc5a   : > { %v6583_v21 = vpack.c.b16 %v6582_v35, %v6581_v44  ;;  %v6371_v12 = vunpack.c.l.b16 %v5527_v32  ;;  %v6729_v35 = vsel %vm2194_vm2, %v14787_v20, -inf }
 0xc5c   : > { %v6372_v7 = vpack.c.b16 %v6371_v12, %v6370_v11  ;;  %10166 = vmatmul.msk.bf16.vlgmr.msra.gmra.mxu0 %vm1303_vm1, %v6554_v61  ;;  %v6588_v18 = vsel %vm1303_vm1, %v6583_v21, 0  ;;  %v14791_v23 = vpop.f32.mrf.mxu3  ;;  %v6474_v61 = vunpack.c.l.b16 %v14523_v41  ;;  %v14814_v41 = vmul.f32 0.35355338, %v5847_v1 }
 0xc5d   : > { %6493 = vmatpush.bf16.xpose.msrb.mxu1 %v6484_v38  ;;  %v7599_v38 = vpack.c.b16 %v7598_v14, %v7597_v37  ;;  %v14789_v14 = vpop.permute.xlu2 %5782  ;;  %v5899_v44 = vpop.f32.mrf.mxu2  ;;  %v7624_v1 = vunpack.c.l.b16 %v14636_v58 }
 0xc5e   : > { %10159 = vmatmul.msk.bf16.vlgmr.msra.gmra.mxu1 %vm1303_vm1, %v6372_v7  ;;  %16962 = vst [vmem:[#allocation53_spill] sm:$0xff] %v14789_v14  ;;  %v14802_v11 = vmul.f32 0.35355338, %v5899_v44  ;;  %v6476_v21 = vpack.c.b16 %v6475_v22, %v6474_v61  ;;  %v6723_v22 = vsel %vm2194_vm2, %v14814_v41, -inf  ;;  %v6296_v61 = vunpack.c.l.b16 %v14525_v25 }
 0xc5f   : > { %7611 = vmatpush.bf16.msra.mxu0 %v7599_v38  ;;  %6721 = vmax.xlane.f32.xlu2 %v6720_v3  ;;  %v5495_v30 = vpop.permute.xlu1 %5494 }
 0xc60   : > { %v6163_v54 = vunpack.c.l.b16 %v5495_v30  ;;  %v6735_v7 = vsel %vm2194_vm2, %v14802_v11, -inf }
 0xc61   : > { %v14785_v28 = vpop.permute.xlu0 %5656 }
 0xc62   : > { %v6164_v46 = vpack.c.b16 %v6163_v54, %v6162_v26  ;;  %v6295_v54 = vunpack.c.l.b16 %v14551_v40  ;;  %v7623_v40 = vunpack.c.l.b16 %v14576_v43 }
 0xc64   : > { %10151 = vmatmul.msk.bf16.vlgmr.msrb.gmra.mxu3 %vm1303_vm1, %v6164_v46  ;;  %v5925_v38 = vpop.f32.mrf.mxu3  ;;  %v6297_v14 = vpack.c.b16 %v6296_v61, %v6295_v54  ;;  %v7625_v59 = vpack.c.b16 %v7624_v1, %v7623_v40 }
 0xc65   : > { %6597 = vmatpush.bf16.xpose.msra.mxu1 %v6588_v18  ;;  %v5559_v12 = vpop.permute.xlu2 %5558  ;;  %v14804_v8 = vpop.f32.mrf.mxu2  ;;  %v14812_v3 = vmul.f32 0.35355338, %v5925_v38  ;;  %v6578_v38 = vunpack.c.l.b16 %v14755_v34 }
 0xc67   : > { %6730 = vmax.xlane.f32.xlu2 %v6729_v35  ;;  %v14796_v37 = vpop.permute.xlu1 %5784  ;;  %v6741_v26 = vsel %vm2194_vm2, %v14812_v3, -inf }
 0xc68   : > { %16963 = vst [vmem:[#allocation54_spill] sm:$0xff] %v14796_v37 }
 0xc69   : > { %v14799_v32 = vpop.permute.xlu0 %5496 }
 0xc6c   : > { %v14816_v30 = vpop.f32.mrf.mxu3 }
 0xc6d   : > { %v5625_v46 = vpop.permute.xlu2 %5624  ;;  %v5951_v35 = vpop.f32.mrf.mxu2 }
 0xc6e   : > { %10163 = vmatmul.msk.bf16.vlgmr.msrb.gmra.mxu1 %vm1303_vm1, %v6476_v21 }
 0xc6f   : > { %7533 = vmatpush.bf16.msrb.mxu1 %v14219_v27  ;;  %6736 = vmax.xlane.f32.xlu2 %v6735_v7  ;;  %v5659_v42 = vpop.permute.xlu1 %5658  ;;  %v6579_v27 = vunpack.c.l.b16 %v5559_v12  ;;  %v6191_v7 = vunpack.c.l.b16 %v5625_v46  ;;  %v14830_v12 = vmul.f32 0.35355338, %v14766_v49  ;;  %v6261_v46 = vpop.f32.mrf.mxu0 }
 0xc71   : > { %v14810_v18 = vpop.permute.xlu0 %5560  ;;  %v6580_v51 = vpack.c.b16 %v6579_v27, %v6578_v38  ;;  %v6399_v27 = vunpack.c.l.b16 %v14785_v28  ;;  %v14852_v28 = vmul.f32 0.35355338, %v14791_v23 }
 0xc73   : > { %v6738_v23 = vsel %vm2194_vm2, %v14852_v28, -inf }
 0xc74   : > { %v5977_v39 = vpop.f32.mrf.mxu3 }
 0xc75   : > { %v14849_v1 = vmul.f32 0.35355338, %v5977_v39  ;;  %v14871_v39 = vmul.f32 0.35355338, %v14804_v8 }
 0xc77   : > { %6742 = vmax.xlane.f32.xlu2 %v6741_v26  ;;  %v5499_v44 = vpop.permute.xlu1 %5498  ;;  %v14827_v26 = vmul.f32 0.35355338, %v5951_v35  ;;  %v6302_v35 = vsel %vm1303_vm1, %v6297_v14, 0  ;;  %v6188_v14 = vunpack.c.l.b16 %v14799_v32  ;;  %v6753_v40 = vsel %vm2194_vm2, %v14849_v1, -inf }
 0xc78   : > { %v6744_v8 = vsel %vm2194_vm2, %v14871_v39, -inf }
 0xc79   : > { %v5627_v21 = vpop.permute.xlu0 %5626  ;;  %6724 = vmax.xlane.f32.xlu0 %v6723_v22  ;;  %v6400_v22 = vunpack.c.l.b16 %v5659_v42  ;;  %v6747_v54 = vsel %vm2194_vm2, %v14827_v26, -inf  ;;  %v6001_v42 = vpop.f32.mrf.mxu2 }
 0xc7a   : > { %v6192_v37 = vunpack.c.l.b16 %v5627_v21 }
 0xc7b   : > { %v6401_v21 = vpack.c.b16 %v6400_v22, %v6399_v27  ;;  %v6263_v22 = vpop.f32.mrf.mxu0 }
 0xc7c   : > { %v6193_v25 = vpack.c.b16 %v6192_v37, %v6191_v7  ;;  %v6189_v37 = vunpack.c.l.b16 %v5499_v44  ;;  %v14854_v44 = vmul.f32 0.35355338, %v6001_v42  ;;  %v14873_v27 = vmul.f32 0.35355338, %v6263_v22 }
 0xc7d   : > { %v6406_v7 = vsel %vm1303_vm1, %v6401_v21, 0  ;;  %v6293_v21 = vunpack.c.l.b16 %v14610_v57 }
 0xc7e   : > { %10167 = vmatmul.msk.bf16.vlgmr.msra.gmra.mxu1 %vm1303_vm1, %v6580_v51  ;;  %v6198_v34 = vsel %vm1303_vm1, %v6193_v25, 0  ;;  %v6726_v51 = vsel %vm2194_vm2, %v14830_v12, -inf  ;;  %v6190_v38 = vpack.c.b16 %v6189_v37, %v6188_v14  ;;  %v6756_v32 = vsel %vm2194_vm2, %v14854_v44, -inf }
 0xc7f   : > { %7637 = vmatpush.bf16.msra.mxu1 %v7625_v59  ;;  %6207 = vmatpush.bf16.xpose.msrb.mxu2 %v6198_v34  ;;  %v14839_v49 = vpop.permute.xlu1 %5562  ;;  %v6732_v59 = vsel %vm2194_vm2, %v14832_v16, -inf  ;;  %v6503_v37 = vunpack.c.l.b16 %v14563_v62  ;;  %v6504_v14 = vunpack.c.l.b16 %v14537_v19  ;;  %v6292_v62 = vunpack.c.l.b16 %v14559_v24  ;;  %v6287_v24 = vpop.f32.mrf.mxu1 }
 0xc80   : > { %6748 = vmax.xlane.f32.xlu2 %v6747_v54  ;;  %6727 = vmax.xlane.f32.xlu1 %v6726_v51  ;;  %v14868_v54 = vmul.f32 0.35355338, %v6261_v46  ;;  %v6027_v46 = vpop.f32.mrf.mxu3  ;;  %v14892_v19 = vmul.f32 0.35355338, %v14816_v30 }
 0xc81   : > { %v14846_v61 = vpop.permute.xlu0 %5690  ;;  %6733 = vmax.xlane.f32.xlu0 %v6732_v59  ;;  %v6003_v51 = vpop.f32.mrf.mxu2  ;;  %v6294_v57 = vpack.c.b16 %v6293_v21, %v6292_v62 }
 0xc82   : > { %v6816_v59 = vsel %vm2194_vm2, %v14868_v54, -inf  ;;  %v6750_v30 = vsel %vm2194_vm2, %v14892_v19, -inf  ;;  %v14906_v21 = vmul.f32 0.35355338, %v6003_v51 }
 0xc86   : > { %10152 = vmatmul.msk.bf16.vlgmr.msrb.gmra.mxu2 %vm1303_vm1, %v6190_v38  ;;  %v6819_v38 = vsel %vm2194_vm2, %v14873_v27, -inf }
 0xc87   : > { %6311 = vmatpush.bf16.xpose.msra.mxu2 %v6302_v35  ;;  %v14860_v25 = vpop.permute.xlu1 %5692  ;;  %v5689_v35 = vpop.permute.xlu2 %5688 }
 0xc88   : > { %6754 = vmax.xlane.f32.xlu2 %v6753_v40  ;;  %6757 = vmax.xlane.f32.xlu1 %v6756_v32  ;;  %v6505_v40 = vpack.c.b16 %v6504_v14, %v6503_v37  ;;  %v14889_v32 = vmul.f32 0.35355338, %v6027_v46  ;;  %v14904_v14 = vmul.f32 0.35355338, %v6287_v24  ;;  %v6608_v46 = vunpack.c.l.b16 %v14846_v61 }
 0xc89   : > { %v14866_v34 = vpop.permute.xlu0 %5754  ;;  %6739 = vmax.xlane.f32.xlu0 %v6738_v23  ;;  %v6053_v22 = vpop.f32.mrf.mxu2  ;;  %v6759_v24 = vsel %vm2194_vm2, %v14906_v21, -inf }
 0xc8a   : > { %16964 = vst [vmem:[#allocation55_spill] sm:$0xff] %v14866_v34  ;;  %v14919_v43 = vmul.f32 0.35355338, %v6053_v22  ;;  %v6322_v34 = vunpack.c.l.b16 %v14632_v2 }
 0xc8f   : > { %6415 = vmatpush.bf16.xpose.msrb.mxu2 %v6406_v7  ;;  %v14878_v42 = vpop.permute.xlu1 %5756  ;;  %v14894_v23 = vpop.permute.xlu2 %5752 }
 0xc90   : > { %16965 = vst [vmem:[#allocation56_spill] sm:$0xff] %v14878_v42  ;;  %6817 = vmax.xlane.f32.xlu2 %v6816_v59  ;;  %6820 = vmax.xlane.f32.xlu1 %v6819_v38  ;;  %v6510_v59 = vsel %vm1303_vm1, %v6505_v40, 0  ;;  %v6822_v40 = vsel %vm2194_vm2, %v14904_v14, -inf }
 0xc91   : > { %v14886_v7 = vpop.permute.xlu0 %5786  ;;  %6745 = vmax.xlane.f32.xlu0 %v6744_v8  ;;  %16967 = vst [vmem:[#allocation58_spill] sm:$0xff] %v14894_v23  ;;  %v6762_v8 = vsel %vm2194_vm2, %v14889_v32, -inf }
 0xc92   : > { %16966 = vst [vmem:[#allocation57_spill] sm:$0xff] %v14886_v7 }
 0xc96   : > { %10156 = vmatmul.msk.bf16.vlgmr.msra.gmra.mxu2 %vm1303_vm1, %v6294_v57 }
 0xc97   : > { %6519 = vmatpush.bf16.xpose.msra.mxu2 %v6510_v59  ;;  %v14900_v38 = vpop.permute.xlu1 %5788  ;;  %v5529_v62 = vpop.permute.xlu2 %5528 }
 0xc98   : > { %16968 = vst [vmem:[#allocation59_spill] sm:$0xff] %v14900_v38  ;;  %6763 = vmax.xlane.f32.xlu2 %v6762_v8  ;;  %v14913_v59 = vpop.f32.mrf.mxu3  ;;  %v6055_v8 = vpop.f32.mrf.mxu2  ;;  %v6607_v38 = vunpack.c.l.b16 %v5689_v35  ;;  %v6396_v58 = vunpack.c.l.b16 %v5529_v62 }
 0xc99   : > { %v5531_v37 = vpop.permute.xlu0 %5530  ;;  %6751 = vmax.xlane.f32.xlu0 %v6750_v30  ;;  %v14917_v61 = vmul.f32 0.35355338, %v6055_v8 }
 0xc9a   : > { %v6397_v7 = vunpack.c.l.b16 %v5531_v37  ;;  %v6609_v51 = vpack.c.b16 %v6608_v46, %v6607_v38  ;;  %v6321_v37 = vunpack.c.l.b16 %v14595_v45 }
 0xc9c   : > { %v6398_v23 = vpack.c.b16 %v6397_v7, %v6396_v58  ;;  %v6614_v35 = vsel %vm1303_vm1, %v6609_v51, 0  ;;  %v6768_v58 = vsel %vm2194_vm2, %v14919_v43, -inf  ;;  %v6323_v7 = vpack.c.b16 %v6322_v34, %v6321_v37 }
 0xc9d   : > { %v6500_v51 = vunpack.c.l.b16 %v14587_v29  ;;  %v7546_v34 = vunpack.c.l.b16 %v14337_v50  ;;  %v6501_v37 = vunpack.c.l.b16 %v14572_v56  ;;  %v6605_v29 = vunpack.c.l.b16 %v14839_v49 }
 0xc9e   : > { %v6328_v8 = vsel %vm1303_vm1, %v6323_v7, 0  ;;  %v7650_v50 = vunpack.c.l.b16 %v14681_v6  ;;  %v6604_v56 = vunpack.c.l.b16 %v14810_v18  ;;  %v6530_v18 = vunpack.c.l.b16 %v14647_v47 }
 0xc9f   : > { %v14911_v57 = vpop.permute.xlu1 %5564  ;;  %v5501_v7 = vpop.permute.xlu2 %5500 }
 0xca0   : > { %6823 = vmax.xlane.f32.xlu2 %v6822_v40  ;;  %v6771_v40 = vsel %vm2194_vm2, %v14917_v61, -inf  ;;  %v6079_v38 = vpop.f32.mrf.mxu3 }
 0xca1   : > { %v5629_v30 = vpop.permute.xlu0 %5628  ;;  %6760 = vmax.xlane.f32.xlu0 %v6759_v24  ;;  %v14929_v22 = vmul.f32 0.35355338, %v6079_v38 }
 0xca2   : > { %v6217_v46 = vunpack.c.l.b16 %v5629_v30 }
 0xca3   : > { %v6774_v30 = vsel %vm2194_vm2, %v14929_v22, -inf }
 0xca6   : > { %10160 = vmatmul.msk.bf16.vlgmr.msrb.gmra.mxu2 %vm1303_vm1, %v6398_v23 }
 0xca7   : > { %6623 = vmatpush.bf16.xpose.msrb.mxu2 %v6614_v35  ;;  %v5631_v24 = vpop.permute.xlu1 %5630  ;;  %v14949_v49 = vpop.permute.xlu2 %5790 }
 0xca8   : > { %6772 = vmax.xlane.f32.xlu2 %v6771_v40  ;;  %v6218_v62 = vunpack.c.l.b16 %v5631_v24  ;;  %v7545_v40 = vunpack.c.l.b16 %v14287_v53  ;;  %v6502_v24 = vpack.c.b16 %v6501_v37, %v6500_v51  ;;  %v7649_v51 = vunpack.c.l.b16 %v14634_v5  ;;  %16970 = vst [vmem:[#allocation61_spill] sm:$0xff] %v14949_v49 }
 0xca9   : > { %v5661_v2 = vpop.permute.xlu0 %5660  ;;  %6769 = vmax.xlane.f32.xlu0 %v6768_v58 }
 0xcaa   : > { %v6219_v23 = vpack.c.b16 %v6218_v62, %v6217_v46  ;;  %v7547_v38 = vpack.c.b16 %v7546_v34, %v7545_v40  ;;  %v6606_v34 = vpack.c.b16 %v6605_v29, %v6604_v56  ;;  %v7651_v40 = vpack.c.b16 %v7650_v50, %v7649_v51 }
 0xcab   : > { %v6633_v51 = vunpack.c.l.b16 %v14860_v25 }
 0xcac   : > { %v6224_v45 = vsel %vm1303_vm1, %v6219_v23, 0  ;;  %v6425_v23 = vunpack.c.l.b16 %v5661_v2  ;;  %v6529_v2 = vunpack.c.l.b16 %v14606_v63 }
 0xcad   : > { %6233 = vmatpush.bf16.xpose.msra.mxu3 %v6224_v45 }
 0xcaf   : > { %v5663_v62 = vpop.permute.xlu1 %5662 }
 0xcb0   : > { %6775 = vmax.xlane.f32.xlu2 %v6774_v30  ;;  %v6426_v58 = vunpack.c.l.b16 %v5663_v62  ;;  %v6318_v62 = vunpack.c.l.b16 %v14618_v33 }
 0xcb1   : > { %v5533_v35 = vpop.permute.xlu0 %5532 }
 0xcb2   : > { %v6427_v53 = vpack.c.b16 %v6426_v58, %v6425_v23  ;;  %v6531_v58 = vpack.c.b16 %v6530_v18, %v6529_v2  ;;  %v6289_v2 = vpop.f32.mrf.mxu1 }
 0xcb4   : > { %v6536_v56 = vsel %vm1303_vm1, %v6531_v58, 0 }
 0xcb5   : > { %6337 = vmatpush.bf16.xpose.msrb.mxu3 %v6328_v8  ;;  %v6214_v8 = vunpack.c.l.b16 %v5501_v7 }
 0xcb6   : > { %10164 = vmatmul.msk.bf16.vlgmr.msra.gmra.mxu2 %vm1303_vm1, %v6502_v24  ;;  %v6432_v24 = vsel %vm1303_vm1, %v6427_v53, 0  ;;  %v14961_v53 = vpop.f32.mrf.mxu2 }
 0xcb7   : > { %7559 = vmatpush.bf16.msra.mxu2 %v7547_v38  ;;  %v6319_v38 = vunpack.c.l.b16 %v14657_v55  ;;  %v5695_v29 = vpop.permute.xlu1 %5694 }
 0xcb9   : > { %v14940_v46 = vpop.permute.xlu0 %5758 }
 0xcba   : > { %16969 = vst [vmem:[#allocation60_spill] sm:$0xff] %v14940_v46 }
 0xcbe   : > { %v6107_v58 = vpop.f32.mrf.mxu2 }
 0xcbf   : > { %v5535_v55 = vpop.permute.xlu1 %5534 }
 0xcc1   : > { %v5503_v45 = vpop.permute.xlu0 %5502 }
 0xcc2   : > { %v6215_v30 = vunpack.c.l.b16 %v5503_v45  ;;  %v6320_v45 = vpack.c.b16 %v6319_v38, %v6318_v62 }
 0xcc4   : > { %v6216_v37 = vpack.c.b16 %v6215_v30, %v6214_v8  ;;  %v6634_v30 = vunpack.c.l.b16 %v5695_v29 }
 0xcc6   : > { %10153 = vmatmul.msk.bf16.vlgmr.msra.gmra.mxu3 %vm1303_vm1, %v6216_v37  ;;  %10168 = vmatmul.msk.bf16.vlgmr.msrb.gmra.mxu2 %vm1303_vm1, %v6606_v34  ;;  %v6423_v34 = vunpack.c.l.b16 %v5535_v55  ;;  %v14967_v37 = vmul.f32 0.35355338, %v14913_v59  ;;  %v6081_v59 = vpop.f32.mrf.mxu3 }
 0xcc7   : > { %6441 = vmatpush.bf16.xpose.msra.mxu3 %v6432_v24  ;;  %7663 = vmatpush.bf16.msrb.mxu2 %v7651_v40  ;;  %v6422_v40 = vunpack.c.l.b16 %v5533_v35  ;;  %v14977_v35 = vmul.f32 0.35355338, %v6289_v2  ;;  %v14981_v29 = vpop.permute.xlu1 %5566 }
 0xcc8   : > { %v6765_v62 = vsel %vm2194_vm2, %v14967_v37, -inf }
 0xcc9   : > { %v6424_v24 = vpack.c.b16 %v6423_v34, %v6422_v40  ;;  %v7571_v34 = vunpack.c.l.b16 %v14408_v31 }
 0xcd2   : > { %v6722_v7 = vpop.xlane.xlu2 %6721 }
 0xcd3   : > { %v6912_v23 = vsub.f32 %v14776_v52, %v6722_v7  ;;  %v14979_v7 = vmul.f32 0.35355338, %v6107_v58 }
 0xcd5   : > { %v6976_v50 = vmul.f32 1.442695, %v6912_v23  ;;  %v6783_v55 = vsel %vm2194_vm2, %v14979_v7, -inf }
 0xcd6   : > { %10157 = vmatmul.msk.bf16.vlgmr.msrb.gmra.mxu3 %vm1303_vm1, %v6320_v45 }
 0xcd7   : > { %10929 = vpow2.f32 %v6976_v50  ;;  %6545 = vmatpush.bf16.xpose.msrb.mxu3 %v6536_v56  ;;  %v14986_v56 = vpop.f32.mrf.mxu0 }
 0xcda   : > { %v6731_v47 = vpop.xlane.xlu2 %6730 }
 0xcdb   : > { %v6915_v63 = vsub.f32 %v14787_v20, %v6731_v47  ;;  %v6635_v20 = vpack.c.b16 %v6634_v30, %v6633_v51  ;;  %v14983_v45 = vpop.f32.mrf.mxu1  ;;  %v6825_v47 = vsel %vm2194_vm2, %v14977_v35, -inf  ;;  %v6131_v30 = vpop.f32.mrf.mxu3  ;;  %v6526_v51 = vunpack.c.l.b16 %v14630_v60 }
 0xcdc   : > { %v14998_v40 = vmul.f32 0.35355338, %v6131_v30 }
 0xcdd   : > { %v14959_v8 = vpop.eup %10929  ;;  %v6982_v33 = vmul.f32 1.442695, %v6915_v63  ;;  %v6640_v38 = vsel %vm1303_vm1, %v6635_v20, 0 }
 0xcde   : > { %v7104_v52 = vsel %vm2194_vm2, %v14959_v8, 0.0 }
 0xcdf   : > { %10931 = vpow2.f32 %v6982_v33  ;;  %7105 = vadd.xlane.f32.xlu1 %v7104_v52  ;;  %v6527_v33 = vunpack.c.l.b16 %v14669_v13  ;;  %v7572_v52 = vunpack.c.l.b16 %v14472_v36 }
 0xce1   : > { %v6528_v20 = vpack.c.b16 %v6527_v33, %v6526_v51 }
 0xce3   : > { %v15009_v31 = vpop.f32.mrf.mxu1 }
 0xce5   : > { %v14969_v18 = vpop.eup %10931 }
 0xce6   : > { %10161 = vmatmul.msk.bf16.vlgmr.msra.gmra.mxu3 %vm1303_vm1, %v6424_v24  ;;  %v7113_v25 = vsel %vm2194_vm2, %v14969_v18, 0.0 }
 0xce7   : > { %6649 = vmatpush.bf16.xpose.msra.mxu3 %v6640_v38  ;;  %6766 = vmax.xlane.f32.xlu1 %v6765_v62  ;;  %v7573_v62 = vpack.c.b16 %v7572_v52, %v7571_v34  ;;  %v6631_v34 = vunpack.c.l.b16 %v14981_v29 }
 0xce8   : > { %7114 = vadd.xlane.f32.xlu2 %v7113_v25  ;;  %v15002_v25 = vpop.f32.mrf.mxu2 }
 0xcec   : > { %v6725_v23 = vpop.xlane.xlu0 %6724 }
 0xced   : > { %v6913_v50 = vsub.f32 %v14814_v41, %v6725_v23  ;;  %v14995_v41 = vmul.f32 0.35355338, %v6081_v59 }
 0xcef   : > { %v6978_v63 = vmul.f32 1.442695, %v6913_v50  ;;  %6826 = vmax.xlane.f32.xlu1 %v6825_v47  ;;  %v6777_v60 = vsel %vm2194_vm2, %v14995_v41, -inf  ;;  %v6737_v47 = vpop.xlane.xlu2 %6736 }
 0xcf0   : > { %6784 = vmax.xlane.f32.xlu2 %v6783_v55  ;;  %v6917_v33 = vsub.f32 %v14802_v11, %v6737_v47  ;;  %v6159_v51 = vpop.f32.mrf.mxu2  ;;  %v7676_v11 = vunpack.c.l.b16 %v14730_v17 }
 0xcf1   : > { %10933 = vpow2.f32 %v6978_v63 }
 0xcf2   : > { %v6986_v29 = vmul.f32 1.442695, %v6917_v33 }
 0xcf3   : > { %v6728_v24 = vpop.xlane.xlu1 %6727 }
 0xcf4   : > { %v6734_v2 = vpop.xlane.xlu0 %6733  ;;  %v6914_v38 = vsub.f32 %v14830_v12, %v6728_v24  ;;  %v6786_v12 = vsel %vm2194_vm2, %v14998_v40, -inf  ;;  %v15027_v24 = vpop.f32.mrf.mxu1 }
 0xcf5   : > { %v6916_v13 = vsub.f32 %v14832_v16, %v6734_v2  ;;  %v6367_v16 = vpop.f32.mrf.mxu0 }
 0xcf6   : > { %10165 = vmatmul.msk.bf16.vlgmr.msrb.gmra.mxu3 %vm1303_vm1, %v6528_v20  ;;  %v6980_v59 = vmul.f32 1.442695, %v6914_v38  ;;  %v15015_v50 = vmul.f32 0.35355338, %v6367_v16  ;;  %v6133_v38 = vpop.f32.mrf.mxu3 }
 0xcf7   : > { %v15007_v36 = vpop.eup %10933  ;;  %v6984_v58 = vmul.f32 1.442695, %v6916_v13  ;;  %7585 = vmatpush.bf16.msrb.mxu3 %v7573_v62  ;;  %6778 = vmax.xlane.f32.xlu1 %v6777_v60  ;;  %v6630_v13 = vunpack.c.l.b16 %v14911_v57  ;;  %v7675_v62 = vunpack.c.l.b16 %v14692_v9  ;;  %v15034_v60 = vmul.f32 0.35355338, %v6159_v51 }
 0xcf8   : > { %6787 = vmax.xlane.f32.xlu2 %v6786_v12  ;;  %v7107_v23 = vsel %vm2194_vm2, %v15007_v36, 0.0  ;;  %10935 = vpow2.f32 %v6980_v59  ;;  %v6843_v30 = vsel %vm2194_vm2, %v15015_v50, -inf  ;;  %v15037_v59 = vmul.f32 0.35355338, %v14961_v53 }
 0xcf9   : > { %7108 = vadd.xlane.f32.xlu0 %v7107_v23  ;;  %10937 = vpow2.f32 %v6984_v58  ;;  %v6632_v58 = vpack.c.b16 %v6631_v34, %v6630_v13  ;;  %v15039_v16 = vmul.f32 0.35355338, %v6133_v38  ;;  %v7677_v47 = vpack.c.b16 %v7676_v11, %v7675_v62 }
 0xcfa   : > { %10939 = vpow2.f32 %v6986_v29  ;;  %v6780_v53 = vsel %vm2194_vm2, %v15037_v59, -inf }
 0xcfc   : > { %v6740_v63 = vpop.xlane.xlu0 %6739  ;;  %v15051_v51 = vpop.f32.mrf.mxu1 }
 0xcfd   : > { %v6918_v38 = vsub.f32 %v14852_v28, %v6740_v63 }
 0xcfe   : > { %v15017_v55 = vpop.eup %10935 }
 0xcff   : > { %v15022_v52 = vpop.eup %10937  ;;  %v7110_v20 = vsel %vm2194_vm2, %v15017_v55, 0.0 }
 0xd00   : > { %6844 = vmax.xlane.f32.xlu2 %v6843_v30  ;;  %v7116_v2 = vsel %vm2194_vm2, %v15022_v52, 0.0  ;;  %v6795_v30 = vsel %vm2194_vm2, %v15034_v60, -inf }
 0xd01   : > { %7111 = vadd.xlane.f32.xlu0 %v7110_v20  ;;  %7117 = vadd.xlane.f32.xlu1 %v7116_v2  ;;  %v15053_v20 = vpop.eup %10939  ;;  %v15055_v2 = vpop.xlane.xlu1 %6757 }
 0xd02   : > { %v7119_v62 = vsel %vm2194_vm2, %v15053_v20, 0.0 }
 0xd04   : > { %v6746_v12 = vpop.xlane.xlu0 %6745 }
 0xd05   : > { %v6920_v23 = vsub.f32 %v14871_v39, %v6746_v12  ;;  %v6789_v39 = vsel %vm2194_vm2, %v15039_v16, -inf }
 0xd06   : > { %10169 = vmatmul.msk.bf16.vlgmr.msra.gmra.mxu3 %vm1303_vm1, %v6632_v58  ;;  %v6183_v58 = vpop.f32.mrf.mxu3 }
 0xd07   : > { %v6992_v57 = vmul.f32 1.442695, %v6920_v23  ;;  %7689 = vmatpush.bf16.msra.mxu3 %v7677_v47  ;;  %v6988_v23 = vmul.f32 1.442695, %v6918_v38  ;;  %v15067_v47 = vmul.f32 0.35355338, %v14986_v56 }
 0xd08   : > { %6796 = vmax.xlane.f32.xlu2 %v6795_v30  ;;  %v15071_v63 = vmul.f32 0.35355338, %v6183_v58 }
 0xd09   : > { %10941 = vpow2.f32 %v6992_v57  ;;  %6781 = vmax.xlane.f32.xlu0 %v6780_v53  ;;  %v15047_v33 = vpop.f32.mrf.mxu2  ;;  %6790 = vmax.xlane.f32.xlu1 %v6789_v39  ;;  %v6743_v57 = vpop.xlane.xlu2 %6742  ;;  %v6840_v56 = vsel %vm2194_vm2, %v15067_v47, -inf }
 0xd0a   : > { %v6599_v53 = vpop.f32.mrf.mxu1  ;;  %10943 = vpow2.f32 %v6988_v23  ;;  %v6821_v38 = vpop.xlane.xlu1 %6820  ;;  %v15086_v23 = vmul.f32 0.35355338, %v15009_v31  ;;  %v15096_v31 = vmul.f32 0.35355338, %v15002_v25 }
 0xd0b   : > { %v15074_v17 = vmul.f32 0.35355338, %v6599_v53  ;;  %v6945_v58 = vsub.f32 %v14873_v27, %v6821_v38  ;;  %v6919_v53 = vsub.f32 %v14812_v3, %v6743_v57  ;;  %v15101_v57 = vmul.f32 0.35355338, %v15027_v24 }
 0xd0c   : > { %v6752_v34 = vpop.xlane.xlu0 %6751  ;;  %16973 = vst [vmem:[#allocation64_spill] sm:$0xff] %v15086_v23  ;;  %v6849_v27 = vsel %vm2194_vm2, %v15086_v23, -inf }
 0xd0d   : > { %16972 = vst [vmem:[#allocation63_spill] sm:$0xff] %v15074_v17  ;;  %v6870_v25 = vsel %vm2194_vm2, %v15101_v57, -inf }
 0xd0e   : > { %v6185_v9 = vpop.f32.mrf.mxu3 }
 0xd0f   : > { %v15057_v11 = vpop.eup %10941 }
 0xd10   : > { %v7128_v13 = vsel %vm2194_vm2, %v15057_v11, 0.0 }
 0xd11   : > { %v6211_v29 = vpop.f32.mrf.mxu2  ;;  %7120 = vadd.xlane.f32.xlu0 %v7119_v62  ;;  %7129 = vadd.xlane.f32.xlu1 %v7128_v13  ;;  %v6469_v62 = vpop.f32.mrf.mxu0  ;;  %v6798_v13 = vsel %vm2194_vm2, %v15071_v63, -inf }
 0xd12   : > { %v15064_v12 = vmul.f32 0.35355338, %v6211_v29 }
 0xd14   : > { %16971 = vst [vmem:[#allocation62_spill] sm:$0xff] %v15064_v12  ;;  %v6761_v30 = vpop.xlane.xlu0 %6760  ;;  %v6807_v28 = vsel %vm2194_vm2, %v15064_v12, -inf }
 0xd15   : > { %v6925_v39 = vsub.f32 %v14906_v21, %v6761_v30  ;;  %6808 = vmax.xlane.f32.xlu2 %v6807_v28  ;;  %v6894_v21 = vsel %vm2194_vm2, %v15074_v17, -inf  ;;  %v15083_v30 = vpop.eup %10943  ;;  %v6749_v28 = vpop.xlane.xlu2 %6748 }
 0xd17   : > { %v7002_v29 = vmul.f32 1.442695, %v6925_v39  ;;  %v7042_v39 = vmul.f32 1.442695, %v6945_v58  ;;  %v6922_v58 = vsub.f32 %v14892_v19, %v6752_v34 }
 0xd19   : > { %6841 = vmax.xlane.f32.xlu0 %v6840_v56  ;;  %6799 = vmax.xlane.f32.xlu1 %v6798_v13  ;;  %10945 = vpow2.f32 %v7002_v29  ;;  %v6471_v6 = vpop.f32.mrf.mxu0  ;;  %v7122_v56 = vsel %vm2194_vm2, %v15083_v30, 0.0  ;;  %v6990_v29 = vmul.f32 1.442695, %v6919_v53 }
 0xd1a   : > { %10947 = vpow2.f32 %v7042_v39 }
 0xd1b   : > { %10949 = vpow2.f32 %v6990_v29 }
 0xd1d   : > { %6895 = vmax.xlane.f32.xlu2 %v6894_v21  ;;  %v15103_v38 = vpop.xlane.xlu2 %6754  ;;  %v6792_v21 = vsel %vm2194_vm2, %v15096_v31, -inf }
 0xd1f   : > { %v15091_v13 = vpop.eup %10945 }
 0xd20   : > { %16974 = vst [vmem:[#allocation65_spill] sm:$0xff] %v15091_v13  ;;  %v7143_v3 = vsel %vm2194_vm2, %v15091_v13, 0.0  ;;  %v15108_v53 = vpop.eup %10947 }
 0xd21   : > { %7123 = vadd.xlane.f32.xlu0 %v7122_v56  ;;  %6850 = vmax.xlane.f32.xlu1 %v6849_v27  ;;  %16975 = vst [vmem:[#allocation66_spill] sm:$0xff] %v15108_v53  ;;  %v6573_v39 = vpop.f32.mrf.mxu0  ;;  %v6996_v56 = vmul.f32 1.442695, %v6922_v58  ;;  %v7203_v24 = vsel %vm2194_vm2, %v15108_v53, 0.0  ;;  %v15114_v27 = vpop.eup %10949  ;;  %v15125_v58 = vmul.f32 0.35355338, %v14983_v45 }
 0xd22   : > { %v15116_v29 = vmul.f32 0.35355338, %v6573_v39  ;;  %v7125_v19 = vsel %vm2194_vm2, %v15114_v27, 0.0 }
 0xd23   : > { %10951 = vpow2.f32 %v6996_v56  ;;  %v6313_v56 = vpop.f32.mrf.mxu2 }
 0xd24   : > { %v6888_v34 = vsel %vm2194_vm2, %v15116_v29, -inf  ;;  %v15135_v49 = vmul.f32 0.35355338, %v6313_v56  ;;  %v6770_v56 = vpop.xlane.xlu0 %6769 }
 0xd25   : > { %7144 = vadd.xlane.f32.xlu2 %v7143_v3  ;;  %v15122_v3 = vpop.xlane.xlu2 %6817  ;;  %v6928_v17 = vsub.f32 %v14919_v43, %v6770_v56  ;;  %v15163_v43 = vmul.f32 0.35355338, %v6185_v9 }
 0xd26   : > { %16977 = vst [vmem:[#allocation68_spill] sm:$0xff] %v15135_v49  ;;  %v6828_v53 = vsel %vm2194_vm2, %v15135_v49, -inf }
 0xd29   : > { %6793 = vmax.xlane.f32.xlu0 %v6792_v21  ;;  %6871 = vmax.xlane.f32.xlu1 %v6870_v25  ;;  %v15127_v21 = vpop.eup %10951  ;;  %v6846_v25 = vsel %vm2194_vm2, %v15125_v58, -inf }
 0xd2a   : > { %16976 = vst [vmem:[#allocation67_spill] sm:$0xff] %v15127_v21  ;;  %v7134_v39 = vsel %vm2194_vm2, %v15127_v21, 0.0 }
 0xd2d   : > { %7204 = vadd.xlane.f32.xlu2 %v7203_v24  ;;  %v15133_v24 = vmul.f32 0.35355338, %v6469_v62 }
 0xd2f   : > { %v6864_v45 = vsel %vm2194_vm2, %v15133_v24, -inf }
 0xd31   : > { %7126 = vadd.xlane.f32.xlu0 %v7125_v19  ;;  %6889 = vmax.xlane.f32.xlu1 %v6888_v34  ;;  %v6764_v19 = vpop.xlane.xlu2 %6763  ;;  %v6921_v34 = vsub.f32 %v14827_v26, %v6749_v28 }
 0xd33   : > { %v6994_v5 = vmul.f32 1.442695, %v6921_v34 }
 0xd35   : > { %10953 = vpow2.f32 %v6994_v5  ;;  %v6926_v5 = vsub.f32 %v14889_v32, %v6764_v19  ;;  %v15175_v19 = vmul.f32 0.35355338, %v15047_v33 }
 0xd37   : > { %16981 = vst [vmem:[#allocation72_spill] sm:$0xff] %v15175_v19 }
 0xd39   : > { %6847 = vmax.xlane.f32.xlu0 %v6846_v25  ;;  %7135 = vadd.xlane.f32.xlu1 %v7134_v39  ;;  %v15142_v25 = vmul.f32 0.35355338, %v6471_v6  ;;  %v15144_v39 = vpop.f32.mrf.mxu2  ;;  %v15146_v62 = vpop.xlane.xlu2 %6823  ;;  %v7008_v6 = vmul.f32 1.442695, %v6928_v17  ;;  %v7004_v17 = vmul.f32 1.442695, %v6926_v5 }
 0xd3b   : > { %16978 = vst [vmem:[#allocation69_spill] sm:$0xff] %v15142_v25  ;;  %v6867_v26 = vsel %vm2194_vm2, %v15142_v25, -inf  ;;  %v15153_v13 = vpop.eup %10953  ;;  %10955 = vpow2.f32 %v7008_v6 }
 0xd3c   : > { %10957 = vpow2.f32 %v7004_v17 }
 0xd41   : > { %6865 = vmax.xlane.f32.xlu0 %v6864_v45  ;;  %6829 = vmax.xlane.f32.xlu1 %v6828_v53  ;;  %v15155_v53 = vpop.f32.mrf.mxu2  ;;  %v6773_v34 = vpop.xlane.xlu2 %6772  ;;  %v7131_v45 = vsel %vm2194_vm2, %v15153_v13, 0.0 }
 0xd42   : > { %v15169_v49 = vpop.eup %10955 }
 0xd49   : > { %v15150_v28 = vpop.f32.mrf.mxu3  ;;  %6868 = vmax.xlane.f32.xlu0 %v6867_v26  ;;  %v6929_v26 = vsub.f32 %v14917_v61, %v6773_v34  ;;  %v6419_v25 = vpop.f32.mrf.mxu2  ;;  %v7152_v34 = vsel %vm2194_vm2, %v15169_v49, 0.0 }
 0xd4a   : > { %v15181_v5 = vpop.xlane.xlu2 %6775 }
 0xd4b   : > { %v7010_v46 = vmul.f32 1.442695, %v6929_v26 }
 0xd4d   : > { %10959 = vpow2.f32 %v7010_v46  ;;  %v6804_v46 = vsel %vm2194_vm2, %v15175_v19, -inf }
 0xd51   : > { %v6237_v12 = vpop.f32.mrf.mxu3  ;;  %7132 = vadd.xlane.f32.xlu0 %v7131_v45  ;;  %v6801_v45 = vsel %vm2194_vm2, %v15163_v43, -inf  ;;  %v6521_v17 = vpop.f32.mrf.mxu2 }
 0xd52   : > { %v15160_v21 = vmul.f32 0.35355338, %v6237_v12  ;;  %v7106_v42 = vpop.xlane.xlu1 %7105 }
 0xd54   : > { %16979 = vst [vmem:[#allocation70_spill] sm:$0xff] %v15160_v21  ;;  %v6813_v56 = vsel %vm2194_vm2, %v15160_v21, -inf  ;;  %v6575_v21 = vpop.f32.mrf.mxu0 }
 0xd55   : > { %6814 = vmax.xlane.f32.xlu2 %v6813_v56  ;;  %v15183_v56 = vpop.eup %10957 }
 0xd56   : > { %16982 = vst [vmem:[#allocation73_spill] sm:$0xff] %v15183_v56 }
 0xd59   : > { %v6339_v32 = vpop.f32.mrf.mxu3  ;;  %6802 = vmax.xlane.f32.xlu0 %v6801_v45 }
 0xd5a   : > { %v15171_v12 = vmul.f32 0.35355338, %v6339_v32  ;;  %v6767_v61 = vpop.xlane.xlu1 %6766  ;;  %v15192_v32 = vmul.f32 0.35355338, %v15051_v51 }
 0xd5b   : > { %v6927_v9 = vsub.f32 %v14967_v37, %v6767_v61  ;;  %v15187_v37 = vpop.eup %10959  ;;  %v7146_v61 = vsel %vm2194_vm2, %v15183_v56, 0.0  ;;  %v15206_v56 = vmul.f32 0.35355338, %v6575_v21  ;;  %v6924_v21 = vsub.f32 %v14854_v44, %v15055_v2 }
 0xd5c   : > { %16980 = vst [vmem:[#allocation71_spill] sm:$0xff] %v15171_v12  ;;  %v6834_v6 = vsel %vm2194_vm2, %v15171_v12, -inf }
 0xd5d   : > { %6835 = vmax.xlane.f32.xlu1 %v6834_v6  ;;  %7153 = vadd.xlane.f32.xlu2 %v7152_v34  ;;  %v7006_v26 = vmul.f32 1.442695, %v6927_v9  ;;  %16983 = vst [vmem:[#allocation74_spill] sm:$0xff] %v15187_v37  ;;  %v7155_v9 = vsel %vm2194_vm2, %v15187_v37, 0.0  ;;  %v7115_v6 = vpop.xlane.xlu2 %7114  ;;  %v6923_v34 = vsub.f32 %v14849_v1, %v15103_v38  ;;  %v15208_v37 = vpop.f32.mrf.mxu2 }
 0xd5e   : > { %16986 = vst [vmem:[#allocation77_spill] sm:$0xff] %v15206_v56 }
 0xd5f   : > { %10961 = vpow2.f32 %v7006_v26  ;;  %v6873_v26 = vsel %vm2194_vm2, %v15192_v32, -inf  ;;  %v6998_v19 = vmul.f32 1.442695, %v6923_v34  ;;  %v15218_v34 = vmul.f32 0.35355338, %v6419_v25 }
 0xd60   : > { %10963 = vrcp.f32 %v7106_v42 }
 0xd61   : > { %v6341_v33 = vpop.f32.mrf.mxu3  ;;  %6805 = vmax.xlane.f32.xlu0 %v6804_v46  ;;  %16987 = vst [vmem:[#allocation78_spill] sm:$0xff] %v15218_v34 }
 0xd62   : > { %v15189_v45 = vpop.xlane.xlu1 %6826  ;;  %v15200_v46 = vmul.f32 0.35355338, %v6341_v33 }
 0xd64   : > { %16984 = vst [vmem:[#allocation75_spill] sm:$0xff] %v15200_v46  ;;  %v6837_v1 = vsel %vm2194_vm2, %v15200_v46, -inf }
 0xd65   : > { %7147 = vadd.xlane.f32.xlu2 %v7146_v61  ;;  %7156 = vadd.xlane.f32.xlu1 %v7155_v9  ;;  %v15204_v51 = vpop.eup %10961  ;;  %v6785_v9 = vpop.xlane.xlu2 %6784 }
 0xd66   : > { %16985 = vst [vmem:[#allocation76_spill] sm:$0xff] %v15204_v51  ;;  %v7149_v42 = vsel %vm2194_vm2, %v15204_v51, 0.0  ;;  %v10964_v38 = vpop.eup %10963  ;;  %v6891_v51 = vsel %vm2194_vm2, %v15206_v56, -inf }
 0xd69   : > { %v6443_v12 = vpop.f32.mrf.mxu3  ;;  %6874 = vmax.xlane.f32.xlu0 %v6873_v26  ;;  %v7360_v26 = vmul.f32 %v10964_v38, %v14959_v8  ;;  %v6855_v8 = vsel %vm2194_vm2, %v15218_v34, -inf }
 0xd6a   : > { %v15214_v33 = vpop.xlane.xlu1 %6778  ;;  %v15221_v46 = vmul.f32 0.35355338, %v6443_v12 }
 0xd6c   : > { %v7109_v61 = vpop.xlane.xlu0 %7108  ;;  %16988 = vst [vmem:[#allocation79_spill] sm:$0xff] %v15221_v46  ;;  %v6858_v25 = vsel %vm2194_vm2, %v15221_v46, -inf }
 0xd6d   : > { %10965 = vrcp.f32 %v7109_v61  ;;  %6838 = vmax.xlane.f32.xlu2 %v6837_v1  ;;  %7150 = vadd.xlane.f32.xlu1 %v7149_v42  ;;  %v7000_v61 = vmul.f32 1.442695, %v6924_v21  ;;  %v7702_v21 = vunpack.c.l.b16 %v14463_v10 }
 0xd6e   : > { %10967 = vpow2.f32 %v6998_v19  ;;  %v7424_v19 = vpack.c.bf16 %v7360_v26, %v7360_v26 }
 0xd6f   : > { %10969 = vrcp.f32 %v7115_v6  ;;  %v6944_v6 = vsub.f32 %v14868_v54, %v15122_v3 }
 0xd70   : > { %v7490_v46 = vunpack.c.l.b16 %v7424_v19 }
 0xd71   : > { %v6445_v23 = vpop.f32.mrf.mxu3  ;;  %6892 = vmax.xlane.f32.xlu0 %v6891_v51  ;;  %v6625_v51 = vpop.f32.mrf.mxu2  ;;  %v7040_v3 = vmul.f32 1.442695, %v6944_v6 }
 0xd73   : > { %v10966_v1 = vpop.eup %10965 }
 0xd74   : > { %v15225_v42 = vpop.eup %10967  ;;  %v7361_v44 = vmul.f32 %v10966_v1, %v15007_v36  ;;  %v7112_v2 = vpop.xlane.xlu0 %7111  ;;  %v15237_v1 = vmul.f32 0.35355338, %v6521_v17 }
 0xd75   : > { %16989 = vst [vmem:[#allocation80_spill] sm:$0xff] %v15225_v42  ;;  %v10970_v12 = vpop.eup %10969  ;;  %10971 = vrcp.f32 %v7112_v2  ;;  %6859 = vmax.xlane.f32.xlu2 %v6858_v25  ;;  %6856 = vmax.xlane.f32.xlu1 %v6855_v8  ;;  %v7118_v36 = vpop.xlane.xlu1 %7117  ;;  %v7137_v26 = vsel %vm2194_vm2, %v15225_v42, 0.0  ;;  %v7701_v25 = vunpack.c.l.b16 %v14331_v48  ;;  %v6933_v42 = vsub.f32 %v14979_v7, %v6785_v9 }
 0xd76   : > { %10973 = vpow2.f32 %v7000_v61  ;;  %v7425_v38 = vpack.c.bf16 %v7361_v44, %v7361_v44  ;;  %v7363_v34 = vmul.f32 %v10970_v12, %v14969_v18  ;;  %v15241_v61 = vmul.f32 0.35355338, %v6625_v51  ;;  %v6788_v8 = vpop.xlane.xlu2 %6787 }
 0xd77   : > { %v7703_v56 = vpack.c.b16 %v7702_v21, %v7701_v25  ;;  %v6934_v18 = vsub.f32 %v14998_v40, %v6788_v8  ;;  %v6876_v51 = vsel %vm2194_vm2, %v15237_v1, -inf  ;;  %10975 = vpow2.f32 %v7040_v3 }
 0xd78   : > { %v7491_v2 = vunpack.c.l.b16 %v7425_v38  ;;  %v7427_v19 = vpack.c.bf16 %v7363_v34, %v7363_v34  ;;  %v7728_v9 = vunpack.c.l.b16 %v14467_v4  ;;  %v7018_v40 = vmul.f32 1.442695, %v6933_v42 }
 0xd79   : > { %v15243_v54 = vpop.f32.mrf.mxu3  ;;  %7138 = vadd.xlane.f32.xlu0 %v7137_v26  ;;  %10977 = vrcp.f32 %v7118_v36  ;;  %v7020_v6 = vmul.f32 1.442695, %v6934_v18  ;;  %v15260_v38 = vmul.f32 0.35355338, %v6445_v23 }
 0xd7a   : > { %v7492_v10 = vpack.c.b16 %v7491_v2, %v7490_v46  ;;  %v6900_v46 = vsel %vm2194_vm2, %v15241_v61, -inf  ;;  %v7517_v34 = vunpack.c.l.b16 %v7427_v19  ;;  %10979 = vpow2.f32 %v7018_v40 }
 0xd7b   : > { %v10972_v44 = vpop.eup %10971  ;;  %10981 = vpow2.f32 %v7020_v6  ;;  %v6861_v23 = vsel %vm2194_vm2, %v15260_v38, -inf  ;;  %v6627_v6 = vpop.f32.mrf.mxu2 }
 0xd7c   : > { %v15246_v17 = vpop.eup %10973  ;;  %v7362_v12 = vmul.f32 %v10972_v44, %v15017_v55  ;;  %v15250_v48 = vpop.xlane.xlu0 %6781  ;;  %10170 = vmatmul.msk.bf16.vlgmr.msrb.gmra.mxu0 %vm2194_vm2, %v7492_v10 }
 0xd7d   : > { %7715 = vmatpush.bf16.msrb.mxu0 %v7703_v56  ;;  %6877 = vmax.xlane.f32.xlu2 %v6876_v51  ;;  %v7140_v55 = vsel %vm2194_vm2, %v15246_v17, 0.0  ;;  %v7727_v56 = vunpack.c.l.b16 %v14428_v15  ;;  %v6791_v26 = vpop.xlane.xlu1 %6790  ;;  %v15265_v4 = vpop.eup %10975 }
 0xd7e   : > { %v7426_v7 = vpack.c.bf16 %v7362_v12, %v7362_v12  ;;  %6901 = vmax.xlane.f32.xlu1 %v6900_v46  ;;  %v7200_v44 = vsel %vm2194_vm2, %v15265_v4, 0.0  ;;  %v6935_v51 = vsub.f32 %v15039_v16, %v6791_v26  ;;  %v7754_v16 = vunpack.c.l.b16 %v14549_v0 }
 0xd7f   : > { %v7729_v3 = vpack.c.b16 %v7728_v9, %v7727_v56  ;;  %v10978_v36 = vpop.eup %10977 }
 0xd80   : > { %v7516_v21 = vunpack.c.l.b16 %v7426_v7  ;;  %v7364_v10 = vmul.f32 %v10978_v36, %v15022_v52  ;;  %v15275_v19 = vpop.eup %10979  ;;  %v15283_v7 = vmul.f32 0.35355338, %v15150_v28  ;;  %v7022_v26 = vmul.f32 1.442695, %v6935_v51 }
 0xd81   : > { %v6549_v2 = vpop.f32.mrf.mxu3  ;;  %7141 = vadd.xlane.f32.xlu0 %v7140_v55  ;;  %v15277_v18 = vpop.eup %10981  ;;  %v15291_v28 = vmul.f32 0.35355338, %v6627_v6 }
 0xd82   : > { %v7518_v25 = vpack.c.b16 %v7517_v34, %v7516_v21  ;;  %v15263_v8 = vmul.f32 0.35355338, %v6549_v2  ;;  %v7428_v9 = vpack.c.bf16 %v7364_v10, %v7364_v10  ;;  %v7167_v34 = vsel %vm2194_vm2, %v15275_v19, 0.0  ;;  %v6845_v2 = vpop.xlane.xlu2 %6844 }
 0xd83   : > { %v7170_v21 = vsel %vm2194_vm2, %v15277_v18, 0.0 }
 0xd84   : > { %v7121_v42 = vpop.xlane.xlu0 %7120  ;;  %10171 = vmatmul.msk.bf16.vlgmr.msrb.gmra.mxu1 %vm2194_vm2, %v7518_v25  ;;  %v6885_v15 = vsel %vm2194_vm2, %v15263_v8, -inf  ;;  %v7542_v25 = vunpack.c.l.b16 %v7428_v9  ;;  %v6903_v9 = vsel %vm2194_vm2, %v15291_v28, -inf }
 0xd85   : > { %10983 = vrcp.f32 %v7121_v42  ;;  %7741 = vmatpush.bf16.msrb.mxu1 %v7729_v3  ;;  %6862 = vmax.xlane.f32.xlu2 %v6861_v23  ;;  %v15280_v46 = vpop.xlane.xlu1 %7129  ;;  %v6810_v3 = vsel %vm2194_vm2, %v15283_v7, -inf  ;;  %v16990_v42 = vld [vmem:[#allocation4_spill] sm:$0xff] }
 0xd86   : > { %6886 = vmax.xlane.f32.xlu1 %v6885_v15  ;;  %v7753_v23 = vunpack.c.l.b16 %v16990_v42  ;;  %v6601_v15 = vpop.f32.mrf.mxu1  ;;  %10985 = vpow2.f32 %v7022_v26  ;;  %v6953_v42 = vsub.f32 %v15015_v50, %v6845_v2 }
 0xd89   : > { %7201 = vadd.xlane.f32.xlu0 %v7200_v44  ;;  %v6651_v52 = vpop.f32.mrf.mxu3  ;;  %v7755_v44 = vpack.c.b16 %v7754_v16, %v7753_v23 }
 0xd8a   : > { %v15296_v36 = vmul.f32 0.35355338, %v6651_v52  ;;  %v6946_v52 = vsub.f32 %v14904_v14, %v15146_v62  ;;  %v15314_v26 = vpop.xlane.xlu2 %6796 }
 0xd8b   : > { %v10984_v12 = vpop.eup %10983 }
 0xd8c   : > { %v7365_v40 = vmul.f32 %v10984_v12, %v15053_v20  ;;  %v6842_v55 = vpop.xlane.xlu0 %6841  ;;  %v15298_v12 = vmul.f32 0.35355338, %v6601_v15  ;;  %v7044_v16 = vmul.f32 1.442695, %v6946_v52 }
 0xd8d   : > { %7168 = vadd.xlane.f32.xlu2 %v7167_v34  ;;  %v6952_v0 = vsub.f32 %v15067_v47, %v6842_v55  ;;  %v6800_v34 = vpop.xlane.xlu1 %6799  ;;  %v15310_v55 = vpop.eup %10985 }
 0xd8e   : > { %v7429_v56 = vpack.c.bf16 %v7365_v40, %v7365_v40  ;;  %7171 = vadd.xlane.f32.xlu1 %v7170_v21  ;;  %v6906_v40 = vsel %vm2194_vm2, %v15296_v36, -inf  ;;  %v6897_v47 = vsel %vm2194_vm2, %v15298_v12, -inf  ;;  %v7173_v62 = vsel %vm2194_vm2, %v15310_v55, 0.0 }
 0xd8f   : > { %v7056_v21 = vmul.f32 1.442695, %v6952_v0  ;;  %v6938_v52 = vsub.f32 %v15071_v63, %v6800_v34 }
 0xd90   : > { %v7543_v20 = vunpack.c.l.b16 %v7429_v56 }
 0xd91   : > { %6811 = vmax.xlane.f32.xlu0 %v6810_v3  ;;  %v6653_v6 = vpop.f32.mrf.mxu3  ;;  %10987 = vpow2.f32 %v7056_v21 }
 0xd92   : > { %v7544_v10 = vpack.c.b16 %v7543_v20, %v7542_v25  ;;  %v15312_v56 = vmul.f32 0.35355338, %v6653_v6  ;;  %v15317_v25 = vmul.f32 0.35355338, %v15144_v39  ;;  %10989 = vpow2.f32 %v7044_v16 }
 0xd94   : > { %10172 = vmatmul.msk.bf16.vlgmr.msra.gmra.mxu2 %vm2194_vm2, %v7544_v10  ;;  %v7124_v51 = vpop.xlane.xlu0 %7123  ;;  %16991 = vst [vmem:[#allocation4_spill] sm:$0xff] %v15312_v56  ;;  %v6909_v3 = vsel %vm2194_vm2, %v15312_v56, -inf  ;;  %v6831_v39 = vsel %vm2194_vm2, %v15317_v25, -inf }
 0xd95   : > { %7767 = vmatpush.bf16.msra.mxu2 %v7755_v44  ;;  %6904 = vmax.xlane.f32.xlu2 %v6903_v9  ;;  %10991 = vrcp.f32 %v7124_v51  ;;  %v15325_v15 = vpop.xlane.xlu1 %6850  ;;  %v15331_v44 = vpop.xlane.xlu2 %6808  ;;  %v6947_v51 = vsub.f32 %v14977_v35, %v15189_v45  ;;  %v7028_v35 = vmul.f32 1.442695, %v6938_v52 }
 0xd96   : > { %6907 = vmax.xlane.f32.xlu1 %v6906_v40 }
 0xd97   : > { %v15329_v10 = vpop.eup %10987 }
 0xd98   : > { %v15333_v0 = vpop.eup %10989  ;;  %v7224_v50 = vsel %vm2194_vm2, %v15329_v10, 0.0 }
 0xd99   : > { %6898 = vmax.xlane.f32.xlu0 %v6897_v47  ;;  %v7206_v21 = vsel %vm2194_vm2, %v15333_v0, 0.0 }
 0xd9b   : > { %v10992_v40 = vpop.eup %10991 }
 0xd9c   : > { %v6794_v14 = vpop.xlane.xlu0 %6793  ;;  %v7366_v6 = vmul.f32 %v10992_v40, %v15083_v30 }
 0xd9d   : > { %v6936_v20 = vsub.f32 %v15096_v31, %v6794_v14  ;;  %7174 = vadd.xlane.f32.xlu2 %v7173_v62  ;;  %v7058_v31 = vmul.f32 1.442695, %v6953_v42  ;;  %v6872_v16 = vpop.xlane.xlu1 %6871  ;;  %v15348_v62 = vmul.f32 0.35355338, %v15155_v53  ;;  %v15352_v63 = vpop.xlane.xlu2 %6895 }
 0xd9e   : > { %6910 = vmax.xlane.f32.xlu1 %v6909_v3  ;;  %v7430_v30 = vpack.c.bf16 %v7366_v6, %v7366_v6 }
 0xd9f   : > { %v7024_v23 = vmul.f32 1.442695, %v6936_v20  ;;  %v7046_v20 = vmul.f32 1.442695, %v6947_v51  ;;  %v6852_v40 = vsel %vm2194_vm2, %v15348_v62, -inf }
 0xda0   : > { %v7568_v51 = vunpack.c.l.b16 %v7430_v30 }
 0xda1   : > { %10993 = vpow2.f32 %v7024_v23  ;;  %6832 = vmax.xlane.f32.xlu0 %v6831_v39  ;;  %v16992_v23 = vld [vmem:[#allocation16_spill] sm:$0xff] }
 0xda2   : > { %v7780_v39 = vunpack.c.l.b16 %v16992_v23 }
 0xda4   : > { %v7127_v9 = vpop.xlane.xlu0 %7126 }
 0xda5   : > { %10995 = vrcp.f32 %v7127_v9  ;;  %v15375_v30 = vpop.xlane.xlu2 %7144 }
 0xda6   : > { %10997 = vpow2.f32 %v7058_v31  ;;  %7225 = vadd.xlane.f32.xlu1 %v7224_v50  ;;  %v6930_v31 = vsub.f32 %v14929_v22, %v15181_v5 }
 0xda7   : > { %v15337_v2 = vpop.eup %10993  ;;  %10999 = vpow2.f32 %v7046_v20 }
 0xda8   : > { %v7176_v47 = vsel %vm2194_vm2, %v15337_v2, 0.0  ;;  %11001 = vpow2.f32 %v7028_v35  ;;  %v6931_v35 = vsub.f32 %v14995_v41, %v15214_v33 }
 0xda9   : > { %7207 = vadd.xlane.f32.xlu0 %v7206_v21  ;;  %7177 = vadd.xlane.f32.xlu2 %v7176_v47  ;;  %v7012_v21 = vmul.f32 1.442695, %v6930_v31 }
 0xdaa   : > { %v7014_v41 = vmul.f32 1.442695, %v6931_v35 }
 0xdab   : > { %v10996_v14 = vpop.eup %10995 }
 0xdac   : > { %v15350_v3 = vpop.eup %10997  ;;  %v7367_v45 = vmul.f32 %v10996_v14, %v15114_v27  ;;  %v6848_v34 = vpop.xlane.xlu0 %6847  ;;  %v6962_v27 = vsub.f32 %v15101_v57, %v6872_v16 }
 0xdad   : > { %v6954_v42 = vsub.f32 %v15125_v58, %v6848_v34  ;;  %v7227_v50 = vsel %vm2194_vm2, %v15350_v3, 0.0  ;;  %v16993_v58 = vld [vmem:[#allocation11_spill] sm:$0xff]  ;;  %v15365_v14 = vpop.xlane.xlu1 %6889 }
 0xdae   : > { %v7431_v9 = vpack.c.bf16 %v7367_v45, %v7367_v45  ;;  %v7779_v6 = vunpack.c.l.b16 %v16993_v58  ;;  %v7076_v47 = vmul.f32 1.442695, %v6962_v27  ;;  %v15368_v45 = vpop.eup %10999 }
 0xdaf   : > { %v7060_v53 = vmul.f32 1.442695, %v6954_v42  ;;  %v15371_v16 = vpop.eup %11001  ;;  %v7209_v23 = vsel %vm2194_vm2, %v15368_v45, 0.0 }
 0xdb0   : > { %v7569_v52 = vunpack.c.l.b16 %v7431_v9  ;;  %v7781_v5 = vpack.c.b16 %v7780_v39, %v7779_v6 }
 0xdb1   : > { %11003 = vpow2.f32 %v7060_v53  ;;  %6853 = vmax.xlane.f32.xlu0 %v6852_v40  ;;  %7228 = vadd.xlane.f32.xlu2 %v7227_v50  ;;  %v15396_v50 = vpop.xlane.xlu2 %7204 }
 0xdb2   : > { %v7570_v22 = vpack.c.b16 %v7569_v52, %v7568_v51  ;;  %11005 = vpow2.f32 %v7012_v21 }
 0xdb3   : > { %11007 = vpow2.f32 %v7076_v47 }
 0xdb4   : > { %10173 = vmatmul.msk.bf16.vlgmr.msrb.gmra.mxu3 %vm2194_vm2, %v7570_v22  ;;  %v6866_v20 = vpop.xlane.xlu0 %6865 }
 0xdb5   : > { %7793 = vmatpush.bf16.msrb.mxu3 %v7781_v5  ;;  %v6960_v57 = vsub.f32 %v15133_v24, %v6866_v20  ;;  %v7182_v24 = vsel %vm2194_vm2, %v15371_v16, 0.0  ;;  %v15391_v53 = vpop.xlane.xlu1 %7135 }
 0xdb7   : > { %v15377_v34 = vpop.eup %11003  ;;  %v7072_v42 = vmul.f32 1.442695, %v6960_v57 }
 0xdb8   : > { %v7230_v39 = vsel %vm2194_vm2, %v15377_v34, 0.0  ;;  %v15387_v31 = vpop.eup %11005 }
 0xdb9   : > { %11009 = vpow2.f32 %v7072_v42  ;;  %7210 = vadd.xlane.f32.xlu0 %v7209_v23  ;;  %7231 = vadd.xlane.f32.xlu1 %v7230_v39  ;;  %v15389_v9 = vpop.eup %11007  ;;  %v7158_v51 = vsel %vm2194_vm2, %v15387_v31, 0.0  ;;  %v15416_v42 = vmul.f32 0.35355338, %v15208_v37 }
 0xdba   : > { %7183 = vadd.xlane.f32.xlu2 %v7182_v24  ;;  %11011 = vpow2.f32 %v7014_v41  ;;  %v7254_v52 = vsel %vm2194_vm2, %v15389_v9, 0.0 }
 0xdbb   : > { %11013 = vrcp.f32 %v15280_v46  ;;  %v6932_v46 = vsub.f32 %v15037_v59, %v15250_v48  ;;  %v16995_v48 = vld [vmem:[#allocation47_spill] sm:$0xff] }
 0xdbc   : > { %v15385_v33 = vpop.xlane.xlu0 %6868  ;;  %v7806_v41 = vunpack.c.l.b16 %v16995_v48 }
 0xdbd   : > { %v15409_v21 = vpop.xlane.xlu1 %6829  ;;  %v7016_v35 = vmul.f32 1.442695, %v6932_v46  ;;  %v6879_v46 = vsel %vm2194_vm2, %v15416_v42, -inf }
 0xdbf   : > { %v15393_v40 = vpop.eup %11009 }
 0xdc0   : > { %16994 = vst [vmem:[#allocation16_spill] sm:$0xff] %v15393_v40  ;;  %v7248_v27 = vsel %vm2194_vm2, %v15393_v40, 0.0  ;;  %v15404_v58 = vpop.eup %11011 }
 0xdc1   : > { %7159 = vadd.xlane.f32.xlu0 %v7158_v51  ;;  %7249 = vadd.xlane.f32.xlu1 %v7248_v27  ;;  %v11014_v22 = vpop.eup %11013  ;;  %v7161_v20 = vsel %vm2194_vm2, %v15404_v58, 0.0  ;;  %v6968_v51 = vsub.f32 %v15116_v29, %v15365_v14 }
 0xdc2   : > { %7255 = vadd.xlane.f32.xlu2 %v7254_v52  ;;  %v7368_v5 = vmul.f32 %v11014_v22, %v15057_v11 }
 0xdc4   : > { %v7133_v6 = vpop.xlane.xlu0 %7132  ;;  %v7432_v23 = vpack.c.bf16 %v7368_v5, %v7368_v5 }
 0xdc5   : > { %11015 = vrcp.f32 %v7133_v6 }
 0xdc6   : > { %11017 = vpow2.f32 %v7016_v35  ;;  %v7594_v52 = vunpack.c.l.b16 %v7432_v23  ;;  %v6937_v23 = vsub.f32 %v15034_v60, %v15314_v26 }
 0xdc8   : > { %v15411_v47 = vpop.xlane.xlu2 %6814 }
 0xdc9   : > { %7162 = vadd.xlane.f32.xlu0 %v7161_v20 }
 0xdcb   : > { %v11016_v57 = vpop.eup %11015 }
 0xdcc   : > { %v7369_v39 = vmul.f32 %v11016_v57, %v15153_v13  ;;  %v6803_v24 = vpop.xlane.xlu0 %6802  ;;  %v16996_v13 = vld [vmem:[#allocation43_spill] sm:$0xff]  ;;  %v7088_v57 = vmul.f32 1.442695, %v6968_v51  ;;  %v15431_v14 = vpop.eup %11017  ;;  %v15442_v51 = vmul.f32 0.35355338, %v15243_v54 }
 0xdcd   : > { %v6939_v59 = vsub.f32 %v15163_v43, %v6803_v24  ;;  %v7805_v5 = vunpack.c.l.b16 %v16996_v13 }
 0xdce   : > { %v7433_v11 = vpack.c.bf16 %v7369_v39, %v7369_v39 }
 0xdcf   : > { %v7030_v27 = vmul.f32 1.442695, %v6939_v59  ;;  %v7807_v20 = vpack.c.b16 %v7806_v41, %v7805_v5  ;;  %v7164_v59 = vsel %vm2194_vm2, %v15431_v14, 0.0  ;;  %v7026_v41 = vmul.f32 1.442695, %v6937_v23 }
 0xdd0   : > { %v7595_v6 = vunpack.c.l.b16 %v7433_v11  ;;  %v15423_v22 = vpop.xlane.xlu1 %6835  ;;  %v7154_v37 = vpop.xlane.xlu2 %7153 }
 0xdd1   : > { %11019 = vpow2.f32 %v7030_v27  ;;  %6880 = vmax.xlane.f32.xlu0 %v6879_v46  ;;  %v16999_v46 = vld [vmem:[#allocation68_spill] sm:$0xff] }
 0xdd2   : > { %v7596_v43 = vpack.c.b16 %v7595_v6, %v7594_v52  ;;  %11021 = vrcp.f32 %v7154_v37  ;;  %v16998_v6 = vld [vmem:[#allocation64_spill] sm:$0xff]  ;;  %v6948_v13 = vsub.f32 %v16999_v46, %v15409_v21  ;;  %v17002_v46 = vld [vmem:[#allocation73_spill] sm:$0xff] }
 0xdd3   : > { %11023 = vpow2.f32 %v7088_v57  ;;  %v6955_v37 = vsub.f32 %v16998_v6, %v15325_v15  ;;  %v6882_v57 = vsel %vm2194_vm2, %v15442_v51, -inf }
 0xdd4   : > { %10174 = vmatmul.msk.bf16.vlgmr.msra.gmra.mxu0 %vm2194_vm2, %v7596_v43  ;;  %v15429_v29 = vpop.xlane.xlu0 %6805  ;;  %v7048_v21 = vmul.f32 1.442695, %v6948_v13 }
 0xdd5   : > { %7819 = vmatpush.bf16.msra.mxu0 %v7807_v20 }
 0xdd7   : > { %v15433_v35 = vpop.eup %11019 }
 0xdd8   : > { %v7157_v39 = vpop.xlane.xlu1 %7156  ;;  %v7148_v24 = vpop.xlane.xlu2 %7147  ;;  %v7185_v11 = vsel %vm2194_vm2, %v15433_v35, 0.0 }
 0xdd9   : > { %7165 = vadd.xlane.f32.xlu0 %v7164_v59  ;;  %7186 = vadd.xlane.f32.xlu1 %v7185_v11  ;;  %v11022_v48 = vpop.eup %11021  ;;  %11025 = vrcp.f32 %v7157_v39  ;;  %v17001_v11 = vld [vmem:[#allocation2_spill] sm:$0xff] }
 0xdda   : > { %11027 = vrcp.f32 %v7148_v24  ;;  %v15444_v60 = vpop.eup %11023  ;;  %v7376_v26 = vmul.f32 %v11022_v48, %v15169_v49  ;;  %v7062_v24 = vmul.f32 1.442695, %v6955_v37  ;;  %v7910_v48 = vunpack.c.l.b16 %v17001_v11  ;;  %v17006_v11 = vld [vmem:[#allocation76_spill] sm:$0xff] }
 0xddb   : > { %16997 = vst [vmem:[#allocation11_spill] sm:$0xff] %v15444_v60  ;;  %11029 = vpow2.f32 %v7026_v41  ;;  %v7272_v49 = vsel %vm2194_vm2, %v15444_v60, 0.0 }
 0xddc   : > { %v6875_v27 = vpop.xlane.xlu0 %6874  ;;  %v7440_v23 = vpack.c.bf16 %v7376_v26, %v7376_v26  ;;  %v17003_v26 = vld [vmem:[#allocation77_spill] sm:$0xff] }
 0xddd   : > { %v6963_v52 = vsub.f32 %v15192_v32, %v6875_v27  ;;  %v17000_v32 = vld [vmem:[#allocation74_spill] sm:$0xff] }
 0xddf   : > { %v7078_v5 = vmul.f32 1.442695, %v6963_v52  ;;  %v11026_v43 = vpop.eup %11025  ;;  %v7698_v52 = vunpack.c.l.b16 %v7440_v23 }
 0xde0   : > { %v7151_v20 = vpop.xlane.xlu1 %7150  ;;  %v15452_v54 = vpop.xlane.xlu2 %6838  ;;  %v7377_v39 = vmul.f32 %v11026_v43, %v17000_v32  ;;  %v17004_v43 = vld [vmem:[#allocation39_spill] sm:$0xff] }
 0xde1   : > { %11031 = vpow2.f32 %v7078_v5  ;;  %6883 = vmax.xlane.f32.xlu0 %v6882_v57  ;;  %7273 = vadd.xlane.f32.xlu1 %v7272_v49  ;;  %v11028_v15 = vpop.eup %11027  ;;  %v7909_v5 = vunpack.c.l.b16 %v17004_v43 }
 0xde2   : > { %11033 = vrcp.f32 %v7151_v20  ;;  %v7441_v59 = vpack.c.bf16 %v7377_v39, %v7377_v39  ;;  %v15460_v27 = vpop.eup %11029  ;;  %v7374_v56 = vmul.f32 %v11028_v15, %v17002_v46  ;;  %v17005_v15 = vld [vmem:[#allocation69_spill] sm:$0xff] }
 0xde3   : > { %11035 = vpow2.f32 %v7062_v24  ;;  %v7911_v49 = vpack.c.b16 %v7910_v48, %v7909_v5  ;;  %v7179_v39 = vsel %vm2194_vm2, %v15460_v27, 0.0  ;;  %v6961_v24 = vsub.f32 %v17005_v15, %v15385_v33  ;;  %v17009_v5 = vld [vmem:[#allocation56_spill] sm:$0xff] }
 0xde4   : > { %v6893_v41 = vpop.xlane.xlu0 %6892  ;;  %v7699_v6 = vunpack.c.l.b16 %v7441_v59  ;;  %11037 = vpow2.f32 %v7048_v21  ;;  %v7438_v59 = vpack.c.bf16 %v7374_v56, %v7374_v56 }
 0xde5   : > { %v6969_v60 = vsub.f32 %v17003_v26, %v6893_v41  ;;  %11039 = vrcp.f32 %v15391_v53  ;;  %v17007_v41 = vld [vmem:[#allocation60_spill] sm:$0xff]  ;;  %v7074_v33 = vmul.f32 1.442695, %v6961_v24 }
 0xde6   : > { %v7700_v37 = vpack.c.b16 %v7699_v6, %v7698_v52  ;;  %v7884_v52 = vunpack.c.l.b16 %v17007_v41  ;;  %v7672_v56 = vunpack.c.l.b16 %v7438_v59  ;;  %v17011_v24 = vld [vmem:[#allocation72_spill] sm:$0xff] }
 0xde7   : > { %v15465_v57 = vpop.eup %11031  ;;  %v7090_v13 = vmul.f32 1.442695, %v6969_v60  ;;  %v6940_v59 = vsub.f32 %v17011_v24, %v15429_v29  ;;  %v17016_v24 = vld [vmem:[#allocation65_spill] sm:$0xff] }
 0xde8   : > { %v11034_v20 = vpop.eup %11033  ;;  %v15468_v32 = vpop.xlane.xlu2 %6859  ;;  %v7257_v23 = vsel %vm2194_vm2, %v15465_v57, 0.0  ;;  %10178 = vmatmul.msk.bf16.vlgmr.msrb.gmra.mxu0 %vm2194_vm2, %v7700_v37 }
 0xde9   : > { %v7375_v21 = vmul.f32 %v11034_v20, %v17006_v11  ;;  %11041 = vpow2.f32 %v7090_v13  ;;  %7258 = vadd.xlane.f32.xlu1 %v7257_v23  ;;  %7923 = vmatpush.bf16.msrb.mxu0 %v7911_v49  ;;  %v15478_v60 = vpop.xlane.xlu1 %6856  ;;  %v15480_v48 = vpop.eup %11035  ;;  %v7883_v13 = vunpack.c.l.b16 %v17009_v5  ;;  %v17012_v11 = vld [vmem:[#allocation67_spill] sm:$0xff] }
 0xdea   : > { %7180 = vadd.xlane.f32.xlu0 %v7179_v39  ;;  %v15483_v46 = vpop.eup %11037 }
 0xdeb   : > { %v7439_v53 = vpack.c.bf16 %v7375_v21, %v7375_v21  ;;  %17008 = vst [vmem:[#allocation47_spill] sm:$0xff] %v15483_v46  ;;  %v11040_v43 = vpop.eup %11039  ;;  %v7885_v49 = vpack.c.b16 %v7884_v52, %v7883_v13  ;;  %v7212_v39 = vsel %vm2194_vm2, %v15483_v46, 0.0  ;;  %v7032_v52 = vmul.f32 1.442695, %v6940_v59 }
 0xdec   : > { %v7139_v6 = vpop.xlane.xlu0 %7138  ;;  %v7370_v21 = vmul.f32 %v11040_v43, %v17012_v11 }
 0xded   : > { %v7673_v26 = vunpack.c.l.b16 %v7439_v53  ;;  %11043 = vrcp.f32 %v7139_v6 }
 0xdee   : > { %11045 = vrcp.f32 %v15375_v30  ;;  %v7233_v30 = vsel %vm2194_vm2, %v15480_v48, 0.0 }
 0xdef   : > { %v15486_v37 = vpop.eup %11041  ;;  %v7674_v20 = vpack.c.b16 %v7673_v26, %v7672_v56  ;;  %11047 = vpow2.f32 %v7074_v33  ;;  %v7434_v56 = vpack.c.bf16 %v7370_v21, %v7370_v21  ;;  %v17013_v26 = vld [vmem:[#allocation80_spill] sm:$0xff] }
 0xdf0   : > { %17010 = vst [vmem:[#allocation43_spill] sm:$0xff] %v15486_v37  ;;  %v15489_v23 = vpop.xlane.xlu2 %6877  ;;  %v7275_v15 = vsel %vm2194_vm2, %v15486_v37, 0.0 }
 0xdf1   : > { %10177 = vmatmul.msk.bf16.vlgmr.msra.gmra.mxu3 %vm2194_vm2, %v7674_v20  ;;  %7213 = vadd.xlane.f32.xlu1 %v7212_v39  ;;  %v15501_v6 = vpop.xlane.xlu1 %6901  ;;  %v17014_v20 = vld [vmem:[#allocation52_spill] sm:$0xff]  ;;  %v17015_v39 = vld [vmem:[#allocation62_spill] sm:$0xff]  ;;  %v7620_v11 = vunpack.c.l.b16 %v7434_v56  ;;  %v17018_v56 = vld [vmem:[#allocation63_spill] sm:$0xff] }
 0xdf2   : > { %7897 = vmatpush.bf16.msra.mxu3 %v7885_v49  ;;  %7276 = vadd.xlane.f32.xlu2 %v7275_v15  ;;  %v7832_v49 = vunpack.c.l.b16 %v17014_v20  ;;  %v6941_v15 = vsub.f32 %v17015_v39, %v15331_v44 }
 0xdf3   : > { %7234 = vadd.xlane.f32.xlu0 %v7233_v30  ;;  %v11044_v41 = vpop.eup %11043 }
 0xdf4   : > { %v7142_v53 = vpop.xlane.xlu0 %7141  ;;  %v11046_v33 = vpop.eup %11045  ;;  %v7371_v29 = vmul.f32 %v11044_v41, %v17013_v26  ;;  %v17017_v41 = vld [vmem:[#allocation50_spill] sm:$0xff]  ;;  %v7034_v20 = vmul.f32 1.442695, %v6941_v15 }
 0xdf5   : > { %v15504_v5 = vpop.eup %11047  ;;  %11049 = vrcp.f32 %v7142_v53  ;;  %v7373_v59 = vmul.f32 %v11046_v33, %v17016_v24  ;;  %v7831_v26 = vunpack.c.l.b16 %v17017_v41 }
 0xdf6   : > { %v7435_v13 = vpack.c.bf16 %v7371_v29, %v7371_v29  ;;  %11051 = vpow2.f32 %v7032_v52  ;;  %v7251_v21 = vsel %vm2194_vm2, %v15504_v5, 0.0 }
 0xdf7   : > { %v7833_v46 = vpack.c.b16 %v7832_v49, %v7831_v26  ;;  %v7437_v40 = vpack.c.bf16 %v7373_v59, %v7373_v59  ;;  %11053 = vpow2.f32 %v7034_v20  ;;  %v17021_v20 = vld [vmem:[#allocation71_spill] sm:$0xff] }
 0xdf8   : > { %v15506_v43 = vpop.xlane.xlu2 %6862  ;;  %v7621_v30 = vunpack.c.l.b16 %v7435_v13  ;;  %v6970_v13 = vsub.f32 %v17018_v56, %v15352_v63  ;;  %v17022_v56 = vld [vmem:[#allocation70_spill] sm:$0xff] }
 0xdf9   : > { %v15521_v33 = vpop.xlane.xlu1 %6886  ;;  %v7647_v49 = vunpack.c.l.b16 %v7437_v40  ;;  %v6950_v40 = vsub.f32 %v17021_v20, %v15423_v22 }
 0xdfa   : > { %v7622_v53 = vpack.c.b16 %v7621_v30, %v7620_v11  ;;  %v17019_v11 = vld [vmem:[#allocation55_spill] sm:$0xff] }
 0xdfb   : > { %7252 = vadd.xlane.f32.xlu0 %v7251_v21  ;;  %v11050_v37 = vpop.eup %11049  ;;  %v7858_v30 = vunpack.c.l.b16 %v17019_v11  ;;  %v7092_v21 = vmul.f32 1.442695, %v6970_v13 }
 0xdfc   : > { %v15515_v29 = vpop.xlane.xlu0 %7201  ;;  %v7372_v44 = vmul.f32 %v11050_v37, %v15246_v17  ;;  %10175 = vmatmul.msk.bf16.vlgmr.msra.gmra.mxu1 %vm2194_vm2, %v7622_v53  ;;  %v15519_v52 = vpop.eup %11051  ;;  %v17020_v37 = vld [vmem:[#allocation58_spill] sm:$0xff] }
 0xdfd   : > { %7845 = vmatpush.bf16.msra.mxu1 %v7833_v46  ;;  %v7188_v17 = vsel %vm2194_vm2, %v15519_v52, 0.0  ;;  %v7857_v59 = vunpack.c.l.b16 %v17020_v37  ;;  %v15533_v53 = vpop.eup %11053  ;;  %11055 = vpow2.f32 %v7092_v21 }
 0xdfe   : > { %v7436_v39 = vpack.c.bf16 %v7372_v44, %v7372_v44 }
 0xdff   : > { %v7859_v26 = vpack.c.b16 %v7858_v30, %v7857_v59  ;;  %v7052_v30 = vmul.f32 1.442695, %v6950_v40 }
 0xe00   : > { %v15525_v24 = vpop.xlane.xlu2 %7168  ;;  %v7646_v15 = vunpack.c.l.b16 %v7436_v39  ;;  %v6943_v39 = vsub.f32 %v17022_v56, %v15411_v47  ;;  %v17023_v47 = vld [vmem:[#allocation78_spill] sm:$0xff] }
 0xe01   : > { %v7172_v13 = vpop.xlane.xlu1 %7171  ;;  %v6957_v59 = vsub.f32 %v17023_v47, %v15478_v60 }
 0xe02   : > { %v7648_v41 = vpack.c.b16 %v7647_v49, %v7646_v15  ;;  %v7038_v49 = vmul.f32 1.442695, %v6943_v39 }
 0xe03   : > { %7189 = vadd.xlane.f32.xlu0 %v7188_v17  ;;  %v15544_v17 = vpop.eup %11055  ;;  %v7066_v40 = vmul.f32 1.442695, %v6957_v59 }
 0xe04   : > { %v6812_v46 = vpop.xlane.xlu0 %6811  ;;  %10176 = vmatmul.msk.bf16.vlgmr.msrb.gmra.mxu2 %vm2194_vm2, %v7648_v41  ;;  %v17024_v41 = vld [vmem:[#allocation75_spill] sm:$0xff]  ;;  %v7278_v20 = vsel %vm2194_vm2, %v15544_v17, 0.0 }
 0xe05   : > { %v6942_v63 = vsub.f32 %v15283_v7, %v6812_v46  ;;  %7871 = vmatpush.bf16.msrb.mxu2 %v7859_v26  ;;  %v7191_v7 = vsel %vm2194_vm2, %v15533_v53, 0.0  ;;  %v6951_v46 = vsub.f32 %v17024_v41, %v15452_v54 }
 0xe07   : > { %v7036_v44 = vmul.f32 1.442695, %v6942_v63 }
 0xe08   : > { %v15539_v11 = vpop.xlane.xlu2 %6904 }
 0xe09   : > { %11057 = vpow2.f32 %v7036_v44  ;;  %v7054_v44 = vmul.f32 1.442695, %v6951_v46  ;;  %v17026_v46 = vld [vmem:[#allocation40_spill] sm:$0xff] }
 0xe0a   : > { %11059 = vrcp.f32 %v7172_v13 }
 0xe0b   : > { %7192 = vadd.xlane.f32.xlu0 %v7191_v7  ;;  %11061 = vpow2.f32 %v7052_v30  ;;  %v6959_v30 = vsub.f32 %v15260_v38, %v15506_v43 }
 0xe0c   : > { %v6899_v15 = vpop.xlane.xlu0 %6898  ;;  %11063 = vpow2.f32 %v7038_v49 }
 0xe0d   : > { %v6971_v22 = vsub.f32 %v15298_v12, %v6899_v15  ;;  %v7070_v43 = vmul.f32 1.442695, %v6959_v30 }
 0xe0f   : > { %v15546_v37 = vpop.eup %11057  ;;  %v7094_v21 = vmul.f32 1.442695, %v6971_v22  ;;  %v17025_v22 = vld [vmem:[#allocation79_spill] sm:$0xff] }
 0xe10   : > { %v7175_v26 = vpop.xlane.xlu2 %7174  ;;  %v7194_v63 = vsel %vm2194_vm2, %v15546_v37, 0.0  ;;  %v11060_v12 = vpop.eup %11059  ;;  %v6958_v47 = vsub.f32 %v17025_v22, %v15468_v32  ;;  %v7988_v32 = vunpack.c.l.b16 %v17026_v46 }
 0xe11   : > { %11065 = vpow2.f32 %v7094_v21  ;;  %7195 = vadd.xlane.f32.xlu2 %v7194_v63  ;;  %v15556_v56 = vpop.eup %11061  ;;  %v7382_v39 = vmul.f32 %v11060_v12, %v15277_v18 }
 0xe12   : > { %11067 = vrcp.f32 %v7175_v26  ;;  %v15560_v13 = vpop.eup %11063  ;;  %v7218_v18 = vsel %vm2194_vm2, %v15556_v56, 0.0  ;;  %v7068_v26 = vmul.f32 1.442695, %v6958_v47 }
 0xe13   : > { %7279 = vadd.xlane.f32.xlu0 %v7278_v20  ;;  %11069 = vpow2.f32 %v7066_v40  ;;  %v7197_v38 = vsel %vm2194_vm2, %v15560_v13, 0.0 }
 0xe14   : > { %v6833_v60 = vpop.xlane.xlu0 %6832  ;;  %11071 = vpow2.f32 %v7054_v44 }
 0xe15   : > { %v6949_v54 = vsub.f32 %v15317_v25, %v6833_v60  ;;  %v7446_v25 = vpack.c.bf16 %v7382_v39, %v7382_v39  ;;  %v15583_v39 = vpop.xlane.xlu1 %6907 }
 0xe17   : > { %v15562_v7 = vpop.eup %11065  ;;  %v7050_v49 = vmul.f32 1.442695, %v6949_v54  ;;  %v7776_v20 = vunpack.c.l.b16 %v7446_v25 }
 0xe18   : > { %v11068_v15 = vpop.eup %11067  ;;  %v7281_v59 = vsel %vm2194_vm2, %v15562_v7, 0.0 }
 0xe19   : > { %v7383_v21 = vmul.f32 %v11068_v15, %v15310_v55  ;;  %11073 = vpow2.f32 %v7050_v49  ;;  %7282 = vadd.xlane.f32.xlu1 %v7281_v59  ;;  %7219 = vadd.xlane.f32.xlu2 %v7218_v18  ;;  %v15578_v12 = vpop.eup %11069  ;;  %v17027_v55 = vld [vmem:[#allocation12_spill] sm:$0xff] }
 0xe1a   : > { %v15580_v44 = vpop.eup %11071  ;;  %v7987_v60 = vunpack.c.l.b16 %v17027_v55  ;;  %11075 = vpow2.f32 %v7070_v43  ;;  %v7239_v15 = vsel %vm2194_vm2, %v15578_v12, 0.0 }
 0xe1b   : > { %v7447_v41 = vpack.c.bf16 %v7383_v21, %v7383_v21  ;;  %7198 = vadd.xlane.f32.xlu0 %v7197_v38  ;;  %11077 = vpow2.f32 %v7068_v26  ;;  %v7221_v47 = vsel %vm2194_vm2, %v15580_v44, 0.0  ;;  %v6964_v38 = vsub.f32 %v15237_v1, %v15489_v23 }
 0xe1c   : > { %v15576_v63 = vpop.xlane.xlu0 %7207  ;;  %v7989_v49 = vpack.c.b16 %v7988_v32, %v7987_v60  ;;  %v7178_v23 = vpop.xlane.xlu2 %7177 }
 0xe1d   : > { %v7777_v40 = vunpack.c.l.b16 %v7447_v41  ;;  %v15601_v41 = vpop.xlane.xlu1 %6910  ;;  %v7080_v26 = vmul.f32 1.442695, %v6964_v38 }
 0xe1e   : > { %17030 = vst [vmem:[#allocation74_spill] sm:$0xff] %v15601_v41 }
 0xe1f   : > { %v15585_v54 = vpop.eup %11073  ;;  %v7778_v30 = vpack.c.b16 %v7777_v40, %v7776_v20 }
 0xe20   : > { %v7215_v22 = vsel %vm2194_vm2, %v15585_v54, 0.0  ;;  %v15594_v18 = vpop.eup %11075 }
 0xe21   : > { %10181 = vmatmul.msk.bf16.vlgmr.msrb.gmra.mxu3 %vm2194_vm2, %v7778_v30  ;;  %7240 = vadd.xlane.f32.xlu2 %v7239_v15  ;;  %17028 = vst [vmem:[#allocation64_spill] sm:$0xff] %v15594_v18  ;;  %v15597_v21 = vpop.eup %11077  ;;  %v7245_v46 = vsel %vm2194_vm2, %v15594_v18, 0.0 }
 0xe22   : > { %8001 = vmatpush.bf16.msrb.mxu3 %v7989_v49  ;;  %7222 = vadd.xlane.f32.xlu1 %v7221_v47  ;;  %17029 = vst [vmem:[#allocation68_spill] sm:$0xff] %v15597_v21  ;;  %v7242_v32 = vsel %vm2194_vm2, %v15597_v21, 0.0 }
 0xe23   : > { %7216 = vadd.xlane.f32.xlu0 %v7215_v22 }
 0xe24   : > { %v6854_v59 = vpop.xlane.xlu0 %6853  ;;  %v15619_v15 = vpop.xlane.xlu2 %7228 }
 0xe25   : > { %v6956_v25 = vsub.f32 %v15348_v62, %v6854_v59  ;;  %v15611_v40 = vpop.xlane.xlu1 %7225 }
 0xe27   : > { %v7064_v43 = vmul.f32 1.442695, %v6956_v25  ;;  %v17033_v25 = vld [vmem:[#allocation9_spill] sm:$0xff] }
 0xe29   : > { %11079 = vpow2.f32 %v7064_v43  ;;  %7246 = vadd.xlane.f32.xlu2 %v7245_v46 }
 0xe2a   : > { %7243 = vadd.xlane.f32.xlu1 %v7242_v32  ;;  %11081 = vpow2.f32 %v7080_v26 }
 0xe2c   : > { %v7211_v20 = vpop.xlane.xlu0 %7210 }
 0xe2d   : > { %v15617_v49 = vpop.xlane.xlu1 %7231 }
 0xe2f   : > { %v15607_v62 = vpop.eup %11079 }
 0xe30   : > { %17031 = vst [vmem:[#allocation2_spill] sm:$0xff] %v15607_v62  ;;  %v7236_v1 = vsel %vm2194_vm2, %v15607_v62, 0.0  ;;  %v15613_v60 = vpop.eup %11081 }
 0xe31   : > { %7237 = vadd.xlane.f32.xlu0 %v7236_v1  ;;  %17032 = vst [vmem:[#allocation73_spill] sm:$0xff] %v15613_v60  ;;  %v7260_v30 = vsel %vm2194_vm2, %v15613_v60, 0.0  ;;  %v7184_v1 = vpop.xlane.xlu2 %7183  ;;  %v17034_v60 = vld [vmem:[#allocation6_spill] sm:$0xff] }
 0xe32   : > { %v7936_v41 = vunpack.c.l.b16 %v17034_v60 }
 0xe34   : > { %v7160_v55 = vpop.xlane.xlu0 %7159 }
 0xe35   : > { %11083 = vrcp.f32 %v7160_v55  ;;  %v15624_v46 = vpop.xlane.xlu1 %7249 }
 0xe39   : > { %7261 = vadd.xlane.f32.xlu0 %v7260_v30 }
 0xe3b   : > { %v11084_v47 = vpop.eup %11083 }
 0xe3c   : > { %v7163_v22 = vpop.xlane.xlu0 %7162  ;;  %v7378_v59 = vmul.f32 %v11084_v47, %v15387_v31 }
 0xe3d   : > { %11085 = vrcp.f32 %v7163_v22 }
 0xe3e   : > { %v7442_v43 = vpack.c.bf16 %v7378_v59, %v7378_v59  ;;  %11087 = vrcp.f32 %v15525_v24 }
 0xe3f   : > { %11089 = vrcp.f32 %v7184_v1 }
 0xe40   : > { %v7724_v31 = vunpack.c.l.b16 %v7442_v43 }
 0xe41   : > { %5812 = vrot.lane.b32.xlu2 %v17033_v25, %s11260_s28  ;;  %v17035_v25 = vld [vmem:[#allocation19_spill] sm:$0xff] }
 0xe42   : > { %v7935_v18 = vunpack.c.l.b16 %v17035_v25 }
 0xe43   : > { %v11086_v38 = vpop.eup %11085 }
 0xe44   : > { %v7379_v32 = vmul.f32 %v11086_v38, %v15404_v58  ;;  %v6881_v26 = vpop.xlane.xlu0 %6880  ;;  %v7937_v21 = vpack.c.b16 %v7936_v41, %v7935_v18  ;;  %v11088_v38 = vpop.eup %11087 }
 0xe45   : > { %v6965_v55 = vsub.f32 %v15416_v42, %v6881_v26  ;;  %v11090_v42 = vpop.eup %11089  ;;  %v7381_v24 = vmul.f32 %v11088_v38, %v15275_v19 }
 0xe46   : > { %v7443_v30 = vpack.c.bf16 %v7379_v32, %v7379_v32  ;;  %v7386_v32 = vmul.f32 %v11090_v42, %v15371_v16  ;;  %v17038_v42 = vld [vmem:[#allocation8_spill] sm:$0xff] }
 0xe47   : > { %v7082_v22 = vmul.f32 1.442695, %v6965_v55  ;;  %v7445_v26 = vpack.c.bf16 %v7381_v24, %v7381_v24 }
 0xe48   : > { %v7725_v47 = vunpack.c.l.b16 %v7443_v30 }
 0xe49   : > { %11091 = vpow2.f32 %v7082_v22  ;;  %v17036_v22 = vld [vmem:[#allocation10_spill] sm:$0xff] }
 0xe4a   : > { %v7726_v59 = vpack.c.b16 %v7725_v47, %v7724_v31  ;;  %v7962_v31 = vunpack.c.l.b16 %v17036_v22  ;;  %v17037_v47 = vld [vmem:[#allocation53_spill] sm:$0xff] }
 0xe4b   : > { %v8040_v25 = vunpack.c.l.b16 %v17037_v47 }
 0xe4c   : > { %v7166_v62 = vpop.xlane.xlu0 %7165  ;;  %10179 = vmatmul.msk.bf16.vlgmr.msrb.gmra.mxu1 %vm2194_vm2, %v7726_v59  ;;  %v7187_v58 = vpop.xlane.xlu1 %7186 }
 0xe4d   : > { %11093 = vrcp.f32 %v7166_v62  ;;  %7949 = vmatpush.bf16.msrb.mxu1 %v7937_v21  ;;  %v7450_v62 = vpack.c.bf16 %v7386_v32, %v7386_v32 }
 0xe4e   : > { %11095 = vrcp.f32 %v7187_v58  ;;  %v6972_v58 = vsub.f32 %v15241_v61, %v15501_v6 }
 0xe4f   : > { %v15632_v60 = vpop.eup %11091  ;;  %11097 = vrcp.f32 %v7211_v20  ;;  %v7828_v24 = vunpack.c.l.b16 %v7450_v62 }
 0xe50   : > { %v7263_v43 = vsel %vm2194_vm2, %v15632_v60, 0.0  ;;  %11099 = vrcp.f32 %v15576_v63 }
 0xe51   : > { %7264 = vadd.xlane.f32.xlu1 %v7263_v43  ;;  %11101 = vrcp.f32 %v7178_v23  ;;  %v17039_v43 = vld [vmem:[#allocation51_spill] sm:$0xff]  ;;  %v6974_v23 = vsub.f32 %v15296_v36, %v15583_v39 }
 0xe52   : > { %v8039_v20 = vunpack.c.l.b16 %v17039_v43  ;;  %v17042_v43 = vld [vmem:[#allocation22_spill] sm:$0xff] }
 0xe53   : > { %v11094_v18 = vpop.eup %11093 }
 0xe54   : > { %v11096_v41 = vpop.eup %11095  ;;  %v7380_v1 = vmul.f32 %v11094_v18, %v15431_v14  ;;  %v6884_v55 = vpop.xlane.xlu0 %6883  ;;  %v7751_v14 = vunpack.c.l.b16 %v7445_v26  ;;  %v8041_v63 = vpack.c.b16 %v8040_v25, %v8039_v20  ;;  %v8143_v20 = vunpack.c.l.b16 %v17042_v43 }
 0xe55   : > { %v7387_v21 = vmul.f32 %v11096_v41, %v15433_v35  ;;  %v6966_v30 = vsub.f32 %v15442_v51, %v6884_v55  ;;  %v7961_v35 = vunpack.c.l.b16 %v17038_v42  ;;  %v7096_v55 = vmul.f32 1.442695, %v6972_v58 }
 0xe56   : > { %v7444_v19 = vpack.c.bf16 %v7380_v1, %v7380_v1  ;;  %v11098_v1 = vpop.eup %11097 }
 0xe57   : > { %v7451_v16 = vpack.c.bf16 %v7387_v21, %v7387_v21  ;;  %v7084_v59 = vmul.f32 1.442695, %v6966_v30  ;;  %v7963_v18 = vpack.c.b16 %v7962_v31, %v7961_v35  ;;  %v11100_v21 = vpop.eup %11099  ;;  %v7395_v62 = vmul.f32 %v11098_v1, %v15368_v45 }
 0xe58   : > { %v7750_v38 = vunpack.c.l.b16 %v7444_v19  ;;  %v11102_v6 = vpop.eup %11101  ;;  %v7394_v22 = vmul.f32 %v11100_v21, %v15333_v0  ;;  %v7100_v19 = vmul.f32 1.442695, %v6974_v23 }
 0xe59   : > { %v7829_v51 = vunpack.c.l.b16 %v7451_v16  ;;  %11103 = vpow2.f32 %v7084_v59  ;;  %v7384_v31 = vmul.f32 %v11102_v6, %v15337_v2  ;;  %v7459_v47 = vpack.c.bf16 %v7395_v62, %v7395_v62  ;;  %v17040_v2 = vld [vmem:[#allocation3_spill] sm:$0xff] }
 0xe5a   : > { %v7752_v32 = vpack.c.b16 %v7751_v14, %v7750_v38  ;;  %v7458_v36 = vpack.c.bf16 %v7394_v22, %v7394_v22  ;;  %v8144_v14 = vunpack.c.l.b16 %v17040_v2  ;;  %v17041_v38 = vld [vmem:[#allocation48_spill] sm:$0xff] }
 0xe5b   : > { %v7830_v41 = vpack.c.b16 %v7829_v51, %v7828_v24  ;;  %v7448_v39 = vpack.c.bf16 %v7384_v31, %v7384_v31  ;;  %v7933_v58 = vunpack.c.l.b16 %v7459_v47  ;;  %v8014_v42 = vunpack.c.l.b16 %v17041_v38  ;;  %v17045_v31 = vld [vmem:[#allocation66_spill] sm:$0xff] }
 0xe5c   : > { %10180 = vmatmul.msk.bf16.vlgmr.msra.gmra.mxu2 %vm2194_vm2, %v7752_v32  ;;  %v17043_v32 = vld [vmem:[#allocation45_spill] sm:$0xff]  ;;  %v8145_v21 = vpack.c.b16 %v8144_v14, %v8143_v20  ;;  %v17047_v14 = vld [vmem:[#allocation24_spill] sm:$0xff] }
 0xe5d   : > { %v7181_v61 = vpop.xlane.xlu0 %7180  ;;  %10183 = vmatmul.msk.bf16.vlgmr.msra.gmra.mxu1 %vm2194_vm2, %v7830_v41  ;;  %7975 = vmatpush.bf16.msra.mxu2 %v7963_v18  ;;  %v7802_v35 = vunpack.c.l.b16 %v7448_v39  ;;  %v8013_v18 = vunpack.c.l.b16 %v17043_v32  ;;  %v17044_v41 = vld [vmem:[#allocation14_spill] sm:$0xff]  ;;  %v8117_v38 = vunpack.c.l.b16 %v17047_v14  ;;  %v17052_v14 = vld [vmem:[#allocation44_spill] sm:$0xff] }
 0xe5e   : > { %11105 = vrcp.f32 %v7181_v61  ;;  %8053 = vmatpush.bf16.msra.mxu1 %v8041_v63 }
 0xe5f   : > { %v15652_v26 = vpop.eup %11103  ;;  %11107 = vpow2.f32 %v7096_v55  ;;  %v8015_v61 = vpack.c.b16 %v8014_v42, %v8013_v18  ;;  %v17048_v42 = vld [vmem:[#allocation38_spill] sm:$0xff] }
 0xe60   : > { %v7266_v30 = vsel %vm2194_vm2, %v15652_v26, 0.0  ;;  %11109 = vrcp.f32 %v15396_v50  ;;  %v7932_v50 = vunpack.c.l.b16 %v7458_v36 }
 0xe61   : > { %7267 = vadd.xlane.f32.xlu0 %v7266_v30  ;;  %11111 = vrcp.f32 %v15515_v29  ;;  %v15667_v29 = vpop.xlane.xlu1 %7273 }
 0xe62   : > { %11113 = vpow2.f32 %v7100_v19  ;;  %v7934_v63 = vpack.c.b16 %v7933_v58, %v7932_v50  ;;  %v8118_v50 = vunpack.c.l.b16 %v17048_v42 }
 0xe64   : > { %v11106_v25 = vpop.eup %11105  ;;  %v8119_v20 = vpack.c.b16 %v8118_v50, %v8117_v38  ;;  %v17053_v38 = vld [vmem:[#allocation54_spill] sm:$0xff] }
 0xe65   : > { %v7385_v45 = vmul.f32 %v11106_v25, %v15460_v27  ;;  %v15662_v16 = vpop.eup %11107  ;;  %v8065_v42 = vunpack.c.l.b16 %v17053_v38 }
 0xe66   : > { %v7235_v59 = vpop.xlane.xlu0 %7234  ;;  %v7284_v27 = vsel %vm2194_vm2, %v15662_v16, 0.0  ;;  %v11110_v51 = vpop.eup %11109 }
 0xe67   : > { %v7449_v0 = vpack.c.bf16 %v7385_v45, %v7385_v45  ;;  %11115 = vrcp.f32 %v7235_v59  ;;  %v11112_v1 = vpop.eup %11111  ;;  %v7393_v19 = vmul.f32 %v11110_v51, %v17045_v31 }
 0xe68   : > { %11117 = vrcp.f32 %v15617_v49  ;;  %v15675_v55 = vpop.eup %11113  ;;  %v7392_v30 = vmul.f32 %v11112_v1, %v15265_v4  ;;  %v17046_v4 = vld [vmem:[#allocation15_spill] sm:$0xff] }
 0xe69   : > { %v7803_v24 = vunpack.c.l.b16 %v7449_v0  ;;  %v7290_v25 = vsel %vm2194_vm2, %v15675_v55, 0.0  ;;  %v7259_v39 = vpop.xlane.xlu1 %7258  ;;  %v7457_v59 = vpack.c.bf16 %v7393_v19, %v7393_v19  ;;  %11119 = vrcp.f32 %v15619_v15  ;;  %v7256_v0 = vpop.xlane.xlu2 %7255 }
 0xe6a   : > { %5816 = vrot.lane.b32.xlu1 %v17044_v41, %s11260_s28  ;;  %7285 = vadd.xlane.f32.xlu2 %v7284_v27  ;;  %v7456_v36 = vpack.c.bf16 %v7392_v30, %v7392_v30  ;;  %11121 = vrcp.f32 %v7259_v39 }
 0xe6b   : > { %v7804_v49 = vpack.c.b16 %v7803_v24, %v7802_v35  ;;  %11123 = vrcp.f32 %v15611_v40  ;;  %v7907_v35 = vunpack.c.l.b16 %v7457_v59 }
 0xe6c   : > { %v7906_v2 = vunpack.c.l.b16 %v7456_v36  ;;  %11125 = vrcp.f32 %v7256_v0 }
 0xe6d   : > { %v11116_v6 = vpop.eup %11115  ;;  %10182 = vmatmul.msk.bf16.vlgmr.msra.gmra.mxu0 %vm2194_vm2, %v7804_v49  ;;  %10187 = vmatmul.msk.bf16.vlgmr.msrb.gmra.mxu1 %vm2194_vm2, %v7934_v63 }
 0xe6e   : > { %v11118_v23 = vpop.eup %11117  ;;  %v7253_v62 = vpop.xlane.xlu0 %7252  ;;  %8027 = vmatpush.bf16.msra.mxu0 %v8015_v61  ;;  %8157 = vmatpush.bf16.msrb.mxu1 %v8145_v21  ;;  %v7403_v22 = vmul.f32 %v11116_v6, %v15480_v48  ;;  %v7908_v27 = vpack.c.b16 %v7907_v35, %v7906_v2  ;;  %v6967_v6 = vsub.f32 %v15263_v8, %v15521_v33  ;;  %v17049_v8 = vld [vmem:[#allocation46_spill] sm:$0xff] }
 0xe6f   : > { %v7402_v47 = vmul.f32 %v11118_v23, %v15377_v34  ;;  %v11120_v15 = vpop.eup %11119 }
 0xe70   : > { %v7467_v45 = vpack.c.bf16 %v7403_v22, %v7403_v22  ;;  %v11122_v43 = vpop.eup %11121  ;;  %v7401_v63 = vmul.f32 %v11120_v15, %v15350_v3  ;;  %v7086_v3 = vmul.f32 1.442695, %v6967_v6  ;;  %v6973_v15 = vsub.f32 %v15291_v28, %v15539_v11 }
 0xe71   : > { %v7466_v58 = vpack.c.bf16 %v7402_v47, %v7402_v47  ;;  %v11124_v32 = vpop.eup %11123  ;;  %v15691_v18 = vpop.xlane.xlu2 %7276  ;;  %v7411_v49 = vmul.f32 %v11122_v43, %v15465_v57 }
 0xe72   : > { %7291 = vadd.xlane.f32.xlu2 %v7290_v25  ;;  %v8037_v34 = vunpack.c.l.b16 %v7467_v45  ;;  %v11126_v40 = vpop.eup %11125  ;;  %v7400_v21 = vmul.f32 %v11124_v32, %v15329_v10  ;;  %v7465_v30 = vpack.c.bf16 %v7401_v63, %v7401_v63  ;;  %v7214_v31 = vpop.xlane.xlu1 %7213  ;;  %v7098_v63 = vmul.f32 1.442695, %v6973_v15 }
 0xe73   : > { %v8036_v24 = vunpack.c.l.b16 %v7466_v58  ;;  %v7410_v61 = vmul.f32 %v11126_v40, %v15389_v9  ;;  %v7475_v22 = vpack.c.bf16 %v7411_v49, %v7411_v49  ;;  %v15703_v45 = vpop.f32.mrf.mxu0  ;;  %v17050_v58 = vld [vmem:[#allocation57_spill] sm:$0xff] }
 0xe74   : > { %v7464_v47 = vpack.c.bf16 %v7400_v21, %v7400_v21  ;;  %v8011_v9 = vunpack.c.l.b16 %v7465_v30  ;;  %v8066_v0 = vunpack.c.l.b16 %v17050_v58 }
 0xe75   : > { %5814 = vrot.lane.b32.xlu0 %v17046_v4, %s11260_s28  ;;  %v8038_v51 = vpack.c.b16 %v8037_v34, %v8036_v24  ;;  %v7474_v25 = vpack.c.bf16 %v7410_v61, %v7410_v61  ;;  %v8141_v59 = vunpack.c.l.b16 %v7475_v22  ;;  %v17054_v61 = vld [vmem:[#allocation16_spill] sm:$0xff] }
 0xe76   : > { %v7190_v48 = vpop.xlane.xlu0 %7189  ;;  %v8010_v4 = vunpack.c.l.b16 %v7464_v47 }
 0xe77   : > { %11127 = vrcp.f32 %v7190_v48  ;;  %v8140_v48 = vunpack.c.l.b16 %v7474_v25 }
 0xe78   : > { %v8012_v50 = vpack.c.b16 %v8011_v9, %v8010_v4 }
 0xe79   : > { %v8142_v35 = vpack.c.b16 %v8141_v59, %v8140_v48 }
 0xe7b   : > { %v15721_v21 = vpop.f32.mrf.mxu0 }
 0xe7d   : > { %10186 = vmatmul.msk.bf16.vlgmr.msrb.gmra.mxu0 %vm2194_vm2, %v7908_v27  ;;  %10191 = vmatmul.msk.bf16.vlgmr.msra.gmra.mxu1 %vm2194_vm2, %v8038_v51  ;;  %v11128_v1 = vpop.eup %11127 }
 0xe7e   : > { %v7193_v41 = vpop.xlane.xlu0 %7192  ;;  %8131 = vmatpush.bf16.msrb.mxu0 %v8119_v20  ;;  %v7388_v23 = vmul.f32 %v11128_v1, %v15519_v52  ;;  %v8222_v52 = vunpack.c.l.b16 %v17049_v8  ;;  %v8067_v20 = vpack.c.b16 %v8066_v0, %v8065_v42  ;;  %v17055_v8 = vld [vmem:[#allocation59_spill] sm:$0xff] }
 0xe7f   : > { %11129 = vrcp.f32 %v7193_v41  ;;  %v17056_v0 = vld [vmem:[#allocation47_spill] sm:$0xff] }
 0xe80   : > { %11131 = vrcp.f32 %v7253_v62  ;;  %v7452_v57 = vpack.c.bf16 %v7388_v23, %v7388_v23  ;;  %v17051_v62 = vld [vmem:[#allocation41_spill] sm:$0xff] }
 0xe81   : > { %v8221_v2 = vunpack.c.l.b16 %v17051_v62 }
 0xe84   : > { %v7196_v36 = vpop.xlane.xlu2 %7195 }
 0xe85   : > { %v11130_v19 = vpop.eup %11129 }
 0xe86   : > { %v7389_v39 = vmul.f32 %v11130_v19, %v15533_v53  ;;  %v7280_v10 = vpop.xlane.xlu0 %7279  ;;  %v7854_v53 = vunpack.c.l.b16 %v7452_v57  ;;  %v11132_v24 = vpop.eup %11131 }
 0xe87   : > { %11133 = vrcp.f32 %v7280_v10  ;;  %v7409_v1 = vmul.f32 %v11132_v24, %v15504_v5 }
 0xe88   : > { %11135 = vrcp.f32 %v15624_v46  ;;  %v7453_v33 = vpack.c.bf16 %v7389_v39, %v7389_v39  ;;  %v8223_v46 = vpack.c.b16 %v8222_v52, %v8221_v2  ;;  %v8091_v52 = vunpack.c.l.b16 %v17055_v8 }
 0xe89   : > { %11137 = vrcp.f32 %v7196_v36  ;;  %v7473_v22 = vpack.c.bf16 %v7409_v1, %v7409_v1 }
 0xe8a   : > { %11139 = vpow2.f32 %v7086_v3  ;;  %v7855_v34 = vunpack.c.l.b16 %v7453_v33  ;;  %5820 = vrot.lane.b32.xlu2 %v17052_v14, %s11260_s28  ;;  %v15736_v33 = vpop.f32.mrf.mxu0 }
 0xe8b   : > { %v8115_v10 = vunpack.c.l.b16 %v7473_v22 }
 0xe8c   : > { %v7856_v27 = vpack.c.b16 %v7855_v34, %v7854_v53  ;;  %v7283_v51 = vpop.xlane.xlu1 %7282  ;;  %v7220_v28 = vpop.xlane.xlu2 %7219  ;;  %v17057_v53 = vld [vmem:[#allocation61_spill] sm:$0xff] }
 0xe8d   : > { %v11134_v43 = vpop.eup %11133  ;;  %11141 = vrcp.f32 %v7283_v51  ;;  %10190 = vmatmul.msk.bf16.vlgmr.msra.gmra.mxu0 %vm2194_vm2, %v8012_v50  ;;  %10195 = vmatmul.msk.bf16.vlgmr.msrb.gmra.mxu1 %vm2194_vm2, %v8142_v35  ;;  %v8092_v34 = vunpack.c.l.b16 %v17057_v53 }
 0xe8e   : > { %v11136_v32 = vpop.eup %11135  ;;  %v7199_v40 = vpop.xlane.xlu0 %7198  ;;  %10184 = vmatmul.msk.bf16.vlgmr.msrb.gmra.mxu2 %vm2194_vm2, %v7856_v27  ;;  %8235 = vmatpush.bf16.msra.mxu0 %v8223_v46  ;;  %v7418_v49 = vmul.f32 %v11134_v43, %v15544_v17  ;;  %v17058_v43 = vld [vmem:[#allocation43_spill] sm:$0xff] }
 0xe8f   : > { %v11138_v41 = vpop.eup %11137  ;;  %11143 = vrcp.f32 %v7199_v40  ;;  %8079 = vmatpush.bf16.msrb.mxu2 %v8067_v20  ;;  %v7408_v6 = vmul.f32 %v11136_v32, %v17054_v61  ;;  %v8093_v35 = vpack.c.b16 %v8092_v34, %v8091_v52  ;;  %v17064_v34 = vld [vmem:[#allocation2_spill] sm:$0xff] }
 0xe90   : > { %v15718_v11 = vpop.eup %11139  ;;  %11145 = vrcp.f32 %v7214_v31  ;;  %v7390_v23 = vmul.f32 %v11138_v41, %v15546_v37  ;;  %v7482_v19 = vpack.c.bf16 %v7418_v49, %v7418_v49  ;;  %v17059_v41 = vld [vmem:[#allocation7_spill] sm:$0xff] }
 0xe91   : > { %v7269_v5 = vsel %vm2194_vm2, %v15718_v11, 0.0  ;;  %11147 = vpow2.f32 %v7098_v63  ;;  %v7472_v36 = vpack.c.bf16 %v7408_v6, %v7408_v6  ;;  %v8170_v1 = vunpack.c.l.b16 %v17059_v41  ;;  %v17061_v6 = vld [vmem:[#allocation5_spill] sm:$0xff] }
 0xe92   : > { %11149 = vrcp.f32 %v15691_v18  ;;  %v7454_v3 = vpack.c.bf16 %v7390_v23, %v7390_v23  ;;  %v15731_v9 = vunpack.c.l.b16 %v7482_v19  ;;  %v8169_v23 = vunpack.c.l.b16 %v17061_v6 }
 0xe93   : > { %v11142_v30 = vpop.eup %11141  ;;  %v8114_v18 = vunpack.c.l.b16 %v7472_v36 }
 0xe94   : > { %v7419_v47 = vmul.f32 %v11142_v30, %v15562_v7  ;;  %7270 = vadd.xlane.f32.xlu1 %v7269_v5  ;;  %v7241_v58 = vpop.xlane.xlu2 %7240  ;;  %v7880_v48 = vunpack.c.l.b16 %v7454_v3  ;;  %v15755_v30 = vpop.f32.mrf.mxu0 }
 0xe95   : > { %v11144_v25 = vpop.eup %11143  ;;  %v7223_v17 = vpop.xlane.xlu1 %7222  ;;  %v8116_v14 = vpack.c.b16 %v8115_v10, %v8114_v18  ;;  %v17062_v10 = vld [vmem:[#allocation17_spill] sm:$0xff] }
 0xe96   : > { %v7483_v57 = vpack.c.bf16 %v7419_v47, %v7419_v47  ;;  %v7391_v31 = vmul.f32 %v11144_v25, %v15560_v13  ;;  %v7217_v37 = vpop.xlane.xlu0 %7216  ;;  %11151 = vrcp.f32 %v7223_v17  ;;  %v11146_v39 = vpop.eup %11145 }
 0xe97   : > { %11153 = vrcp.f32 %v7217_v37  ;;  %v15738_v13 = vpop.eup %11147  ;;  %v7396_v4 = vmul.f32 %v11146_v39, %v17056_v0  ;;  %v15757_v3 = vpop.f32.mrf.mxu1 }
 0xe98   : > { %11155 = vrcp.f32 %v15667_v29  ;;  %v15733_v7 = vunpack.c.l.b16 %v7483_v57  ;;  %v7455_v59 = vpack.c.bf16 %v7391_v31, %v7391_v31  ;;  %v11150_v2 = vpop.eup %11149  ;;  %v7287_v27 = vsel %vm2194_vm2, %v15738_v13, 0.0 }
 0xe99   : > { %11157 = vrcp.f32 %v7220_v28  ;;  %v7460_v46 = vpack.c.bf16 %v7396_v4, %v7396_v4  ;;  %v7417_v20 = vmul.f32 %v11150_v2, %v17058_v43  ;;  %v17060_v28 = vld [vmem:[#allocation11_spill] sm:$0xff] }
 0xe9a   : > { %v8246_v29 = vpack.c.b16 %v15733_v7, %v15731_v9  ;;  %v7881_v62 = vunpack.c.l.b16 %v7455_v59  ;;  %11159 = vrcp.f32 %v7241_v58  ;;  %v8196_v59 = vunpack.c.l.b16 %v17062_v10  ;;  %v17063_v58 = vld [vmem:[#allocation13_spill] sm:$0xff] }
 0xe9b   : > { %v7958_v49 = vunpack.c.l.b16 %v7460_v46  ;;  %v7481_v22 = vpack.c.bf16 %v7417_v20, %v7417_v20  ;;  %v8195_v0 = vunpack.c.l.b16 %v17063_v58  ;;  %v17066_v46 = vld [vmem:[#allocation68_spill] sm:$0xff] }
 0xe9c   : > { %v11152_v38 = vpop.eup %11151  ;;  %v7882_v42 = vpack.c.b16 %v7881_v62, %v7880_v48  ;;  %v7247_v5 = vpop.xlane.xlu2 %7246 }
 0xe9d   : > { %v11154_v50 = vpop.eup %11153  ;;  %10194 = vmatmul.msk.bf16.vlgmr.msrb.gmra.mxu0 %vm2194_vm2, %v8116_v14  ;;  %v7399_v40 = vmul.f32 %v11152_v38, %v15580_v44  ;;  %v7244_v25 = vpop.xlane.xlu1 %7243  ;;  %v8171_v44 = vpack.c.b16 %v8170_v1, %v8169_v23 }
 0xe9e   : > { %v11156_v24 = vpop.eup %11155  ;;  %v7397_v15 = vmul.f32 %v11154_v50, %v15585_v54  ;;  %10185 = vmatmul.msk.bf16.vlgmr.msra.gmra.mxu3 %vm2194_vm2, %v7882_v42  ;;  %v7717_v62 = vpop.f32.mrf.mxu0  ;;  %v8197_v42 = vpack.c.b16 %v8196_v59, %v8195_v0 }
 0xe9f   : > { %v11158_v51 = vpop.eup %11157  ;;  %8105 = vmatpush.bf16.msra.mxu3 %v8093_v35  ;;  %7288 = vadd.xlane.f32.xlu0 %v7287_v27  ;;  %v7416_v63 = vmul.f32 %v11156_v24, %v17060_v28  ;;  %v7463_v47 = vpack.c.bf16 %v7399_v40, %v7399_v40  ;;  %v15768_v35 = vpop.f32.mrf.mxu1  ;;  %v17067_v27 = vld [vmem:[#allocation64_spill] sm:$0xff] }
 0xea0   : > { %v7461_v32 = vpack.c.bf16 %v7397_v15, %v7397_v15  ;;  %v7398_v54 = vmul.f32 %v11158_v51, %v15556_v56  ;;  %v11160_v17 = vpop.eup %11159  ;;  %v8219_v56 = vunpack.c.l.b16 %v7481_v22 }
 0xea1   : > { %v7480_v57 = vpack.c.bf16 %v7416_v63, %v7416_v63  ;;  %v7985_v37 = vunpack.c.l.b16 %v7463_v47  ;;  %v7405_v39 = vmul.f32 %v11160_v17, %v15578_v12  ;;  %v17065_v12 = vld [vmem:[#allocation42_spill] sm:$0xff]  ;;  %v17071_v47 = vld [vmem:[#allocation4_spill] sm:$0xff] }
 0xea2   : > { %v7959_v61 = vunpack.c.l.b16 %v7461_v32  ;;  %v7462_v31 = vpack.c.bf16 %v7398_v54, %v7398_v54  ;;  %v17068_v32 = vld [vmem:[#allocation49_spill] sm:$0xff] }
 0xea3   : > { %v8218_v8 = vunpack.c.l.b16 %v7480_v57  ;;  %v7469_v53 = vpack.c.bf16 %v7405_v39, %v7405_v39 }
 0xea4   : > { %v7960_v19 = vpack.c.b16 %v7959_v61, %v7958_v49  ;;  %v7238_v36 = vpop.xlane.xlu0 %7237  ;;  %v7984_v52 = vunpack.c.l.b16 %v7462_v31 }
 0xea5   : > { %11161 = vrcp.f32 %v7238_v36  ;;  %v8220_v4 = vpack.c.b16 %v8219_v56, %v8218_v8  ;;  %v8063_v24 = vunpack.c.l.b16 %v7469_v53  ;;  %v17072_v36 = vld [vmem:[#allocation73_spill] sm:$0xff] }
 0xea6   : > { %11163 = vrcp.f32 %v7247_v5  ;;  %10188 = vmatmul.msk.bf16.vlgmr.msra.gmra.mxu2 %vm2194_vm2, %v7960_v19  ;;  %v7986_v2 = vpack.c.b16 %v7985_v37, %v7984_v52  ;;  %v7719_v1 = vpop.f32.mrf.mxu0  ;;  %v17070_v19 = vld [vmem:[#allocation74_spill] sm:$0xff] }
 0xea7   : > { %11165 = vrcp.f32 %v7244_v25  ;;  %8183 = vmatpush.bf16.msra.mxu2 %v8171_v44  ;;  %v15775_v28 = vpop.f32.mrf.mxu1  ;;  %v10466_v54 = vpack.i.bf16 %v7719_v1, %v7717_v62  ;;  %v6975_v25 = vsub.f32 %v17071_v47, %v17070_v19  ;;  %v5813_v62 = vpop.permute.xlu2 %5812 }
 0xea8   : > { %v8247_v53 = vunpack.c.l.b16 %v5813_v62 }
 0xea9   : > { %v7102_v44 = vmul.f32 1.442695, %v6975_v25 }
 0xeab   : > { %v11162_v18 = vpop.eup %11161 }
 0xeac   : > { %v11164_v48 = vpop.eup %11163  ;;  %v7404_v14 = vmul.f32 %v11162_v18, %v17064_v34  ;;  %v7262_v6 = vpop.xlane.xlu0 %7261 }
 0xead   : > { %v11166_v38 = vpop.eup %11165  ;;  %10198 = vmatmul.msk.bf16.vlgmr.msra.gmra.mxu0 %vm2194_vm2, %v8220_v4  ;;  %5818 = vrot.lane.b32.xlu1 %v17065_v12, %s11260_s28  ;;  %v7407_v51 = vmul.f32 %v11164_v48, %v17067_v27  ;;  %11167 = vrcp.f32 %v7262_v6  ;;  %v15792_v48 = vpop.f32.mrf.mxu2 }
 0xeae   : > { %v7468_v50 = vpack.c.bf16 %v7404_v14, %v7404_v14  ;;  %10189 = vmatmul.msk.bf16.vlgmr.msrb.gmra.mxu3 %vm2194_vm2, %v7986_v2  ;;  %v7406_v15 = vmul.f32 %v11166_v38, %v17066_v46 }
 0xeaf   : > { %8209 = vmatpush.bf16.msrb.mxu3 %v8197_v42  ;;  %v7471_v41 = vpack.c.bf16 %v7407_v51, %v7407_v51  ;;  %v15779_v23 = vpop.f32.mrf.mxu1 }
 0xeb0   : > { %v8062_v43 = vunpack.c.l.b16 %v7468_v50  ;;  %v7470_v40 = vpack.c.bf16 %v7406_v15, %v7406_v15 }
 0xeb1   : > { %v8089_v49 = vunpack.c.l.b16 %v7471_v41 }
 0xeb2   : > { %v8064_v20 = vpack.c.b16 %v8063_v24, %v8062_v43  ;;  %v8088_v63 = vunpack.c.l.b16 %v7470_v40 }
 0xeb3   : > { %5822 = vrot.lane.b32.xlu0 %v17068_v32, %s11260_s28  ;;  %v11168_v5 = vpop.eup %11167 }
 0xeb4   : > { %v8090_v61 = vpack.c.b16 %v8089_v49, %v8088_v63  ;;  %v7412_v17 = vmul.f32 %v11168_v5, %v17072_v36  ;;  %v15818_v63 = vpop.f32.mrf.mxu3 }
 0xeb5   : > { %v15798_v12 = vpop.f32.mrf.mxu2 }
 0xeb6   : > { %10192 = vmatmul.msk.bf16.vlgmr.msrb.gmra.mxu2 %vm2194_vm2, %v8064_v20  ;;  %v7476_v56 = vpack.c.bf16 %v7412_v17, %v7412_v17 }
 0xeb8   : > { %v8166_v10 = vunpack.c.l.b16 %v7476_v56 }
 0xebb   : > { %10467 = vrot.lane.b32.xlu0 %v10466_v54, %s17069_s25 }
 0xebd   : > { %v15806_v46 = vpop.f32.mrf.mxu2 }
 0xebe   : > { %10193 = vmatmul.msk.bf16.vlgmr.msra.gmra.mxu3 %vm2194_vm2, %v8090_v61 }
 0xec4   : > { %v7265_v22 = vpop.xlane.xlu1 %7264 }
 0xec5   : > { %11169 = vrcp.f32 %v7265_v22  ;;  %v15811_v43 = vpop.f32.mrf.mxu2 }
 0xec6   : > { %11171 = vpow2.f32 %v7102_v44 }
 0xec9   : > { %v7743_v57 = vpop.f32.mrf.mxu1 }
 0xecb   : > { %v11170_v31 = vpop.eup %11169 }
 0xecc   : > { %v7413_v37 = vmul.f32 %v11170_v31, %v15632_v60  ;;  %v15785_v18 = vpop.eup %11171 }
 0xecd   : > { %v7293_v58 = vsel %vm2194_vm2, %v15785_v18, 0.0 }
 0xece   : > { %v7477_v39 = vpack.c.bf16 %v7413_v37, %v7413_v37 }
 0xed0   : > { %v8167_v59 = vunpack.c.l.b16 %v7477_v39 }
 0xed1   : > { %v7745_v8 = vpop.f32.mrf.mxu1 }
 0xed2   : > { %v8168_v52 = vpack.c.b16 %v8167_v59, %v8166_v10  ;;  %v10481_v54 = vpack.i.bf16 %v7745_v8, %v7743_v57 }
 0xed4   : > { %10196 = vmatmul.msk.bf16.vlgmr.msra.gmra.mxu2 %vm2194_vm2, %v8168_v52  ;;  %v7268_v4 = vpop.xlane.xlu0 %7267 }
 0xed5   : > { %11173 = vrcp.f32 %v7268_v4 }
 0xed7   : > { %7294 = vadd.xlane.f32.xlu1 %v7293_v58 }
 0xeda   : > { %v15790_v0 = vpop.f32.mrf.mxu1 }
 0xedb   : > { %v11174_v1 = vpop.eup %11173 }
 0xedc   : > { %v5817_v20 = vpop.permute.xlu1 %5816  ;;  %v7414_v61 = vmul.f32 %v11174_v1, %v15652_v26  ;;  %v15829_v26 = vpop.f32.mrf.mxu3 }
 0xedd   : > { %v7286_v5 = vpop.xlane.xlu2 %7285 }
 0xede   : > { %v7478_v22 = vpack.c.bf16 %v7414_v61, %v7414_v61 }
 0xee0   : > { %v8192_v17 = vunpack.c.l.b16 %v7478_v22 }
 0xee2   : > { %v15794_v60 = vpop.f32.mrf.mxu1 }
 0xee4   : > { %v15835_v4 = vpop.f32.mrf.mxu3 }
 0xee5   : > { %v7292_v10 = vpop.xlane.xlu2 %7291 }
 0xee7   : > { %v5815_v2 = vpop.permute.xlu0 %5814 }
 0xee8   : > { %v8248_v34 = vunpack.c.l.b16 %v5815_v2 }
 0xeea   : > { %v8249_v14 = vpack.c.b16 %v8248_v34, %v8247_v53  ;;  %v15796_v38 = vpop.f32.mrf.mxu0  ;;  %v7951_v42 = vpop.f32.mrf.mxu1 }
 0xeec   : > { %8261 = vmatpush.bf16.msra.mxu1 %v8249_v14  ;;  %v8273_v14 = vunpack.c.l.b16 %v5817_v20 }
 0xeef   : > { %10199 = vmatmul.msk.bf16.vlgmr.msra.gmra.mxu1 %vm2194_vm2, %v8246_v29  ;;  %v7769_v29 = vpop.f32.mrf.mxu2 }
 0xef2   : > { %v15804_v50 = vpop.f32.mrf.mxu0  ;;  %v7953_v24 = vpop.f32.mrf.mxu1 }
 0xef3   : > { %v10486_v15 = vpack.i.bf16 %v7953_v24, %v7951_v42 }
 0xef5   : > { %10487 = vrot.lane.b32.xlu1 %v10486_v15, %s11262_s21 }
 0xef7   : > { %v7771_v19 = vpop.f32.mrf.mxu2 }
 0xef8   : > { %v10496_v44 = vpack.i.bf16 %v7771_v19, %v7769_v29  ;;  %v5821_v29 = vpop.permute.xlu2 %5820 }
 0xefa   : > { %v7925_v27 = vpop.f32.mrf.mxu0  ;;  %v15809_v51 = vpop.f32.mrf.mxu1 }
 0xf02   : > { %v7927_v32 = vpop.f32.mrf.mxu0  ;;  %v15813_v40 = vpop.f32.mrf.mxu1 }
 0xf03   : > { %v10471_v9 = vpack.i.bf16 %v7927_v32, %v7925_v27  ;;  %v10546_v7 = vpack.i.bf16 %v15813_v40, %v15809_v51 }
 0xf05   : > { %10472 = vrot.lane.b32.xlu2 %v10471_v9, %s11262_s21 }
 0xf07   : > { %v7271_v41 = vpop.xlane.xlu1 %7270 }
 0xf08   : > { %11175 = vrcp.f32 %v7271_v41 }
 0xf09   : > { %11177 = vrcp.f32 %v7286_v5 }
 0xf0a   : > { %v15820_v49 = vpop.f32.mrf.mxu0  ;;  %v8159_v2 = vpop.f32.mrf.mxu1 }
 0xf0d   : > { %10482 = vrot.lane.b32.xlu2 %v10481_v54, %s17069_s25  ;;  %v8299_v54 = vunpack.c.l.b16 %v5821_v29 }
 0xf0e   : > { %v11176_v6 = vpop.eup %11175 }
 0xf0f   : > { %v7415_v47 = vmul.f32 %v11176_v6, %v15718_v11  ;;  %v11178_v11 = vpop.eup %11177 }
 0xf10   : > { %v7420_v52 = vmul.f32 %v11178_v11, %v15662_v16 }
 0xf11   : > { %v7479_v25 = vpack.c.bf16 %v7415_v47, %v7415_v47  ;;  %v7873_v39 = vpop.f32.mrf.mxu2 }
 0xf12   : > { %v15825_v36 = vpop.f32.mrf.mxu0  ;;  %v7289_v56 = vpop.xlane.xlu0 %7288  ;;  %v7484_v53 = vpack.c.bf16 %v7420_v52, %v7420_v52 }
 0xf13   : > { %v8193_v31 = vunpack.c.l.b16 %v7479_v25  ;;  %v10531_v57 = vpack.i.bf16 %v15825_v36, %v15820_v49  ;;  %11179 = vrcp.f32 %v7289_v56  ;;  %v8161_v20 = vpop.f32.mrf.mxu1 }
 0xf14   : > { %v8270_v9 = vunpack.c.l.b16 %v7484_v53  ;;  %v10491_v5 = vpack.i.bf16 %v8161_v20, %v8159_v2  ;;  %11181 = vrcp.f32 %v7292_v10 }
 0xf15   : > { %v8194_v37 = vpack.c.b16 %v8193_v31, %v8192_v17  ;;  %10497 = vrot.lane.b32.xlu2 %v10496_v44, %s17069_s25  ;;  %v10526_v31 = vpack.i.bf16 %v15804_v50, %v15796_v38 }
 0xf17   : > { %10197 = vmatmul.msk.bf16.vlgmr.msrb.gmra.mxu3 %vm2194_vm2, %v8194_v37 }
 0xf19   : > { %v11180_v59 = vpop.eup %11179  ;;  %v7875_v15 = vpop.f32.mrf.mxu2 }
 0xf1a   : > { %v8133_v8 = vpop.f32.mrf.mxu0  ;;  %v7421_v58 = vmul.f32 %v11180_v59, %v15738_v13  ;;  %v15838_v13 = vpop.f32.mrf.mxu3  ;;  %v10556_v50 = vpack.i.bf16 %v7875_v15, %v7873_v39  ;;  %v10322_v39 = vld [vmem:[%s16698_s8 + $0x18] sm:$0xff]  ;;  %v10321_v15 = vld [vmem:[%s16698_s8 + $0x10] sm:$0xff] }
 0xf1b   : > { %v11182_v59 = vpop.eup %11181  ;;  %8620 = vmatpush.bf16.msrb.mxu0 %v10322_v39 }
 0xf1c   : > { %v7485_v62 = vpack.c.bf16 %v7421_v58, %v7421_v58  ;;  %v7422_v52 = vmul.f32 %v11182_v59, %v15675_v55 }
 0xf1e   : > { %v8271_v24 = vunpack.c.l.b16 %v7485_v62  ;;  %v7486_v53 = vpack.c.bf16 %v7422_v52, %v7422_v52 }
 0xf1f   : > { %v5819_v34 = vpop.permute.xlu1 %5818  ;;  %8621 = vmatpush.bf16.msrb.mxu0 %v10321_v15 }
 0xf20   : > { %v8274_v42 = vunpack.c.l.b16 %v5819_v34  ;;  %v8272_v1 = vpack.c.b16 %v8271_v24, %v8270_v9  ;;  %v8296_v34 = vunpack.c.l.b16 %v7486_v53 }
 0xf22   : > { %v8275_v27 = vpack.c.b16 %v8274_v42, %v8273_v14  ;;  %v8135_v32 = vpop.f32.mrf.mxu0  ;;  %v7795_v19 = vpop.f32.mrf.mxu3 }
 0xf23   : > { %v10476_v41 = vpack.i.bf16 %v8135_v32, %v8133_v8  ;;  %v10541_v8 = vpack.i.bf16 %v15794_v60, %v15790_v0 }
 0xf24   : > { %8287 = vmatpush.bf16.msrb.mxu2 %v8275_v27 }
 0xf25   : > { %10477 = vrot.lane.b32.xlu0 %v10476_v41, %s11263_s24  ;;  %v5823_v16 = vpop.permute.xlu0 %5822 }
 0xf26   : > { %v8300_v61 = vunpack.c.l.b16 %v5823_v16 }
 0xf27   : > { %10200 = vmatmul.msk.bf16.vlgmr.msrb.gmra.mxu2 %vm2194_vm2, %v8272_v1 }
 0xf28   : > { %v8301_v6 = vpack.c.b16 %v8300_v61, %v8299_v54 }
 0xf29   : > { %v7977_v22 = vpop.f32.mrf.mxu2 }
 0xf2a   : > { %8313 = vmatpush.bf16.msra.mxu3 %v8301_v6  ;;  %v7797_v17 = vpop.f32.mrf.mxu3 }
 0xf2b   : > { %v10511_v44 = vpack.i.bf16 %v7797_v17, %v7795_v19 }
 0xf2d   : > { %10492 = vrot.lane.b32.xlu0 %v10491_v5, %s11263_s24  ;;  %v10468_v49 = vpop.permute.xlu0 %10467 }
 0xf2e   : > { %v10469_v16 = vunpack.i.l.bf16 %v10468_v49 }
 0xf30   : > { %v8512_v61 = vsel %vm1303_vm1, %v15703_v45, %v10469_v16 }
 0xf31   : > { %v7979_v47 = vpop.f32.mrf.mxu2 }
 0xf32   : > { %v10501_v25 = vpack.i.bf16 %v7979_v47, %v7977_v22  ;;  %v7899_v37 = vpop.f32.mrf.mxu3 }
 0xf35   : > { %10502 = vrot.lane.b32.xlu0 %v10501_v25, %s11262_s21 }
 0xf39   : > { %v8081_v56 = vpop.f32.mrf.mxu2 }
 0xf3a   : > { %v7901_v2 = vpop.f32.mrf.mxu3 }
 0xf3b   : > { %v10571_v0 = vpack.i.bf16 %v7901_v2, %v7899_v37 }
 0xf3d   : > { %10512 = vrot.lane.b32.xlu0 %v10511_v44, %s17069_s25 }
 0xf41   : > { %v8083_v58 = vpop.f32.mrf.mxu2 }
 0xf42   : > { %v8003_v60 = vpop.f32.mrf.mxu3  ;;  %v10561_v29 = vpack.i.bf16 %v8083_v58, %v8081_v56 }
 0xf45   : > { %10527 = vrot.lane.b32.xlu0 %v10526_v31, %s17069_s25  ;;  %v8237_v31 = vpop.f32.mrf.mxu0 }
 0xf4a   : > { %v7295_v11 = vpop.xlane.xlu1 %7294  ;;  %v8005_v32 = vpop.f32.mrf.mxu3 }
 0xf4b   : > { %11183 = vrcp.f32 %v7295_v11 }
 0xf4d   : > { %10542 = vrot.lane.b32.xlu0 %v10541_v8, %s17069_s25 }
 0xf51   : > { %v11184_v62 = vpop.eup %11183 }
 0xf52   : > { %v7423_v38 = vmul.f32 %v11184_v62, %v15785_v18  ;;  %v10516_v18 = vpack.i.bf16 %v8005_v32, %v8003_v60  ;;  %v8107_v9 = vpop.f32.mrf.mxu3 }
 0xf54   : > { %v7487_v10 = vpack.c.bf16 %v7423_v38, %v7423_v38 }
 0xf55   : > { %10557 = vrot.lane.b32.xlu0 %v10556_v50, %s17069_s25 }
 0xf56   : > { %v8297_v14 = vunpack.c.l.b16 %v7487_v10 }
 0xf57   : > { %v8185_v42 = vpop.f32.mrf.mxu2 }
 0xf58   : > { %v8298_v24 = vpack.c.b16 %v8297_v14, %v8296_v34  ;;  %v8239_v34 = vpop.f32.mrf.mxu0 }
 0xf5a   : > { %10201 = vmatmul.msk.bf16.vlgmr.msra.gmra.mxu3 %vm2194_vm2, %v8298_v24  ;;  %v8109_v41 = vpop.f32.mrf.mxu3  ;;  %v10536_v24 = vpack.i.bf16 %v8239_v34, %v8237_v31 }
 0xf5b   : > { %v10576_v1 = vpack.i.bf16 %v8109_v41, %v8107_v9 }
 0xf5d   : > { %10572 = vrot.lane.b32.xlu0 %v10571_v0, %s17069_s25 }
 0xf5f   : > { %v8187_v55 = vpop.f32.mrf.mxu2  ;;  %v10473_v36 = vpop.permute.xlu2 %10472 }
 0xf60   : > { %v10506_v27 = vpack.i.bf16 %v8187_v55, %v8185_v42  ;;  %v10475_v54 = vunpack.i.h.bf16 %v10473_v36  ;;  %v10474_v51 = vunpack.i.l.bf16 %v10473_v36 }
 0xf62   : > { %10507 = vrot.lane.b32.xlu2 %v10506_v27, %s11263_s24  ;;  %v8528_v5 = vsel %vm2194_vm2, %v8512_v61, %v10474_v51 }
 0xf67   : > { %v10483_v44 = vpop.permute.xlu2 %10482 }
 0xf68   : > { %v10485_v56 = vunpack.i.h.bf16 %v10483_v44  ;;  %v10484_v37 = vunpack.i.l.bf16 %v10483_v44 }
 0xf6a   : > { %10517 = vrot.lane.b32.xlu2 %v10516_v18, %s11262_s21  ;;  %v8515_v58 = vsel %vm1303_vm1, %v15768_v35, %v10485_v56  ;;  %v8514_v62 = vsel %vm1303_vm1, %v15757_v3, %v10484_v37 }
 0xf6c   : > { %v8263_v38 = vpop.f32.mrf.mxu1 }
 0xf6f   : > { %v10498_v55 = vpop.permute.xlu2 %10497 }
 0xf70   : > { %v10500_v18 = vunpack.i.h.bf16 %v10498_v55  ;;  %v10499_v39 = vunpack.i.l.bf16 %v10498_v55 }
 0xf72   : > { %10532 = vrot.lane.b32.xlu2 %v10531_v57, %s11262_s21  ;;  %v10470_v57 = vunpack.i.h.bf16 %v10468_v49  ;;  %v8516_v49 = vsel %vm1303_vm1, %v15792_v48, %v10499_v39 }
 0xf74   : > { %v8265_v35 = vpop.f32.mrf.mxu1 }
 0xf75   : > { %v10551_v60 = vpack.i.bf16 %v8265_v35, %v8263_v38  ;;  %v17074_v35 = vld [vmem:[#allocation26_spill] sm:$0xff] }
 0xf7a   : > { %10547 = vrot.lane.b32.xlu2 %v10546_v7, %s11262_s21  ;;  %v8513_v7 = vsel %vm1303_vm1, %v15721_v21, %v10470_v57  ;;  %v10488_v21 = vpop.permute.xlu1 %10487 }
 0xf7b   : > { %v8529_v22 = vsel %vm2194_vm2, %v8513_v7, %v10475_v54  ;;  %v10490_v59 = vunpack.i.h.bf16 %v10488_v21  ;;  %v10489_v8 = vunpack.i.l.bf16 %v10488_v21 }
 0xf7d   : > { %v8530_v50 = vsel %vm2194_vm2, %v8514_v62, %v10489_v8  ;;  %v8531_v10 = vsel %vm2194_vm2, %v8515_v58, %v10490_v59  ;;  %v17073_v62 = vld [vmem:[#allocation20_spill] sm:$0xff] }
 0xf82   : > { %10562 = vrot.lane.b32.xlu2 %v10561_v29, %s11262_s21 }
 0xf8a   : > { %10577 = vrot.lane.b32.xlu2 %v10576_v1, %s11262_s21  ;;  %v8517_v1 = vsel %vm1303_vm1, %v15798_v12, %v10500_v18 }
 0xf97   : > { %v10478_v40 = vpop.permute.xlu0 %10477 }
 0xf98   : > { %v10480_v20 = vunpack.i.h.bf16 %v10478_v40  ;;  %v10479_v6 = vunpack.i.l.bf16 %v10478_v40 }
 0xf9a   : > { %v8544_v19 = vsel %vm4019_vm3, %v8528_v5, %v10479_v6  ;;  %v8545_v47 = vsel %vm4019_vm3, %v8529_v22, %v10480_v20  ;;  %v8211_v25 = vpop.f32.mrf.mxu3 }
 0xf9b   : > { %v8560_v17 = vpack.c.bf16 %v8545_v47, %v8544_v19 }
 0xf9d   : > { %10215 = vmatmul.msk.bf16.vlgmr.msrb.gmra.mxu0 %vm701_vm0, %v8560_v17  ;;  %v15908_v17 = vld [vmem:[%s16699_s9 + $0x1] ss:$0 sm:$0xff] }
 0xf9f   : > { %v10493_v45 = vpop.permute.xlu0 %10492 }
 0xfa0   : > { %v10495_v2 = vunpack.i.h.bf16 %v10493_v45  ;;  %v10494_v53 = vunpack.i.l.bf16 %v10493_v45 }
 0xfa2   : > { %v8213_v11 = vpop.f32.mrf.mxu3  ;;  %v8546_v14 = vsel %vm4019_vm3, %v8530_v50, %v10494_v53  ;;  %v8547_v42 = vsel %vm4019_vm3, %v8531_v10, %v10495_v2 }
 0xfa3   : > { %v10521_v52 = vpack.i.bf16 %v8213_v11, %v8211_v25  ;;  %v8561_v0 = vpack.c.bf16 %v8547_v42, %v8546_v14 }
 0xfa5   : > { %10522 = vrot.lane.b32.xlu1 %v10521_v52, %s11263_s24 }
 0xfa7   : > { %v10503_v27 = vpop.permute.xlu0 %10502 }
 0xfa8   : > { %v10505_v15 = vunpack.i.h.bf16 %v10503_v27  ;;  %v10504_v9 = vunpack.i.l.bf16 %v10503_v27 }
 0xfaa   : > { %v8289_v3 = vpop.f32.mrf.mxu2  ;;  %v8532_v16 = vsel %vm2194_vm2, %v8516_v49, %v10504_v9  ;;  %v8533_v54 = vsel %vm2194_vm2, %v8517_v1, %v10505_v15 }
 0xfad   : > { %10216 = vmatmul.msk.bf16.gmra.mxu0 %vm701_vm0, %v8561_v0  ;;  %10537 = vrot.lane.b32.xlu1 %v10536_v24, %s11263_s24 }
 0xfaf   : > { %v10513_v48 = vpop.permute.xlu0 %10512 }
 0xfb0   : > { %v10515_v22 = vunpack.i.h.bf16 %v10513_v48  ;;  %v10514_v5 = vunpack.i.l.bf16 %v10513_v48 }
 0xfb2   : > { %v8291_v32 = vpop.f32.mrf.mxu2  ;;  %v8519_v44 = vsel %vm1303_vm1, %v15829_v26, %v10515_v22  ;;  %v8518_v31 = vsel %vm1303_vm1, %v15818_v63, %v10514_v5 }
 0xfb3   : > { %v10566_v29 = vpack.i.bf16 %v8291_v32, %v8289_v3 }
 0xfb5   : > { %10552 = vrot.lane.b32.xlu1 %v10551_v60, %s11263_s24 }
 0xfb7   : > { %v10528_v63 = vpop.permute.xlu0 %10527 }
 0xfb8   : > { %v10530_v50 = vunpack.i.h.bf16 %v10528_v63  ;;  %v10529_v10 = vunpack.i.l.bf16 %v10528_v63 }
 0xfba   : > { %v8521_v55 = vsel %vm1303_vm1, %v15755_v30, %v10530_v50  ;;  %v8520_v27 = vsel %vm1303_vm1, %v15736_v33, %v10529_v10  ;;  %v17075_v30 = vld [vmem:[#allocation29_spill] sm:$0xff] }
 0xfbc   : > { %v10508_v41 = vpop.permute.xlu2 %10507 }
 0xfbd   : > { %v10510_v36 = vunpack.i.h.bf16 %v10508_v41  ;;  %v10509_v57 = vunpack.i.l.bf16 %v10508_v41  ;;  %10567 = vrot.lane.b32.xlu1 %v10566_v29, %s11263_s24 }
 0xfbf   : > { %v8548_v51 = vsel %vm4019_vm3, %v8532_v16, %v10509_v57  ;;  %v8549_v40 = vsel %vm4019_vm3, %v8533_v54, %v10510_v36  ;;  %v10543_v33 = vpop.permute.xlu0 %10542 }
 0xfc0   : > { %v8562_v7 = vpack.c.bf16 %v8549_v40, %v8548_v51  ;;  %v10545_v54 = vunpack.i.h.bf16 %v10543_v33  ;;  %v10544_v51 = vunpack.i.l.bf16 %v10543_v33 }
 0xfc2   : > { %10217 = vmatmul.msk.bf16.gmra.mxu0 %vm701_vm0, %v8562_v7  ;;  %v8523_v5 = vsel %vm1303_vm1, %v15779_v23, %v10545_v54 }
 0xfc4   : > { %v10518_v6 = vpop.permute.xlu2 %10517 }
 0xfc5   : > { %v10520_v19 = vunpack.i.h.bf16 %v10518_v6  ;;  %v10519_v47 = vunpack.i.l.bf16 %v10518_v6  ;;  %v17076_v6 = vld [vmem:[#allocation23_spill] sm:$0xff] }
 0xfc7   : > { %v8535_v37 = vsel %vm2194_vm2, %v8519_v44, %v10520_v19  ;;  %v8534_v45 = vsel %vm2194_vm2, %v8518_v31, %v10519_v47  ;;  %v8522_v19 = vsel %vm1303_vm1, %v15775_v28, %v10544_v51 }
 0xfcc   : > { %v10533_v53 = vpop.permute.xlu2 %10532 }
 0xfcd   : > { %v10535_v14 = vunpack.i.h.bf16 %v10533_v53  ;;  %v10534_v42 = vunpack.i.l.bf16 %v10533_v53 }
 0xfcf   : > { %v8537_v32 = vsel %vm2194_vm2, %v8521_v55, %v10535_v14  ;;  %v8536_v18 = vsel %vm2194_vm2, %v8520_v27, %v10534_v42 }
 0xfd4   : > { %v10548_v57 = vpop.permute.xlu2 %10547 }
 0xfd5   : > { %v10550_v7 = vunpack.i.h.bf16 %v10548_v57 }
 0xfd7   : > { %v8539_v47 = vsel %vm2194_vm2, %v8523_v5, %v10550_v7  ;;  %v17079_v7 = vld [vmem:[#allocation18_spill] sm:$0xff] }
 0xfdd   : > { %v8315_v61 = vpop.f32.mrf.mxu3 }
 0xfe5   : > { %v8317_v12 = vpop.f32.mrf.mxu3 }
 0xfe6   : > { %v10581_v20 = vpack.i.bf16 %v8317_v12, %v8315_v61  ;;  %v10549_v61 = vunpack.i.l.bf16 %v10548_v57 }
 0xfe8   : > { %10582 = vrot.lane.b32.xlu1 %v10581_v20, %s11263_s24 }
0x1017   : > { %v10523_v25 = vpop.permute.xlu1 %10522 }
0x1018   : > { %v10525_v21 = vunpack.i.h.bf16 %v10523_v25  ;;  %v10524_v56 = vunpack.i.l.bf16 %v10523_v25  ;;  %v8538_v25 = vsel %vm2194_vm2, %v8522_v19, %v10549_v61  ;;  %v17080_v19 = vld [vmem:[#allocation25_spill] sm:$0xff] }
0x101a   : > { %v8550_v11 = vsel %vm4019_vm3, %v8534_v45, %v10524_v56  ;;  %v8551_v59 = vsel %vm4019_vm3, %v8535_v37, %v10525_v21  ;;  %v8623_v8 = vpop.f32.mrf.mxu0  ;;  %v10558_v37 = vpop.permute.xlu0 %10557 }
0x101b   : > { %v8563_v52 = vpack.c.bf16 %v8551_v59, %v8550_v11  ;;  %v8624_v58 = vadd.f32 %v15908_v17, %v8623_v8  ;;  %v10563_v45 = vpop.permute.xlu2 %10562  ;;  %v10560_v59 = vunpack.i.h.bf16 %v10558_v37  ;;  %v10559_v8 = vunpack.i.l.bf16 %v10558_v37 }
0x101c   : > { %v10564_v63 = vunpack.i.l.bf16 %v10563_v45 }
0x101d   : > { %v15920_v2 = vadd.f32 %v8624_v58, %v17073_v62  ;;  %10218 = vmatmul.msk.bf16.gmra.mxu0 %vm701_vm0, %v8563_v52  ;;  %v17077_v52 = vld [vmem:[#allocation21_spill] sm:$0xff]  ;;  %v10565_v62 = vunpack.i.h.bf16 %v10563_v45  ;;  %v8525_v50 = vsel %vm1303_vm1, %v15811_v43, %v10560_v59  ;;  %v8524_v10 = vsel %vm1303_vm1, %v15806_v46, %v10559_v8  ;;  %v17081_v45 = vld [vmem:[#allocation27_spill] sm:$0xff] }
0x101e   : > { %v8540_v14 = vsel %vm2194_vm2, %v8524_v10, %v10564_v63 }
0x101f   : > { %v8683_v26 = vsel %vm701_vm0, %v15920_v2, 0.0  ;;  %v10538_v38 = vpop.permute.xlu1 %10537 }
0x1020   : > { %8684 = vadd.xlane.f32.xlu0 %v8683_v26  ;;  %v10540_v0 = vunpack.i.h.bf16 %v10538_v38  ;;  %v10539_v3 = vunpack.i.l.bf16 %v10538_v38 }
0x1022   : > { %v8625_v34 = vpop.f32.mrf.mxu0  ;;  %v8552_v15 = vsel %vm4019_vm3, %v8536_v18, %v10539_v3  ;;  %v8553_v9 = vsel %vm4019_vm3, %v8537_v32, %v10540_v0  ;;  %v10573_v46 = vpop.permute.xlu0 %10572 }
0x1023   : > { %v8626_v24 = vadd.f32 %v15908_v17, %v8625_v34  ;;  %v8564_v41 = vpack.c.bf16 %v8553_v9, %v8552_v15  ;;  %v8541_v34 = vsel %vm2194_vm2, %v8525_v50, %v10565_v62  ;;  %v10578_v32 = vpop.permute.xlu2 %10577  ;;  %v10575_v18 = vunpack.i.h.bf16 %v10573_v46 }
0x1024   : > { %v10580_v15 = vunpack.i.h.bf16 %v10578_v32  ;;  %v10579_v9 = vunpack.i.l.bf16 %v10578_v32  ;;  %v17084_v32 = vld [vmem:[#allocation34_spill] sm:$0xff] }
0x1025   : > { %v15927_v60 = vadd.f32 %v8626_v24, %v17074_v35  ;;  %v17078_v35 = vld [vmem:[#allocation30_spill] sm:$0xff] }
0x1027   : > { %v8686_v39 = vsel %vm701_vm0, %v15927_v60, 0.0  ;;  %v10553_v16 = vpop.permute.xlu1 %10552 }
0x1028   : > { %8687 = vadd.xlane.f32.xlu2 %v8686_v39  ;;  %v10555_v20 = vunpack.i.h.bf16 %v10553_v16  ;;  %v10554_v48 = vunpack.i.l.bf16 %v10553_v16  ;;  %v10574_v39 = vunpack.i.l.bf16 %v10573_v46 }
0x102a   : > { %v8628_v29 = vpop.f32.mrf.mxu0  ;;  %v8554_v31 = vsel %vm4019_vm3, %v8538_v25, %v10554_v48  ;;  %v8555_v21 = vsel %vm4019_vm3, %v8539_v47, %v10555_v20 }
0x102b   : > { %v8629_v1 = vadd.f32 %v15908_v17, %v8628_v29  ;;  %v8565_v56 = vpack.c.bf16 %v8555_v21, %v8554_v31 }
0x102d   : > { %v15941_v49 = vadd.f32 %v8629_v1, %v17075_v30  ;;  %10219 = vmatmul.msk.bf16.gmra.mxu0 %vm701_vm0, %v8564_v41  ;;  %v8527_v41 = vsel %vm1303_vm1, %v15838_v13, %v10575_v18  ;;  %v8526_v1 = vsel %vm1303_vm1, %v15835_v4, %v10574_v39 }
0x102e   : > { %v8542_v57 = vsel %vm2194_vm2, %v8526_v1, %v10579_v9 }
0x102f   : > { %v8689_v36 = vsel %vm701_vm0, %v15941_v49, 0.0  ;;  %v10568_v11 = vpop.permute.xlu1 %10567 }
0x1030   : > { %8690 = vadd.xlane.f32.xlu1 %v8689_v36  ;;  %v10570_v26 = vunpack.i.h.bf16 %v10568_v11  ;;  %v10569_v53 = vunpack.i.l.bf16 %v10568_v11  ;;  %v8543_v36 = vsel %vm2194_vm2, %v8527_v41, %v10580_v15 }
0x1032   : > { %v8630_v40 = vpop.f32.mrf.mxu0  ;;  %v8556_v24 = vsel %vm4019_vm3, %v8540_v14, %v10569_v53  ;;  %v8557_v0 = vsel %vm4019_vm3, %v8541_v34, %v10570_v26  ;;  %v17082_v53 = vld [vmem:[#allocation35_spill] sm:$0xff] }
0x1033   : > { %v8631_v12 = vadd.f32 %v15908_v17, %v8630_v40  ;;  %v8566_v27 = vpack.c.bf16 %v8557_v0, %v8556_v24  ;;  %v17083_v24 = vld [vmem:[#allocation33_spill] sm:$0xff] }
0x1035   : > { %v15948_v22 = vadd.f32 %v8631_v12, %v17076_v6 }
0x1037   : > { %v8692_v44 = vsel %vm701_vm0, %v15948_v22, 0.0 }
0x1038   : > { %8693 = vadd.xlane.f32.xlu0 %v8692_v44 }
0x103d   : > { %10220 = vmatmul.msk.bf16.gmra.mxu0 %vm701_vm0, %v8565_v56 }
0x103f   : > { %v8633_v23 = vpop.f32.mrf.mxu0 }
0x1040   : > { %v8634_v28 = vadd.f32 %v15908_v17, %v8633_v23 }
0x1042   : > { %v15963_v58 = vadd.f32 %v8634_v28, %v17077_v52 }
0x1044   : > { %v8695_v38 = vsel %vm701_vm0, %v15963_v58, 0.0 }
0x1045   : > { %8696 = vadd.xlane.f32.xlu2 %v8695_v38 }
0x1047   : > { %v8635_v42 = vpop.f32.mrf.mxu0 }
0x1048   : > { %v8636_v3 = vadd.f32 %v15908_v17, %v8635_v42 }
0x104a   : > { %v15977_v55 = vadd.f32 %v8636_v3, %v17078_v35 }
0x104c   : > { %v8698_v43 = vsel %vm701_vm0, %v15977_v55, 0.0 }
0x104d   : > { %10221 = vmatmul.msk.bf16.gmra.mxu0 %vm701_vm0, %v8566_v27  ;;  %8699 = vadd.xlane.f32.xlu1 %v8698_v43 }
0x105a   : > { %v10583_v29 = vpop.permute.xlu1 %10582 }
0x105b   : > { %v10585_v30 = vunpack.i.h.bf16 %v10583_v29  ;;  %v10584_v33 = vunpack.i.l.bf16 %v10583_v29 }
0x105d   : > { %v8558_v16 = vsel %vm4019_vm3, %v8542_v57, %v10584_v33  ;;  %v8559_v54 = vsel %vm4019_vm3, %v8543_v36, %v10585_v30  ;;  %v17085_v33 = vld [vmem:[#allocation32_spill] sm:$0xff] }
0x105e   : > { %v8567_v51 = vpack.c.bf16 %v8559_v54, %v8558_v16 }
0x1060   : > { %10222 = vmatmul.msk.bf16.gmra.mxu0 %vm701_vm0, %v8567_v51 }
0x1093   : > { %v8685_v40 = vpop.xlane.xlu0 %8684 }
0x1094   : > { %v8731_v61 = vmul.f32 %v8685_v40, %v17079_v7 }
0x1096   : > { %v15993_v13 = vsub.f32 %v15920_v2, %v8731_v61 }
0x1098   : > { %v8763_v4 = vmul.f32 %v15993_v13, %v15993_v13 }
0x109a   : > { %v8638_v12 = vpop.f32.mrf.mxu0  ;;  %v8779_v20 = vsel %vm701_vm0, %v8763_v4, 0.0 }
0x109b   : > { %v8639_v48 = vadd.f32 %v15908_v17, %v8638_v12  ;;  %v8688_v6 = vpop.xlane.xlu2 %8687  ;;  %8780 = vadd.xlane.f32.xlu0 %v8779_v20  ;;  %v10324_v20 = vld [vmem:[%s16702_s12 + $0x18] sm:$0xff] }
0x109c   : > { %v8732_v5 = vmul.f32 %v8688_v6, %v17079_v7  ;;  %9133 = vmatpush.bf16.msrb.mxu1 %v10324_v20 }
0x109d   : > { %v16001_v47 = vadd.f32 %v8639_v48, %v17080_v19 }
0x109e   : > { %v16004_v25 = vsub.f32 %v15927_v60, %v8732_v5  ;;  %v10323_v5 = vld [vmem:[%s16702_s12 + $0x10] sm:$0xff] }
0x109f   : > { %v8701_v2 = vsel %vm701_vm0, %v16001_v47, 0.0 }
0x10a0   : > { %8702 = vadd.xlane.f32.xlu1 %v8701_v2  ;;  %v8764_v44 = vmul.f32 %v16004_v25, %v16004_v25  ;;  %9134 = vmatpush.bf16.msrb.mxu1 %v10323_v5 }
0x10a2   : > { %v8640_v31 = vpop.f32.mrf.mxu0  ;;  %v8782_v21 = vsel %vm701_vm0, %v8764_v44, 0.0 }
0x10a3   : > { %v8641_v56 = vadd.f32 %v15908_v17, %v8640_v31  ;;  %v8691_v37 = vpop.xlane.xlu1 %8690  ;;  %8783 = vadd.xlane.f32.xlu2 %v8782_v21 }
0x10a4   : > { %v8733_v23 = vmul.f32 %v8691_v37, %v17079_v7 }
0x10a5   : > { %v16014_v28 = vadd.f32 %v8641_v56, %v17081_v45 }
0x10a6   : > { %v16017_v60 = vsub.f32 %v15941_v49, %v8733_v23 }
0x10a7   : > { %v8704_v11 = vsel %vm701_vm0, %v16014_v28, 0.0 }
0x10a8   : > { %8705 = vadd.xlane.f32.xlu0 %v8704_v11  ;;  %v8765_v59 = vmul.f32 %v16017_v60, %v16017_v60 }
0x10aa   : > { %v8643_v8 = vpop.f32.mrf.mxu0  ;;  %v8785_v52 = vsel %vm701_vm0, %v8765_v59, 0.0 }
0x10ab   : > { %v8644_v62 = vadd.f32 %v15908_v17, %v8643_v8  ;;  %8786 = vadd.xlane.f32.xlu2 %v8785_v52  ;;  %v8694_v63 = vpop.xlane.xlu0 %8693 }
0x10ac   : > { %v8734_v26 = vmul.f32 %v8694_v63, %v17079_v7 }
0x10ad   : > { %v16027_v38 = vadd.f32 %v8644_v62, %v17082_v53 }
0x10ae   : > { %v16030_v49 = vsub.f32 %v15948_v22, %v8734_v26  ;;  %v17087_v26 = vld [vmem:[#allocation28_spill] sm:$0xff] }
0x10af   : > { %v8707_v50 = vsel %vm701_vm0, %v16027_v38, 0.0 }
0x10b0   : > { %8708 = vadd.xlane.f32.xlu0 %v8707_v50  ;;  %v8766_v10 = vmul.f32 %v16030_v49, %v16030_v49 }
0x10b2   : > { %v8645_v34 = vpop.f32.mrf.mxu0  ;;  %v8788_v14 = vsel %vm701_vm0, %v8766_v10, 0.0 }
0x10b3   : > { %v8646_v42 = vadd.f32 %v15908_v17, %v8645_v34  ;;  %8789 = vadd.xlane.f32.xlu1 %v8788_v14 }
0x10b5   : > { %v16039_v0 = vadd.f32 %v8646_v42, %v17083_v24 }
0x10b7   : > { %v8710_v22 = vsel %vm701_vm0, %v16039_v0, 0.0 }
0x10b8   : > { %8711 = vadd.xlane.f32.xlu2 %v8710_v22  ;;  %v8697_v3 = vpop.xlane.xlu2 %8696 }
0x10b9   : > { %v8735_v35 = vmul.f32 %v8697_v3, %v17079_v7 }
0x10ba   : > { %v8648_v27 = vpop.f32.mrf.mxu0 }
0x10bb   : > { %v16045_v43 = vsub.f32 %v15963_v58, %v8735_v35  ;;  %v8649_v46 = vadd.f32 %v15908_v17, %v8648_v27 }
0x10bd   : > { %v16049_v18 = vadd.f32 %v8649_v46, %v17084_v32  ;;  %v8767_v39 = vmul.f32 %v16045_v43, %v16045_v43 }
0x10bf   : > { %v8713_v15 = vsel %vm701_vm0, %v16049_v18, 0.0  ;;  %v8791_v9 = vsel %vm701_vm0, %v8767_v39, 0.0 }
0x10c0   : > { %v8700_v29 = vpop.xlane.xlu1 %8699  ;;  %8714 = vadd.xlane.f32.xlu2 %v8713_v15  ;;  %8792 = vadd.xlane.f32.xlu1 %v8791_v9 }
0x10c1   : > { %v8736_v41 = vmul.f32 %v8700_v29, %v17079_v7  ;;  %v17088_v29 = vld [vmem:[#allocation31_spill] sm:$0xff] }
0x10c2   : > { %v8650_v58 = vpop.f32.mrf.mxu0 }
0x10c3   : > { %v16058_v1 = vsub.f32 %v15977_v55, %v8736_v41  ;;  %v8651_v30 = vadd.f32 %v15908_v17, %v8650_v58  ;;  %v17086_v55 = vld [vmem:[#allocation36_spill] sm:$0xff] }
0x10c5   : > { %v16062_v36 = vadd.f32 %v8651_v30, %v17085_v33  ;;  %v8768_v57 = vmul.f32 %v16058_v1, %v16058_v1 }
0x10c7   : > { %v8794_v16 = vsel %vm701_vm0, %v8768_v57, 0.0  ;;  %v8716_v54 = vsel %vm701_vm0, %v16062_v36, 0.0 }
0x10c8   : > { %8795 = vadd.xlane.f32.xlu0 %v8794_v16  ;;  %8717 = vadd.xlane.f32.xlu1 %v8716_v54 }
0x10ca   : > { %v8653_v51 = vpop.f32.mrf.mxu0 }
0x10cb   : > { %v8654_v40 = vadd.f32 %v15908_v17, %v8653_v51 }
0x10cd   : > { %v16071_v61 = vadd.f32 %v8654_v40, %v17086_v55 }
0x10cf   : > { %v8719_v4 = vsel %vm701_vm0, %v16071_v61, 0.0 }
0x10d0   : > { %8720 = vadd.xlane.f32.xlu1 %v8719_v4 }
0x10d2   : > { %v8655_v2 = vpop.f32.mrf.mxu0 }
0x10d3   : > { %v8656_v45 = vadd.f32 %v15908_v17, %v8655_v2 }
0x10d5   : > { %v16093_v53 = vadd.f32 %v8656_v45, %v17087_v26 }
0x10d7   : > { %v8722_v27 = vsel %vm701_vm0, %v16093_v53, 0.0 }
0x10dd   : > { %v8658_v62 = vpop.f32.mrf.mxu0 }
0x10de   : > { %v8659_v3 = vadd.f32 %v15908_v17, %v8658_v62 }
0x10e0   : > { %v16110_v41 = vadd.f32 %v8659_v3, %v17088_v29 }
0x10e5   : > { %v8660_v58 = vpop.f32.mrf.mxu0 }
0x10e6   : > { %v8661_v4 = vadd.f32 %v15908_v17, %v8660_v58 }
0x110e   : > { %v8781_v12 = vpop.xlane.xlu0 %8780 }
0x110f   : > { %v8827_v48 = vmul.f32 %v8781_v12, %v17079_v7  ;;  %v16122_v12 = vld [vmem:[%s16700_s10 + $0x1] ss:$0 sm:$0xff] }
0x1111   : > { %v8843_v6 = vadd.f32 1e-05, %v8827_v48  ;;  %v8725_v48 = vsel %vm701_vm0, %v16110_v41, 0.0 }
0x1113   : > { %11185 = vrsqrt.f32 %v8843_v6  ;;  %v8703_v19 = vpop.xlane.xlu1 %8702  ;;  %vm8865_vm2 = vweird.f32 %v8843_v6 }
0x1114   : > { %v8737_v44 = vmul.f32 %v8703_v19, %v17079_v7 }
0x1116   : > { %v16084_v31 = vsub.f32 %v16001_v47, %v8737_v44  ;;  %v8784_v21 = vpop.xlane.xlu2 %8783 }
0x1117   : > { %v8828_v56 = vmul.f32 %v8784_v21, %v17079_v7 }
0x1118   : > { %v8769_v37 = vmul.f32 %v16084_v31, %v16084_v31 }
0x1119   : > { %v11186_v23 = vpop.eup %11185  ;;  %v8844_v11 = vadd.f32 1e-05, %v8828_v56 }
0x111a   : > { %v8860_v59 = vmul.f32 %v11186_v23, %v8843_v6  ;;  %v8797_v8 = vsel %vm701_vm0, %v8769_v37, 0.0  ;;  %vm8866_vm1 = vweird.f32 %v11186_v23  ;;  %v16136_v37 = vld [vmem:[%s16701_s11 + $0x1] ss:$0 sm:$0xff] }
0x111b   : > { %11187 = vrsqrt.f32 %v8844_v11  ;;  %8798 = vadd.xlane.f32.xlu0 %v8797_v8  ;;  %v8706_v52 = vpop.xlane.xlu0 %8705  ;;  %vm8867_vm3 = vmor %vm8865_vm2, %vm8866_vm1  ;;  %vm8875_vm13 = vweird.f32 %v8844_v11 }
0x111c   : > { %v8861_v63 = vmul.f32 %v11186_v23, %v8860_v59  ;;  %v8738_v47 = vmul.f32 %v8706_v52, %v17079_v7 }
0x111e   : > { %v8862_v50 = vmul.f32 0.5, %v8861_v63  ;;  %v16096_v10 = vsub.f32 %v16014_v28, %v8738_v47  ;;  %v8787_v34 = vpop.xlane.xlu2 %8786 }
0x111f   : > { %v8829_v14 = vmul.f32 %v8787_v34, %v17079_v7 }
0x1120   : > { %v8863_v42 = vsub.f32 1.5, %v8862_v50  ;;  %v8770_v24 = vmul.f32 %v16096_v10, %v16096_v10 }
0x1121   : > { %v11188_v22 = vpop.eup %11187  ;;  %v16102_v35 = vadd.f32 1e-05, %v8829_v14 }
0x1122   : > { %v8864_v46 = vmul.f32 %v11186_v23, %v8863_v42  ;;  %v8870_v32 = vmul.f32 %v11188_v22, %v8844_v11  ;;  %v8800_v28 = vsel %vm701_vm0, %v8770_v24, 0.0  ;;  %vm8876_vm12 = vweird.f32 %v11188_v22 }
0x1123   : > { %11189 = vrsqrt.f32 %v16102_v35  ;;  %8723 = vadd.xlane.f32.xlu0 %v8722_v27  ;;  %8801 = vadd.xlane.f32.xlu2 %v8800_v28  ;;  %v8709_v39 = vpop.xlane.xlu0 %8708  ;;  %vm8877_vm14 = vmor %vm8875_vm13, %vm8876_vm12  ;;  %vm8885_vm4 = vweird.f32 %v16102_v35 }
0x1124   : > { %v8871_v15 = vmul.f32 %v11188_v22, %v8870_v32  ;;  %v8739_v9 = vmul.f32 %v8709_v39, %v17079_v7  ;;  %v8868_v30 = vsel %vm8867_vm3, %v11186_v23, %v8864_v46 }
0x1125   : > { %v9019_v20 = vmul.f32 %v8868_v30, %v15993_v13  ;;  %v17089_v13 = vld [vmem:[#allocation37_spill] sm:$0xff] }
0x1126   : > { %v8872_v33 = vmul.f32 0.5, %v8871_v15  ;;  %v16113_v57 = vsub.f32 %v16027_v38, %v8739_v9  ;;  %v8790_v16 = vpop.xlane.xlu1 %8789  ;;  %v16131_v56 = vadd.f32 %v8661_v4, %v17089_v13 }
0x1127   : > { %v8830_v54 = vmul.f32 %v8790_v16, %v17079_v7  ;;  %v9038_v23 = vmul.f32 %v16122_v12, %v9019_v20 }
0x1128   : > { %v8873_v51 = vsub.f32 1.5, %v8872_v33  ;;  %v8771_v40 = vmul.f32 %v16113_v57, %v16113_v57 }
0x1129   : > { %v11190_v55 = vpop.eup %11189  ;;  %v8846_v38 = vadd.f32 1e-05, %v8830_v54  ;;  %v16147_v47 = vadd.f32 %v16136_v37, %v9038_v23 }
0x112a   : > { %v8874_v6 = vmul.f32 %v11188_v22, %v8873_v51  ;;  %v8880_v5 = vmul.f32 %v11190_v55, %v16102_v35  ;;  %v8803_v19 = vsel %vm701_vm0, %v8771_v40, 0.0  ;;  %vm8886_vm15 = vweird.f32 %v11190_v55 }
0x112b   : > { %11191 = vrsqrt.f32 %v8846_v38  ;;  %v8712_v17 = vpop.xlane.xlu2 %8711  ;;  %8726 = vadd.xlane.f32.xlu0 %v8725_v48  ;;  %8804 = vadd.xlane.f32.xlu2 %v8803_v19  ;;  %vm8887_vm6 = vmor %vm8885_vm4, %vm8886_vm15  ;;  %vm8895_vm8 = vweird.f32 %v8846_v38 }
0x112c   : > { %v8878_v2 = vsel %vm8877_vm14, %v11188_v22, %v8874_v6  ;;  %v8881_v44 = vmul.f32 %v11190_v55, %v8880_v5  ;;  %v8740_v21 = vmul.f32 %v8712_v17, %v17079_v7 }
0x112d   : > { %v9020_v45 = vmul.f32 %v8878_v2, %v16004_v25  ;;  %v8728_v25 = vsel %vm701_vm0, %v16131_v56, 0.0 }
0x112e   : > { %v8882_v11 = vmul.f32 0.5, %v8881_v44  ;;  %v16141_v59 = vsub.f32 %v16039_v0, %v8740_v21 }
0x112f   : > { %v9039_v8 = vmul.f32 %v16122_v12, %v9020_v45 }
0x1130   : > { %v8883_v52 = vsub.f32 1.5, %v8882_v11  ;;  %v8772_v62 = vmul.f32 %v16141_v59, %v16141_v59 }
0x1131   : > { %v11192_v63 = vpop.eup %11191  ;;  %v16150_v26 = vadd.f32 %v16136_v37, %v9039_v8 }
0x1132   : > { %v8884_v50 = vmul.f32 %v11190_v55, %v8883_v52  ;;  %v8890_v0 = vmul.f32 %v11192_v63, %v8846_v38  ;;  %v8806_v34 = vsel %vm701_vm0, %v8772_v62, 0.0  ;;  %vm8896_vm7 = vweird.f32 %v11192_v63 }
0x1133   : > { %v9073_v14 = vpack.c.bf16 %v16150_v26, %v16147_v47  ;;  %v8715_v42 = vpop.xlane.xlu2 %8714  ;;  %8807 = vadd.xlane.f32.xlu1 %v8806_v34  ;;  %v8793_v24 = vpop.xlane.xlu1 %8792  ;;  %8729 = vadd.xlane.f32.xlu2 %v8728_v25  ;;  %vm8897_vm9 = vmor %vm8895_vm8, %vm8896_vm7 }
0x1134   : > { %v8891_v22 = vmul.f32 %v11192_v63, %v8890_v0  ;;  %v8741_v3 = vmul.f32 %v8715_v42, %v17079_v7  ;;  %v8831_v27 = vmul.f32 %v8793_v24, %v17079_v7  ;;  %v8888_v46 = vsel %vm8887_vm6, %v11190_v55, %v8884_v50 }
0x1135   : > { %10238 = vmatmul.msk.bf16.vlgmr.msrb.gmra.mxu1 %vm701_vm0, %v9073_v14  ;;  %v9021_v9 = vmul.f32 %v8888_v46, %v16017_v60 }
0x1136   : > { %v8892_v32 = vmul.f32 0.5, %v8891_v22  ;;  %v16162_v28 = vsub.f32 %v16049_v18, %v8741_v3  ;;  %v8847_v39 = vadd.f32 1e-05, %v8831_v27 }
0x1137   : > { %v9040_v40 = vmul.f32 %v16122_v12, %v9021_v9 }
0x1138   : > { %v8893_v15 = vsub.f32 1.5, %v8892_v32  ;;  %11193 = vrsqrt.f32 %v8847_v39  ;;  %v8773_v35 = vmul.f32 %v16162_v28, %v16162_v28  ;;  %vm8905_vm11 = vweird.f32 %v8847_v39 }
0x1139   : > { %v16179_v5 = vadd.f32 %v16136_v37, %v9040_v40 }
0x113a   : > { %v8894_v29 = vmul.f32 %v11192_v63, %v8893_v15  ;;  %v8809_v58 = vsel %vm701_vm0, %v8773_v35, 0.0  ;;  %v10327_v35 = vld [vmem:[%s16704_s14 + $0x30] sm:$0xff] }
0x113b   : > { %8810 = vadd.xlane.f32.xlu1 %v8809_v58  ;;  %v8718_v30 = vpop.xlane.xlu1 %8717  ;;  %v8796_v33 = vpop.xlane.xlu0 %8795 }
0x113c   : > { %v8898_v16 = vsel %vm8897_vm9, %v11192_v63, %v8894_v29  ;;  %v8742_v18 = vmul.f32 %v8718_v30, %v17079_v7  ;;  %v8832_v54 = vmul.f32 %v8796_v33, %v17079_v7 }
0x113d   : > { %v9022_v51 = vmul.f32 %v8898_v16, %v16030_v49 }
0x113e   : > { %v11194_v55 = vpop.eup %11193  ;;  %v16173_v60 = vsub.f32 %v16062_v36, %v8742_v18  ;;  %v8848_v4 = vadd.f32 1e-05, %v8832_v54  ;;  %v10326_v18 = vld [vmem:[%s16704_s14 + $0x28] sm:$0xff] }
0x113f   : > { %v8900_v20 = vmul.f32 %v11194_v55, %v8847_v39  ;;  %v9041_v38 = vmul.f32 %v16122_v12, %v9022_v51  ;;  %vm8906_vm10 = vweird.f32 %v11194_v55 }
0x1140   : > { %11195 = vrsqrt.f32 %v8848_v4  ;;  %v8774_v48 = vmul.f32 %v16173_v60, %v16173_v60  ;;  %vm8907_vm1 = vmor %vm8905_vm11, %vm8906_vm10  ;;  %vm8915_vm3 = vweird.f32 %v8848_v4 }
0x1141   : > { %v8901_v6 = vmul.f32 %v11194_v55, %v8900_v20  ;;  %v16182_v49 = vadd.f32 %v16136_v37, %v9041_v38 }
0x1142   : > { %v8812_v19 = vsel %vm701_vm0, %v8774_v48, 0.0 }
0x1143   : > { %v8902_v17 = vmul.f32 0.5, %v8901_v6  ;;  %8813 = vadd.xlane.f32.xlu0 %v8812_v19  ;;  %v8721_v36 = vpop.xlane.xlu1 %8720  ;;  %v9074_v2 = vpack.c.bf16 %v16182_v49, %v16179_v5 }
0x1144   : > { %v8743_v44 = vmul.f32 %v8721_v36, %v17079_v7 }
0x1145   : > { %v8903_v21 = vsub.f32 1.5, %v8902_v17  ;;  %10239 = vmatmul.msk.bf16.gmra.mxu1 %vm701_vm0, %v9074_v2 }
0x1146   : > { %v11196_v13 = vpop.eup %11195  ;;  %v16190_v23 = vsub.f32 %v16071_v61, %v8743_v44 }
0x1147   : > { %v8904_v45 = vmul.f32 %v11194_v55, %v8903_v21  ;;  %v8910_v11 = vmul.f32 %v11196_v13, %v8848_v4  ;;  %vm8916_vm2 = vweird.f32 %v11196_v13 }
0x1148   : > { %v8775_v8 = vmul.f32 %v16190_v23, %v16190_v23  ;;  %vm8917_vm12 = vmor %vm8915_vm3, %vm8916_vm2 }
0x1149   : > { %v8911_v52 = vmul.f32 %v11196_v13, %v8910_v11  ;;  %v8908_v63 = vsel %vm8907_vm1, %v11194_v55, %v8904_v45 }
0x114a   : > { %v8815_v62 = vsel %vm701_vm0, %v8775_v8, 0.0  ;;  %v9023_v0 = vmul.f32 %v8908_v63, %v16045_v43 }
0x114b   : > { %v8912_v25 = vmul.f32 0.5, %v8911_v52  ;;  %8816 = vadd.xlane.f32.xlu2 %v8815_v62 }
0x114c   : > { %v9042_v42 = vmul.f32 %v16122_v12, %v9023_v0 }
0x114d   : > { %v8913_v50 = vsub.f32 1.5, %v8912_v25 }
0x114e   : > { %v16200_v22 = vadd.f32 %v16136_v37, %v9042_v42 }
0x114f   : > { %v8914_v61 = vmul.f32 %v11196_v13, %v8913_v50 }
0x1151   : > { %v8918_v34 = vsel %vm8917_vm12, %v11196_v13, %v8914_v61 }
0x1152   : > { %v9024_v14 = vmul.f32 %v8918_v34, %v16058_v1  ;;  %v10328_v1 = vld [vmem:[%s16704_s14 + $0x38] sm:$0xff] }
0x1153   : > { %9266 = vmatpush.bf16.msra.mxu2 %v10328_v1 }
0x1154   : > { %v9043_v24 = vmul.f32 %v16122_v12, %v9024_v14 }
0x1156   : > { %v16203_v3 = vadd.f32 %v16136_v37, %v9043_v24 }
0x1157   : > { %9267 = vmatpush.bf16.msra.mxu2 %v10327_v35 }
0x1158   : > { %v9075_v27 = vpack.c.bf16 %v16203_v3, %v16200_v22 }
0x115a   : > { %10240 = vmatmul.msk.bf16.gmra.mxu1 %vm701_vm0, %v9075_v27 }
0x115b   : > { %9268 = vmatpush.bf16.msra.mxu2 %v10326_v18 }
0x118e   : > { %v8799_v43 = vpop.xlane.xlu0 %8798 }
0x118f   : > { %v8833_v46 = vmul.f32 %v8799_v43, %v17079_v7 }
0x1191   : > { %v8849_v32 = vadd.f32 1e-05, %v8833_v46 }
0x1193   : > { %11197 = vrsqrt.f32 %v8849_v32  ;;  %vm8925_vm14 = vweird.f32 %v8849_v32 }
0x1196   : > { %v8802_v39 = vpop.xlane.xlu2 %8801  ;;  %v8724_v15 = vpop.xlane.xlu0 %8723 }
0x1197   : > { %v8834_v9 = vmul.f32 %v8802_v39, %v17079_v7  ;;  %v8744_v29 = vmul.f32 %v8724_v15, %v17079_v7 }
0x1199   : > { %v11198_v58 = vpop.eup %11197  ;;  %v8850_v30 = vadd.f32 1e-05, %v8834_v9  ;;  %v16218_v33 = vsub.f32 %v16093_v53, %v8744_v29  ;;  %v10325_v53 = vld [vmem:[%s16704_s14 + $0x20] sm:$0xff] }
0x119a   : > { %v8920_v16 = vmul.f32 %v11198_v58, %v8849_v32  ;;  %9269 = vmatpush.bf16.msra.mxu2 %v10325_v53  ;;  %vm8926_vm13 = vweird.f32 %v11198_v58 }
0x119b   : > { %11199 = vrsqrt.f32 %v8850_v30  ;;  %v8776_v54 = vmul.f32 %v16218_v33, %v16218_v33  ;;  %vm8927_vm15 = vmor %vm8925_vm14, %vm8926_vm13  ;;  %vm8935_vm6 = vweird.f32 %v8850_v30 }
0x119c   : > { %v8921_v51 = vmul.f32 %v11198_v58, %v8920_v16 }
0x119d   : > { %v8818_v40 = vsel %vm701_vm0, %v8776_v54, 0.0 }
0x119e   : > { %v8922_v55 = vmul.f32 0.5, %v8921_v51  ;;  %v8805_v4 = vpop.xlane.xlu2 %8804  ;;  %8819 = vadd.xlane.f32.xlu1 %v8818_v40  ;;  %v8727_v20 = vpop.xlane.xlu0 %8726  ;;  %v16261_v40 = vld [vmem:[%s16703_s13 + $0x1] ss:$0 sm:$0xff] }
0x119f   : > { %v8835_v38 = vmul.f32 %v8805_v4, %v17079_v7  ;;  %v8745_v48 = vmul.f32 %v8727_v20, %v17079_v7 }
0x11a0   : > { %v8923_v6 = vsub.f32 1.5, %v8922_v55 }
0x11a1   : > { %v11200_v19 = vpop.eup %11199  ;;  %v8851_v17 = vadd.f32 1e-05, %v8835_v38  ;;  %v16232_v36 = vsub.f32 %v16110_v41, %v8745_v48 }
0x11a2   : > { %v8924_v2 = vmul.f32 %v11198_v58, %v8923_v6  ;;  %v8930_v44 = vmul.f32 %v11200_v19, %v8850_v30  ;;  %vm8936_vm4 = vweird.f32 %v11200_v19 }
0x11a3   : > { %11201 = vrsqrt.f32 %v8851_v17  ;;  %v8777_v21 = vmul.f32 %v16232_v36, %v16232_v36  ;;  %vm8937_vm7 = vmor %vm8935_vm6, %vm8936_vm4  ;;  %vm8945_vm9 = vweird.f32 %v8851_v17 }
0x11a4   : > { %v8931_v13 = vmul.f32 %v11200_v19, %v8930_v44  ;;  %v8928_v11 = vsel %vm8927_vm15, %v11198_v58, %v8924_v2 }
0x11a5   : > { %v8821_v45 = vsel %vm701_vm0, %v8777_v21, 0.0  ;;  %v9025_v0 = vmul.f32 %v8928_v11, %v16084_v31 }
0x11a6   : > { %v8932_v8 = vmul.f32 0.5, %v8931_v13  ;;  %v8808_v52 = vpop.xlane.xlu1 %8807  ;;  %v8730_v62 = vpop.xlane.xlu2 %8729  ;;  %8822 = vadd.xlane.f32.xlu0 %v8821_v45 }
0x11a7   : > { %v8836_v41 = vmul.f32 %v8808_v52, %v17079_v7  ;;  %v8746_v63 = vmul.f32 %v8730_v62, %v17079_v7  ;;  %v9044_v31 = vmul.f32 %v16122_v12, %v9025_v0 }
0x11a8   : > { %v8933_v25 = vsub.f32 1.5, %v8932_v8 }
0x11a9   : > { %v11202_v50 = vpop.eup %11201  ;;  %v8852_v61 = vadd.f32 1e-05, %v8836_v41  ;;  %v16241_v34 = vsub.f32 %v16131_v56, %v8746_v63  ;;  %v16251_v58 = vadd.f32 %v16136_v37, %v9044_v31 }
0x11aa   : > { %v8934_v14 = vmul.f32 %v11200_v19, %v8933_v25  ;;  %v8940_v42 = vmul.f32 %v11202_v50, %v8851_v17  ;;  %vm8946_vm8 = vweird.f32 %v11202_v50 }
0x11ab   : > { %11203 = vrsqrt.f32 %v8852_v61  ;;  %v8778_v24 = vmul.f32 %v16241_v34, %v16241_v34  ;;  %vm8947_vm10 = vmor %vm8945_vm9, %vm8946_vm8  ;;  %vm8955_vm1 = vweird.f32 %v8852_v61 }
0x11ac   : > { %v8938_v27 = vsel %vm8937_vm7, %v11200_v19, %v8934_v14  ;;  %v8941_v43 = vmul.f32 %v11202_v50, %v8940_v42 }
0x11ad   : > { %v9026_v46 = vmul.f32 %v8938_v27, %v16096_v10  ;;  %v8824_v32 = vsel %vm701_vm0, %v8778_v24, 0.0 }
0x11ae   : > { %v8942_v1 = vmul.f32 0.5, %v8941_v43  ;;  %v8811_v39 = vpop.xlane.xlu1 %8810  ;;  %8825 = vadd.xlane.f32.xlu2 %v8824_v32 }
0x11af   : > { %v8837_v56 = vmul.f32 %v8811_v39, %v17079_v7  ;;  %v9045_v15 = vmul.f32 %v16122_v12, %v9026_v46 }
0x11b0   : > { %v8943_v35 = vsub.f32 1.5, %v8942_v1 }
0x11b1   : > { %v11204_v9 = vpop.eup %11203  ;;  %v8853_v29 = vadd.f32 1e-05, %v8837_v56  ;;  %v16254_v30 = vadd.f32 %v16136_v37, %v9045_v15 }
0x11b2   : > { %v8944_v10 = vmul.f32 %v11202_v50, %v8943_v35  ;;  %v8950_v16 = vmul.f32 %v11204_v9, %v8852_v61  ;;  %v9136_v18 = vpop.f32.mrf.mxu1  ;;  %vm8956_vm11 = vweird.f32 %v11204_v9 }
0x11b3   : > { %11205 = vrsqrt.f32 %v8853_v29  ;;  %v9076_v54 = vpack.c.bf16 %v16254_v30, %v16251_v58  ;;  %v9137_v19 = vadd.f32 %v16261_v40, %v9136_v18  ;;  %vm8957_vm2 = vmor %vm8955_vm1, %vm8956_vm11  ;;  %vm8965_vm12 = vweird.f32 %v8853_v29 }
0x11b4   : > { %v8951_v51 = vmul.f32 %v11204_v9, %v8950_v16  ;;  %v8948_v55 = vsel %vm8947_vm10, %v11202_v50, %v8944_v10 }
0x11b5   : > { %10241 = vmatmul.msk.bf16.gmra.mxu1 %vm701_vm0, %v9076_v54  ;;  %v9027_v6 = vmul.f32 %v8948_v55, %v16113_v57  ;;  %v9176_v52 = vmax.f32 %v9137_v19, 0.0 }
0x11b6   : > { %v8952_v4 = vmul.f32 0.5, %v8951_v51  ;;  %v8814_v20 = vpop.xlane.xlu0 %8813 }
0x11b7   : > { %v8838_v53 = vmul.f32 %v8814_v20, %v17079_v7  ;;  %v9046_v41 = vmul.f32 %v16122_v12, %v9027_v6 }
0x11b8   : > { %v8953_v38 = vsub.f32 1.5, %v8952_v4 }
0x11b9   : > { %v11206_v48 = vpop.eup %11205  ;;  %v8854_v17 = vadd.f32 1e-05, %v8838_v53  ;;  %v16273_v61 = vadd.f32 %v16136_v37, %v9046_v41 }
0x11ba   : > { %v8954_v2 = vmul.f32 %v11204_v9, %v8953_v38  ;;  %v8960_v44 = vmul.f32 %v11206_v48, %v8853_v29  ;;  %v9138_v21 = vpop.f32.mrf.mxu1  ;;  %vm8966_vm3 = vweird.f32 %v11206_v48 }
0x11bb   : > { %11207 = vrsqrt.f32 %v8854_v17  ;;  %v9139_v13 = vadd.f32 %v16261_v40, %v9138_v21  ;;  %vm8967_vm13 = vmor %vm8965_vm12, %vm8966_vm3  ;;  %vm8975_vm15 = vweird.f32 %v8854_v17 }
0x11bc   : > { %v8958_v45 = vsel %vm8957_vm2, %v11204_v9, %v8954_v2  ;;  %v8961_v11 = vmul.f32 %v11206_v48, %v8960_v44 }
0x11bd   : > { %v9028_v8 = vmul.f32 %v8958_v45, %v16141_v59  ;;  %v9177_v62 = vmax.f32 %v9139_v13, 0.0 }
0x11be   : > { %v8962_v57 = vmul.f32 0.5, %v8961_v11 }
0x11bf   : > { %v9192_v63 = vpack.c.bf16 %v9177_v62, %v9176_v52  ;;  %v9047_v25 = vmul.f32 %v16122_v12, %v9028_v8 }
0x11c0   : > { %v8963_v50 = vsub.f32 1.5, %v8962_v57 }
0x11c1   : > { %v11208_v0 = vpop.eup %11207  ;;  %10271 = vmatmul.msk.bf16.vlgmr.msra.gmra.mxu2 %vm4713_vm5, %v9192_v63  ;;  %v16276_v14 = vadd.f32 %v16136_v37, %v9047_v25 }
0x11c2   : > { %v8964_v42 = vmul.f32 %v11206_v48, %v8963_v50  ;;  %v8970_v59 = vmul.f32 %v11208_v0, %v8854_v17  ;;  %v9141_v24 = vpop.f32.mrf.mxu1  ;;  %vm8976_vm14 = vweird.f32 %v11208_v0  ;;  %v8817_v17 = vpop.xlane.xlu2 %8816 }
0x11c3   : > { %v9077_v27 = vpack.c.bf16 %v16276_v14, %v16273_v61  ;;  %v9142_v39 = vadd.f32 %v16261_v40, %v9141_v24  ;;  %vm8977_vm4 = vmor %vm8975_vm15, %vm8976_vm14  ;;  %v8839_v2 = vmul.f32 %v8817_v17, %v17079_v7 }
0x11c4   : > { %v8971_v43 = vmul.f32 %v11208_v0, %v8970_v59  ;;  %v8968_v46 = vsel %vm8967_vm13, %v11206_v48, %v8964_v42 }
0x11c5   : > { %10242 = vmatmul.msk.bf16.gmra.mxu1 %vm701_vm0, %v9077_v27  ;;  %v9029_v1 = vmul.f32 %v8968_v46, %v16162_v28  ;;  %v9178_v10 = vmax.f32 %v9142_v39, 0.0  ;;  %v8855_v44 = vadd.f32 1e-05, %v8839_v2 }
0x11c6   : > { %v8972_v32 = vmul.f32 0.5, %v8971_v43 }
0x11c7   : > { %v9048_v18 = vmul.f32 %v16122_v12, %v9029_v1  ;;  %11209 = vrsqrt.f32 %v8855_v44  ;;  %vm8985_vm7 = vweird.f32 %v8855_v44 }
0x11c8   : > { %v8973_v31 = vsub.f32 1.5, %v8972_v32 }
0x11c9   : > { %v16289_v28 = vadd.f32 %v16136_v37, %v9048_v18 }
0x11ca   : > { %v8974_v56 = vmul.f32 %v11208_v0, %v8973_v31  ;;  %v9143_v15 = vpop.f32.mrf.mxu1 }
0x11cb   : > { %v9144_v35 = vadd.f32 %v16261_v40, %v9143_v15 }
0x11cc   : > { %v8978_v9 = vsel %vm8977_vm4, %v11208_v0, %v8974_v56 }
0x11cd   : > { %v9030_v29 = vmul.f32 %v8978_v9, %v16173_v60  ;;  %v9179_v16 = vmax.f32 %v9144_v35, 0.0  ;;  %v11210_v21 = vpop.eup %11209 }
0x11ce   : > { %v8980_v13 = vmul.f32 %v11210_v21, %v8855_v44  ;;  %vm8986_vm6 = vweird.f32 %v11210_v21 }
0x11cf   : > { %v9193_v54 = vpack.c.bf16 %v9179_v16, %v9178_v10  ;;  %v9049_v51 = vmul.f32 %v16122_v12, %v9030_v29  ;;  %vm8987_vm8 = vmor %vm8985_vm7, %vm8986_vm6 }
0x11d0   : > { %v8981_v45 = vmul.f32 %v11210_v21, %v8980_v13 }
0x11d1   : > { %10272 = vmatmul.msk.bf16.gmra.mxu2 %vm4713_vm5, %v9193_v54  ;;  %v16292_v55 = vadd.f32 %v16136_v37, %v9049_v51 }
0x11d2   : > { %v8982_v62 = vmul.f32 0.5, %v8981_v45 }
0x11d3   : > { %v9078_v4 = vpack.c.bf16 %v16292_v55, %v16289_v28 }
0x11d4   : > { %v8983_v41 = vsub.f32 1.5, %v8982_v62 }
0x11d5   : > { %10243 = vmatmul.msk.bf16.gmra.mxu1 %vm701_vm0, %v9078_v4 }
0x11d6   : > { %v8984_v0 = vmul.f32 %v11210_v21, %v8983_v41 }
0x11d7   : > { %v9146_v60 = vpop.f32.mrf.mxu1 }
0x11d8   : > { %v9147_v20 = vadd.f32 %v16261_v40, %v9146_v60  ;;  %v8988_v24 = vsel %vm8987_vm8, %v11210_v21, %v8984_v0 }
0x11d9   : > { %v9031_v1 = vmul.f32 %v8988_v24, %v16190_v23 }
0x11da   : > { %v9180_v48 = vmax.f32 %v9147_v20, 0.0 }
0x11db   : > { %v9050_v10 = vmul.f32 %v16122_v12, %v9031_v1 }
0x11dd   : > { %v16309_v4 = vadd.f32 %v16136_v37, %v9050_v10 }
0x11df   : > { %v9148_v53 = vpop.f32.mrf.mxu1 }
0x11e0   : > { %v9149_v38 = vadd.f32 %v16261_v40, %v9148_v53 }
0x11e2   : > { %v9181_v6 = vmax.f32 %v9149_v38, 0.0 }
0x11e4   : > { %v9194_v19 = vpack.c.bf16 %v9181_v6, %v9180_v48 }
0x11e6   : > { %10273 = vmatmul.msk.bf16.gmra.mxu2 %vm4713_vm5, %v9194_v19 }
0x1211   : > { %v8820_v11 = vpop.xlane.xlu1 %8819 }
0x1212   : > { %v8840_v8 = vmul.f32 %v8820_v11, %v17079_v7 }
0x1214   : > { %v8856_v52 = vadd.f32 1e-05, %v8840_v8 }
0x1216   : > { %11211 = vrsqrt.f32 %v8856_v52  ;;  %vm8995_vm10 = vweird.f32 %v8856_v52 }
0x1219   : > { %v8823_v57 = vpop.xlane.xlu0 %8822 }
0x121a   : > { %v8841_v63 = vmul.f32 %v8823_v57, %v17079_v7 }
0x121c   : > { %v11212_v25 = vpop.eup %11211  ;;  %v8857_v50 = vadd.f32 1e-05, %v8841_v63 }
0x121d   : > { %v8990_v42 = vmul.f32 %v11212_v25, %v8856_v52  ;;  %vm8996_vm9 = vweird.f32 %v11212_v25 }
0x121e   : > { %11213 = vrsqrt.f32 %v8857_v50  ;;  %vm8997_vm11 = vmor %vm8995_vm10, %vm8996_vm9  ;;  %vm9005_vm2 = vweird.f32 %v8857_v50 }
0x121f   : > { %v8991_v59 = vmul.f32 %v11212_v25, %v8990_v42 }
0x1221   : > { %v8992_v27 = vmul.f32 0.5, %v8991_v59  ;;  %v8826_v43 = vpop.xlane.xlu2 %8825 }
0x1222   : > { %v8842_v46 = vmul.f32 %v8826_v43, %v17079_v7 }
0x1223   : > { %v8993_v32 = vsub.f32 1.5, %v8992_v27 }
0x1224   : > { %v11214_v31 = vpop.eup %11213  ;;  %v8858_v39 = vadd.f32 1e-05, %v8842_v46 }
0x1225   : > { %v8994_v56 = vmul.f32 %v11212_v25, %v8993_v32  ;;  %v9000_v15 = vmul.f32 %v11214_v31, %v8857_v50  ;;  %vm9006_vm1 = vweird.f32 %v11214_v31 }
0x1226   : > { %11215 = vrsqrt.f32 %v8858_v39  ;;  %vm9007_vm3 = vmor %vm9005_vm2, %vm9006_vm1  ;;  %vm9015_vm13 = vweird.f32 %v8858_v39 }
0x1227   : > { %v8998_v35 = vsel %vm8997_vm11, %v11212_v25, %v8994_v56  ;;  %v9001_v9 = vmul.f32 %v11214_v31, %v9000_v15 }
0x1228   : > { %v9032_v29 = vmul.f32 %v8998_v35, %v16218_v33 }
0x1229   : > { %v9002_v16 = vmul.f32 0.5, %v9001_v9 }
0x122a   : > { %v9051_v18 = vmul.f32 %v16122_v12, %v9032_v29 }
0x122b   : > { %v9003_v54 = vsub.f32 1.5, %v9002_v16 }
0x122c   : > { %v11216_v51 = vpop.eup %11215  ;;  %v16312_v23 = vadd.f32 %v16136_v37, %v9051_v18 }
0x122d   : > { %v9004_v60 = vmul.f32 %v11214_v31, %v9003_v54  ;;  %v9010_v20 = vmul.f32 %v11216_v51, %v8858_v39  ;;  %vm9016_vm12 = vweird.f32 %v11216_v51 }
0x122e   : > { %v9079_v53 = vpack.c.bf16 %v16312_v23, %v16309_v4  ;;  %vm9017_vm14 = vmor %vm9015_vm13, %vm9016_vm12 }
0x122f   : > { %v9011_v33 = vmul.f32 %v11216_v51, %v9010_v20  ;;  %v9008_v38 = vsel %vm9007_vm3, %v11214_v31, %v9004_v60 }
0x1230   : > { %10244 = vmatmul.msk.bf16.gmra.mxu1 %vm701_vm0, %v9079_v53  ;;  %v9033_v17 = vmul.f32 %v9008_v38, %v16232_v36 }
0x1231   : > { %v9012_v48 = vmul.f32 0.5, %v9011_v33 }
0x1232   : > { %v9151_v6 = vpop.f32.mrf.mxu1  ;;  %v9052_v13 = vmul.f32 %v16122_v12, %v9033_v17 }
0x1233   : > { %v9013_v19 = vsub.f32 1.5, %v9012_v48  ;;  %v9152_v45 = vadd.f32 %v16261_v40, %v9151_v6 }
0x1234   : > { %v16324_v62 = vadd.f32 %v16136_v37, %v9052_v13 }
0x1235   : > { %v9014_v2 = vmul.f32 %v11216_v51, %v9013_v19  ;;  %v9182_v41 = vmax.f32 %v9152_v45, 0.0 }
0x1237   : > { %v9018_v44 = vsel %vm9017_vm14, %v11216_v51, %v9014_v2 }
0x1238   : > { %v9034_v21 = vmul.f32 %v9018_v44, %v16241_v34 }
0x123a   : > { %v9153_v11 = vpop.f32.mrf.mxu1  ;;  %v9053_v8 = vmul.f32 %v16122_v12, %v9034_v21  ;;  %v16336_v12 = vld [vmem:[%s16705_s15 + $0x1] ss:$0 sm:$0xff] }
0x123b   : > { %v9154_v52 = vadd.f32 %v16261_v40, %v9153_v11 }
0x123c   : > { %v16327_v36 = vadd.f32 %v16136_v37, %v9053_v8 }
0x123d   : > { %v9183_v57 = vmax.f32 %v9154_v52, 0.0 }
0x123e   : > { %v9080_v34 = vpack.c.bf16 %v16327_v36, %v16324_v62 }
0x123f   : > { %v9195_v63 = vpack.c.bf16 %v9183_v57, %v9182_v41 }
0x1240   : > { %10245 = vmatmul.msk.bf16.gmra.mxu1 %vm701_vm0, %v9080_v34 }
0x1241   : > { %10274 = vmatmul.msk.bf16.gmra.mxu2 %vm4713_vm5, %v9195_v63 }
0x1242   : > { %v9156_v25 = vpop.f32.mrf.mxu1 }
0x1243   : > { %v9157_v42 = vadd.f32 %v16261_v40, %v9156_v25 }
0x1244   : > { %v9271_v50 = vpop.f32.mrf.mxu2 }
0x1245   : > { %v9272_v37 = vadd.f32 %v16336_v12, %v9271_v50  ;;  %v9184_v46 = vmax.f32 %v9157_v42, 0.0 }
0x1247   : > { %v9311_v0 = vadd.f32 %v9272_v37, %v16147_v47 }
0x1249   : > { %v9331_v59 = vsel %vm701_vm0, %v9311_v0, 0.0 }
0x124a   : > { %9332 = vadd.xlane.f32.xlu1 %v9331_v59  ;;  %v9158_v24 = vpop.f32.mrf.mxu1 }
0x124b   : > { %v9159_v27 = vadd.f32 %v16261_v40, %v9158_v24 }
0x124c   : > { %v9273_v43 = vpop.f32.mrf.mxu2 }
0x124d   : > { %v9185_v32 = vmax.f32 %v9159_v27, 0.0  ;;  %v9274_v31 = vadd.f32 %v16336_v12, %v9273_v43 }
0x124f   : > { %v9196_v1 = vpack.c.bf16 %v9185_v32, %v9184_v46  ;;  %v9312_v39 = vadd.f32 %v9274_v31, %v16150_v26 }
0x1251   : > { %10275 = vmatmul.msk.bf16.gmra.mxu2 %vm4713_vm5, %v9196_v1  ;;  %v9334_v47 = vsel %vm701_vm0, %v9312_v39, 0.0 }
0x1252   : > { %9335 = vadd.xlane.f32.xlu0 %v9334_v47  ;;  %v9161_v56 = vpop.f32.mrf.mxu1 }
0x1253   : > { %v9162_v29 = vadd.f32 %v16261_v40, %v9161_v56 }
0x1254   : > { %v9276_v15 = vpop.f32.mrf.mxu2 }
0x1255   : > { %v9277_v35 = vadd.f32 %v16336_v12, %v9276_v15  ;;  %v9186_v54 = vmax.f32 %v9162_v29, 0.0 }
0x1257   : > { %v16349_v9 = vadd.f32 %v9277_v35, %v16179_v5 }
0x1259   : > { %v9337_v10 = vsel %vm701_vm0, %v16349_v9, 0.0 }
0x125a   : > { %9338 = vadd.xlane.f32.xlu2 %v9337_v10  ;;  %v9163_v16 = vpop.f32.mrf.mxu1 }
0x125b   : > { %v9164_v26 = vadd.f32 %v16261_v40, %v9163_v16 }
0x125c   : > { %v9278_v18 = vpop.f32.mrf.mxu2 }
0x125d   : > { %v9187_v51 = vmax.f32 %v9164_v26, 0.0  ;;  %v9279_v60 = vadd.f32 %v16336_v12, %v9278_v18 }
0x125f   : > { %v9197_v20 = vpack.c.bf16 %v9187_v51, %v9186_v54  ;;  %v16357_v53 = vadd.f32 %v9279_v60, %v16182_v49 }
0x1261   : > { %v9340_v5 = vsel %vm701_vm0, %v16357_v53, 0.0  ;;  %10276 = vmatmul.msk.bf16.gmra.mxu2 %vm4713_vm5, %v9197_v20 }
0x1262   : > { %9341 = vadd.xlane.f32.xlu1 %v9340_v5 }
0x1269   : > { %v9281_v33 = vpop.f32.mrf.mxu2 }
0x126a   : > { %v9282_v38 = vadd.f32 %v16336_v12, %v9281_v33 }
0x126c   : > { %v16364_v48 = vadd.f32 %v9282_v38, %v16200_v22 }
0x126e   : > { %v9343_v6 = vsel %vm701_vm0, %v16364_v48, 0.0 }
0x126f   : > { %9344 = vadd.xlane.f32.xlu0 %v9343_v6 }
0x1271   : > { %v9283_v19 = vpop.f32.mrf.mxu2 }
0x1272   : > { %v9284_v49 = vadd.f32 %v16336_v12, %v9283_v19 }
0x1274   : > { %v16370_v17 = vadd.f32 %v9284_v49, %v16203_v3 }
0x1276   : > { %v9346_v2 = vsel %vm701_vm0, %v16370_v17, 0.0 }
0x1277   : > { %9347 = vadd.xlane.f32.xlu2 %v9346_v2 }
0x12ad   : > { %v9166_v44 = vpop.f32.mrf.mxu1 }
0x12ae   : > { %v9167_v21 = vadd.f32 %v16261_v40, %v9166_v44 }
0x12b0   : > { %v9188_v45 = vmax.f32 %v9167_v21, 0.0 }
0x12b5   : > { %v9168_v13 = vpop.f32.mrf.mxu1 }
0x12b6   : > { %v9169_v22 = vadd.f32 %v16261_v40, %v9168_v13 }
0x12b8   : > { %v9189_v11 = vmax.f32 %v9169_v22, 0.0 }
0x12ba   : > { %v9198_v8 = vpack.c.bf16 %v9189_v11, %v9188_v45 }
0x12bc   : > { %10277 = vmatmul.msk.bf16.gmra.mxu2 %vm4713_vm5, %v9198_v8 }
0x12bd   : > { %v9333_v52 = vpop.xlane.xlu1 %9332  ;;  %v9171_v41 = vpop.f32.mrf.mxu1 }
0x12be   : > { %v9379_v3 = vmul.f32 %v9333_v52, %v17079_v7  ;;  %v9172_v63 = vadd.f32 %v16261_v40, %v9171_v41 }
0x12c0   : > { %v16378_v57 = vsub.f32 %v9311_v0, %v9379_v3  ;;  %v9190_v43 = vmax.f32 %v9172_v63, 0.0 }
0x12c2   : > { %v9411_v34 = vmul.f32 %v16378_v57, %v16378_v57 }
0x12c4   : > { %v9286_v25 = vpop.f32.mrf.mxu2  ;;  %v9427_v50 = vsel %vm701_vm0, %v9411_v34, 0.0 }
0x12c5   : > { %v9287_v37 = vadd.f32 %v16336_v12, %v9286_v25  ;;  %9428 = vadd.xlane.f32.xlu1 %v9427_v50  ;;  %v9336_v42 = vpop.xlane.xlu0 %9335  ;;  %v9173_v59 = vpop.f32.mrf.mxu1 }
0x12c6   : > { %v9380_v24 = vmul.f32 %v9336_v42, %v17079_v7  ;;  %v9174_v27 = vadd.f32 %v16261_v40, %v9173_v59 }
0x12c7   : > { %v16388_v0 = vadd.f32 %v9287_v37, %v16251_v58  ;;  %v10329_v37 = vld [vmem:[%s16708_s18] sm:$0xff] }
0x12c8   : > { %v16390_v46 = vsub.f32 %v9312_v39, %v9380_v24  ;;  %v9191_v32 = vmax.f32 %v9174_v27, 0.0 }
0x12c9   : > { %v9349_v31 = vsel %vm701_vm0, %v16388_v0, 0.0 }
0x12ca   : > { %v9199_v1 = vpack.c.bf16 %v9191_v32, %v9190_v43  ;;  %9350 = vadd.xlane.f32.xlu2 %v9349_v31  ;;  %v9412_v47 = vmul.f32 %v16390_v46, %v16390_v46 }
0x12cc   : > { %v9288_v56 = vpop.f32.mrf.mxu2  ;;  %10278 = vmatmul.msk.bf16.gmra.mxu2 %vm4713_vm5, %v9199_v1  ;;  %v9430_v40 = vsel %vm701_vm0, %v9412_v47, 0.0 }
0x12cd   : > { %v9339_v15 = vpop.xlane.xlu2 %9338  ;;  %v9289_v58 = vadd.f32 %v16336_v12, %v9288_v56  ;;  %9431 = vadd.xlane.f32.xlu0 %v9430_v40 }
0x12ce   : > { %v9381_v39 = vmul.f32 %v9339_v15, %v17079_v7 }
0x12cf   : > { %v16401_v35 = vadd.f32 %v9289_v58, %v16254_v30 }
0x12d0   : > { %v16404_v29 = vsub.f32 %v16349_v9, %v9381_v39 }
0x12d1   : > { %v9352_v10 = vsel %vm701_vm0, %v16401_v35, 0.0 }
0x12d2   : > { %9353 = vadd.xlane.f32.xlu1 %v9352_v10  ;;  %v9413_v16 = vmul.f32 %v16404_v29, %v16404_v29 }
0x12d4   : > { %v9291_v26 = vpop.f32.mrf.mxu2  ;;  %v9433_v18 = vsel %vm701_vm0, %v9413_v16, 0.0 }
0x12d5   : > { %v9292_v54 = vadd.f32 %v16336_v12, %v9291_v26  ;;  %v9342_v51 = vpop.xlane.xlu1 %9341  ;;  %9434 = vadd.xlane.f32.xlu0 %v9433_v18 }
0x12d6   : > { %v9382_v30 = vmul.f32 %v9342_v51, %v17079_v7 }
0x12d7   : > { %v16414_v60 = vadd.f32 %v9292_v54, %v16273_v61 }
0x12d8   : > { %v16417_v9 = vsub.f32 %v16357_v53, %v9382_v30 }
0x12d9   : > { %v9355_v20 = vsel %vm701_vm0, %v16414_v60, 0.0 }
0x12da   : > { %9356 = vadd.xlane.f32.xlu1 %v9355_v20  ;;  %v9414_v5 = vmul.f32 %v16417_v9, %v16417_v9 }
0x12dc   : > { %v9293_v33 = vpop.f32.mrf.mxu2  ;;  %v9436_v38 = vsel %vm701_vm0, %v9414_v5, 0.0 }
0x12dd   : > { %v9294_v6 = vadd.f32 %v16336_v12, %v9293_v33  ;;  %9437 = vadd.xlane.f32.xlu2 %v9436_v38 }
0x12df   : > { %v16426_v19 = vadd.f32 %v9294_v6, %v16276_v14 }
0x12e1   : > { %v9358_v61 = vsel %vm701_vm0, %v16426_v19, 0.0 }
0x12e2   : > { %9359 = vadd.xlane.f32.xlu0 %v9358_v61  ;;  %v9345_v53 = vpop.xlane.xlu0 %9344 }
0x12e3   : > { %v9383_v49 = vmul.f32 %v9345_v53, %v17079_v7 }
0x12e4   : > { %v9296_v2 = vpop.f32.mrf.mxu2 }
0x12e5   : > { %v16432_v44 = vsub.f32 %v16364_v48, %v9383_v49  ;;  %v9297_v21 = vadd.f32 %v16336_v12, %v9296_v2 }
0x12e7   : > { %v16436_v13 = vadd.f32 %v9297_v21, %v16289_v28  ;;  %v9415_v14 = vmul.f32 %v16432_v44, %v16432_v44 }
0x12e9   : > { %v9361_v22 = vsel %vm701_vm0, %v16436_v13, 0.0  ;;  %v9439_v45 = vsel %vm701_vm0, %v9415_v14, 0.0 }
0x12ea   : > { %v9348_v11 = vpop.xlane.xlu2 %9347  ;;  %9362 = vadd.xlane.f32.xlu0 %v9361_v22  ;;  %9440 = vadd.xlane.f32.xlu2 %v9439_v45 }
0x12eb   : > { %v9384_v8 = vmul.f32 %v9348_v11, %v17079_v7 }
0x12ec   : > { %v9298_v48 = vpop.f32.mrf.mxu2 }
0x12ed   : > { %v16445_v52 = vsub.f32 %v16370_v17, %v9384_v8  ;;  %v9299_v28 = vadd.f32 %v16336_v12, %v9298_v48  ;;  %v10330_v17 = vld [vmem:[%s16708_s18 + $0x8] sm:$0xff] }
0x12ee   : > { %9779 = vmatpush.bf16.msrb.mxu3 %v10330_v17  ;;  %v16508_v17 = vld [vmem:[%s16706_s16 + $0x1] ss:$0 sm:$0xff] }
0x12ef   : > { %v16449_v41 = vadd.f32 %v9299_v28, %v16292_v55  ;;  %v9416_v3 = vmul.f32 %v16445_v52, %v16445_v52 }
0x12f1   : > { %v9442_v34 = vsel %vm701_vm0, %v9416_v3, 0.0  ;;  %v9364_v63 = vsel %vm701_vm0, %v16449_v41, 0.0 }
0x12f2   : > { %9443 = vadd.xlane.f32.xlu1 %v9442_v34  ;;  %9365 = vadd.xlane.f32.xlu2 %v9364_v63 }
0x12f3   : > { %9780 = vmatpush.bf16.msrb.mxu3 %v10329_v37 }
0x1338   : > { %v9429_v25 = vpop.xlane.xlu1 %9428 }
0x1339   : > { %v9475_v50 = vmul.f32 %v9429_v25, %v17079_v7 }
0x133b   : > { %v9491_v55 = vadd.f32 1e-05, %v9475_v50 }
0x133d   : > { %11217 = vrsqrt.f32 %v9491_v55  ;;  %v9351_v42 = vpop.xlane.xlu2 %9350  ;;  %vm9513_vm15 = vweird.f32 %v9491_v55 }
0x133e   : > { %v9385_v59 = vmul.f32 %v9351_v42, %v17079_v7 }
0x133f   : > { %v9301_v24 = vpop.f32.mrf.mxu2 }
0x1340   : > { %v16465_v27 = vsub.f32 %v16388_v0, %v9385_v59  ;;  %v9302_v43 = vadd.f32 %v16336_v12, %v9301_v24  ;;  %v9432_v32 = vpop.xlane.xlu0 %9431 }
0x1341   : > { %v9476_v31 = vmul.f32 %v9432_v32, %v17079_v7 }
0x1342   : > { %v16470_v1 = vadd.f32 %v9302_v43, %v16309_v4  ;;  %v9417_v47 = vmul.f32 %v16465_v27, %v16465_v27 }
0x1343   : > { %v11218_v56 = vpop.eup %11217  ;;  %v9492_v40 = vadd.f32 1e-05, %v9476_v31 }
0x1344   : > { %v9508_v15 = vmul.f32 %v11218_v56, %v9491_v55  ;;  %v9445_v58 = vsel %vm701_vm0, %v9417_v47, 0.0  ;;  %v9367_v0 = vsel %vm701_vm0, %v16470_v1, 0.0  ;;  %vm9514_vm5 = vweird.f32 %v11218_v56 }
0x1345   : > { %11219 = vrsqrt.f32 %v9492_v40  ;;  %9446 = vadd.xlane.f32.xlu1 %v9445_v58  ;;  %v9354_v39 = vpop.xlane.xlu1 %9353  ;;  %9368 = vadd.xlane.f32.xlu2 %v9367_v0  ;;  %vm9515_vm4 = vmor %vm9513_vm15, %vm9514_vm5  ;;  %vm9523_vm7 = vweird.f32 %v9492_v40 }
0x1346   : > { %v9509_v10 = vmul.f32 %v11218_v56, %v9508_v15  ;;  %v9386_v16 = vmul.f32 %v9354_v39, %v17079_v7 }
0x1347   : > { %v9303_v4 = vpop.f32.mrf.mxu2 }
0x1348   : > { %v9510_v26 = vmul.f32 0.5, %v9509_v10  ;;  %v16479_v18 = vsub.f32 %v16401_v35, %v9386_v16  ;;  %v9304_v54 = vadd.f32 %v16336_v12, %v9303_v4  ;;  %v9435_v51 = vpop.xlane.xlu0 %9434 }
0x1349   : > { %v9477_v30 = vmul.f32 %v9435_v51, %v17079_v7 }
0x134a   : > { %v9511_v20 = vsub.f32 1.5, %v9510_v26  ;;  %v16484_v5 = vadd.f32 %v9304_v54, %v16312_v23  ;;  %v9418_v33 = vmul.f32 %v16479_v18, %v16479_v18 }
0x134b   : > { %v11220_v38 = vpop.eup %11219  ;;  %v16488_v6 = vadd.f32 1e-05, %v9477_v30 }
0x134c   : > { %v9512_v61 = vmul.f32 %v11218_v56, %v9511_v20  ;;  %v9518_v53 = vmul.f32 %v11220_v38, %v9492_v40  ;;  %v9370_v35 = vsel %vm701_vm0, %v16484_v5, 0.0  ;;  %v9448_v2 = vsel %vm701_vm0, %v9418_v33, 0.0 }
0x134d   : > { %11221 = vrsqrt.f32 %v16488_v6  ;;  %v9357_v49 = vpop.xlane.xlu1 %9356  ;;  %9371 = vadd.xlane.f32.xlu1 %v9370_v35  ;;  %9449 = vadd.xlane.f32.xlu0 %v9448_v2  ;;  %vm9524_vm6 = vweird.f32 %v11220_v38  ;;  %vm9533_vm10 = vweird.f32 %v16488_v6 }
0x134e   : > { %v9519_v23 = vmul.f32 %v11220_v38, %v9518_v53  ;;  %v9387_v21 = vmul.f32 %v9357_v49, %v17079_v7  ;;  %v9516_v22 = vsel %vm9515_vm4, %v11218_v56, %v9512_v61  ;;  %vm9525_vm8 = vmor %vm9523_vm7, %vm9524_vm6 }
0x134f   : > { %v9306_v14 = vpop.f32.mrf.mxu2 }
0x1350   : > { %v9520_v45 = vmul.f32 0.5, %v9519_v23  ;;  %v16496_v11 = vsub.f32 %v16414_v60, %v9387_v21  ;;  %v9438_v8 = vpop.xlane.xlu2 %9437  ;;  %v9307_v48 = vadd.f32 %v16336_v12, %v9306_v14  ;;  %v9667_v60 = vmul.f32 %v9516_v22, %v16378_v57  ;;  %v16519_v57 = vld [vmem:[%s16707_s17 + $0x1] ss:$0 sm:$0xff] }
0x1351   : > { %v9478_v28 = vmul.f32 %v9438_v8, %v17079_v7 }
0x1352   : > { %v9521_v3 = vsub.f32 1.5, %v9520_v45  ;;  %v16501_v34 = vadd.f32 %v9307_v48, %v16324_v62  ;;  %v9419_v63 = vmul.f32 %v16496_v11, %v16496_v11  ;;  %v9686_v31 = vmul.f32 %v16508_v17, %v9667_v60 }
0x1353   : > { %v11222_v25 = vpop.eup %11221  ;;  %v9494_v50 = vadd.f32 1e-05, %v9478_v28 }
0x1354   : > { %v9522_v55 = vmul.f32 %v11220_v38, %v9521_v3  ;;  %v9528_v37 = vmul.f32 %v11222_v25, %v16488_v6  ;;  %v9373_v62 = vsel %vm701_vm0, %v16501_v34, 0.0  ;;  %v9451_v42 = vsel %vm701_vm0, %v9419_v63, 0.0 }
0x1355   : > { %11223 = vrsqrt.f32 %v9494_v50  ;;  %9374 = vadd.xlane.f32.xlu1 %v9373_v62  ;;  %v9360_v59 = vpop.xlane.xlu0 %9359  ;;  %9452 = vadd.xlane.f32.xlu0 %v9451_v42  ;;  %v9705_v26 = vadd.f32 %v16519_v57, %v9686_v31  ;;  %vm9534_vm9 = vweird.f32 %v11222_v25  ;;  %vm9543_vm2 = vweird.f32 %v9494_v50 }
0x1356   : > { %v9526_v24 = vsel %vm9525_vm8, %v11220_v38, %v9522_v55  ;;  %v9529_v43 = vmul.f32 %v11222_v25, %v9528_v37  ;;  %v9388_v32 = vmul.f32 %v9360_v59, %v17079_v7  ;;  %vm9535_vm11 = vmor %vm9533_vm10, %vm9534_vm9 }
0x1357   : > { %v9668_v47 = vmul.f32 %v9526_v24, %v16390_v46  ;;  %v9308_v56 = vpop.f32.mrf.mxu2 }
0x1358   : > { %v9530_v40 = vmul.f32 0.5, %v9529_v43  ;;  %v16524_v15 = vsub.f32 %v16426_v19, %v9388_v32  ;;  %v9309_v58 = vadd.f32 %v16336_v12, %v9308_v56 }
0x1359   : > { %v9687_v0 = vmul.f32 %v16508_v17, %v9668_v47 }
0x135a   : > { %v9531_v39 = vsub.f32 1.5, %v9530_v40  ;;  %v16529_v10 = vadd.f32 %v9309_v58, %v16327_v36  ;;  %v9420_v16 = vmul.f32 %v16524_v15, %v16524_v15 }
0x135b   : > { %v11224_v4 = vpop.eup %11223  ;;  %v9706_v46 = vadd.f32 %v16519_v57, %v9687_v0 }
0x135c   : > { %v9532_v54 = vmul.f32 %v11222_v25, %v9531_v39  ;;  %v9538_v19 = vmul.f32 %v11224_v4, %v9494_v50  ;;  %v9376_v12 = vsel %vm701_vm0, %v16529_v10, 0.0  ;;  %v9454_v20 = vsel %vm701_vm0, %v9420_v16, 0.0 }
0x135d   : > { %v9721_v51 = vpack.c.bf16 %v9706_v46, %v9705_v26  ;;  %v9441_v30 = vpop.xlane.xlu2 %9440  ;;  %v9363_v36 = vpop.xlane.xlu0 %9362  ;;  %9377 = vadd.xlane.f32.xlu0 %v9376_v12  ;;  %9455 = vadd.xlane.f32.xlu2 %v9454_v20  ;;  %vm9544_vm1 = vweird.f32 %v11224_v4 }
0x135e   : > { %v9539_v33 = vmul.f32 %v11224_v4, %v9538_v19  ;;  %v9479_v38 = vmul.f32 %v9441_v30, %v17079_v7  ;;  %v9389_v61 = vmul.f32 %v9363_v36, %v17079_v7  ;;  %v9536_v53 = vsel %vm9535_vm11, %v11222_v25, %v9532_v54  ;;  %vm9545_vm3 = vmor %vm9543_vm2, %vm9544_vm1 }
0x135f   : > { %10289 = vmatmul.msk.bf16.vlgmr.msrb.gmra.mxu3 %vm701_vm0, %v9721_v51  ;;  %v9669_v6 = vmul.f32 %v9536_v53, %v16404_v29 }
0x1360   : > { %v9540_v35 = vmul.f32 0.5, %v9539_v33  ;;  %v9495_v49 = vadd.f32 1e-05, %v9479_v38  ;;  %v16543_v2 = vsub.f32 %v16436_v13, %v9389_v61 }
0x1361   : > { %v9688_v29 = vmul.f32 %v16508_v17, %v9669_v6 }
0x1362   : > { %v9541_v23 = vsub.f32 1.5, %v9540_v35  ;;  %11225 = vrsqrt.f32 %v9495_v49  ;;  %v9421_v21 = vmul.f32 %v16543_v2, %v16543_v2  ;;  %vm9553_vm13 = vweird.f32 %v9495_v49 }
0x1363   : > { %v9707_v42 = vadd.f32 %v16519_v57, %v9688_v29 }
0x1364   : > { %v9542_v14 = vmul.f32 %v11224_v4, %v9541_v23  ;;  %v9457_v8 = vsel %vm701_vm0, %v9421_v21, 0.0 }
0x1365   : > { %v9444_v22 = vpop.xlane.xlu1 %9443  ;;  %v9366_v45 = vpop.xlane.xlu2 %9365  ;;  %9458 = vadd.xlane.f32.xlu2 %v9457_v8 }
0x1366   : > { %v9546_v48 = vsel %vm9545_vm3, %v11224_v4, %v9542_v14  ;;  %v9480_v28 = vmul.f32 %v9444_v22, %v17079_v7  ;;  %v9390_v13 = vmul.f32 %v9366_v45, %v17079_v7 }
0x1367   : > { %v9670_v3 = vmul.f32 %v9546_v48, %v16417_v9 }
0x1368   : > { %v11226_v63 = vpop.eup %11225  ;;  %v9496_v25 = vadd.f32 1e-05, %v9480_v28  ;;  %v16554_v60 = vsub.f32 %v16449_v41, %v9390_v13 }
0x1369   : > { %v9548_v50 = vmul.f32 %v11226_v63, %v9495_v49  ;;  %v9689_v55 = vmul.f32 %v16508_v17, %v9670_v3  ;;  %vm9554_vm12 = vweird.f32 %v11226_v63 }
0x136a   : > { %11227 = vrsqrt.f32 %v9496_v25  ;;  %v9422_v37 = vmul.f32 %v16554_v60, %v16554_v60  ;;  %vm9555_vm14 = vmor %vm9553_vm13, %vm9554_vm12  ;;  %vm9563_vm15 = vweird.f32 %v9496_v25 }
0x136b   : > { %v9549_v62 = vmul.f32 %v11226_v63, %v9548_v50  ;;  %v9708_v59 = vadd.f32 %v16519_v57, %v9689_v55 }
0x136c   : > { %v9460_v9 = vsel %vm701_vm0, %v9422_v37, 0.0 }
0x136d   : > { %v9550_v24 = vmul.f32 0.5, %v9549_v62  ;;  %9461 = vadd.xlane.f32.xlu1 %v9460_v9  ;;  %v9722_v43 = vpack.c.bf16 %v9708_v59, %v9707_v42 }
0x136f   : > { %v9551_v32 = vsub.f32 1.5, %v9550_v24  ;;  %10290 = vmatmul.msk.bf16.gmra.mxu3 %vm701_vm0, %v9722_v43 }
0x1370   : > { %v11228_v41 = vpop.eup %11227 }
0x1371   : > { %v9552_v31 = vmul.f32 %v11226_v63, %v9551_v32  ;;  %v9558_v47 = vmul.f32 %v11228_v41, %v9496_v25  ;;  %vm9564_vm5 = vweird.f32 %v11228_v41 }
0x1372   : > { %vm9565_vm4 = vmor %vm9563_vm15, %vm9564_vm5 }
0x1373   : > { %v9559_v56 = vmul.f32 %v11228_v41, %v9558_v47  ;;  %v9556_v40 = vsel %vm9555_vm14, %v11226_v63, %v9552_v31 }
0x1374   : > { %v9671_v39 = vmul.f32 %v9556_v40, %v16432_v44 }
0x1375   : > { %v9560_v58 = vmul.f32 0.5, %v9559_v56 }
0x1376   : > { %v9690_v46 = vmul.f32 %v16508_v17, %v9671_v39 }
0x1377   : > { %v9561_v0 = vsub.f32 1.5, %v9560_v58 }
0x1378   : > { %v9709_v19 = vadd.f32 %v16519_v57, %v9690_v46 }
0x1379   : > { %v9562_v16 = vmul.f32 %v11228_v41, %v9561_v0 }
0x137b   : > { %v9566_v4 = vsel %vm9565_vm4, %v11228_v41, %v9562_v16 }
0x137c   : > { %v9672_v26 = vmul.f32 %v9566_v4, %v16445_v52 }
0x137e   : > { %v9691_v54 = vmul.f32 %v16508_v17, %v9672_v26 }
0x1380   : > { %v9710_v12 = vadd.f32 %v16519_v57, %v9691_v54 }
0x1382   : > { %v9723_v51 = vpack.c.bf16 %v9710_v12, %v9709_v19 }
0x1384   : > { %10291 = vmatmul.msk.bf16.gmra.mxu3 %vm701_vm0, %v9723_v51 }
0x13b8   : > { %v9447_v30 = vpop.xlane.xlu1 %9446  ;;  %v9369_v20 = vpop.xlane.xlu2 %9368 }
0x13b9   : > { %v9481_v44 = vmul.f32 %v9447_v30, %v17079_v7  ;;  %v9391_v36 = vmul.f32 %v9369_v20, %v17079_v7 }
0x13bb   : > { %v9497_v33 = vadd.f32 1e-05, %v9481_v44  ;;  %v16573_v52 = vsub.f32 %v16470_v1, %v9391_v36 }
0x13bd   : > { %11229 = vrsqrt.f32 %v9497_v33  ;;  %v9423_v38 = vmul.f32 %v16573_v52, %v16573_v52  ;;  %vm9573_vm7 = vweird.f32 %v9497_v33 }
0x13bf   : > { %v9463_v61 = vsel %vm701_vm0, %v9423_v38, 0.0 }
0x13c0   : > { %v9372_v53 = vpop.xlane.xlu1 %9371  ;;  %9464 = vadd.xlane.f32.xlu0 %v9463_v61  ;;  %v9450_v49 = vpop.xlane.xlu0 %9449 }
0x13c1   : > { %v9392_v35 = vmul.f32 %v9372_v53, %v17079_v7  ;;  %v9482_v23 = vmul.f32 %v9450_v49, %v17079_v7 }
0x13c3   : > { %v11230_v6 = vpop.eup %11229  ;;  %v16581_v21 = vsub.f32 %v16484_v5, %v9392_v35  ;;  %v9498_v1 = vadd.f32 1e-05, %v9482_v23  ;;  %v16612_v35 = vld [vmem:[%s16709_s19] ss:$0 sm:$0xff] }
0x13c4   : > { %v9568_v14 = vmul.f32 %v11230_v6, %v9497_v33  ;;  %vm9574_vm6 = vweird.f32 %v11230_v6 }
0x13c5   : > { %v9424_v22 = vmul.f32 %v16581_v21, %v16581_v21  ;;  %11231 = vrsqrt.f32 %v9498_v1  ;;  %vm9575_vm8 = vmor %vm9573_vm7, %vm9574_vm6  ;;  %vm9583_vm10 = vweird.f32 %v9498_v1 }
0x13c6   : > { %v9569_v45 = vmul.f32 %v11230_v6, %v9568_v14 }
0x13c7   : > { %v9466_v8 = vsel %vm701_vm0, %v9424_v22, 0.0 }
0x13c8   : > { %v9570_v48 = vmul.f32 0.5, %v9569_v45  ;;  %v9375_v28 = vpop.xlane.xlu1 %9374  ;;  %9467 = vadd.xlane.f32.xlu2 %v9466_v8  ;;  %v9453_v3 = vpop.xlane.xlu0 %9452 }
0x13c9   : > { %v9393_v13 = vmul.f32 %v9375_v28, %v17079_v7  ;;  %v9483_v63 = vmul.f32 %v9453_v3, %v17079_v7 }
0x13ca   : > { %v9571_v29 = vsub.f32 1.5, %v9570_v48 }
0x13cb   : > { %v16589_v5 = vsub.f32 %v16501_v34, %v9393_v13  ;;  %v11232_v25 = vpop.eup %11231  ;;  %v9499_v50 = vadd.f32 1e-05, %v9483_v63 }
0x13cc   : > { %v9572_v55 = vmul.f32 %v11230_v6, %v9571_v29  ;;  %v9578_v37 = vmul.f32 %v11232_v25, %v9498_v1  ;;  %vm9584_vm9 = vweird.f32 %v11232_v25 }
0x13cd   : > { %v9425_v62 = vmul.f32 %v16589_v5, %v16589_v5  ;;  %11233 = vrsqrt.f32 %v9499_v50  ;;  %vm9585_vm11 = vmor %vm9583_vm10, %vm9584_vm9  ;;  %vm9593_vm2 = vweird.f32 %v9499_v50 }
0x13ce   : > { %v9579_v42 = vmul.f32 %v11232_v25, %v9578_v37  ;;  %v9576_v9 = vsel %vm9575_vm8, %v11230_v6, %v9572_v55 }
0x13cf   : > { %v9469_v59 = vsel %vm701_vm0, %v9425_v62, 0.0  ;;  %v9673_v56 = vmul.f32 %v9576_v9, %v16465_v27 }
0x13d0   : > { %9470 = vadd.xlane.f32.xlu1 %v9469_v59  ;;  %v9580_v24 = vmul.f32 0.5, %v9579_v42  ;;  %v9456_v43 = vpop.xlane.xlu2 %9455  ;;  %v9378_v34 = vpop.xlane.xlu0 %9377 }
0x13d1   : > { %v9484_v32 = vmul.f32 %v9456_v43, %v17079_v7  ;;  %v9394_v41 = vmul.f32 %v9378_v34, %v17079_v7  ;;  %v9692_v27 = vmul.f32 %v16508_v17, %v9673_v56 }
0x13d2   : > { %v9581_v31 = vsub.f32 1.5, %v9580_v24 }
0x13d3   : > { %v11234_v47 = vpop.eup %11233  ;;  %v9500_v40 = vadd.f32 1e-05, %v9484_v32  ;;  %v16598_v58 = vsub.f32 %v16529_v10, %v9394_v41  ;;  %v9711_v36 = vadd.f32 %v16519_v57, %v9692_v27 }
0x13d4   : > { %v9582_v0 = vmul.f32 %v11232_v25, %v9581_v31  ;;  %v9588_v39 = vmul.f32 %v11234_v47, %v9499_v50  ;;  %vm9594_vm1 = vweird.f32 %v11234_v47 }
0x13d5   : > { %11235 = vrsqrt.f32 %v9500_v40  ;;  %v9426_v16 = vmul.f32 %v16598_v58, %v16598_v58  ;;  %vm9595_vm3 = vmor %vm9593_vm2, %vm9594_vm1  ;;  %vm9603_vm13 = vweird.f32 %v9500_v40 }
0x13d6   : > { %v9586_v4 = vsel %vm9585_vm11, %v11232_v25, %v9582_v0  ;;  %v9589_v26 = vmul.f32 %v11234_v47, %v9588_v39 }
0x13d7   : > { %v9674_v46 = vmul.f32 %v9586_v4, %v16479_v18  ;;  %v9472_v54 = vsel %vm701_vm0, %v9426_v16, 0.0 }
0x13d8   : > { %v9590_v19 = vmul.f32 0.5, %v9589_v26  ;;  %v9459_v12 = vpop.xlane.xlu2 %9458  ;;  %9473 = vadd.xlane.f32.xlu0 %v9472_v54 }
0x13d9   : > { %v9485_v10 = vmul.f32 %v9459_v12, %v17079_v7  ;;  %v9693_v51 = vmul.f32 %v16508_v17, %v9674_v46 }
0x13da   : > { %v9591_v30 = vsub.f32 1.5, %v9590_v19 }
0x13db   : > { %v11236_v20 = vpop.eup %11235  ;;  %v9501_v44 = vadd.f32 1e-05, %v9485_v10  ;;  %v9712_v33 = vadd.f32 %v16519_v57, %v9693_v51 }
0x13dc   : > { %v9592_v18 = vmul.f32 %v11234_v47, %v9591_v30  ;;  %v9598_v38 = vmul.f32 %v11236_v20, %v9500_v40  ;;  %vm9604_vm12 = vweird.f32 %v11236_v20 }
0x13dd   : > { %11237 = vrsqrt.f32 %v9501_v44  ;;  %v9724_v61 = vpack.c.bf16 %v9712_v33, %v9711_v36  ;;  %vm9605_vm14 = vmor %vm9603_vm13, %vm9604_vm12  ;;  %vm9613_vm15 = vweird.f32 %v9501_v44 }
0x13de   : > { %v9599_v53 = vmul.f32 %v11236_v20, %v9598_v38  ;;  %v9596_v23 = vsel %vm9595_vm3, %v11234_v47, %v9592_v18 }
0x13df   : > { %10292 = vmatmul.msk.bf16.gmra.mxu3 %vm701_vm0, %v9724_v61  ;;  %v9675_v28 = vmul.f32 %v9596_v23, %v16496_v11 }
0x13e0   : > { %v9462_v49 = vpop.xlane.xlu1 %9461  ;;  %v9600_v6 = vmul.f32 0.5, %v9599_v53 }
0x13e1   : > { %v9486_v14 = vmul.f32 %v9462_v49, %v17079_v7  ;;  %v9694_v50 = vmul.f32 %v16508_v17, %v9675_v28 }
0x13e2   : > { %v9782_v1 = vpop.f32.mrf.mxu3  ;;  %v9601_v22 = vsub.f32 1.5, %v9600_v6 }
0x13e3   : > { %v9502_v45 = vadd.f32 1e-05, %v9486_v14  ;;  %v9783_v8 = vadd.f32 %v16612_v35, %v9782_v1  ;;  %v11238_v48 = vpop.eup %11237  ;;  %v9713_v24 = vadd.f32 %v16519_v57, %v9694_v50 }
0x13e4   : > { %v9602_v13 = vmul.f32 %v11236_v20, %v9601_v22  ;;  %v9608_v3 = vmul.f32 %v11238_v48, %v9501_v44  ;;  %vm9614_vm5 = vweird.f32 %v11238_v48 }
0x13e5   : > { %11239 = vrsqrt.f32 %v9502_v45  ;;  %9822 = vst [vmem:[%s16621_s4] sm:$0xff] %v9783_v8  ;;  %vm9615_vm4 = vmor %vm9613_vm15, %vm9614_vm5  ;;  %vm9623_vm7 = vweird.f32 %v9502_v45 }
0x13e6   : > { %v9606_v29 = vsel %vm9605_vm14, %v11236_v20, %v9602_v13  ;;  %v9609_v63 = vmul.f32 %v11238_v48, %v9608_v3 }
0x13e7   : > { %v9676_v25 = vmul.f32 %v9606_v29, %v16524_v15 }
0x13e8   : > { %v9610_v55 = vmul.f32 0.5, %v9609_v63 }
0x13e9   : > { %v9695_v62 = vmul.f32 %v16508_v17, %v9676_v25 }
0x13ea   : > { %v9784_v37 = vpop.f32.mrf.mxu3  ;;  %v9611_v59 = vsub.f32 1.5, %v9610_v55 }
0x13eb   : > { %v11240_v42 = vpop.eup %11239  ;;  %v9785_v11 = vadd.f32 %v16612_v35, %v9784_v37  ;;  %v9714_v43 = vadd.f32 %v16519_v57, %v9695_v62 }
0x13ec   : > { %v9618_v9 = vmul.f32 %v11240_v42, %v9502_v45  ;;  %v9612_v34 = vmul.f32 %v11238_v48, %v9611_v59  ;;  %vm9624_vm6 = vweird.f32 %v11240_v42 }
0x13ed   : > { %9823 = vst [vmem:[%s16621_s4 + $0x8] sm:$0xff] %v9785_v11  ;;  %v9725_v32 = vpack.c.bf16 %v9714_v43, %v9713_v24  ;;  %vm9625_vm8 = vmor %vm9623_vm7, %vm9624_vm6 }
0x13ee   : > { %v9619_v15 = vmul.f32 %v11240_v42, %v9618_v9  ;;  %v9616_v41 = vsel %vm9615_vm4, %v11238_v48, %v9612_v34 }
0x13ef   : > { %10293 = vmatmul.msk.bf16.gmra.mxu3 %vm701_vm0, %v9725_v32  ;;  %v9677_v40 = vmul.f32 %v9616_v41, %v16543_v2 }
0x13f0   : > { %v9620_v31 = vmul.f32 0.5, %v9619_v15 }
0x13f1   : > { %v9696_v26 = vmul.f32 %v16508_v17, %v9677_v40 }
0x13f2   : > { %v9621_v47 = vsub.f32 1.5, %v9620_v31  ;;  %v9787_v56 = vpop.f32.mrf.mxu3 }
0x13f3   : > { %v9788_v0 = vadd.f32 %v16612_v35, %v9787_v56  ;;  %v9715_v2 = vadd.f32 %v16519_v57, %v9696_v26 }
0x13f4   : > { %v9622_v39 = vmul.f32 %v11240_v42, %v9621_v47 }
0x13f5   : > { %9824 = vst [vmem:[%s16621_s4 + $0x10] sm:$0xff] %v9788_v0 }
0x13f6   : > { %v9626_v16 = vsel %vm9625_vm8, %v11240_v42, %v9622_v39 }
0x13f7   : > { %v9678_v4 = vmul.f32 %v9626_v16, %v16554_v60 }
0x13f9   : > { %v9697_v46 = vmul.f32 %v16508_v17, %v9678_v4 }
0x13fa   : > { %v9789_v54 = vpop.f32.mrf.mxu3 }
0x13fb   : > { %v9790_v27 = vadd.f32 %v16612_v35, %v9789_v54  ;;  %v9716_v19 = vadd.f32 %v16519_v57, %v9697_v46 }
0x13fd   : > { %9825 = vst [vmem:[%s16621_s4 + $0x18] sm:$0xff] %v9790_v27  ;;  %v9726_v12 = vpack.c.bf16 %v9716_v19, %v9715_v2 }
0x13ff   : > { %10294 = vmatmul.msk.bf16.gmra.mxu3 %vm701_vm0, %v9726_v12 }
0x1407   : > { %v9792_v10 = vpop.f32.mrf.mxu3 }
0x1408   : > { %v9793_v51 = vadd.f32 %v16612_v35, %v9792_v10 }
0x140a   : > { %9826 = vst [vmem:[%s16621_s4 + $0x20] sm:$0xff] %v9793_v51 }
0x140f   : > { %v9794_v60 = vpop.f32.mrf.mxu3 }
0x1410   : > { %v9795_v30 = vadd.f32 %v16612_v35, %v9794_v60 }
0x1412   : > { %9827 = vst [vmem:[%s16621_s4 + $0x28] sm:$0xff] %v9795_v30 }
0x1433   : > { %v9465_v20 = vpop.xlane.xlu0 %9464 }
0x1434   : > { %v9487_v44 = vmul.f32 %v9465_v20, %v17079_v7 }
0x1436   : > { %v9503_v36 = vadd.f32 1e-05, %v9487_v44 }
0x1438   : > { %11241 = vrsqrt.f32 %v9503_v36  ;;  %vm9633_vm10 = vweird.f32 %v9503_v36 }
0x143b   : > { %v9468_v33 = vpop.xlane.xlu2 %9467 }
0x143c   : > { %v9488_v18 = vmul.f32 %v9468_v33, %v17079_v7 }
0x143e   : > { %v11242_v38 = vpop.eup %11241  ;;  %v9504_v61 = vadd.f32 1e-05, %v9488_v18 }
0x143f   : > { %v9628_v53 = vmul.f32 %v11242_v38, %v9503_v36  ;;  %vm9634_vm9 = vweird.f32 %v11242_v38 }
0x1440   : > { %11243 = vrsqrt.f32 %v9504_v61  ;;  %vm9635_vm11 = vmor %vm9633_vm10, %vm9634_vm9  ;;  %vm9643_vm2 = vweird.f32 %v9504_v61 }
0x1441   : > { %v9629_v49 = vmul.f32 %v11242_v38, %v9628_v53 }
0x1443   : > { %v9630_v23 = vmul.f32 0.5, %v9629_v49  ;;  %v9471_v6 = vpop.xlane.xlu1 %9470 }
0x1444   : > { %v9489_v14 = vmul.f32 %v9471_v6, %v17079_v7 }
0x1445   : > { %v9631_v1 = vsub.f32 1.5, %v9630_v23 }
0x1446   : > { %v11244_v22 = vpop.eup %11243  ;;  %v9505_v45 = vadd.f32 1e-05, %v9489_v14 }
0x1447   : > { %v9632_v8 = vmul.f32 %v11242_v38, %v9631_v1  ;;  %v9638_v48 = vmul.f32 %v11244_v22, %v9504_v61  ;;  %vm9644_vm1 = vweird.f32 %v11244_v22 }
0x1448   : > { %11245 = vrsqrt.f32 %v9505_v45  ;;  %vm9645_vm3 = vmor %vm9643_vm2, %vm9644_vm1  ;;  %vm9653_vm13 = vweird.f32 %v9505_v45 }
0x1449   : > { %v9639_v28 = vmul.f32 %v11244_v22, %v9638_v48  ;;  %v9636_v13 = vsel %vm9635_vm11, %v11242_v38, %v9632_v8 }
0x144a   : > { %v9679_v55 = vmul.f32 %v9636_v13, %v16573_v52 }
0x144b   : > { %v9640_v3 = vmul.f32 0.5, %v9639_v28  ;;  %v9474_v29 = vpop.xlane.xlu0 %9473 }
0x144c   : > { %v9490_v25 = vmul.f32 %v9474_v29, %v17079_v7  ;;  %v9698_v24 = vmul.f32 %v16508_v17, %v9679_v55 }
0x144d   : > { %v9641_v63 = vsub.f32 1.5, %v9640_v3 }
0x144e   : > { %v11246_v50 = vpop.eup %11245  ;;  %v9506_v42 = vadd.f32 1e-05, %v9490_v25  ;;  %v9717_v7 = vadd.f32 %v16519_v57, %v9698_v24 }
0x144f   : > { %v9642_v37 = vmul.f32 %v11244_v22, %v9641_v63  ;;  %v9648_v62 = vmul.f32 %v11246_v50, %v9505_v45  ;;  %vm9654_vm12 = vweird.f32 %v11246_v50 }
0x1450   : > { %11247 = vrsqrt.f32 %v9506_v42  ;;  %vm9655_vm14 = vmor %vm9653_vm13, %vm9654_vm12  ;;  %vm9663_vm15 = vweird.f32 %v9506_v42 }
0x1451   : > { %v9646_v59 = vsel %vm9645_vm3, %v11244_v22, %v9642_v37  ;;  %v9649_v11 = vmul.f32 %v11246_v50, %v9648_v62 }
0x1452   : > { %v9680_v9 = vmul.f32 %v9646_v59, %v16581_v21 }
0x1453   : > { %v9650_v43 = vmul.f32 0.5, %v9649_v11 }
0x1454   : > { %v9699_v34 = vmul.f32 %v16508_v17, %v9680_v9 }
0x1455   : > { %v9651_v15 = vsub.f32 1.5, %v9650_v43 }
0x1456   : > { %v9718_v52 = vadd.f32 %v16519_v57, %v9699_v34  ;;  %v11248_v32 = vpop.eup %11247 }
0x1457   : > { %v9652_v41 = vmul.f32 %v11246_v50, %v9651_v15  ;;  %v9658_v31 = vmul.f32 %v11248_v32, %v9506_v42  ;;  %vm9664_vm5 = vweird.f32 %v11248_v32 }
0x1458   : > { %v9727_v47 = vpack.c.bf16 %v9718_v52, %v9717_v7  ;;  %vm9665_vm4 = vmor %vm9663_vm15, %vm9664_vm5 }
0x1459   : > { %v9659_v56 = vmul.f32 %v11248_v32, %v9658_v31  ;;  %v9656_v21 = vsel %vm9655_vm14, %v11246_v50, %v9652_v41 }
0x145a   : > { %10295 = vmatmul.msk.bf16.gmra.mxu3 %vm701_vm0, %v9727_v47  ;;  %v9681_v39 = vmul.f32 %v9656_v21, %v16589_v5 }
0x145b   : > { %v9660_v40 = vmul.f32 0.5, %v9659_v56 }
0x145c   : > { %v9700_v54 = vmul.f32 %v16508_v17, %v9681_v39 }
0x145d   : > { %v9661_v0 = vsub.f32 1.5, %v9660_v40 }
0x145e   : > { %v9719_v5 = vadd.f32 %v16519_v57, %v9700_v54 }
0x145f   : > { %v9662_v16 = vmul.f32 %v11248_v32, %v9661_v0 }
0x1461   : > { %v9666_v4 = vsel %vm9665_vm4, %v11248_v32, %v9662_v16 }
0x1462   : > { %v9682_v26 = vmul.f32 %v9666_v4, %v16598_v58  ;;  %v9797_v46 = vpop.f32.mrf.mxu3 }
0x1463   : > { %v9798_v27 = vadd.f32 %v16612_v35, %v9797_v46 }
0x1464   : > { %v9701_v2 = vmul.f32 %v16508_v17, %v9682_v26 }
0x1465   : > { %9828 = vst [vmem:[%s16621_s4 + $0x30] sm:$0xff] %v9798_v27 }
0x1466   : > { %v9720_v19 = vadd.f32 %v16519_v57, %v9701_v2 }
0x1468   : > { %v9728_v12 = vpack.c.bf16 %v9720_v19, %v9719_v5 }
0x146a   : > { %v9799_v10 = vpop.f32.mrf.mxu3  ;;  %10296 = vmatmul.msk.bf16.gmra.mxu3 %vm701_vm0, %v9728_v12 }
0x146b   : > { %v9800_v58 = vadd.f32 %v16612_v35, %v9799_v10 }
0x146d   : > { %9829 = vst [vmem:[%s16621_s4 + $0x38] sm:$0xff] %v9800_v58 }
0x1472   : > { %v9802_v51 = vpop.f32.mrf.mxu3 }
0x1473   : > { %v9803_v60 = vadd.f32 %v16612_v35, %v9802_v51 }
0x1475   : > { %9830 = vst [vmem:[%s16621_s4 + $0x40] sm:$0xff] %v9803_v60 }
0x147a   : > { %v9804_v17 = vpop.f32.mrf.mxu3 }
0x147b   : > { %v9805_v30 = vadd.f32 %v16612_v35, %v9804_v17 }
0x147d   : > { %9831 = vst [vmem:[%s16621_s4 + $0x48] sm:$0xff] %v9805_v30 }
0x1482   : > { %v9807_v57 = vpop.f32.mrf.mxu3 }
0x1483   : > { %v9808_v20 = vadd.f32 %v16612_v35, %v9807_v57 }
0x1485   : > { %9832 = vst [vmem:[%s16621_s4 + $0x50] sm:$0xff] %v9808_v20 }
0x148a   : > { %v9809_v44 = vpop.f32.mrf.mxu3 }
0x148b   : > { %v9810_v36 = vadd.f32 %v16612_v35, %v9809_v44 }
0x148d   : > { %9833 = vst [vmem:[%s16621_s4 + $0x58] sm:$0xff] %v9810_v36 }
0x14dd   : > { %v9812_v33 = vpop.f32.mrf.mxu3 }
0x14de   : > { %v9813_v18 = vadd.f32 %v16612_v35, %v9812_v33 }
0x14e0   : > { %9834 = vst [vmem:[%s16621_s4 + $0x60] sm:$0xff] %v9813_v18 }
0x14e5   : > { %v9814_v38 = vpop.f32.mrf.mxu3 }
0x14e6   : > { %v9815_v61 = vadd.f32 %v16612_v35, %v9814_v38 }
0x14e8   : > { %9835 = vst [vmem:[%s16621_s4 + $0x68] sm:$0xff] %v9815_v61 }
0x14ed   : > { %v9817_v53 = vpop.f32.mrf.mxu3 }
0x14ee   : > { %v9818_v49 = vadd.f32 %v16612_v35, %v9817_v53 }
0x14f0   : > { %9836 = vst [vmem:[%s16621_s4 + $0x70] sm:$0xff] %v9818_v49 }
0x14f5   : > { %v9819_v23 = vpop.f32.mrf.mxu3 }
0x14f6   : > { %v9820_v6 = vadd.f32 %v16612_v35, %v9819_v23 }
0x14f8   : > { %9837 = vst [vmem:[%s16621_s4 + $0x78] sm:$0xff] %v9820_v6 }
0x14f9 PF: > { %s30_s1 = sadd.s32 1, %s11256_s1  }
0x14fa   : > { %p27_p4 = scmp.ge.s32.totalorder %s30_s1, 4  }
0x14fc   :  { %29 = sbr.rel (!%p27_p4) target bundleno = 6 (0x6), region = 146 }

</bundles_post_ra>
